<compile_context>
chip_gen: v6e
topology: v6e:2x2x1
jax: 0.10.0
libtpu: 0.0.40
codegen_flags: <defaults>
</compile_context>

<pallas_src>
import jax
import jax.numpy as jnp
from jax import lax
from jax.experimental import pallas as pl
from jax.experimental.pallas import tpu as pltpu


def _round_up(a, b):
    return (a + b - 1) // b * b


# ----------------------------------------------------------------------------
# Pallas kernel: one M-tile of  relu(patches @ W1 + b1) @ [Wc|Wr]_pad + b_pad
# ----------------------------------------------------------------------------
def rpn_kernel(p_ref, w1_ref, b1_ref, wh_ref, bh_ref, out_ref):
    # 3x3 conv for this M-tile: (tm, K) @ (K, 512), bf16 operands, f32 accum.
    h = jnp.dot(p_ref[...], w1_ref[...], preferred_element_type=jnp.float32)
    # bias + ReLU (the "preprocess" head)
    h = jnp.maximum(h + b1_ref[...], 0.0)
    # fused 1x1 classifier+regressor heads: single lane-dense (tm, 128) matmul
    out = jnp.dot(h.astype(jnp.bfloat16), wh_ref[...],
                  preferred_element_type=jnp.float32) + bh_ref[...]
    out_ref[...] = out.astype(out_ref.dtype)


def rpn_pallas(x, W1, b1, Wc, bc, Wr, br, *, tm_target=256):
    """x: (N, 512, H, W) float32 NCHW.  Returns (obj, bbox) in NCHW."""
    N, C, H, W = x.shape
    KH = KW = 3
    Ho, Wo = H - KH + 1, W - KW + 1
    M = N * Ho * Wo
    K = C * KH * KW                  # 4608
    Chid = W1.shape[0]               # 512
    Cobj = Wc.shape[0]               # 18
    Cbox = Wr.shape[0]               # 36
    Cpad = 128                       # lane-dense fused-head output width

    # ---- glue: im2col with column order (c, kh, kw) to match OIHW weights ----
    cols = [x[:, :, kh:kh + Ho, kw:kw + Wo]
            for kh in range(KH) for kw in range(KW)]          # each (N,C,Ho,Wo)
    p = jnp.stack(cols, axis=2).reshape(N, K, Ho, Wo)
    patches = p.transpose(0, 2, 3, 1).reshape(M, K).astype(jnp.bfloat16)

    # ---- M tiling (respect the (8,128) sublane rule; pad M if needed) ----
    M8 = _round_up(M, 8)
    if M8 <= tm_target:
        tm, M_pad = M8, M8            # single tile == full (padded) array dims
    else:
        tm, M_pad = tm_target, _round_up(M, tm_target)
    if M_pad != M:
        patches = jnp.pad(patches, ((0, M_pad - M), (0, 0)))

    # ---- weights in matmul form (bf16 MXU operands, f32 biases) ----
    w1_flat = W1.reshape(Chid, K).T.astype(jnp.bfloat16)          # (K, 512)
    b1_row = b1.reshape(1, Chid).astype(jnp.float32)
    wh = jnp.concatenate([Wc.reshape(Cobj, Chid).T,
                          Wr.reshape(Cbox, Chid).T], axis=1)      # (512, 54)
    wh = jnp.pad(wh, ((0, 0), (0, Cpad - Cobj - Cbox))).astype(jnp.bfloat16)
    bh = jnp.pad(jnp.concatenate([bc, br]),
                 (0, Cpad - Cobj - Cbox)).reshape(1, Cpad).astype(jnp.float32)

    out_flat = pl.pallas_call(
        rpn_kernel,
        out_shape=jax.ShapeDtypeStruct((M_pad, Cpad), jnp.float32),
        grid=(M_pad // tm,),
        in_specs=[
            pl.BlockSpec((tm, K), lambda m: (m, 0)),        # patches tile
            pl.BlockSpec((K, Chid), lambda m: (0, 0)),      # W1 (VMEM resident)
            pl.BlockSpec((1, Chid), lambda m: (0, 0)),      # b1
            pl.BlockSpec((Chid, Cpad), lambda m: (0, 0)),   # fused head weights
            pl.BlockSpec((1, Cpad), lambda m: (0, 0)),      # fused head bias
        ],
        out_specs=pl.BlockSpec((tm, Cpad), lambda m: (m, 0)),
        compiler_params=pltpu.CompilerParams(
            dimension_semantics=("parallel",),              # megacore on v7x
            vmem_limit_bytes=40 * 1024 * 1024),             # safe on 64 MiB v7x
    )(patches, w1_flat, b1_row, wh, bh)

    # ---- glue: slice the fused heads and go back to NCHW ----
    heads = out_flat[:M].astype(x.dtype)
    obj = heads[:, :Cobj].reshape(N, Ho, Wo, Cobj).transpose(0, 3, 1, 2)
    bbox = heads[:, Cobj:Cobj + Cbox].reshape(N, Ho, Wo, Cbox).transpose(0, 3, 1, 2)
    return obj, bbox


# ----------------------------------------------------------------------------
# Pure-JAX f32 reference (matches the PyTorch module) for a correctness check.
# ----------------------------------------------------------------------------
def rpn_ref(x, W1, b1, Wc, bc, Wr, br):
    dn = ("NCHW", "OIHW", "NCHW")
    h = lax.conv_general_dilated(x, W1, (1, 1), "VALID", dimension_numbers=dn)
    h = jnp.maximum(h + b1[None, :, None, None], 0.0)
    obj = lax.conv_general_dilated(h, Wc, (1, 1), "VALID", dimension_numbers=dn)
    obj = obj + bc[None, :, None, None]
    bbox = lax.conv_general_dilated(h, Wr, (1, 1), "VALID", dimension_numbers=dn)
    bbox = bbox + br[None, :, None, None]
    return obj, bbox


if __name__ == "__main__":
    key = jax.random.PRNGKey(0)
    ks = jax.random.split(key, 8)

    N, C, H, W = 2, 512, 8, 8          # channel count (512) fixed by the module
    x = jax.random.normal(ks[0], (N, C, H, W), dtype=jnp.float32)

    # Deterministic synthetic parameters (PyTorch OIHW conv layout, small scale).
    W1 = jax.random.normal(ks[1], (512, 512, 3, 3), dtype=jnp.float32) * 0.02
    b1 = jax.random.normal(ks[2], (512,), dtype=jnp.float32) * 0.02
    Wc = jax.random.normal(ks[3], (18, 512, 1, 1), dtype=jnp.float32) * 0.02
    bc = jax.random.normal(ks[4], (18,), dtype=jnp.float32) * 0.02
    Wr = jax.random.normal(ks[5], (36, 512, 1, 1), dtype=jnp.float32) * 0.02
    br = jax.random.normal(ks[6], (36,), dtype=jnp.float32) * 0.02

    obj, bbox = jax.jit(rpn_pallas)(x, W1, b1, Wc, bc, Wr, br)
    jax.block_until_ready((obj, bbox))

    obj_r, bbox_r = rpn_ref(x, W1, b1, Wc, bc, Wr, br)
    assert obj.shape == (N, 18, H - 2, W - 2), obj.shape
    assert bbox.shape == (N, 36, H - 2, W - 2), bbox.shape
    # bf16 MXU operands with f32 accumulation -> relaxed tolerance vs f32 ref
    assert jnp.allclose(obj, obj_r, atol=2e-2, rtol=2e-2), \
        float(jnp.max(jnp.abs(obj - obj_r)))
    assert jnp.allclose(bbox, bbox_r, atol=2e-2, rtol=2e-2), \
        float(jnp.max(jnp.abs(bbox - bbox_r)))

    print("KERNEL_OK")
</pallas_src>

<mosaic_0001>
module attributes {stable_mosaic.version = 11 : i64} {
  func.func @rpn_kernel(%arg0: i32, %arg1: memref<72x4608xbf16, #tpu.memory_space<vmem>>, %arg2: memref<4608x512xbf16, #tpu.memory_space<vmem>>, %arg3: memref<1x512xf32, #tpu.memory_space<vmem>>, %arg4: memref<512x128xbf16, #tpu.memory_space<vmem>>, %arg5: memref<1x128xf32, #tpu.memory_space<vmem>>, %arg6: memref<72x128xf32, #tpu.memory_space<vmem>>) attributes {dimension_semantics = [#tpu.dimension_semantics<parallel>], iteration_bounds = array<i64: 1>, scalar_prefetch = 0 : i64, scratch_operands = 0 : i64, tpu.core_type = #tpu.core_type<tc>, window_params = [{transform_indices = @transform_0, window_bounds = array<i64: 72, 4608>}, {pipeline_mode = #tpu.pipeline_mode<synchronous>, transform_indices = @transform_1, window_bounds = array<i64: 4608, 512>}, {pipeline_mode = #tpu.pipeline_mode<synchronous>, transform_indices = @transform_2, window_bounds = array<i64: 1, 512>}, {pipeline_mode = #tpu.pipeline_mode<synchronous>, transform_indices = @transform_3, window_bounds = array<i64: 512, 128>}, {pipeline_mode = #tpu.pipeline_mode<synchronous>, transform_indices = @transform_4, window_bounds = array<i64: 1, 128>}, {transform_indices = @transform_5, window_bounds = array<i64: 72, 128>}]} {
    %c0 = arith.constant 0 : index
    %c0_0 = arith.constant 0 : index
    %0 = vector.load %arg1[%c0, %c0_0] : memref<72x4608xbf16, #tpu.memory_space<vmem>>, vector<72x4608xbf16>
    %c0_1 = arith.constant 0 : index
    %c0_2 = arith.constant 0 : index
    %1 = vector.load %arg2[%c0_1, %c0_2] : memref<4608x512xbf16, #tpu.memory_space<vmem>>, vector<4608x512xbf16>
    %cst = arith.constant dense<0.000000e+00> : vector<72x512xf32>
    %2 = tpu.matmul %0, %1, %cst {dimension_numbers = #tpu.dot_dimension_numbers<[1], [0], [0], [1], [0, 0, 1, 1], [], []>} : vector<72x4608xbf16>, vector<4608x512xbf16>, vector<72x512xf32> -> vector<72x512xf32>
    %c0_3 = arith.constant 0 : index
    %c0_4 = arith.constant 0 : index
    %3 = vector.load %arg3[%c0_3, %c0_4] : memref<1x512xf32, #tpu.memory_space<vmem>>, vector<1x512xf32>
    %4 = vector.broadcast %3 : vector<1x512xf32> to vector<72x512xf32>
    %5 = arith.addf %2, %4 : vector<72x512xf32>
    %cst_5 = arith.constant 0.000000e+00 : f32
    %6 = vector.broadcast %cst_5 : f32 to vector<72x512xf32>
    %7 = arith.maximumf %5, %6 : vector<72x512xf32>
    %8 = arith.truncf %7 : vector<72x512xf32> to vector<72x512xbf16>
    %c0_6 = arith.constant 0 : index
    %c0_7 = arith.constant 0 : index
    %9 = vector.load %arg4[%c0_6, %c0_7] : memref<512x128xbf16, #tpu.memory_space<vmem>>, vector<512x128xbf16>
    %cst_8 = arith.constant dense<0.000000e+00> : vector<72x128xf32>
    %10 = tpu.matmul %8, %9, %cst_8 {dimension_numbers = #tpu.dot_dimension_numbers<[1], [0], [0], [1], [0, 0, 1, 1], [], []>} : vector<72x512xbf16>, vector<512x128xbf16>, vector<72x128xf32> -> vector<72x128xf32>
    %c0_9 = arith.constant 0 : index
    %c0_10 = arith.constant 0 : index
    %11 = vector.load %arg5[%c0_9, %c0_10] : memref<1x128xf32, #tpu.memory_space<vmem>>, vector<1x128xf32>
    %12 = vector.broadcast %11 : vector<1x128xf32> to vector<72x128xf32>
    %13 = arith.addf %10, %12 : vector<72x128xf32>
    %c0_11 = arith.constant 0 : index
    %c0_12 = arith.constant 0 : index
    %14 = vector.load %arg6[%c0_11, %c0_12] : memref<72x128xf32, #tpu.memory_space<vmem>>, vector<72x128xf32>
    tpu.vector_store %arg6[%c0_11, %c0_12], %13 {strides = array<i32>} : memref<72x128xf32, #tpu.memory_space<vmem>>, vector<72x128xf32>,
    return
  }
  func.func @transform_0(%arg0: i32) -> (i32, i32) {
    %c0_i32 = arith.constant 0 : i32
    %c0_i32_0 = arith.constant 0 : i32
    return %arg0, %c0_i32 : i32, i32
  }
  func.func @transform_1(%arg0: i32) -> (i32, i32) {
    %c0_i32 = arith.constant 0 : i32
    %c0_i32_0 = arith.constant 0 : i32
    %c0_i32_1 = arith.constant 0 : i32
    return %c0_i32, %c0_i32_0 : i32, i32
  }
  func.func @transform_2(%arg0: i32) -> (i32, i32) {
    %c0_i32 = arith.constant 0 : i32
    %c0_i32_0 = arith.constant 0 : i32
    %c0_i32_1 = arith.constant 0 : i32
    return %c0_i32, %c0_i32_0 : i32, i32
  }
  func.func @transform_3(%arg0: i32) -> (i32, i32) {
    %c0_i32 = arith.constant 0 : i32
    %c0_i32_0 = arith.constant 0 : i32
    %c0_i32_1 = arith.constant 0 : i32
    return %c0_i32, %c0_i32_0 : i32, i32
  }
  func.func @transform_4(%arg0: i32) -> (i32, i32) {
    %c0_i32 = arith.constant 0 : i32
    %c0_i32_0 = arith.constant 0 : i32
    %c0_i32_1 = arith.constant 0 : i32
    return %c0_i32, %c0_i32_0 : i32, i32
  }
  func.func @transform_5(%arg0: i32) -> (i32, i32) {
    %c0_i32 = arith.constant 0 : i32
    %c0_i32_0 = arith.constant 0 : i32
    return %arg0, %c0_i32 : i32, i32
  }
}

</mosaic_0001>

<bundles_post_ra>
// kernel: rpn_pallas.1
= control target key start
LH: loop header
LB: loop body
LE: loop exit
PB: predicated region body
PF: predicated region fallthrough
CT: control target
= control target key end

     0   :  { %s20776_s1 = inlined_call_operand.vmem [shape: bf16[4608,512], index: 1, kind: input, shape index: {}]   ;;  %s20777_s0 = inlined_call_operand.vmem [shape: bf16[72,4608], index: 0, kind: input, shape index: {}]   ;;  %s20778_s2 = inlined_call_operand.vmem [shape: f32[1,512], index: 2, kind: input, shape index: {}]   ;;  %s20779_s3 = inlined_call_operand.vmem [shape: bf16[512,128], index: 3, kind: input, shape index: {}]   ;;  %s20780_s4 = inlined_call_operand.vmem [shape: f32[1,128], index: 4, kind: input, shape index: {}]   ;;  %s20781_s5 = inlined_call_operand.vmem [shape: f32[72,128], index: 5, kind: output, shape index: {}]  }
   0x1   :  { %v12812_v0 = vld [vmem:[%s20776_s1 + $0xe4] ss:$16 sps:$4 sm:$0xff]   ;;  %v12816_v2 = vld [vmem:[%s20776_s1 + $0xe0] ss:$16 sps:$4 sm:$0xff]   ;;  %v12913_v51 = vld [vmem:[%s20777_s0 + $0xc] ss:$144 sps:$4 sm:$0xff]  }
   0x2   :  { %v12814_v1 = vld [vmem:[%s20776_s1 + $0x2e4] ss:$16 sps:$4 sm:$0xff]   ;;  %7963 = vmatprep.subr.bf16.mxu0 %v12812_v0  ;;  %v12817_v3 = vld [vmem:[%s20776_s1 + $0x2e0] ss:$16 sps:$4 sm:$0xff]   ;;  %8076 = vmatprep.mubr.bf16.mxu1 %v12913_v51 }
   0x3   :  { %8044 = vmatprep.subr.bf16.mxu1 %v12814_v1  ;;  %v12818_v4 = vld [vmem:[%s20776_s1 + $0xc4] ss:$16 sps:$4 sm:$0xff]   ;;  %7964 = vmatpush1.bf16.msra.mxu0 %v12816_v2  ;;  %v12822_v6 = vld [vmem:[%s20776_s1 + $0xc0] ss:$16 sps:$4 sm:$0xff]  }
   0x4   :  { %8045 = vmatpush1.bf16.msra.mxu1 %v12817_v3  ;;  %v12820_v5 = vld [vmem:[%s20776_s1 + $0x2c4] ss:$16 sps:$4 sm:$0xff]   ;;  %7965 = vmatprep.subr.bf16.mxu0 %v12818_v4  ;;  %v12823_v7 = vld [vmem:[%s20776_s1 + $0x2c0] ss:$16 sps:$4 sm:$0xff]  }
   0x5   :  { %8046 = vmatprep.subr.bf16.mxu1 %v12820_v5  ;;  %v12824_v8 = vld [vmem:[%s20776_s1 + $0xa4] ss:$16 sps:$4 sm:$0xff]   ;;  %v12828_v10 = vld [vmem:[%s20776_s1 + $0xa0] ss:$16 sps:$4 sm:$0xff]   ;;  %v12911_v5 = vld [vmem:[%s20777_s0 + $0x8] ss:$144 sps:$4 sm:$0xff]  }
   0x6   :  { %v12826_v9 = vld [vmem:[%s20776_s1 + $0x2a4] ss:$16 sps:$4 sm:$0xff]   ;;  %v12829_v11 = vld [vmem:[%s20776_s1 + $0x2a0] ss:$16 sps:$4 sm:$0xff]  }
   0x7   :  { %7966 = vmatpush1.bf16.msra.mxu0 %v12822_v6  ;;  %v12830_v12 = vld [vmem:[%s20776_s1 + $0x84] ss:$16 sps:$4 sm:$0xff]   ;;  %v12834_v14 = vld [vmem:[%s20776_s1 + $0x80] ss:$16 sps:$4 sm:$0xff]  }
   0x8   :  { %8047 = vmatpush1.bf16.msra.mxu1 %v12823_v7  ;;  %7967 = vmatprep.subr.bf16.mxu0 %v12824_v8  ;;  %v12832_v13 = vld [vmem:[%s20776_s1 + $0x284] ss:$16 sps:$4 sm:$0xff]   ;;  %v12835_v15 = vld [vmem:[%s20776_s1 + $0x280] ss:$16 sps:$4 sm:$0xff]  }
   0x9   :  { %8048 = vmatprep.subr.bf16.mxu1 %v12826_v9  ;;  %v12836_v16 = vld [vmem:[%s20776_s1 + $0x64] ss:$16 sps:$4 sm:$0xff]   ;;  %v12840_v18 = vld [vmem:[%s20776_s1 + $0x60] ss:$16 sps:$4 sm:$0xff]  }
   0xa   :  { %v12838_v17 = vld [vmem:[%s20776_s1 + $0x264] ss:$16 sps:$4 sm:$0xff]   ;;  %v12841_v19 = vld [vmem:[%s20776_s1 + $0x260] ss:$16 sps:$4 sm:$0xff]  }
   0xb   :  { %7968 = vmatpush1.bf16.msra.mxu0 %v12828_v10  ;;  %v12842_v20 = vld [vmem:[%s20776_s1 + $0x44] ss:$16 sps:$4 sm:$0xff]   ;;  %v12846_v22 = vld [vmem:[%s20776_s1 + $0x40] ss:$16 sps:$4 sm:$0xff]  }
   0xc   :  { %8049 = vmatpush1.bf16.msra.mxu1 %v12829_v11  ;;  %7969 = vmatprep.subr.bf16.mxu0 %v12830_v12  ;;  %v12844_v21 = vld [vmem:[%s20776_s1 + $0x244] ss:$16 sps:$4 sm:$0xff]   ;;  %v12847_v23 = vld [vmem:[%s20776_s1 + $0x240] ss:$16 sps:$4 sm:$0xff]   ;;  %v12959_v11 = vld [vmem:[%s20777_s0 + $0x12c] ss:$144 sps:$4 sm:$0xff]  }
   0xd   :  { %8050 = vmatprep.subr.bf16.mxu1 %v12832_v13  ;;  %v12848_v24 = vld [vmem:[%s20776_s1 + $0x24] ss:$16 sps:$4 sm:$0xff]   ;;  %v12852_v26 = vld [vmem:[%s20776_s1 + $0x20] ss:$16 sps:$4 sm:$0xff]  }
   0xe   :  { %v12850_v25 = vld [vmem:[%s20776_s1 + $0x224] ss:$16 sps:$4 sm:$0xff]   ;;  %v12853_v27 = vld [vmem:[%s20776_s1 + $0x220] ss:$16 sps:$4 sm:$0xff]  }
   0xf   :  { %7970 = vmatpush1.bf16.msra.mxu0 %v12834_v14  ;;  %v12854_v28 = vld [vmem:[%s20776_s1 + $0x4] ss:$16 sps:$4 sm:$0xff]   ;;  %v12858_v30 = vld [vmem:[%s20776_s1] ss:$16 sps:$4 sm:$0xff]  }
  0x10   :  { %8051 = vmatpush1.bf16.msra.mxu1 %v12835_v15  ;;  %7971 = vmatprep.subr.bf16.mxu0 %v12836_v16  ;;  %v12856_v29 = vld [vmem:[%s20776_s1 + $0x204] ss:$16 sps:$4 sm:$0xff]   ;;  %v12859_v31 = vld [vmem:[%s20776_s1 + $0x200] ss:$16 sps:$4 sm:$0xff]  }
  0x11   :  { %8052 = vmatprep.subr.bf16.mxu1 %v12838_v17  ;;  %v12860_v32 = vld [vmem:[%s20776_s1 + $0x1e4] ss:$16 sps:$4 sm:$0xff]   ;;  %v12864_v34 = vld [vmem:[%s20776_s1 + $0x1e0] ss:$16 sps:$4 sm:$0xff]  }
  0x12   :  { %v12862_v33 = vld [vmem:[%s20776_s1 + $0x3e4] ss:$16 sps:$4 sm:$0xff]   ;;  %v12865_v35 = vld [vmem:[%s20776_s1 + $0x3e0] ss:$16 sps:$4 sm:$0xff]  }
  0x13   :  { %7972 = vmatpush1.bf16.msra.mxu0 %v12840_v18  ;;  %v12866_v36 = vld [vmem:[%s20776_s1 + $0x1c4] ss:$16 sps:$4 sm:$0xff]   ;;  %v12870_v38 = vld [vmem:[%s20776_s1 + $0x1c0] ss:$16 sps:$4 sm:$0xff]  }
  0x14   :  { %8053 = vmatpush1.bf16.msra.mxu1 %v12841_v19  ;;  %7973 = vmatprep.subr.bf16.mxu0 %v12842_v20  ;;  %v12868_v37 = vld [vmem:[%s20776_s1 + $0x3c4] ss:$16 sps:$4 sm:$0xff]   ;;  %v12871_v39 = vld [vmem:[%s20776_s1 + $0x3c0] ss:$16 sps:$4 sm:$0xff]   ;;  %v12967_v20 = vld [vmem:[%s20777_s0 + $0x128] ss:$144 sps:$4 sm:$0xff]  }
  0x15   :  { %8054 = vmatprep.subr.bf16.mxu1 %v12844_v21  ;;  %v12872_v40 = vld [vmem:[%s20776_s1 + $0x1a4] ss:$16 sps:$4 sm:$0xff]   ;;  %v12876_v42 = vld [vmem:[%s20776_s1 + $0x1a0] ss:$16 sps:$4 sm:$0xff]  }
  0x16   :  { %v12874_v41 = vld [vmem:[%s20776_s1 + $0x3a4] ss:$16 sps:$4 sm:$0xff]   ;;  %v12877_v43 = vld [vmem:[%s20776_s1 + $0x3a0] ss:$16 sps:$4 sm:$0xff]  }
  0x17   :  { %7974 = vmatpush1.bf16.msra.mxu0 %v12846_v22  ;;  %v12878_v44 = vld [vmem:[%s20776_s1 + $0x184] ss:$16 sps:$4 sm:$0xff]   ;;  %v12882_v46 = vld [vmem:[%s20776_s1 + $0x180] ss:$16 sps:$4 sm:$0xff]  }
  0x18   :  { %8055 = vmatpush1.bf16.msra.mxu1 %v12847_v23  ;;  %7975 = vmatprep.subr.bf16.mxu0 %v12848_v24  ;;  %v12880_v45 = vld [vmem:[%s20776_s1 + $0x384] ss:$16 sps:$4 sm:$0xff]   ;;  %v12883_v47 = vld [vmem:[%s20776_s1 + $0x380] ss:$16 sps:$4 sm:$0xff]   ;;  %v12977_v23 = vld [vmem:[%s20777_s0 + $0x24c] ss:$144 sps:$4 sm:$0xff]  }
  0x19   :  { %8056 = vmatprep.subr.bf16.mxu1 %v12850_v25  ;;  %v12884_v48 = vld [vmem:[%s20776_s1 + $0x164] ss:$16 sps:$4 sm:$0xff]   ;;  %v12888_v52 = vld [vmem:[%s20776_s1 + $0x160] ss:$16 sps:$4 sm:$0xff]  }
  0x1a   :  { %v12910_v49 = vld [vmem:[%s20777_s0 + $0x4] ss:$144 sps:$4 sm:$0xff]   ;;  %v12889_v53 = vld [vmem:[%s20776_s1 + $0x360] ss:$16 sps:$4 sm:$0xff]  }
  0x1b   :  { %7976 = vmatpush1.bf16.msra.mxu0 %v12852_v26  ;;  %v12886_v50 = vld [vmem:[%s20776_s1 + $0x364] ss:$16 sps:$4 sm:$0xff]   ;;  %7995 = vmatprep.mubr.bf16.mxu0 %v12910_v49  ;;  %v12894_v56 = vld [vmem:[%s20776_s1 + $0x140] ss:$16 sps:$4 sm:$0xff]  }
  0x1c   :  { %8057 = vmatpush1.bf16.msra.mxu1 %v12853_v27  ;;  %7977 = vmatprep.subr.bf16.mxu0 %v12854_v28  ;;  %v12890_v54 = vld [vmem:[%s20776_s1 + $0x144] ss:$16 sps:$4 sm:$0xff]   ;;  %v12895_v57 = vld [vmem:[%s20776_s1 + $0x340] ss:$16 sps:$4 sm:$0xff]  }
  0x1d   :  { %8058 = vmatprep.subr.bf16.mxu1 %v12856_v29  ;;  %v12892_v55 = vld [vmem:[%s20776_s1 + $0x344] ss:$16 sps:$4 sm:$0xff]   ;;  %v12900_v60 = vld [vmem:[%s20776_s1 + $0x120] ss:$16 sps:$4 sm:$0xff]  }
  0x1e   :  { %v12896_v58 = vld [vmem:[%s20776_s1 + $0x124] ss:$16 sps:$4 sm:$0xff]   ;;  %v12901_v61 = vld [vmem:[%s20776_s1 + $0x320] ss:$16 sps:$4 sm:$0xff]  }
  0x1f   :  { %7978 = vmatpush1.bf16.msra.mxu0 %v12858_v30  ;;  %v12898_v59 = vld [vmem:[%s20776_s1 + $0x324] ss:$16 sps:$4 sm:$0xff]   ;;  %v12906_v0 = vld [vmem:[%s20776_s1 + $0x100] ss:$16 sps:$4 sm:$0xff]  }
  0x20   :  { %8059 = vmatpush1.bf16.msra.mxu1 %v12859_v31  ;;  %7979 = vmatprep.subr.bf16.mxu0 %v12860_v32  ;;  %v12902_v62 = vld [vmem:[%s20776_s1 + $0x104] ss:$16 sps:$4 sm:$0xff]   ;;  %v12907_v1 = vld [vmem:[%s20776_s1 + $0x300] ss:$16 sps:$4 sm:$0xff]   ;;  %v12985_v32 = vld [vmem:[%s20777_s0 + $0x248] ss:$144 sps:$4 sm:$0xff]  }
  0x21   :  { %8060 = vmatprep.subr.bf16.mxu1 %v12862_v33  ;;  %v12904_v63 = vld [vmem:[%s20776_s1 + $0x304] ss:$16 sps:$4 sm:$0xff]   ;;  %v12908_v3 = vld [vmem:[%s20777_s0] ss:$144 sps:$4 sm:$0xff]  }
  0x22   :  { %v12916_v2 = vld [vmem:[%s20776_s1 + $0x4e4] ss:$16 sps:$4 sm:$0xff]   ;;  %v12914_v6 = vld [vmem:[%s20776_s1 + $0x4e0] ss:$16 sps:$4 sm:$0xff]  }
  0x23   :  { %7980 = vmatpush2.bf16.msra.mxu0 %v12864_v34  ;;  %v12919_v4 = vld [vmem:[%s20776_s1 + $0x6e4] ss:$16 sps:$4 sm:$0xff]   ;;  %v12917_v7 = vld [vmem:[%s20776_s1 + $0x6e0] ss:$16 sps:$4 sm:$0xff]  }
  0x24   :  { %8061 = vmatpush2.bf16.msra.mxu1 %v12865_v35  ;;  %7981 = vmatprep.subr.bf16.mxu0 %v12866_v36  ;;  %v12922_v8 = vld [vmem:[%s20776_s1 + $0x4c4] ss:$16 sps:$4 sm:$0xff]   ;;  %v12920_v12 = vld [vmem:[%s20776_s1 + $0x4c0] ss:$16 sps:$4 sm:$0xff]   ;;  %v12995_v35 = vld [vmem:[%s20777_s0 + $0x36c] ss:$144 sps:$4 sm:$0xff]  }
  0x25   :  { %8062 = vmatprep.subr.bf16.mxu1 %v12868_v37  ;;  %v12925_v9 = vld [vmem:[%s20776_s1 + $0x6c4] ss:$16 sps:$4 sm:$0xff]   ;;  %v12923_v13 = vld [vmem:[%s20776_s1 + $0x6c0] ss:$16 sps:$4 sm:$0xff]  }
  0x26   :  { %v12956_v10 = vld [vmem:[%s20777_s0 + $0x124] ss:$144 sps:$4 sm:$0xff]   ;;  %v12926_v16 = vld [vmem:[%s20776_s1 + $0x4a0] ss:$16 sps:$4 sm:$0xff]  }
  0x27   :  { %7982 = vmatpush2.bf16.msra.mxu0 %v12870_v38  ;;  %v12928_v14 = vld [vmem:[%s20776_s1 + $0x4a4] ss:$16 sps:$4 sm:$0xff]   ;;  %v12929_v17 = vld [vmem:[%s20776_s1 + $0x6a0] ss:$16 sps:$4 sm:$0xff]  }
  0x28   :  { %8063 = vmatpush2.bf16.msra.mxu1 %v12871_v39  ;;  %7983 = vmatprep.subr.bf16.mxu0 %v12872_v40  ;;  %v12931_v15 = vld [vmem:[%s20776_s1 + $0x6a4] ss:$16 sps:$4 sm:$0xff]   ;;  %v12958_v19 = vld [vmem:[%s20777_s0 + $0x120] ss:$144 sps:$4 sm:$0xff]  }
  0x29   :  { %8064 = vmatprep.subr.bf16.mxu1 %v12874_v41  ;;  %v12934_v18 = vld [vmem:[%s20776_s1 + $0x484] ss:$16 sps:$4 sm:$0xff]   ;;  %v12932_v24 = vld [vmem:[%s20776_s1 + $0x480] ss:$16 sps:$4 sm:$0xff]  }
  0x2a   :  { %v12937_v21 = vld [vmem:[%s20776_s1 + $0x684] ss:$16 sps:$4 sm:$0xff]   ;;  %v12935_v25 = vld [vmem:[%s20776_s1 + $0x680] ss:$16 sps:$4 sm:$0xff]  }
  0x2b   :  { %7984 = vmatpush2.bf16.msra.mxu0 %v12876_v42  ;;  %v12974_v22 = vld [vmem:[%s20777_s0 + $0x244] ss:$144 sps:$4 sm:$0xff]   ;;  %v12938_v28 = vld [vmem:[%s20776_s1 + $0x460] ss:$16 sps:$4 sm:$0xff]  }
  0x2c   :  { %8065 = vmatpush2.bf16.msra.mxu1 %v12877_v43  ;;  %7985 = vmatprep.subr.bf16.mxu0 %v12878_v44  ;;  %v12940_v26 = vld [vmem:[%s20776_s1 + $0x464] ss:$16 sps:$4 sm:$0xff]   ;;  %v12941_v29 = vld [vmem:[%s20776_s1 + $0x660] ss:$16 sps:$4 sm:$0xff]   ;;  %v13003_v43 = vld [vmem:[%s20777_s0 + $0x368] ss:$144 sps:$4 sm:$0xff]  }
  0x2d   :  { %8066 = vmatprep.subr.bf16.mxu1 %v12880_v45  ;;  %v12943_v27 = vld [vmem:[%s20776_s1 + $0x664] ss:$16 sps:$4 sm:$0xff]   ;;  %v12976_v31 = vld [vmem:[%s20777_s0 + $0x240] ss:$144 sps:$4 sm:$0xff]   ;;  %v166_v45 = vld [vmem:[%s20777_s0 + $0x488] sm:$0xff] }
  0x2e   :  { %v12946_v30 = vld [vmem:[%s20776_s1 + $0x444] ss:$16 sps:$4 sm:$0xff]   ;;  %v12944_v36 = vld [vmem:[%s20776_s1 + $0x440] ss:$16 sps:$4 sm:$0xff]   ;;  %v15337_v49 = vcombine.high %v166_v45, %v166_v45 }
  0x2f   :  { %7986 = vmatpush2.bf16.msra.mxu0 %v12882_v46  ;;  %v12949_v33 = vld [vmem:[%s20776_s1 + $0x644] ss:$16 sps:$4 sm:$0xff]   ;;  %v12947_v37 = vld [vmem:[%s20776_s1 + $0x640] ss:$16 sps:$4 sm:$0xff]  }
  0x30   :  { %8067 = vmatpush2.bf16.msra.mxu1 %v12883_v47  ;;  %7987 = vmatprep.subr.bf16.mxu0 %v12884_v48  ;;  %v12992_v34 = vld [vmem:[%s20777_s0 + $0x364] ss:$144 sps:$4 sm:$0xff]   ;;  %v12950_v40 = vld [vmem:[%s20776_s1 + $0x420] ss:$16 sps:$4 sm:$0xff]  }
  0x31   :  { %8068 = vmatprep.subr.bf16.mxu1 %v12886_v50  ;;  %v12952_v38 = vld [vmem:[%s20776_s1 + $0x424] ss:$16 sps:$4 sm:$0xff]   ;;  %v12953_v41 = vld [vmem:[%s20776_s1 + $0x620] ss:$16 sps:$4 sm:$0xff]  }
  0x32   :  { %v12955_v39 = vld [vmem:[%s20776_s1 + $0x624] ss:$16 sps:$4 sm:$0xff]   ;;  %v12994_v42 = vld [vmem:[%s20777_s0 + $0x360] ss:$144 sps:$4 sm:$0xff]  }
  0x33   :  { %7988 = vmatpush2.bf16.msra.mxu0 %v12888_v52  ;;  %v165_v44 = vld [vmem:[%s20777_s0 + $0x480] sm:$0xff] }
  0x34   :  { %8069 = vmatpush2.bf16.msra.mxu1 %v12889_v53  ;;  %7989 = vmatprep.subr.bf16.mxu0 %v12890_v54  ;;  %v12963_v46 = vld [vmem:[%s20776_s1 + $0x404] ss:$16 sps:$4 sm:$0xff]   ;;  %v15335_v48 = vcombine.high %v165_v44, %v165_v44  ;;  %v12961_v50 = vld [vmem:[%s20776_s1 + $0x400] ss:$16 sps:$4 sm:$0xff]   ;;  %v15353_v54 = vcombine.low %v165_v44, %v165_v44 }
  0x35   :  { %8070 = vmatprep.subr.bf16.mxu1 %v12892_v55  ;;  %v12966_v47 = vld [vmem:[%s20776_s1 + $0x604] ss:$16 sps:$4 sm:$0xff]   ;;  %v12964_v51 = vld [vmem:[%s20776_s1 + $0x600] ss:$16 sps:$4 sm:$0xff]   ;;  %v15355_v55 = vcombine.low %v166_v45, %v166_v45  ;;  %v13077_v45 = vld [vmem:[%s20777_s0 + $0x25c] ss:$144 sps:$4 sm:$0xff]  }
  0x36   :  { %v12970_v52 = vld [vmem:[%s20776_s1 + $0x5e4] ss:$16 sps:$4 sm:$0xff]  }
  0x37   :  { %7990 = vmatpush2.bf16.msra.mxu0 %v12894_v56  ;;  %v12973_v53 = vld [vmem:[%s20776_s1 + $0x7e4] ss:$16 sps:$4 sm:$0xff]   ;;  %v12968_v56 = vld [vmem:[%s20776_s1 + $0x5e0] ss:$16 sps:$4 sm:$0xff]  }
  0x38   :  { %8071 = vmatpush2.bf16.msra.mxu1 %v12895_v57  ;;  %7991 = vmatprep.subr.bf16.mxu0 %v12896_v58  ;;  %v12971_v57 = vld [vmem:[%s20776_s1 + $0x7e0] ss:$16 sps:$4 sm:$0xff]   ;;  %v12981_v58 = vld [vmem:[%s20776_s1 + $0x5c4] ss:$16 sps:$4 sm:$0xff]  }
  0x39   :  { %8072 = vmatprep.subr.bf16.mxu1 %v12898_v59  ;;  %v12984_v59 = vld [vmem:[%s20776_s1 + $0x7c4] ss:$16 sps:$4 sm:$0xff]  }
  0x3a   :  { %v13068_v44 = vld [vmem:[%s20777_s0 + $0x254] ss:$144 sps:$4 sm:$0xff]  }
  0x3b   :  { %7992 = vmatpush2.bf16.msra.mxu0 %v12900_v60  ;;  %v13034_v60 = vld [vmem:[%s20777_s0 + $0x14] ss:$144 sps:$4 sm:$0xff]  }
  0x3c   :  { %8073 = vmatpush2.bf16.msra.mxu1 %v12901_v61  ;;  %7993 = vmatprep.subr.bf16.mxu0 %v12902_v62  ;;  %v13037_v61 = vld [vmem:[%s20777_s0 + $0x1c] ss:$144 sps:$4 sm:$0xff]   ;;  %v12979_v62 = vld [vmem:[%s20776_s1 + $0x5c0] ss:$16 sps:$4 sm:$0xff]  }
  0x3d   :  { %8074 = vmatprep.subr.bf16.mxu1 %v12904_v63  ;;  %v12982_v63 = vld [vmem:[%s20776_s1 + $0x7c0] ss:$16 sps:$4 sm:$0xff]  }
  0x3f   :  { %7994 = vmatpush2.bf16.msra.mxu0 %v12906_v0  ;;  %v12988_v0 = vld [vmem:[%s20776_s1 + $0x5a4] ss:$16 sps:$4 sm:$0xff]  }
  0x40   :  { %8075 = vmatpush2.bf16.msra.mxu1 %v12907_v1  ;;  %8125 = vmatprep.subr.bf16.mxu0 %v12916_v2  ;;  %v12991_v1 = vld [vmem:[%s20776_s1 + $0x7a4] ss:$16 sps:$4 sm:$0xff]   ;;  %v12986_v2 = vld [vmem:[%s20776_s1 + $0x5a0] ss:$16 sps:$4 sm:$0xff]  }
  0x41   :  { %8206 = vmatprep.subr.bf16.mxu1 %v12919_v4  ;;  %v12999_v4 = vld [vmem:[%s20776_s1 + $0x584] ss:$16 sps:$4 sm:$0xff]  }
  0x42   :  { %7996 = vmatmul.mubr.bf16.vlgmr.msra.gmra.mxu0 %v12908_v3  ;;  %v12989_v3 = vld [vmem:[%s20776_s1 + $0x7a0] ss:$16 sps:$4 sm:$0xff]  }
  0x43   :  { %8077 = vmatmul.mubr.bf16.vlgmr.msra.gmra.mxu1 %v12911_v5  ;;  %8126 = vmatpush1.bf16.msra.mxu0 %v12914_v6  ;;  %v13002_v5 = vld [vmem:[%s20776_s1 + $0x784] ss:$16 sps:$4 sm:$0xff]   ;;  %v12997_v6 = vld [vmem:[%s20776_s1 + $0x580] ss:$16 sps:$4 sm:$0xff]  }
  0x44   :  { %8207 = vmatpush1.bf16.msra.mxu1 %v12917_v7  ;;  %8127 = vmatprep.subr.bf16.mxu0 %v12922_v8  ;;  %v13000_v7 = vld [vmem:[%s20776_s1 + $0x780] ss:$16 sps:$4 sm:$0xff]   ;;  %v13006_v8 = vld [vmem:[%s20776_s1 + $0x564] ss:$16 sps:$4 sm:$0xff]  }
  0x45   :  { %8208 = vmatprep.subr.bf16.mxu1 %v12925_v9  ;;  %8005 = vmatprep.mubr.bf16.mxu0 %v12956_v10  ;;  %v13009_v9 = vld [vmem:[%s20776_s1 + $0x764] ss:$16 sps:$4 sm:$0xff]   ;;  %v13004_v10 = vld [vmem:[%s20776_s1 + $0x560] ss:$16 sps:$4 sm:$0xff]  }
  0x46   :  { %8086 = vmatprep.mubr.bf16.mxu1 %v12959_v11  ;;  %v13007_v11 = vld [vmem:[%s20776_s1 + $0x760] ss:$16 sps:$4 sm:$0xff]  }
  0x47   :  { %8128 = vmatpush1.bf16.msra.mxu0 %v12920_v12  ;;  %v13015_v12 = vld [vmem:[%s20776_s1 + $0x544] ss:$16 sps:$4 sm:$0xff]  }
  0x48   :  { %8209 = vmatpush1.bf16.msra.mxu1 %v12923_v13  ;;  %8129 = vmatprep.subr.bf16.mxu0 %v12928_v14  ;;  %v13018_v13 = vld [vmem:[%s20776_s1 + $0x744] ss:$16 sps:$4 sm:$0xff]   ;;  %v13013_v14 = vld [vmem:[%s20776_s1 + $0x540] ss:$16 sps:$4 sm:$0xff]  }
  0x49   :  { %8210 = vmatprep.subr.bf16.mxu1 %v12931_v15  ;;  %v13016_v15 = vld [vmem:[%s20776_s1 + $0x740] ss:$16 sps:$4 sm:$0xff]  }
  0x4a   :  { %8006 = vmatmul.mubr.bf16.gmra.mxu0 %v12958_v19  ;;  %v13023_v19 = vld [vmem:[%s20776_s1 + $0x720] ss:$16 sps:$4 sm:$0xff]  }
  0x4b   :  { %8087 = vmatmul.mubr.bf16.gmra.mxu1 %v12967_v20  ;;  %8130 = vmatpush1.bf16.msra.mxu0 %v12926_v16  ;;  %v13022_v16 = vld [vmem:[%s20776_s1 + $0x524] ss:$16 sps:$4 sm:$0xff]  }
  0x4c   :  { %8211 = vmatpush1.bf16.msra.mxu1 %v12929_v17  ;;  %8131 = vmatprep.subr.bf16.mxu0 %v12934_v18  ;;  %v13025_v17 = vld [vmem:[%s20776_s1 + $0x724] ss:$16 sps:$4 sm:$0xff]   ;;  %v13020_v18 = vld [vmem:[%s20776_s1 + $0x520] ss:$16 sps:$4 sm:$0xff]  }
  0x4d   :  { %8212 = vmatprep.subr.bf16.mxu1 %v12937_v21  ;;  %8015 = vmatprep.mubr.bf16.mxu0 %v12974_v22  ;;  %v13028_v20 = vld [vmem:[%s20776_s1 + $0x504] ss:$16 sps:$4 sm:$0xff]   ;;  %v13026_v22 = vld [vmem:[%s20776_s1 + $0x500] ss:$16 sps:$4 sm:$0xff]  }
  0x4e   :  { %8096 = vmatprep.mubr.bf16.mxu1 %v12977_v23  ;;  %v13031_v21 = vld [vmem:[%s20776_s1 + $0x704] ss:$16 sps:$4 sm:$0xff]   ;;  %v13029_v23 = vld [vmem:[%s20776_s1 + $0x700] ss:$16 sps:$4 sm:$0xff]  }
  0x4f   :  { %8132 = vmatpush1.bf16.msra.mxu0 %v12932_v24  ;;  %v13032_v24 = vld [vmem:[%s20777_s0 + $0x10] ss:$144 sps:$4 sm:$0xff]  }
  0x50   :  { %8213 = vmatpush1.bf16.msra.mxu1 %v12935_v25  ;;  %8133 = vmatprep.subr.bf16.mxu0 %v12940_v26  ;;  %v13040_v25 = vld [vmem:[%s20776_s1 + $0x8e4] ss:$16 sps:$4 sm:$0xff]  }
  0x51   :  { %8214 = vmatprep.subr.bf16.mxu1 %v12943_v27  ;;  %v13043_v26 = vld [vmem:[%s20776_s1 + $0xae4] ss:$16 sps:$4 sm:$0xff]   ;;  %v13035_v27 = vld [vmem:[%s20777_s0 + $0x18] ss:$144 sps:$4 sm:$0xff]  }
  0x52   :  { %8016 = vmatmul.mubr.bf16.gmra.mxu0 %v12976_v31  ;;  %v13049_v31 = vld [vmem:[%s20776_s1 + $0xac4] ss:$16 sps:$4 sm:$0xff]  }
  0x53   :  { %8097 = vmatmul.mubr.bf16.gmra.mxu1 %v12985_v32  ;;  %8134 = vmatpush1.bf16.msra.mxu0 %v12938_v28  ;;  %v13038_v28 = vld [vmem:[%s20776_s1 + $0x8e0] ss:$16 sps:$4 sm:$0xff]   ;;  %v13050_v32 = vld [vmem:[%s20777_s0 + $0x134] ss:$144 sps:$4 sm:$0xff]  }
  0x54   :  { %8215 = vmatpush1.bf16.msra.mxu1 %v12941_v29  ;;  %8135 = vmatprep.subr.bf16.mxu0 %v12946_v30  ;;  %v13041_v29 = vld [vmem:[%s20776_s1 + $0xae0] ss:$16 sps:$4 sm:$0xff]   ;;  %v13046_v30 = vld [vmem:[%s20776_s1 + $0x8c4] ss:$16 sps:$4 sm:$0xff]  }
  0x55   :  { %8216 = vmatprep.subr.bf16.mxu1 %v12949_v33  ;;  %8025 = vmatprep.mubr.bf16.mxu0 %v12992_v34  ;;  %v13059_v33 = vld [vmem:[%s20777_s0 + $0x13c] ss:$144 sps:$4 sm:$0xff]   ;;  %v13044_v34 = vld [vmem:[%s20776_s1 + $0x8c0] ss:$16 sps:$4 sm:$0xff]  }
  0x56   :  { %8106 = vmatprep.mubr.bf16.mxu1 %v12995_v35  ;;  %v13047_v35 = vld [vmem:[%s20776_s1 + $0xac0] ss:$16 sps:$4 sm:$0xff]  }
  0x57   :  { %8136 = vmatpush1.bf16.msra.mxu0 %v12944_v36  ;;  %v13055_v36 = vld [vmem:[%s20776_s1 + $0x8a4] ss:$16 sps:$4 sm:$0xff]  }
  0x58   :  { %8217 = vmatpush1.bf16.msra.mxu1 %v12947_v37  ;;  %8137 = vmatprep.subr.bf16.mxu0 %v12952_v38  ;;  %v13058_v37 = vld [vmem:[%s20776_s1 + $0xaa4] ss:$16 sps:$4 sm:$0xff]   ;;  %v13052_v38 = vld [vmem:[%s20777_s0 + $0x130] ss:$144 sps:$4 sm:$0xff]  }
  0x59   :  { %8218 = vmatprep.subr.bf16.mxu1 %v12955_v39  ;;  %v13053_v39 = vld [vmem:[%s20776_s1 + $0x8a0] ss:$16 sps:$4 sm:$0xff]  }
  0x5a   :  { %8026 = vmatmul.mubr.bf16.gmra.mxu0 %v12994_v42  ;;  %v13064_v42 = vld [vmem:[%s20776_s1 + $0x884] ss:$16 sps:$4 sm:$0xff]  }
  0x5b   :  { %8107 = vmatmul.mubr.bf16.gmra.mxu1 %v13003_v43  ;;  %8138 = vmatpush1.bf16.msra.mxu0 %v12950_v40  ;;  %v13056_v40 = vld [vmem:[%s20776_s1 + $0xaa0] ss:$16 sps:$4 sm:$0xff]   ;;  %v13067_v43 = vld [vmem:[%s20776_s1 + $0xa84] ss:$16 sps:$4 sm:$0xff]  }
  0x5c   :  { %8219 = vmatpush1.bf16.msra.mxu1 %v12953_v41  ;;  %8139 = vmatprep.subr.bf16.mxu0 %v12963_v46  ;;  %v13061_v41 = vld [vmem:[%s20777_s0 + $0x138] ss:$144 sps:$4 sm:$0xff]   ;;  %v13062_v46 = vld [vmem:[%s20776_s1 + $0x880] ss:$16 sps:$4 sm:$0xff]  }
  0x5d   :  { %8220 = vmatprep.subr.bf16.mxu1 %v12966_v47  ;;  %8035 = vmatprep.mubr.bf16.mxu0 %v15335_v48  ;;  %v13065_v47 = vld [vmem:[%s20776_s1 + $0xa80] ss:$16 sps:$4 sm:$0xff]  }
  0x5e   :  { %8116 = vmatprep.mubr.bf16.mxu1 %v15337_v49 }
  0x5f   :  { %8140 = vmatpush1.bf16.msra.mxu0 %v12961_v50  ;;  %v13073_v50 = vld [vmem:[%s20776_s1 + $0x864] ss:$16 sps:$4 sm:$0xff]  }
  0x60   :  { %8221 = vmatpush1.bf16.msra.mxu1 %v12964_v51  ;;  %8141 = vmatprep.subr.bf16.mxu0 %v12970_v52  ;;  %v13076_v51 = vld [vmem:[%s20776_s1 + $0xa64] ss:$16 sps:$4 sm:$0xff]   ;;  %v13070_v52 = vld [vmem:[%s20777_s0 + $0x250] ss:$144 sps:$4 sm:$0xff]  }
  0x61   :  { %8222 = vmatprep.subr.bf16.mxu1 %v12973_v53  ;;  %v13071_v53 = vld [vmem:[%s20776_s1 + $0x860] ss:$16 sps:$4 sm:$0xff]  }
  0x62   :  { %8036 = vmatmul.mubr.bf16.gmra.mxu0 %v15353_v54 }
  0x63   :  { %8117 = vmatmul.mubr.bf16.gmra.mxu1 %v15355_v55  ;;  %8142 = vmatpush2.bf16.msra.mxu0 %v12968_v56  ;;  %v13074_v56 = vld [vmem:[%s20776_s1 + $0xa60] ss:$16 sps:$4 sm:$0xff]  }
  0x64   :  { %8223 = vmatpush2.bf16.msra.mxu1 %v12971_v57  ;;  %8143 = vmatprep.subr.bf16.mxu0 %v12981_v58  ;;  %v13079_v57 = vld [vmem:[%s20777_s0 + $0x258] ss:$144 sps:$4 sm:$0xff]   ;;  %v13082_v58 = vld [vmem:[%s20776_s1 + $0x844] ss:$16 sps:$4 sm:$0xff]  }
  0x65   :  { %8224 = vmatprep.subr.bf16.mxu1 %v12984_v59  ;;  %8157 = vmatprep.mubr.bf16.mxu0 %v13034_v60  ;;  %v13085_v59 = vld [vmem:[%s20776_s1 + $0xa44] ss:$16 sps:$4 sm:$0xff]  }
  0x66   :  { %8238 = vmatprep.mubr.bf16.mxu1 %v13037_v61  ;;  %v13086_v60 = vld [vmem:[%s20777_s0 + $0x374] ss:$144 sps:$4 sm:$0xff]   ;;  %v13095_v61 = vld [vmem:[%s20777_s0 + $0x37c] ss:$144 sps:$4 sm:$0xff]  }
  0x67   :  { %8144 = vmatpush2.bf16.msra.mxu0 %v12979_v62  ;;  %v13080_v62 = vld [vmem:[%s20776_s1 + $0x840] ss:$16 sps:$4 sm:$0xff]  }
  0x68   :  { %8225 = vmatpush2.bf16.msra.mxu1 %v12982_v63  ;;  %8145 = vmatprep.subr.bf16.mxu0 %v12988_v0  ;;  %v13083_v63 = vld [vmem:[%s20776_s1 + $0xa40] ss:$16 sps:$4 sm:$0xff]   ;;  %v13091_v0 = vld [vmem:[%s20776_s1 + $0x824] ss:$16 sps:$4 sm:$0xff]  }
  0x69   :  { %8226 = vmatprep.subr.bf16.mxu1 %v12991_v1  ;;  %v13088_v1 = vld [vmem:[%s20777_s0 + $0x370] ss:$144 sps:$4 sm:$0xff]  }
  0x6b   :  { %8146 = vmatpush2.bf16.msra.mxu0 %v12986_v2  ;;  %v13094_v2 = vld [vmem:[%s20776_s1 + $0xa24] ss:$16 sps:$4 sm:$0xff]  }
  0x6c   :  { %8227 = vmatpush2.bf16.msra.mxu1 %v12989_v3  ;;  %8147 = vmatprep.subr.bf16.mxu0 %v12999_v4  ;;  %v13089_v3 = vld [vmem:[%s20776_s1 + $0x820] ss:$16 sps:$4 sm:$0xff]  }
  0x6d   :  { %8228 = vmatprep.subr.bf16.mxu1 %v13002_v5  ;;  %v13092_v4 = vld [vmem:[%s20776_s1 + $0xa20] ss:$16 sps:$4 sm:$0xff]   ;;  %v13097_v5 = vld [vmem:[%s20777_s0 + $0x378] ss:$144 sps:$4 sm:$0xff]  }
  0x6f   :  { %8148 = vmatpush2.bf16.msra.mxu0 %v12997_v6  ;;  %v167_v6 = vld [vmem:[%s20777_s0 + $0x490] sm:$0xff] }
  0x70   :  { %8229 = vmatpush2.bf16.msra.mxu1 %v13000_v7  ;;  %8149 = vmatprep.subr.bf16.mxu0 %v13006_v8  ;;  %v168_v7 = vld [vmem:[%s20777_s0 + $0x498] sm:$0xff]  ;;  %v13100_v8 = vld [vmem:[%s20776_s1 + $0x804] ss:$16 sps:$4 sm:$0xff]  }
  0x71   :  { %8230 = vmatprep.subr.bf16.mxu1 %v13009_v9  ;;  %v13103_v9 = vld [vmem:[%s20776_s1 + $0xa04] ss:$16 sps:$4 sm:$0xff]  }
  0x73   :  { %8150 = vmatpush2.bf16.msra.mxu0 %v13004_v10  ;;  %v15593_v10 = vcombine.high %v167_v6, %v167_v6 }
  0x74   :  { %8231 = vmatpush2.bf16.msra.mxu1 %v13007_v11  ;;  %8151 = vmatprep.subr.bf16.mxu0 %v13015_v12  ;;  %v15595_v11 = vcombine.high %v168_v7, %v168_v7  ;;  %v13098_v12 = vld [vmem:[%s20776_s1 + $0x800] ss:$16 sps:$4 sm:$0xff]  }
  0x75   :  { %8232 = vmatprep.subr.bf16.mxu1 %v13018_v13  ;;  %v13101_v13 = vld [vmem:[%s20776_s1 + $0xa00] ss:$16 sps:$4 sm:$0xff]  }
  0x77   :  { %8152 = vmatpush2.bf16.msra.mxu0 %v13013_v14  ;;  %v13108_v14 = vld [vmem:[%s20776_s1 + $0x9e4] ss:$16 sps:$4 sm:$0xff]  }
  0x78   :  { %8233 = vmatpush2.bf16.msra.mxu1 %v13016_v15  ;;  %8153 = vmatprep.subr.bf16.mxu0 %v13022_v16  ;;  %v13111_v15 = vld [vmem:[%s20776_s1 + $0xbe4] ss:$16 sps:$4 sm:$0xff]   ;;  %v15611_v16 = vcombine.low %v167_v6, %v167_v6  ;;  %v13185_v6 = vld [vmem:[%s20777_s0 + $0x148] ss:$144 sps:$4 sm:$0xff]  }
  0x79   :  { %8234 = vmatprep.subr.bf16.mxu1 %v13025_v17  ;;  %v13106_v17 = vld [vmem:[%s20776_s1 + $0x9e0] ss:$16 sps:$4 sm:$0xff]  }
  0x7b   :  { %8154 = vmatpush2.bf16.msra.mxu0 %v13020_v18  ;;  %v13109_v18 = vld [vmem:[%s20776_s1 + $0xbe0] ss:$16 sps:$4 sm:$0xff]  }
  0x7c   :  { %8235 = vmatpush2.bf16.msra.mxu1 %v13023_v19  ;;  %8155 = vmatprep.subr.bf16.mxu0 %v13028_v20  ;;  %v15619_v19 = vcombine.low %v168_v7, %v168_v7  ;;  %v13116_v20 = vld [vmem:[%s20776_s1 + $0x9c4] ss:$16 sps:$4 sm:$0xff]   ;;  %v13180_v7 = vld [vmem:[%s20776_s1 + $0xea0] ss:$16 sps:$4 sm:$0xff]  }
  0x7d   :  { %8236 = vmatprep.subr.bf16.mxu1 %v13031_v21  ;;  %v13119_v21 = vld [vmem:[%s20776_s1 + $0xbc4] ss:$16 sps:$4 sm:$0xff]  }
  0x7f   :  { %8156 = vmatpush2.bf16.msra.mxu0 %v13026_v22  ;;  %v13158_v22 = vld [vmem:[%s20777_s0 + $0x24] ss:$144 sps:$4 sm:$0xff]  }
  0x80   :  { %8237 = vmatpush2.bf16.msra.mxu1 %v13029_v23  ;;  %8287 = vmatprep.subr.bf16.mxu0 %v13040_v25  ;;  %v13161_v23 = vld [vmem:[%s20777_s0 + $0x2c] ss:$144 sps:$4 sm:$0xff]   ;;  %v13117_v25 = vld [vmem:[%s20776_s1 + $0xbc0] ss:$16 sps:$4 sm:$0xff]  }
  0x81   :  { %8368 = vmatprep.subr.bf16.mxu1 %v13043_v26  ;;  %v13122_v26 = vld [vmem:[%s20776_s1 + $0x9a4] ss:$16 sps:$4 sm:$0xff]  }
  0x82   :  { %8158 = vmatmul.mubr.bf16.vlgmr.msra.gmra.mxu0 %v13032_v24  ;;  %v13114_v24 = vld [vmem:[%s20776_s1 + $0x9c0] ss:$16 sps:$4 sm:$0xff]  }
  0x83   :  { %8239 = vmatmul.mubr.bf16.vlgmr.msra.gmra.mxu1 %v13035_v27  ;;  %8288 = vmatpush1.bf16.msra.mxu0 %v13038_v28  ;;  %v13125_v27 = vld [vmem:[%s20776_s1 + $0xba4] ss:$16 sps:$4 sm:$0xff]   ;;  %v13120_v28 = vld [vmem:[%s20776_s1 + $0x9a0] ss:$16 sps:$4 sm:$0xff]  }
  0x84   :  { %8369 = vmatpush1.bf16.msra.mxu1 %v13041_v29  ;;  %8289 = vmatprep.subr.bf16.mxu0 %v13046_v30  ;;  %v13123_v29 = vld [vmem:[%s20776_s1 + $0xba0] ss:$16 sps:$4 sm:$0xff]   ;;  %v13128_v30 = vld [vmem:[%s20776_s1 + $0x984] ss:$16 sps:$4 sm:$0xff]  }
  0x85   :  { %8370 = vmatprep.subr.bf16.mxu1 %v13049_v31  ;;  %8167 = vmatprep.mubr.bf16.mxu0 %v13050_v32  ;;  %v13131_v31 = vld [vmem:[%s20776_s1 + $0xb84] ss:$16 sps:$4 sm:$0xff]   ;;  %v13126_v32 = vld [vmem:[%s20776_s1 + $0x980] ss:$16 sps:$4 sm:$0xff]  }
  0x86   :  { %8248 = vmatprep.mubr.bf16.mxu1 %v13059_v33  ;;  %v13129_v33 = vld [vmem:[%s20776_s1 + $0xb80] ss:$16 sps:$4 sm:$0xff]  }
  0x87   :  { %8290 = vmatpush1.bf16.msra.mxu0 %v13044_v34  ;;  %v13134_v34 = vld [vmem:[%s20776_s1 + $0x964] ss:$16 sps:$4 sm:$0xff]  }
  0x88   :  { %8371 = vmatpush1.bf16.msra.mxu1 %v13047_v35  ;;  %8291 = vmatprep.subr.bf16.mxu0 %v13055_v36  ;;  %v13137_v35 = vld [vmem:[%s20776_s1 + $0xb64] ss:$16 sps:$4 sm:$0xff]   ;;  %v13132_v36 = vld [vmem:[%s20776_s1 + $0x960] ss:$16 sps:$4 sm:$0xff]  }
  0x89   :  { %8372 = vmatprep.subr.bf16.mxu1 %v13058_v37  ;;  %v13135_v37 = vld [vmem:[%s20776_s1 + $0xb60] ss:$16 sps:$4 sm:$0xff]  }
  0x8a   :  { %8168 = vmatmul.mubr.bf16.gmra.mxu0 %v13052_v38  ;;  %v13140_v38 = vld [vmem:[%s20776_s1 + $0x944] ss:$16 sps:$4 sm:$0xff]  }
  0x8b   :  { %8249 = vmatmul.mubr.bf16.gmra.mxu1 %v13061_v41  ;;  %8292 = vmatpush1.bf16.msra.mxu0 %v13053_v39  ;;  %v13143_v39 = vld [vmem:[%s20776_s1 + $0xb44] ss:$16 sps:$4 sm:$0xff]   ;;  %v13141_v41 = vld [vmem:[%s20776_s1 + $0xb40] ss:$16 sps:$4 sm:$0xff]  }
  0x8c   :  { %8373 = vmatpush1.bf16.msra.mxu1 %v13056_v40  ;;  %8293 = vmatprep.subr.bf16.mxu0 %v13064_v42  ;;  %v13138_v40 = vld [vmem:[%s20776_s1 + $0x940] ss:$16 sps:$4 sm:$0xff]   ;;  %v13146_v42 = vld [vmem:[%s20776_s1 + $0x924] ss:$16 sps:$4 sm:$0xff]  }
  0x8d   :  { %8374 = vmatprep.subr.bf16.mxu1 %v13067_v43  ;;  %8177 = vmatprep.mubr.bf16.mxu0 %v13068_v44  ;;  %v13149_v43 = vld [vmem:[%s20776_s1 + $0xb24] ss:$16 sps:$4 sm:$0xff]   ;;  %v13144_v44 = vld [vmem:[%s20776_s1 + $0x920] ss:$16 sps:$4 sm:$0xff]  }
  0x8e   :  { %8258 = vmatprep.mubr.bf16.mxu1 %v13077_v45  ;;  %v13147_v45 = vld [vmem:[%s20776_s1 + $0xb20] ss:$16 sps:$4 sm:$0xff]  }
  0x8f   :  { %8294 = vmatpush1.bf16.msra.mxu0 %v13062_v46  ;;  %v13152_v46 = vld [vmem:[%s20776_s1 + $0x904] ss:$16 sps:$4 sm:$0xff]  }
  0x90   :  { %8375 = vmatpush1.bf16.msra.mxu1 %v13065_v47  ;;  %8295 = vmatprep.subr.bf16.mxu0 %v13073_v50  ;;  %v13155_v47 = vld [vmem:[%s20776_s1 + $0xb04] ss:$16 sps:$4 sm:$0xff]   ;;  %v13150_v50 = vld [vmem:[%s20776_s1 + $0x900] ss:$16 sps:$4 sm:$0xff]  }
  0x91   :  { %8376 = vmatprep.subr.bf16.mxu1 %v13076_v51  ;;  %v13153_v51 = vld [vmem:[%s20776_s1 + $0xb00] ss:$16 sps:$4 sm:$0xff]  }
  0x92   :  { %8178 = vmatmul.mubr.bf16.gmra.mxu0 %v13070_v52  ;;  %v13156_v52 = vld [vmem:[%s20777_s0 + $0x20] ss:$144 sps:$4 sm:$0xff]  }
  0x93   :  { %8259 = vmatmul.mubr.bf16.gmra.mxu1 %v13079_v57  ;;  %8296 = vmatpush1.bf16.msra.mxu0 %v13071_v53  ;;  %v13164_v53 = vld [vmem:[%s20776_s1 + $0xce4] ss:$16 sps:$4 sm:$0xff]   ;;  %v13159_v57 = vld [vmem:[%s20777_s0 + $0x28] ss:$144 sps:$4 sm:$0xff]  }
  0x94   :  { %8377 = vmatpush1.bf16.msra.mxu1 %v13074_v56  ;;  %8297 = vmatprep.subr.bf16.mxu0 %v13082_v58  ;;  %v13167_v56 = vld [vmem:[%s20776_s1 + $0xee4] ss:$16 sps:$4 sm:$0xff]   ;;  %v13162_v58 = vld [vmem:[%s20776_s1 + $0xce0] ss:$16 sps:$4 sm:$0xff]  }
  0x95   :  { %8378 = vmatprep.subr.bf16.mxu1 %v13085_v59  ;;  %8187 = vmatprep.mubr.bf16.mxu0 %v13086_v60  ;;  %v13165_v59 = vld [vmem:[%s20776_s1 + $0xee0] ss:$16 sps:$4 sm:$0xff]   ;;  %v13170_v60 = vld [vmem:[%s20776_s1 + $0xcc4] ss:$16 sps:$4 sm:$0xff]  }
  0x96   :  { %8268 = vmatprep.mubr.bf16.mxu1 %v13095_v61  ;;  %v13173_v61 = vld [vmem:[%s20776_s1 + $0xec4] ss:$16 sps:$4 sm:$0xff]  }
  0x97   :  { %8298 = vmatpush1.bf16.msra.mxu0 %v13080_v62  ;;  %v13174_v62 = vld [vmem:[%s20777_s0 + $0x144] ss:$144 sps:$4 sm:$0xff]  }
  0x98   :  { %8379 = vmatpush1.bf16.msra.mxu1 %v13083_v63  ;;  %8299 = vmatprep.subr.bf16.mxu0 %v13091_v0  ;;  %v13183_v63 = vld [vmem:[%s20777_s0 + $0x14c] ss:$144 sps:$4 sm:$0xff]   ;;  %v13168_v0 = vld [vmem:[%s20776_s1 + $0xcc0] ss:$16 sps:$4 sm:$0xff]  }
  0x99   :  { %8380 = vmatprep.subr.bf16.mxu1 %v13094_v2  ;;  %v13176_v2 = vld [vmem:[%s20777_s0 + $0x140] ss:$144 sps:$4 sm:$0xff]  }
  0x9a   :  { %8188 = vmatmul.mubr.bf16.gmra.mxu0 %v13088_v1  ;;  %v13171_v1 = vld [vmem:[%s20776_s1 + $0xec0] ss:$16 sps:$4 sm:$0xff]  }
  0x9b   :  { %8269 = vmatmul.mubr.bf16.gmra.mxu1 %v13097_v5  ;;  %8300 = vmatpush1.bf16.msra.mxu0 %v13089_v3  ;;  %v13179_v3 = vld [vmem:[%s20776_s1 + $0xca4] ss:$16 sps:$4 sm:$0xff]   ;;  %v13177_v5 = vld [vmem:[%s20776_s1 + $0xca0] ss:$16 sps:$4 sm:$0xff]  }
  0x9c   :  { %8381 = vmatpush1.bf16.msra.mxu1 %v13092_v4  ;;  %8301 = vmatprep.subr.bf16.mxu0 %v13100_v8  ;;  %v13182_v4 = vld [vmem:[%s20776_s1 + $0xea4] ss:$16 sps:$4 sm:$0xff]  }
  0x9d   :  { %8382 = vmatprep.subr.bf16.mxu1 %v13103_v9  ;;  %8197 = vmatprep.mubr.bf16.mxu0 %v15593_v10  ;;  %v13188_v8 = vld [vmem:[%s20776_s1 + $0xc84] ss:$16 sps:$4 sm:$0xff]  }
  0x9e   :  { %8278 = vmatprep.mubr.bf16.mxu1 %v15595_v11  ;;  %v13191_v9 = vld [vmem:[%s20776_s1 + $0xe84] ss:$16 sps:$4 sm:$0xff]  }
  0x9f   :  { %8302 = vmatpush1.bf16.msra.mxu0 %v13098_v12  ;;  %v13192_v12 = vld [vmem:[%s20777_s0 + $0x264] ss:$144 sps:$4 sm:$0xff]  }
  0xa0   :  { %8383 = vmatpush1.bf16.msra.mxu1 %v13101_v13  ;;  %8303 = vmatprep.subr.bf16.mxu0 %v13108_v14  ;;  %v13201_v13 = vld [vmem:[%s20777_s0 + $0x26c] ss:$144 sps:$4 sm:$0xff]   ;;  %v13186_v14 = vld [vmem:[%s20776_s1 + $0xc80] ss:$16 sps:$4 sm:$0xff]  }
  0xa1   :  { %8384 = vmatprep.subr.bf16.mxu1 %v13111_v15  ;;  %v13189_v15 = vld [vmem:[%s20776_s1 + $0xe80] ss:$16 sps:$4 sm:$0xff]  }
  0xa2   :  { %8198 = vmatmul.mubr.bf16.gmra.mxu0 %v15611_v16 }
  0xa3   :  { %8279 = vmatmul.mubr.bf16.gmra.mxu1 %v15619_v19  ;;  %8304 = vmatpush2.bf16.msra.mxu0 %v13106_v17  ;;  %v13194_v17 = vld [vmem:[%s20777_s0 + $0x260] ss:$144 sps:$4 sm:$0xff]  }
  0xa4   :  { %8385 = vmatpush2.bf16.msra.mxu1 %v13109_v18  ;;  %8305 = vmatprep.subr.bf16.mxu0 %v13116_v20  ;;  %v13197_v18 = vld [vmem:[%s20776_s1 + $0xc64] ss:$16 sps:$4 sm:$0xff]  }
  0xa5   :  { %8386 = vmatprep.subr.bf16.mxu1 %v13119_v21  ;;  %8319 = vmatprep.mubr.bf16.mxu0 %v13158_v22  ;;  %v13200_v20 = vld [vmem:[%s20776_s1 + $0xe64] ss:$16 sps:$4 sm:$0xff]   ;;  %v13195_v21 = vld [vmem:[%s20776_s1 + $0xc60] ss:$16 sps:$4 sm:$0xff]  }
  0xa6   :  { %8400 = vmatprep.mubr.bf16.mxu1 %v13161_v23  ;;  %v13198_v22 = vld [vmem:[%s20776_s1 + $0xe60] ss:$16 sps:$4 sm:$0xff]   ;;  %v13203_v23 = vld [vmem:[%s20777_s0 + $0x268] ss:$144 sps:$4 sm:$0xff]  }
  0xa7   :  { %8306 = vmatpush2.bf16.msra.mxu0 %v13114_v24  ;;  %v13206_v24 = vld [vmem:[%s20776_s1 + $0xc44] ss:$16 sps:$4 sm:$0xff]  }
  0xa8   :  { %8387 = vmatpush2.bf16.msra.mxu1 %v13117_v25  ;;  %8307 = vmatprep.subr.bf16.mxu0 %v13122_v26  ;;  %v13209_v25 = vld [vmem:[%s20776_s1 + $0xe44] ss:$16 sps:$4 sm:$0xff]  }
  0xa9   :  { %8388 = vmatprep.subr.bf16.mxu1 %v13125_v27  ;;  %v13210_v26 = vld [vmem:[%s20777_s0 + $0x384] ss:$144 sps:$4 sm:$0xff]   ;;  %v13219_v27 = vld [vmem:[%s20777_s0 + $0x38c] ss:$144 sps:$4 sm:$0xff]  }
  0xab   :  { %8308 = vmatpush2.bf16.msra.mxu0 %v13120_v28  ;;  %v13204_v28 = vld [vmem:[%s20776_s1 + $0xc40] ss:$16 sps:$4 sm:$0xff]  }
  0xac   :  { %8389 = vmatpush2.bf16.msra.mxu1 %v13123_v29  ;;  %8309 = vmatprep.subr.bf16.mxu0 %v13128_v30  ;;  %v13207_v29 = vld [vmem:[%s20776_s1 + $0xe40] ss:$16 sps:$4 sm:$0xff]   ;;  %v13215_v30 = vld [vmem:[%s20776_s1 + $0xc24] ss:$16 sps:$4 sm:$0xff]  }
  0xad   :  { %8390 = vmatprep.subr.bf16.mxu1 %v13131_v31  ;;  %v13212_v31 = vld [vmem:[%s20777_s0 + $0x380] ss:$144 sps:$4 sm:$0xff]  }
  0xaf   :  { %8310 = vmatpush2.bf16.msra.mxu0 %v13126_v32  ;;  %v13218_v32 = vld [vmem:[%s20776_s1 + $0xe24] ss:$16 sps:$4 sm:$0xff]  }
  0xb0   :  { %8391 = vmatpush2.bf16.msra.mxu1 %v13129_v33  ;;  %8311 = vmatprep.subr.bf16.mxu0 %v13134_v34  ;;  %v13213_v33 = vld [vmem:[%s20776_s1 + $0xc20] ss:$16 sps:$4 sm:$0xff]   ;;  %v13221_v34 = vld [vmem:[%s20777_s0 + $0x388] ss:$144 sps:$4 sm:$0xff]  }
  0xb1   :  { %8392 = vmatprep.subr.bf16.mxu1 %v13137_v35  ;;  %v169_v35 = vld [vmem:[%s20777_s0 + $0x4a0] sm:$0xff] }
  0xb3   :  { %8312 = vmatpush2.bf16.msra.mxu0 %v13132_v36  ;;  %v170_v36 = vld [vmem:[%s20777_s0 + $0x4a8] sm:$0xff] }
  0xb4   :  { %8393 = vmatpush2.bf16.msra.mxu1 %v13135_v37  ;;  %8313 = vmatprep.subr.bf16.mxu0 %v13140_v38  ;;  %v13216_v37 = vld [vmem:[%s20776_s1 + $0xe20] ss:$16 sps:$4 sm:$0xff]   ;;  %v13224_v38 = vld [vmem:[%s20776_s1 + $0xc04] ss:$16 sps:$4 sm:$0xff]  }
  0xb5   :  { %8394 = vmatprep.subr.bf16.mxu1 %v13143_v39  ;;  %v13227_v39 = vld [vmem:[%s20776_s1 + $0xe04] ss:$16 sps:$4 sm:$0xff]  }
  0xb7   :  { %8314 = vmatpush2.bf16.msra.mxu0 %v13138_v40  ;;  %v15851_v40 = vcombine.high %v169_v35, %v169_v35 }
  0xb8   :  { %8395 = vmatpush2.bf16.msra.mxu1 %v13141_v41  ;;  %8315 = vmatprep.subr.bf16.mxu0 %v13146_v42  ;;  %v15853_v41 = vcombine.high %v170_v36, %v170_v36  ;;  %v13222_v42 = vld [vmem:[%s20776_s1 + $0xc00] ss:$16 sps:$4 sm:$0xff]  }
  0xb9   :  { %8396 = vmatprep.subr.bf16.mxu1 %v13149_v43  ;;  %v13225_v43 = vld [vmem:[%s20776_s1 + $0xe00] ss:$16 sps:$4 sm:$0xff]  }
  0xbb   :  { %8316 = vmatpush2.bf16.msra.mxu0 %v13144_v44  ;;  %v13232_v44 = vld [vmem:[%s20776_s1 + $0xde4] ss:$16 sps:$4 sm:$0xff]  }
  0xbc   :  { %8397 = vmatpush2.bf16.msra.mxu1 %v13147_v45  ;;  %8317 = vmatprep.subr.bf16.mxu0 %v13152_v46  ;;  %v13235_v45 = vld [vmem:[%s20776_s1 + $0xfe4] ss:$16 sps:$4 sm:$0xff]   ;;  %v15869_v46 = vcombine.low %v169_v35, %v169_v35  ;;  %v13289_v35 = vld [vmem:[%s20776_s1 + $0x12e0] ss:$16 sps:$4 sm:$0xff]  }
  0xbd   :  { %8398 = vmatprep.subr.bf16.mxu1 %v13155_v47  ;;  %v13230_v47 = vld [vmem:[%s20776_s1 + $0xde0] ss:$16 sps:$4 sm:$0xff]  }
  0xbf   :  { %8318 = vmatpush2.bf16.msra.mxu0 %v13150_v50  ;;  %v13233_v50 = vld [vmem:[%s20776_s1 + $0xfe0] ss:$16 sps:$4 sm:$0xff]  }
  0xc0   :  { %8399 = vmatpush2.bf16.msra.mxu1 %v13153_v51  ;;  %8449 = vmatprep.subr.bf16.mxu0 %v13164_v53  ;;  %v15877_v51 = vcombine.low %v170_v36, %v170_v36  ;;  %v13243_v53 = vld [vmem:[%s20776_s1 + $0xfc4] ss:$16 sps:$4 sm:$0xff]  }
  0xc1   :  { %8530 = vmatprep.subr.bf16.mxu1 %v13167_v56  ;;  %v13282_v56 = vld [vmem:[%s20777_s0 + $0x34] ss:$144 sps:$4 sm:$0xff]  }
  0xc2   :  { %8320 = vmatmul.mubr.bf16.vlgmr.msra.gmra.mxu0 %v13156_v52  ;;  %v13240_v52 = vld [vmem:[%s20776_s1 + $0xdc4] ss:$16 sps:$4 sm:$0xff]  }
  0xc3   :  { %8401 = vmatmul.mubr.bf16.vlgmr.msra.gmra.mxu1 %v13159_v57  ;;  %8450 = vmatpush1.bf16.msra.mxu0 %v13162_v58  ;;  %v13285_v57 = vld [vmem:[%s20777_s0 + $0x3c] ss:$144 sps:$4 sm:$0xff]   ;;  %v13238_v58 = vld [vmem:[%s20776_s1 + $0xdc0] ss:$16 sps:$4 sm:$0xff]   ;;  %v13294_v36 = vld [vmem:[%s20776_s1 + $0x10c4] ss:$16 sps:$4 sm:$0xff]  }
  0xc4   :  { %8531 = vmatpush1.bf16.msra.mxu1 %v13165_v59  ;;  %8451 = vmatprep.subr.bf16.mxu0 %v13170_v60  ;;  %v13241_v59 = vld [vmem:[%s20776_s1 + $0xfc0] ss:$16 sps:$4 sm:$0xff]   ;;  %v13246_v60 = vld [vmem:[%s20776_s1 + $0xda4] ss:$16 sps:$4 sm:$0xff]  }
  0xc5   :  { %8532 = vmatprep.subr.bf16.mxu1 %v13173_v61  ;;  %8329 = vmatprep.mubr.bf16.mxu0 %v13174_v62  ;;  %v13249_v61 = vld [vmem:[%s20776_s1 + $0xfa4] ss:$16 sps:$4 sm:$0xff]   ;;  %v13244_v62 = vld [vmem:[%s20776_s1 + $0xda0] ss:$16 sps:$4 sm:$0xff]  }
  0xc6   :  { %8410 = vmatprep.mubr.bf16.mxu1 %v13183_v63  ;;  %v13247_v63 = vld [vmem:[%s20776_s1 + $0xfa0] ss:$16 sps:$4 sm:$0xff]  }
  0xc7   :  { %8452 = vmatpush1.bf16.msra.mxu0 %v13168_v0  ;;  %v13252_v0 = vld [vmem:[%s20776_s1 + $0xd84] ss:$16 sps:$4 sm:$0xff]  }
  0xc8   :  { %8533 = vmatpush1.bf16.msra.mxu1 %v13171_v1  ;;  %8453 = vmatprep.subr.bf16.mxu0 %v13179_v3  ;;  %v13255_v1 = vld [vmem:[%s20776_s1 + $0xf84] ss:$16 sps:$4 sm:$0xff]   ;;  %v13253_v3 = vld [vmem:[%s20776_s1 + $0xf80] ss:$16 sps:$4 sm:$0xff]  }
  0xc9   :  { %8534 = vmatprep.subr.bf16.mxu1 %v13182_v4  ;;  %v13258_v4 = vld [vmem:[%s20776_s1 + $0xd64] ss:$16 sps:$4 sm:$0xff]  }
  0xca   :  { %8330 = vmatmul.mubr.bf16.gmra.mxu0 %v13176_v2  ;;  %v13250_v2 = vld [vmem:[%s20776_s1 + $0xd80] ss:$16 sps:$4 sm:$0xff]  }
  0xcb   :  { %8411 = vmatmul.mubr.bf16.gmra.mxu1 %v13185_v6  ;;  %8454 = vmatpush1.bf16.msra.mxu0 %v13177_v5  ;;  %v13261_v5 = vld [vmem:[%s20776_s1 + $0xf64] ss:$16 sps:$4 sm:$0xff]   ;;  %v13256_v6 = vld [vmem:[%s20776_s1 + $0xd60] ss:$16 sps:$4 sm:$0xff]  }
  0xcc   :  { %8535 = vmatpush1.bf16.msra.mxu1 %v13180_v7  ;;  %8455 = vmatprep.subr.bf16.mxu0 %v13188_v8  ;;  %v13259_v7 = vld [vmem:[%s20776_s1 + $0xf60] ss:$16 sps:$4 sm:$0xff]   ;;  %v13264_v8 = vld [vmem:[%s20776_s1 + $0xd44] ss:$16 sps:$4 sm:$0xff]  }
  0xcd   :  { %8536 = vmatprep.subr.bf16.mxu1 %v13191_v9  ;;  %8339 = vmatprep.mubr.bf16.mxu0 %v13192_v12  ;;  %v13267_v9 = vld [vmem:[%s20776_s1 + $0xf44] ss:$16 sps:$4 sm:$0xff]   ;;  %v13262_v12 = vld [vmem:[%s20776_s1 + $0xd40] ss:$16 sps:$4 sm:$0xff]  }
  0xce   :  { %8420 = vmatprep.mubr.bf16.mxu1 %v13201_v13  ;;  %v13265_v13 = vld [vmem:[%s20776_s1 + $0xf40] ss:$16 sps:$4 sm:$0xff]  }
  0xcf   :  { %8456 = vmatpush1.bf16.msra.mxu0 %v13186_v14  ;;  %v1337_v14 = vlaneseq }
  0xd0   :  { %8537 = vmatpush1.bf16.msra.mxu1 %v13189_v15  ;;  %8457 = vmatprep.subr.bf16.mxu0 %v13197_v18  ;;  %v13270_v15 = vld [vmem:[%s20776_s1 + $0xd24] ss:$16 sps:$4 sm:$0xff]   ;;  %v13268_v18 = vld [vmem:[%s20776_s1 + $0xd20] ss:$16 sps:$4 sm:$0xff]  }
  0xd1   :  { %8538 = vmatprep.subr.bf16.mxu1 %v13200_v20  ;;  %v13271_v20 = vld [vmem:[%s20776_s1 + $0xf20] ss:$16 sps:$4 sm:$0xff]  }
  0xd2   :  { %8340 = vmatmul.mubr.bf16.gmra.mxu0 %v13194_v17  ;;  %v13273_v17 = vld [vmem:[%s20776_s1 + $0xf24] ss:$16 sps:$4 sm:$0xff]  }
  0xd3   :  { %8421 = vmatmul.mubr.bf16.gmra.mxu1 %v13203_v23  ;;  %8458 = vmatpush1.bf16.msra.mxu0 %v13195_v21  ;;  %v15959_v21 = vshrl.u32 %v1337_v14, 7  ;;  %v13279_v23 = vld [vmem:[%s20776_s1 + $0xf04] ss:$16 sps:$4 sm:$0xff]  }
  0xd4   :  { %8539 = vmatpush1.bf16.msra.mxu1 %v13198_v22  ;;  %8459 = vmatprep.subr.bf16.mxu0 %v13206_v24  ;;  %v13276_v22 = vld [vmem:[%s20776_s1 + $0xd04] ss:$16 sps:$4 sm:$0xff]   ;;  %v13274_v24 = vld [vmem:[%s20776_s1 + $0xd00] ss:$16 sps:$4 sm:$0xff]  }
  0xd5   :  { %8540 = vmatprep.subr.bf16.mxu1 %v13209_v25  ;;  %8349 = vmatprep.mubr.bf16.mxu0 %v13210_v26  ;;  %v13277_v25 = vld [vmem:[%s20776_s1 + $0xf00] ss:$16 sps:$4 sm:$0xff]  }
  0xd6   :  { %8430 = vmatprep.mubr.bf16.mxu1 %v13219_v27  ;;  %v1335_v26 = vld [vmem:[%s20778_s2] sm:$0xf]  ;;  %v1339_v27 = vsub.s32 0, %v15959_v21 }
  0xd7   :  { %8460 = vmatpush1.bf16.msra.mxu0 %v13204_v28  ;;  %v13288_v28 = vld [vmem:[%s20776_s1 + $0x10e4] ss:$16 sps:$4 sm:$0xff]  }
  0xd8   :  { %8541 = vmatpush1.bf16.msra.mxu1 %v13207_v29  ;;  %8461 = vmatprep.subr.bf16.mxu0 %v13215_v30  ;;  %v13291_v29 = vld [vmem:[%s20776_s1 + $0x12e4] ss:$16 sps:$4 sm:$0xff]   ;;  %v13280_v30 = vld [vmem:[%s20777_s0 + $0x30] ss:$144 sps:$4 sm:$0xff]  }
  0xd9   :  { %8542 = vmatprep.subr.bf16.mxu1 %v13218_v32  ;;  %v1343_v32 = vsub.s32 1, %v15959_v21 }
  0xda   :  { %8350 = vmatmul.mubr.bf16.gmra.mxu0 %v13212_v31  ;;  %v13283_v31 = vld [vmem:[%s20777_s0 + $0x38] ss:$144 sps:$4 sm:$0xff]  }
  0xdb   :  { %8431 = vmatmul.mubr.bf16.gmra.mxu1 %v13221_v34  ;;  %8462 = vmatpush1.bf16.msra.mxu0 %v13213_v33  ;;  %v13286_v33 = vld [vmem:[%s20776_s1 + $0x10e0] ss:$16 sps:$4 sm:$0xff]   ;;  %v15993_v34 = vrot.slane %v1335_v26, %v1339_v27 }
  0xdc   :  { %8543 = vmatpush1.bf16.msra.mxu1 %v13216_v37  ;;  %8463 = vmatprep.subr.bf16.mxu0 %v13224_v38  ;;  %v13297_v37 = vld [vmem:[%s20776_s1 + $0x12c4] ss:$16 sps:$4 sm:$0xff]   ;;  %v16004_v38 = vrot.slane %v1335_v26, %v1343_v32  ;;  %v13319_v26 = vld [vmem:[%s20776_s1 + $0x1060] ss:$16 sps:$4 sm:$0xff]  }
  0xdd   :  { %8544 = vmatprep.subr.bf16.mxu1 %v13227_v39  ;;  %8359 = vmatprep.mubr.bf16.mxu0 %v15851_v40  ;;  %v13298_v39 = vld [vmem:[%s20777_s0 + $0x154] ss:$144 sps:$4 sm:$0xff]   ;;  %v13322_v32 = vld [vmem:[%s20776_s1 + $0x1260] ss:$16 sps:$4 sm:$0xff]  }
  0xde   :  { %8440 = vmatprep.mubr.bf16.mxu1 %v15853_v41  ;;  %20791 = vst [vmem:[#allocation2_spill] sm:$0xff] %v16004_v38 }
  0xdf   :  { %8464 = vmatpush1.bf16.msra.mxu0 %v13222_v42  ;;  %v13307_v42 = vld [vmem:[%s20777_s0 + $0x15c] ss:$144 sps:$4 sm:$0xff]  }
  0xe0   :  { %8545 = vmatpush1.bf16.msra.mxu1 %v13225_v43  ;;  %8465 = vmatprep.subr.bf16.mxu0 %v13232_v44 }
  0xe1   :  { %8546 = vmatprep.subr.bf16.mxu1 %v13235_v45  ;;  %v13292_v45 = vld [vmem:[%s20776_s1 + $0x10c0] ss:$16 sps:$4 sm:$0xff]  }
  0xe2   :  { %8360 = vmatmul.mubr.bf16.gmra.mxu0 %v15869_v46 }
  0xe3   :  { %8441 = vmatmul.mubr.bf16.gmra.mxu1 %v15877_v51  ;;  %8466 = vmatpush2.bf16.msra.mxu0 %v13230_v47 }
  0xe4   :  { %8547 = vmatpush2.bf16.msra.mxu1 %v13233_v50  ;;  %8467 = vmatprep.subr.bf16.mxu0 %v13240_v52  ;;  %v13295_v50 = vld [vmem:[%s20776_s1 + $0x12c0] ss:$16 sps:$4 sm:$0xff]  }
  0xe5   :  { %8548 = vmatprep.subr.bf16.mxu1 %v13243_v53  ;;  %8481 = vmatprep.mubr.bf16.mxu0 %v13282_v56  ;;  %v13303_v56 = vld [vmem:[%s20776_s1 + $0x10a4] ss:$16 sps:$4 sm:$0xff]  }
  0xe6   :  { %8562 = vmatprep.mubr.bf16.mxu1 %v13285_v57  ;;  %v13306_v57 = vld [vmem:[%s20776_s1 + $0x12a4] ss:$16 sps:$4 sm:$0xff]  }
  0xe7   :  { %8468 = vmatpush2.bf16.msra.mxu0 %v13238_v58 }
  0xe8   :  { %8549 = vmatpush2.bf16.msra.mxu1 %v13241_v59  ;;  %8469 = vmatprep.subr.bf16.mxu0 %v13246_v60  ;;  %v13300_v60 = vld [vmem:[%s20777_s0 + $0x150] ss:$144 sps:$4 sm:$0xff]  }
  0xe9   :  { %8550 = vmatprep.subr.bf16.mxu1 %v13249_v61  ;;  %v13301_v61 = vld [vmem:[%s20776_s1 + $0x10a0] ss:$16 sps:$4 sm:$0xff]  }
  0xeb   :  { %8470 = vmatpush2.bf16.msra.mxu0 %v13244_v62 }
  0xec   :  { %8551 = vmatpush2.bf16.msra.mxu1 %v13247_v63  ;;  %8471 = vmatprep.subr.bf16.mxu0 %v13252_v0  ;;  %v13309_v0 = vld [vmem:[%s20777_s0 + $0x158] ss:$144 sps:$4 sm:$0xff]  }
  0xed   :  { %8552 = vmatprep.subr.bf16.mxu1 %v13255_v1 }
  0xef   :  { %8472 = vmatpush2.bf16.msra.mxu0 %v13250_v2 }
  0xf0   :  { %8553 = vmatpush2.bf16.msra.mxu1 %v13253_v3  ;;  %8473 = vmatprep.subr.bf16.mxu0 %v13258_v4  ;;  %v13304_v3 = vld [vmem:[%s20776_s1 + $0x12a0] ss:$16 sps:$4 sm:$0xff]  }
  0xf1   :  { %8554 = vmatprep.subr.bf16.mxu1 %v13261_v5 }
  0xf3   :  { %8474 = vmatpush2.bf16.msra.mxu0 %v13256_v6  ;;  %v13312_v6 = vld [vmem:[%s20776_s1 + $0x1084] ss:$16 sps:$4 sm:$0xff]  }
  0xf4   :  { %8555 = vmatpush2.bf16.msra.mxu1 %v13259_v7  ;;  %8475 = vmatprep.subr.bf16.mxu0 %v13264_v8  ;;  %v13315_v7 = vld [vmem:[%s20776_s1 + $0x1284] ss:$16 sps:$4 sm:$0xff]  }
  0xf5   :  { %8556 = vmatprep.subr.bf16.mxu1 %v13267_v9  ;;  %v13316_v9 = vld [vmem:[%s20777_s0 + $0x274] ss:$144 sps:$4 sm:$0xff]  }
  0xf7   :  { %8476 = vmatpush2.bf16.msra.mxu0 %v13262_v12  ;;  %v13325_v12 = vld [vmem:[%s20777_s0 + $0x27c] ss:$144 sps:$4 sm:$0xff]  }
  0xf8   :  { %8557 = vmatpush2.bf16.msra.mxu1 %v13265_v13  ;;  %8477 = vmatprep.subr.bf16.mxu0 %v13270_v15  ;;  %v13310_v13 = vld [vmem:[%s20776_s1 + $0x1080] ss:$16 sps:$4 sm:$0xff]  }
  0xf9   :  { %8558 = vmatprep.subr.bf16.mxu1 %v13273_v17  ;;  %v13313_v17 = vld [vmem:[%s20776_s1 + $0x1280] ss:$16 sps:$4 sm:$0xff]  }
  0xfb   :  { %8478 = vmatpush2.bf16.msra.mxu0 %v13268_v18 }
  0xfc   :  { %8559 = vmatpush2.bf16.msra.mxu1 %v13271_v20  ;;  %8479 = vmatprep.subr.bf16.mxu0 %v13276_v22  ;;  %v13321_v20 = vld [vmem:[%s20776_s1 + $0x1064] ss:$16 sps:$4 sm:$0xff]  }
  0xfd   :  { %8560 = vmatprep.subr.bf16.mxu1 %v13279_v23  ;;  %v13324_v22 = vld [vmem:[%s20776_s1 + $0x1264] ss:$16 sps:$4 sm:$0xff]  }
  0xff   :  { %8480 = vmatpush2.bf16.msra.mxu0 %v13274_v24 }
 0x100   :  { %8561 = vmatpush2.bf16.msra.mxu1 %v13277_v25  ;;  %8611 = vmatprep.subr.bf16.mxu0 %v13288_v28  ;;  %v13318_v25 = vld [vmem:[%s20777_s0 + $0x270] ss:$144 sps:$4 sm:$0xff]  }
 0x101   :  { %8692 = vmatprep.subr.bf16.mxu1 %v13291_v29  ;;  %v13327_v29 = vld [vmem:[%s20777_s0 + $0x278] ss:$144 sps:$4 sm:$0xff]  }
 0x102   :  { %v7997_v43 = vpop.f32.mrf.mxu0  ;;  %8482 = vmatmul.mubr.bf16.vlgmr.msra.gmra.mxu0 %v13280_v30 }
 0x103   :  { %v8078_v44 = vpop.f32.mrf.mxu1  ;;  %8563 = vmatmul.mubr.bf16.vlgmr.msra.gmra.mxu1 %v13283_v31  ;;  %v7998_v47 = vadd.f32 %v7997_v43, %v15993_v34  ;;  %8612 = vmatpush1.bf16.msra.mxu0 %v13286_v33  ;;  %v13334_v43 = vld [vmem:[%s20777_s0 + $0x394] ss:$144 sps:$4 sm:$0xff]  }
 0x104   :  { %8693 = vmatpush1.bf16.msra.mxu1 %v13289_v35  ;;  %v7999_v52 = vpop.f32.mrf.mxu0  ;;  %8613 = vmatprep.subr.bf16.mxu0 %v13294_v36  ;;  %v13330_v36 = vld [vmem:[%s20776_s1 + $0x1044] ss:$16 sps:$4 sm:$0xff]  }
 0x105   :  { %v8080_v53 = vpop.f32.mrf.mxu1  ;;  %8694 = vmatprep.subr.bf16.mxu1 %v13297_v37  ;;  %v16025_v58 = vadd.f32 %v8078_v44, %v7998_v47  ;;  %v8000_v59 = vadd.f32 %v7999_v52, %v16004_v38  ;;  %8491 = vmatprep.mubr.bf16.mxu0 %v13298_v39  ;;  %v13333_v37 = vld [vmem:[%s20776_s1 + $0x1244] ss:$16 sps:$4 sm:$0xff]   ;;  %v13343_v44 = vld [vmem:[%s20777_s0 + $0x39c] ss:$144 sps:$4 sm:$0xff]   ;;  %v13328_v47 = vld [vmem:[%s20776_s1 + $0x1040] ss:$16 sps:$4 sm:$0xff]  }
 0x106   :  { %8572 = vmatprep.mubr.bf16.mxu1 %v13307_v42  ;;  %v8001_v62 = vpop.f32.mrf.mxu0 }
 0x107   :  { %v8082_v63 = vpop.f32.mrf.mxu1  ;;  %v16037_v1 = vadd.f32 %v8080_v53, %v8000_v59  ;;  %v8002_v2 = vadd.f32 %v8001_v62, %v15993_v34  ;;  %8614 = vmatpush1.bf16.msra.mxu0 %v13292_v45  ;;  %v13331_v53 = vld [vmem:[%s20776_s1 + $0x1240] ss:$16 sps:$4 sm:$0xff]   ;;  %v13339_v59 = vld [vmem:[%s20776_s1 + $0x1024] ss:$16 sps:$4 sm:$0xff]  }
 0x108   :  { %8695 = vmatpush1.bf16.msra.mxu1 %v13295_v50  ;;  %v16043_v4 = vpop.f32.mrf.mxu0  ;;  %8615 = vmatprep.subr.bf16.mxu0 %v13303_v56 }
 0x109   :  { %20792 = vst [vmem:[#allocation3_spill] sm:$0xff] %v16043_v4  ;;  %v16045_v5 = vpop.f32.mrf.mxu1  ;;  %8696 = vmatprep.subr.bf16.mxu1 %v13306_v57  ;;  %v16053_v8 = vadd.f32 %v8082_v63, %v8002_v2  ;;  %v13336_v57 = vld [vmem:[%s20777_s0 + $0x390] ss:$144 sps:$4 sm:$0xff]  }
 0x10a   :  { %20793 = vst [vmem:[#allocation4_spill] sm:$0xff] %v16045_v5  ;;  %8492 = vmatmul.mubr.bf16.gmra.mxu0 %v13300_v60  ;;  %v8007_v14 = vpop.f32.mrf.mxu0  ;;  %v13342_v60 = vld [vmem:[%s20776_s1 + $0x1224] ss:$16 sps:$4 sm:$0xff]   ;;  %v13337_v63 = vld [vmem:[%s20776_s1 + $0x1020] ss:$16 sps:$4 sm:$0xff]  }
 0x10b   :  { %8573 = vmatmul.mubr.bf16.gmra.mxu1 %v13309_v0  ;;  %v8088_v15 = vpop.f32.mrf.mxu1  ;;  %8616 = vmatpush1.bf16.msra.mxu0 %v13301_v61  ;;  %v8008_v18 = vadd.f32 %v8007_v14, %v15993_v34  ;;  %v13345_v0 = vld [vmem:[%s20777_s0 + $0x398] ss:$144 sps:$4 sm:$0xff]   ;;  %v171_v2 = vld [vmem:[%s20777_s0 + $0x4b0] sm:$0xff] }
 0x10c   :  { %8697 = vmatpush1.bf16.msra.mxu1 %v13304_v3  ;;  %8617 = vmatprep.subr.bf16.mxu0 %v13312_v6  ;;  %v8009_v23 = vpop.f32.mrf.mxu0 }
 0x10d   :  { %8698 = vmatprep.subr.bf16.mxu1 %v13315_v7  ;;  %v8090_v24 = vpop.f32.mrf.mxu1  ;;  %8501 = vmatprep.mubr.bf16.mxu0 %v13316_v9  ;;  %v8010_v27 = vadd.f32 %v8009_v23, %v16004_v38  ;;  %v16081_v28 = vadd.f32 %v8088_v15, %v8008_v18  ;;  %v172_v7 = vld [vmem:[%s20777_s0 + $0x4b8] sm:$0xff]  ;;  %v13351_v18 = vld [vmem:[%s20776_s1 + $0x1204] ss:$16 sps:$4 sm:$0xff]   ;;  %v16157_v23 = vcombine.high %v171_v2, %v171_v2 }
 0x10e   :  { %8582 = vmatprep.mubr.bf16.mxu1 %v13325_v12  ;;  %v8011_v30 = vpop.f32.mrf.mxu0 }
 0x10f   :  { %v8092_v31 = vpop.f32.mrf.mxu1  ;;  %8618 = vmatpush1.bf16.msra.mxu0 %v13310_v13  ;;  %v8012_v33 = vadd.f32 %v8011_v30, %v15993_v34  ;;  %v16090_v35 = vadd.f32 %v8090_v24, %v8010_v27  ;;  %v13340_v13 = vld [vmem:[%s20776_s1 + $0x1220] ss:$16 sps:$4 sm:$0xff]   ;;  %v16159_v24 = vcombine.high %v172_v7, %v172_v7 }
 0x110   :  { %8699 = vmatpush1.bf16.msra.mxu1 %v13313_v17  ;;  %8619 = vmatprep.subr.bf16.mxu0 %v13321_v20  ;;  %v16098_v39 = vpop.f32.mrf.mxu0  ;;  %v13348_v17 = vld [vmem:[%s20776_s1 + $0x1004] ss:$16 sps:$4 sm:$0xff]   ;;  %v13349_v30 = vld [vmem:[%s20776_s1 + $0x1200] ss:$16 sps:$4 sm:$0xff]  }
 0x111   :  { %8700 = vmatprep.subr.bf16.mxu1 %v13324_v22  ;;  %20794 = vst [vmem:[#allocation5_spill] sm:$0xff] %v16098_v39  ;;  %v16100_v42 = vpop.f32.mrf.mxu1  ;;  %v16108_v45 = vadd.f32 %v8092_v31, %v8012_v33  ;;  %v13359_v33 = vld [vmem:[%s20776_s1 + $0x13e4] ss:$16 sps:$4 sm:$0xff]   ;;  %v13803_v39 = vld [vmem:[%s20777_s0 + $0x198] ss:$144 sps:$4 sm:$0xff]  }
 0x112   :  { %20795 = vst [vmem:[#allocation6_spill] sm:$0xff] %v16100_v42  ;;  %8502 = vmatmul.mubr.bf16.gmra.mxu0 %v13318_v25  ;;  %v8017_v50 = vpop.f32.mrf.mxu0 }
 0x113   :  { %8583 = vmatmul.mubr.bf16.gmra.mxu1 %v13327_v29  ;;  %v8098_v52 = vpop.f32.mrf.mxu1  ;;  %8620 = vmatpush1.bf16.msra.mxu0 %v13319_v26  ;;  %v8018_v56 = vadd.f32 %v8017_v50, %v15993_v34  ;;  %v13346_v26 = vld [vmem:[%s20776_s1 + $0x1000] ss:$16 sps:$4 sm:$0xff]  }
 0x114   :  { %8701 = vmatpush1.bf16.msra.mxu1 %v13322_v32  ;;  %8621 = vmatprep.subr.bf16.mxu0 %v13330_v36  ;;  %v8019_v61 = vpop.f32.mrf.mxu0  ;;  %v13356_v32 = vld [vmem:[%s20776_s1 + $0x11e4] ss:$16 sps:$4 sm:$0xff]   ;;  %v13354_v50 = vld [vmem:[%s20776_s1 + $0x11e0] ss:$16 sps:$4 sm:$0xff]  }
 0x115   :  { %8702 = vmatprep.subr.bf16.mxu1 %v13333_v37  ;;  %v8100_v62 = vpop.f32.mrf.mxu1  ;;  %8511 = vmatprep.mubr.bf16.mxu0 %v13334_v43  ;;  %v8020_v3 = vadd.f32 %v8019_v61, %v16004_v38  ;;  %v16136_v6 = vadd.f32 %v8098_v52, %v8018_v56  ;;  %v16186_v52 = vcombine.low %v172_v7, %v172_v7  ;;  %v13364_v61 = vld [vmem:[%s20776_s1 + $0x11c4] ss:$16 sps:$4 sm:$0xff]   ;;  %v13409_v7 = vld [vmem:[%s20777_s0 + $0x4c] ss:$144 sps:$4 sm:$0xff]  }
 0x116   :  { %8592 = vmatprep.mubr.bf16.mxu1 %v13343_v44  ;;  %v8021_v9 = vpop.f32.mrf.mxu0 }
 0x117   :  { %v8102_v12 = vpop.f32.mrf.mxu1  ;;  %8622 = vmatpush1.bf16.msra.mxu0 %v13328_v47  ;;  %v8022_v14 = vadd.f32 %v8021_v9, %v15993_v34  ;;  %v16145_v15 = vadd.f32 %v8100_v62, %v8020_v3  ;;  %v16181_v47 = vcombine.low %v171_v2, %v171_v2  ;;  %v13367_v62 = vld [vmem:[%s20776_s1 + $0x13c4] ss:$16 sps:$4 sm:$0xff]  }
 0x118   :  { %8703 = vmatpush1.bf16.msra.mxu1 %v13331_v53  ;;  %8623 = vmatprep.subr.bf16.mxu0 %v13339_v59  ;;  %v16153_v20 = vpop.f32.mrf.mxu0  ;;  %v13406_v3 = vld [vmem:[%s20777_s0 + $0x44] ss:$144 sps:$4 sm:$0xff]  }
 0x119   :  { %8704 = vmatprep.subr.bf16.mxu1 %v13342_v60  ;;  %20796 = vst [vmem:[#allocation7_spill] sm:$0xff] %v16153_v20  ;;  %v16155_v22 = vpop.f32.mrf.mxu1  ;;  %v16161_v25 = vadd.f32 %v8102_v12, %v8022_v14  ;;  %v13365_v14 = vld [vmem:[%s20776_s1 + $0x13c0] ss:$16 sps:$4 sm:$0xff]  }
 0x11a   :  { %20797 = vst [vmem:[#allocation8_spill] sm:$0xff] %v16155_v22  ;;  %8512 = vmatmul.mubr.bf16.gmra.mxu0 %v13336_v57  ;;  %v8027_v27 = vpop.f32.mrf.mxu0  ;;  %v13357_v57 = vld [vmem:[%s20776_s1 + $0x13e0] ss:$16 sps:$4 sm:$0xff]  }
 0x11b   :  { %8593 = vmatmul.mubr.bf16.gmra.mxu1 %v13345_v0  ;;  %v8108_v29 = vpop.f32.mrf.mxu1  ;;  %8624 = vmatpush1.bf16.msra.mxu0 %v13337_v63  ;;  %v8028_v31 = vadd.f32 %v8027_v27, %v15993_v34  ;;  %v175_v22 = vld [vmem:[%s20777_s0 + $0x4d0] sm:$0xff] }
 0x11c   :  { %8705 = vmatpush1.bf16.msra.mxu1 %v13340_v13  ;;  %8625 = vmatprep.subr.bf16.mxu0 %v13348_v17  ;;  %v8029_v36 = vpop.f32.mrf.mxu0  ;;  %v13362_v13 = vld [vmem:[%s20776_s1 + $0x11c0] ss:$16 sps:$4 sm:$0xff]  }
 0x11d   :  { %8706 = vmatprep.subr.bf16.mxu1 %v13351_v18  ;;  %v8110_v37 = vpop.f32.mrf.mxu1  ;;  %8521 = vmatprep.mubr.bf16.mxu0 %v16157_v23  ;;  %v8030_v43 = vadd.f32 %v8029_v36, %v16004_v38  ;;  %v16179_v44 = vadd.f32 %v8108_v29, %v8028_v31  ;;  %v13370_v18 = vld [vmem:[%s20776_s1 + $0x11a4] ss:$16 sps:$4 sm:$0xff]   ;;  %v13371_v36 = vld [vmem:[%s20776_s1 + $0x13a0] ss:$16 sps:$4 sm:$0xff]  }
 0x11e   :  { %8602 = vmatprep.mubr.bf16.mxu1 %v16159_v24  ;;  %v8031_v53 = vpop.f32.mrf.mxu0 }
 0x11f   :  { %v8112_v56 = vpop.f32.mrf.mxu1  ;;  %8626 = vmatpush1.bf16.msra.mxu0 %v13346_v26  ;;  %v8032_v59 = vadd.f32 %v8031_v53, %v15993_v34  ;;  %v16192_v60 = vadd.f32 %v8110_v37, %v8030_v43  ;;  %v13373_v26 = vld [vmem:[%s20776_s1 + $0x13a4] ss:$16 sps:$4 sm:$0xff]  }
 0x120   :  { %8707 = vmatpush1.bf16.msra.mxu1 %v13349_v30  ;;  %8627 = vmatprep.subr.bf16.mxu0 %v13356_v32  ;;  %v16200_v63 = vpop.f32.mrf.mxu0  ;;  %v13376_v37 = vld [vmem:[%s20776_s1 + $0x1184] ss:$16 sps:$4 sm:$0xff]  }
 0x121   :  { %8708 = vmatprep.subr.bf16.mxu1 %v13359_v33  ;;  %20798 = vst [vmem:[#allocation9_spill] sm:$0xff] %v16200_v63  ;;  %v16202_v0 = vpop.f32.mrf.mxu1  ;;  %v16204_v2 = vadd.f32 %v8112_v56, %v8032_v59  ;;  %v13377_v59 = vld [vmem:[%s20776_s1 + $0x1380] ss:$16 sps:$4 sm:$0xff]  }
 0x122   :  { %20799 = vst [vmem:[#allocation10_spill] sm:$0xff] %v16202_v0  ;;  %8522 = vmatmul.mubr.bf16.gmra.mxu0 %v16181_v47  ;;  %v8037_v9 = vpop.f32.mrf.mxu0 }
 0x123   :  { %8603 = vmatmul.mubr.bf16.gmra.mxu1 %v16186_v52  ;;  %v8118_v12 = vpop.f32.mrf.mxu1  ;;  %8628 = vmatpush2.bf16.msra.mxu0 %v13354_v50  ;;  %v8038_v17 = vadd.f32 %v8037_v9, %v15993_v34  ;;  %v13368_v34 = vld [vmem:[%s20776_s1 + $0x11a0] ss:$16 sps:$4 sm:$0xff]   ;;  %v13379_v50 = vld [vmem:[%s20776_s1 + $0x1384] ss:$16 sps:$4 sm:$0xff]  }
 0x124   :  { %8709 = vmatpush2.bf16.msra.mxu1 %v13357_v57  ;;  %8629 = vmatprep.subr.bf16.mxu0 %v13364_v61  ;;  %v8039_v27 = vpop.f32.mrf.mxu0  ;;  %v13374_v57 = vld [vmem:[%s20776_s1 + $0x1180] ss:$16 sps:$4 sm:$0xff]   ;;  %v13382_v61 = vld [vmem:[%s20776_s1 + $0x1164] ss:$16 sps:$4 sm:$0xff]  }
 0x125   :  { %8710 = vmatprep.subr.bf16.mxu1 %v13367_v62  ;;  %v8120_v29 = vpop.f32.mrf.mxu1  ;;  %v8040_v30 = vadd.f32 %v8039_v27, %v16004_v38  ;;  %v16228_v31 = vadd.f32 %v8118_v12, %v8038_v17  ;;  %8643 = vmatprep.mubr.bf16.mxu0 %v13406_v3  ;;  %v13385_v62 = vld [vmem:[%s20776_s1 + $0x1364] ss:$16 sps:$4 sm:$0xff]   ;;  %v13380_v3 = vld [vmem:[%s20776_s1 + $0x1160] ss:$16 sps:$4 sm:$0xff]  }
 0x126   :  { %8724 = vmatprep.mubr.bf16.mxu1 %v13409_v7  ;;  %v8041_v32 = vpop.f32.mrf.mxu0  ;;  %v13383_v7 = vld [vmem:[%s20776_s1 + $0x1360] ss:$16 sps:$4 sm:$0xff]   ;;  %v13388_v9 = vld [vmem:[%s20776_s1 + $0x1144] ss:$16 sps:$4 sm:$0xff]  }
 0x127   :  { %v8122_v33 = vpop.f32.mrf.mxu1  ;;  %8630 = vmatpush2.bf16.msra.mxu0 %v13362_v13  ;;  %v16239_v43 = vadd.f32 %v8120_v29, %v8040_v30  ;;  %v13391_v12 = vld [vmem:[%s20776_s1 + $0x1344] ss:$16 sps:$4 sm:$0xff]   ;;  %v13386_v13 = vld [vmem:[%s20776_s1 + $0x1140] ss:$16 sps:$4 sm:$0xff]  }
 0x128   :  { %8711 = vmatpush2.bf16.msra.mxu1 %v13365_v14  ;;  %8631 = vmatprep.subr.bf16.mxu0 %v13370_v18  ;;  %v8042_v53 = vpop.f32.mrf.mxu0  ;;  %v13389_v14 = vld [vmem:[%s20776_s1 + $0x1340] ss:$16 sps:$4 sm:$0xff]   ;;  %v13394_v17 = vld [vmem:[%s20776_s1 + $0x1124] ss:$16 sps:$4 sm:$0xff]  }
 0x129   :  { %8712 = vmatprep.subr.bf16.mxu1 %v13373_v26  ;;  %v8123_v56 = vpop.f32.mrf.mxu1  ;;  %v13397_v18 = vld [vmem:[%s20776_s1 + $0x1324] ss:$16 sps:$4 sm:$0xff]   ;;  %v13392_v26 = vld [vmem:[%s20776_s1 + $0x1120] ss:$16 sps:$4 sm:$0xff]  }
 0x12a   :  { %v13395_v27 = vld [vmem:[%s20776_s1 + $0x1320] ss:$16 sps:$4 sm:$0xff]   ;;  %v13400_v29 = vld [vmem:[%s20776_s1 + $0x1104] ss:$16 sps:$4 sm:$0xff]  }
 0x12b   :  { %8632 = vmatpush2.bf16.msra.mxu0 %v13368_v34  ;;  %v13403_v30 = vld [vmem:[%s20776_s1 + $0x1304] ss:$16 sps:$4 sm:$0xff]   ;;  %v13398_v34 = vld [vmem:[%s20776_s1 + $0x1100] ss:$16 sps:$4 sm:$0xff]  }
 0x12c   :  { %8713 = vmatpush2.bf16.msra.mxu1 %v13371_v36  ;;  %8633 = vmatprep.subr.bf16.mxu0 %v13376_v37  ;;  %v13401_v32 = vld [vmem:[%s20776_s1 + $0x1300] ss:$16 sps:$4 sm:$0xff]   ;;  %v13412_v33 = vld [vmem:[%s20776_s1 + $0x14e4] ss:$16 sps:$4 sm:$0xff]  }
 0x12d   :  { %8714 = vmatprep.subr.bf16.mxu1 %v13379_v50  ;;  %v13404_v36 = vld [vmem:[%s20777_s0 + $0x40] ss:$144 sps:$4 sm:$0xff]   ;;  %v13415_v37 = vld [vmem:[%s20776_s1 + $0x16e4] ss:$16 sps:$4 sm:$0xff]   ;;  %v13407_v50 = vld [vmem:[%s20777_s0 + $0x48] ss:$144 sps:$4 sm:$0xff]  }
 0x12e   :  { %v13410_v53 = vld [vmem:[%s20776_s1 + $0x14e0] ss:$16 sps:$4 sm:$0xff]  }
 0x12f   :  { %8634 = vmatpush2.bf16.msra.mxu0 %v13374_v57  ;;  %v13413_v56 = vld [vmem:[%s20776_s1 + $0x16e0] ss:$16 sps:$4 sm:$0xff]   ;;  %v13418_v57 = vld [vmem:[%s20776_s1 + $0x14c4] ss:$16 sps:$4 sm:$0xff]  }
 0x130   :  { %8715 = vmatpush2.bf16.msra.mxu1 %v13377_v59  ;;  %8635 = vmatprep.subr.bf16.mxu0 %v13382_v61  ;;  %v13421_v59 = vld [vmem:[%s20776_s1 + $0x16c4] ss:$16 sps:$4 sm:$0xff]  }
 0x131   :  { %8716 = vmatprep.subr.bf16.mxu1 %v13385_v62  ;;  %v13422_v61 = vld [vmem:[%s20777_s0 + $0x164] ss:$144 sps:$4 sm:$0xff]   ;;  %v13431_v62 = vld [vmem:[%s20777_s0 + $0x16c] ss:$144 sps:$4 sm:$0xff]  }
 0x133   :  { %8636 = vmatpush2.bf16.msra.mxu0 %v13380_v3 }
 0x134   :  { %8717 = vmatpush2.bf16.msra.mxu1 %v13383_v7  ;;  %8637 = vmatprep.subr.bf16.mxu0 %v13388_v9  ;;  %v13416_v9 = vld [vmem:[%s20776_s1 + $0x14c0] ss:$16 sps:$4 sm:$0xff]  }
 0x135   :  { %8718 = vmatprep.subr.bf16.mxu1 %v13391_v12 }
 0x137   :  { %8638 = vmatpush2.bf16.msra.mxu0 %v13386_v13  ;;  %v13419_v13 = vld [vmem:[%s20776_s1 + $0x16c0] ss:$16 sps:$4 sm:$0xff]  }
 0x138   :  { %8719 = vmatpush2.bf16.msra.mxu1 %v13389_v14  ;;  %8639 = vmatprep.subr.bf16.mxu0 %v13394_v17  ;;  %v13427_v14 = vld [vmem:[%s20776_s1 + $0x14a4] ss:$16 sps:$4 sm:$0xff]  }
 0x139   :  { %8720 = vmatprep.subr.bf16.mxu1 %v13397_v18 }
 0x13b   :  { %8640 = vmatpush2.bf16.msra.mxu0 %v13392_v26  ;;  %v13424_v26 = vld [vmem:[%s20777_s0 + $0x160] ss:$144 sps:$4 sm:$0xff]  }
 0x13c   :  { %8721 = vmatpush2.bf16.msra.mxu1 %v13395_v27  ;;  %8641 = vmatprep.subr.bf16.mxu0 %v13400_v29 }
 0x13d   :  { %8722 = vmatprep.subr.bf16.mxu1 %v13403_v30  ;;  %v13425_v30 = vld [vmem:[%s20776_s1 + $0x14a0] ss:$16 sps:$4 sm:$0xff]  }
 0x13f   :  { %8642 = vmatpush2.bf16.msra.mxu0 %v13398_v34 }
 0x140   :  { %8723 = vmatpush2.bf16.msra.mxu1 %v13401_v32  ;;  %8773 = vmatprep.subr.bf16.mxu0 %v13412_v33  ;;  %v13428_v33 = vld [vmem:[%s20776_s1 + $0x16a0] ss:$16 sps:$4 sm:$0xff]  }
 0x141   :  { %8854 = vmatprep.subr.bf16.mxu1 %v13415_v37 }
 0x142   :  { %v8159_v3 = vpop.f32.mrf.mxu0  ;;  %8644 = vmatmul.mubr.bf16.vlgmr.msra.gmra.mxu0 %v13404_v36  ;;  %v13433_v36 = vld [vmem:[%s20777_s0 + $0x168] ss:$144 sps:$4 sm:$0xff]  }
 0x143   :  { %v8240_v7 = vpop.f32.mrf.mxu1  ;;  %8725 = vmatmul.mubr.bf16.vlgmr.msra.gmra.mxu1 %v13407_v50  ;;  %v8160_v12 = vadd.f32 %v8159_v3, %v16025_v58  ;;  %8774 = vmatpush1.bf16.msra.mxu0 %v13410_v53  ;;  %v13430_v58 = vld [vmem:[%s20776_s1 + $0x16a4] ss:$16 sps:$4 sm:$0xff]  }
 0x144   :  { %8855 = vmatpush1.bf16.msra.mxu1 %v13413_v56  ;;  %v8161_v17 = vpop.f32.mrf.mxu0  ;;  %8775 = vmatprep.subr.bf16.mxu0 %v13418_v57  ;;  %v13436_v50 = vld [vmem:[%s20776_s1 + $0x1484] ss:$16 sps:$4 sm:$0xff]  }
 0x145   :  { %v8242_v18 = vpop.f32.mrf.mxu1  ;;  %8856 = vmatprep.subr.bf16.mxu1 %v13421_v59  ;;  %v16344_v27 = vadd.f32 %v8240_v7, %v8160_v12  ;;  %v8162_v29 = vadd.f32 %v8161_v17, %v16037_v1  ;;  %8653 = vmatprep.mubr.bf16.mxu0 %v13422_v61  ;;  %v13439_v53 = vld [vmem:[%s20776_s1 + $0x1684] ss:$16 sps:$4 sm:$0xff]   ;;  %v13449_v61 = vld [vmem:[%s20777_s0 + $0x28c] ss:$144 sps:$4 sm:$0xff]   ;;  %v13434_v7 = vld [vmem:[%s20776_s1 + $0x1480] ss:$16 sps:$4 sm:$0xff]  }
 0x146   :  { %8734 = vmatprep.mubr.bf16.mxu1 %v13431_v62  ;;  %v8163_v34 = vpop.f32.mrf.mxu0  ;;  %v13437_v12 = vld [vmem:[%s20776_s1 + $0x1680] ss:$16 sps:$4 sm:$0xff]  }
 0x147   :  { %v8244_v32 = vpop.f32.mrf.mxu1  ;;  %v16356_v37 = vadd.f32 %v8242_v18, %v8162_v29  ;;  %v8164_v1 = vadd.f32 %v8163_v34, %v16053_v8  ;;  %8776 = vmatpush1.bf16.msra.mxu0 %v13416_v9  ;;  %v13440_v8 = vld [vmem:[%s20777_s0 + $0x284] ss:$144 sps:$4 sm:$0xff]   ;;  %v13442_v18 = vld [vmem:[%s20777_s0 + $0x280] ss:$144 sps:$4 sm:$0xff]  }
 0x148   :  { %8857 = vmatpush1.bf16.msra.mxu1 %v13419_v13  ;;  %v16365_v56 = vpop.f32.mrf.mxu0  ;;  %8777 = vmatprep.subr.bf16.mxu0 %v13427_v14  ;;  %v13445_v13 = vld [vmem:[%s20776_s1 + $0x1464] ss:$16 sps:$4 sm:$0xff]   ;;  %v13443_v29 = vld [vmem:[%s20776_s1 + $0x1460] ss:$16 sps:$4 sm:$0xff]  }
 0x149   :  { %20800 = vst [vmem:[#allocation11_spill] sm:$0xff] %v16365_v56  ;;  %v16367_v57 = vpop.f32.mrf.mxu1  ;;  %8858 = vmatprep.subr.bf16.mxu1 %v13430_v58  ;;  %v16372_v59 = vadd.f32 %v8244_v32, %v8164_v1  ;;  %v13446_v32 = vld [vmem:[%s20776_s1 + $0x1660] ss:$16 sps:$4 sm:$0xff]   ;;  %v13454_v1 = vld [vmem:[%s20776_s1 + $0x1444] ss:$16 sps:$4 sm:$0xff]  }
 0x14a   :  { %20801 = vst [vmem:[#allocation12_spill] sm:$0xff] %v16367_v57  ;;  %v8169_v62 = vpop.f32.mrf.mxu0  ;;  %8654 = vmatmul.mubr.bf16.gmra.mxu0 %v13424_v26 }
 0x14b   :  { %v8250_v3 = vpop.f32.mrf.mxu1  ;;  %8735 = vmatmul.mubr.bf16.gmra.mxu1 %v13433_v36  ;;  %v8170_v9 = vadd.f32 %v8169_v62, %v16081_v28  ;;  %8778 = vmatpush1.bf16.msra.mxu0 %v13425_v30  ;;  %v13448_v28 = vld [vmem:[%s20776_s1 + $0x1664] ss:$16 sps:$4 sm:$0xff]   ;;  %v13467_v62 = vld [vmem:[%s20777_s0 + $0x3ac] ss:$144 sps:$4 sm:$0xff]  }
 0x14c   :  { %8859 = vmatpush1.bf16.msra.mxu1 %v13428_v33  ;;  %v8171_v14 = vpop.f32.mrf.mxu0  ;;  %8779 = vmatprep.subr.bf16.mxu0 %v13436_v50  ;;  %v13451_v33 = vld [vmem:[%s20777_s0 + $0x288] ss:$144 sps:$4 sm:$0xff]   ;;  %v13457_v50 = vld [vmem:[%s20776_s1 + $0x1644] ss:$16 sps:$4 sm:$0xff]  }
 0x14d   :  { %v8252_v17 = vpop.f32.mrf.mxu1  ;;  %8860 = vmatprep.subr.bf16.mxu1 %v13439_v53  ;;  %v8172_v26 = vadd.f32 %v8171_v14, %v16090_v35  ;;  %v16394_v58 = vadd.f32 %v8250_v3, %v8170_v9  ;;  %8663 = vmatprep.mubr.bf16.mxu0 %v13440_v8  ;;  %v13452_v9 = vld [vmem:[%s20776_s1 + $0x1440] ss:$16 sps:$4 sm:$0xff]   ;;  %v13463_v14 = vld [vmem:[%s20776_s1 + $0x1424] ss:$16 sps:$4 sm:$0xff]  }
 0x14e   :  { %8744 = vmatprep.mubr.bf16.mxu1 %v13449_v61  ;;  %v8173_v30 = vpop.f32.mrf.mxu0 }
 0x14f   :  { %v8254_v34 = vpop.f32.mrf.mxu1  ;;  %v8174_v35 = vadd.f32 %v8173_v30, %v16108_v45  ;;  %v16406_v36 = vadd.f32 %v8252_v17, %v8172_v26  ;;  %8780 = vmatpush1.bf16.msra.mxu0 %v13434_v7  ;;  %v13458_v45 = vld [vmem:[%s20777_s0 + $0x3a4] ss:$144 sps:$4 sm:$0xff]   ;;  %v13461_v30 = vld [vmem:[%s20776_s1 + $0x1420] ss:$16 sps:$4 sm:$0xff]  }
 0x150   :  { %8861 = vmatpush1.bf16.msra.mxu1 %v13437_v12  ;;  %v16414_v53 = vpop.f32.mrf.mxu0  ;;  %8781 = vmatprep.subr.bf16.mxu0 %v13445_v13  ;;  %v13455_v13 = vld [vmem:[%s20776_s1 + $0x1640] ss:$16 sps:$4 sm:$0xff]  }
 0x151   :  { %20802 = vst [vmem:[#allocation13_spill] sm:$0xff] %v16414_v53  ;;  %v16416_v8 = vpop.f32.mrf.mxu1  ;;  %8862 = vmatprep.subr.bf16.mxu1 %v13448_v28  ;;  %v16421_v61 = vadd.f32 %v8254_v34, %v8174_v35  ;;  %v13460_v28 = vld [vmem:[%s20777_s0 + $0x3a0] ss:$144 sps:$4 sm:$0xff]   ;;  %v13469_v34 = vld [vmem:[%s20777_s0 + $0x3a8] ss:$144 sps:$4 sm:$0xff]  }
 0x152   :  { %20803 = vst [vmem:[#allocation14_spill] sm:$0xff] %v16416_v8  ;;  %v8179_v3 = vpop.f32.mrf.mxu0  ;;  %8664 = vmatmul.mubr.bf16.gmra.mxu0 %v13442_v18  ;;  %v173_v35 = vld [vmem:[%s20777_s0 + $0x4c0] sm:$0xff] }
 0x153   :  { %v8260_v7 = vpop.f32.mrf.mxu1  ;;  %8745 = vmatmul.mubr.bf16.gmra.mxu1 %v13451_v33  ;;  %v8180_v12 = vadd.f32 %v8179_v3, %v16136_v6  ;;  %8782 = vmatpush1.bf16.msra.mxu0 %v13443_v29  ;;  %v13466_v6 = vld [vmem:[%s20776_s1 + $0x1624] ss:$16 sps:$4 sm:$0xff]  }
 0x154   :  { %8863 = vmatpush1.bf16.msra.mxu1 %v13446_v32  ;;  %v8181_v17 = vpop.f32.mrf.mxu0  ;;  %8783 = vmatprep.subr.bf16.mxu0 %v13454_v1 }
 0x155   :  { %v8262_v18 = vpop.f32.mrf.mxu1  ;;  %8864 = vmatprep.subr.bf16.mxu1 %v13457_v50  ;;  %v8182_v26 = vadd.f32 %v8181_v17, %v16145_v15  ;;  %v16443_v29 = vadd.f32 %v8260_v7, %v8180_v12  ;;  %8673 = vmatprep.mubr.bf16.mxu0 %v13458_v45  ;;  %v174_v15 = vld [vmem:[%s20777_s0 + $0x4c8] sm:$0xff]  ;;  %v13464_v45 = vld [vmem:[%s20776_s1 + $0x1620] ss:$16 sps:$4 sm:$0xff]   ;;  %v16475_v12 = vcombine.high %v173_v35, %v173_v35 }
 0x156   :  { %8754 = vmatprep.mubr.bf16.mxu1 %v13467_v62  ;;  %v8183_v32 = vpop.f32.mrf.mxu0  ;;  %v13472_v62 = vld [vmem:[%s20776_s1 + $0x1404] ss:$16 sps:$4 sm:$0xff]  }
 0x157   :  { %v8264_v33 = vpop.f32.mrf.mxu1  ;;  %v8184_v1 = vadd.f32 %v8183_v32, %v16161_v25  ;;  %v16458_v50 = vadd.f32 %v8262_v18, %v8182_v26  ;;  %8784 = vmatpush1.bf16.msra.mxu0 %v13452_v9  ;;  %v13475_v25 = vld [vmem:[%s20776_s1 + $0x1604] ss:$16 sps:$4 sm:$0xff]   ;;  %v13470_v26 = vld [vmem:[%s20776_s1 + $0x1400] ss:$16 sps:$4 sm:$0xff]  }
 0x158   :  { %8865 = vmatpush1.bf16.msra.mxu1 %v13455_v13  ;;  %v16466_v3 = vpop.f32.mrf.mxu0  ;;  %8785 = vmatprep.subr.bf16.mxu0 %v13463_v14  ;;  %v16477_v13 = vcombine.high %v174_v15, %v174_v15 }
 0x159   :  { %20804 = vst [vmem:[#allocation15_spill] sm:$0xff] %v16466_v3  ;;  %v16468_v7 = vpop.f32.mrf.mxu1  ;;  %8866 = vmatprep.subr.bf16.mxu1 %v13466_v6  ;;  %v16473_v9 = vadd.f32 %v8264_v33, %v8184_v1  ;;  %v13473_v6 = vld [vmem:[%s20776_s1 + $0x1600] ss:$16 sps:$4 sm:$0xff]   ;;  %v13575_v3 = vld [vmem:[%s20777_s0 + $0x298] ss:$144 sps:$4 sm:$0xff]  }
 0x15a   :  { %20805 = vst [vmem:[#allocation16_spill] sm:$0xff] %v16468_v7  ;;  %v8189_v17 = vpop.f32.mrf.mxu0  ;;  %8674 = vmatmul.mubr.bf16.gmra.mxu0 %v13460_v28  ;;  %v13480_v28 = vld [vmem:[%s20776_s1 + $0x15e4] ss:$16 sps:$4 sm:$0xff]  }
 0x15b   :  { %v8270_v18 = vpop.f32.mrf.mxu1  ;;  %8755 = vmatmul.mubr.bf16.gmra.mxu1 %v13469_v34  ;;  %v8190_v14 = vadd.f32 %v8189_v17, %v16179_v44  ;;  %8786 = vmatpush1.bf16.msra.mxu0 %v13461_v30  ;;  %v13483_v34 = vld [vmem:[%s20776_s1 + $0x17e4] ss:$16 sps:$4 sm:$0xff]   ;;  %v16502_v17 = vcombine.low %v174_v15, %v174_v15 }
 0x15c   :  { %8867 = vmatpush1.bf16.msra.mxu1 %v13464_v45  ;;  %v8191_v32 = vpop.f32.mrf.mxu0  ;;  %8787 = vmatprep.subr.bf16.mxu0 %v13472_v62  ;;  %v16497_v62 = vcombine.low %v173_v35, %v173_v35  ;;  %v13488_v15 = vld [vmem:[%s20776_s1 + $0x15c4] ss:$16 sps:$4 sm:$0xff]  }
 0x15d   :  { %v8272_v33 = vpop.f32.mrf.mxu1  ;;  %8868 = vmatprep.subr.bf16.mxu1 %v13475_v25  ;;  %v8192_v44 = vadd.f32 %v8191_v32, %v16192_v60  ;;  %v16493_v30 = vadd.f32 %v8270_v18, %v8190_v14  ;;  %8683 = vmatprep.mubr.bf16.mxu0 %v16475_v12  ;;  %v13478_v25 = vld [vmem:[%s20776_s1 + $0x15e0] ss:$16 sps:$4 sm:$0xff]   ;;  %v13530_v14 = vld [vmem:[%s20777_s0 + $0x54] ss:$144 sps:$4 sm:$0xff]  }
 0x15e   :  { %8764 = vmatprep.mubr.bf16.mxu1 %v16477_v13  ;;  %v8193_v1 = vpop.f32.mrf.mxu0  ;;  %v13481_v60 = vld [vmem:[%s20776_s1 + $0x17e0] ss:$16 sps:$4 sm:$0xff]  }
 0x15f   :  { %v8274_v45 = vpop.f32.mrf.mxu1  ;;  %v8194_v0 = vadd.f32 %v8193_v1, %v16204_v2  ;;  %v16505_v7 = vadd.f32 %v8272_v33, %v8192_v44  ;;  %8788 = vmatpush1.bf16.msra.mxu0 %v13470_v26  ;;  %v13491_v2 = vld [vmem:[%s20776_s1 + $0x17c4] ss:$16 sps:$4 sm:$0xff]  }
 0x160   :  { %8869 = vmatpush1.bf16.msra.mxu1 %v13473_v6  ;;  %v16510_v18 = vpop.f32.mrf.mxu0  ;;  %8789 = vmatprep.subr.bf16.mxu0 %v13480_v28  ;;  %v13533_v6 = vld [vmem:[%s20777_s0 + $0x5c] ss:$144 sps:$4 sm:$0xff]   ;;  %v13486_v28 = vld [vmem:[%s20776_s1 + $0x15c0] ss:$16 sps:$4 sm:$0xff]  }
 0x161   :  { %20806 = vst [vmem:[#allocation17_spill] sm:$0xff] %v16510_v18  ;;  %v16512_v35 = vpop.f32.mrf.mxu1  ;;  %8870 = vmatprep.subr.bf16.mxu1 %v13483_v34  ;;  %v16520_v26 = vadd.f32 %v8274_v45, %v8194_v0  ;;  %v13489_v34 = vld [vmem:[%s20776_s1 + $0x17c0] ss:$16 sps:$4 sm:$0xff]   ;;  %v13494_v45 = vld [vmem:[%s20776_s1 + $0x15a4] ss:$16 sps:$4 sm:$0xff]  }
 0x162   :  { %20807 = vst [vmem:[#allocation18_spill] sm:$0xff] %v16512_v35  ;;  %v8199_v32 = vpop.f32.mrf.mxu0  ;;  %8684 = vmatmul.mubr.bf16.gmra.mxu0 %v16497_v62  ;;  %v13497_v35 = vld [vmem:[%s20776_s1 + $0x17a4] ss:$16 sps:$4 sm:$0xff]   ;;  %v13495_v18 = vld [vmem:[%s20776_s1 + $0x17a0] ss:$16 sps:$4 sm:$0xff]  }
 0x163   :  { %v8280_v33 = vpop.f32.mrf.mxu1  ;;  %8765 = vmatmul.mubr.bf16.gmra.mxu1 %v16502_v17  ;;  %v8200_v0 = vadd.f32 %v8199_v32, %v16228_v31  ;;  %8790 = vmatpush2.bf16.msra.mxu0 %v13478_v25 }
 0x164   :  { %8871 = vmatpush2.bf16.msra.mxu1 %v13481_v60  ;;  %v8201_v44 = vpop.f32.mrf.mxu0  ;;  %8791 = vmatprep.subr.bf16.mxu0 %v13488_v15  ;;  %v13492_v60 = vld [vmem:[%s20776_s1 + $0x15a0] ss:$16 sps:$4 sm:$0xff]  }
 0x165   :  { %v8282_v1 = vpop.f32.mrf.mxu1  ;;  %8872 = vmatprep.subr.bf16.mxu1 %v13491_v2  ;;  %v8202_v31 = vadd.f32 %v8201_v44, %v16239_v43  ;;  %v16544_v25 = vadd.f32 %v8280_v33, %v8200_v0  ;;  %8805 = vmatprep.mubr.bf16.mxu0 %v13530_v14  ;;  %v13500_v43 = vld [vmem:[%s20776_s1 + $0x1584] ss:$16 sps:$4 sm:$0xff]   ;;  %v13504_v44 = vld [vmem:[%s20776_s1 + $0x1560] ss:$16 sps:$4 sm:$0xff]  }
 0x166   :  { %8886 = vmatprep.mubr.bf16.mxu1 %v13533_v6  ;;  %v8203_v15 = vpop.f32.mrf.mxu0  ;;  %v13503_v14 = vld [vmem:[%s20776_s1 + $0x1784] ss:$16 sps:$4 sm:$0xff]  }
 0x167   :  { %v8284_v2 = vpop.f32.mrf.mxu1  ;;  %v16549_v32 = vadd.f32 %v8282_v1, %v8202_v31  ;;  %8792 = vmatpush2.bf16.msra.mxu0 %v13486_v28  ;;  %v13498_v28 = vld [vmem:[%s20776_s1 + $0x1580] ss:$16 sps:$4 sm:$0xff]   ;;  %v13506_v0 = vld [vmem:[%s20776_s1 + $0x1564] ss:$16 sps:$4 sm:$0xff]  }
 0x168   :  { %8873 = vmatpush2.bf16.msra.mxu1 %v13489_v34  ;;  %8793 = vmatprep.subr.bf16.mxu0 %v13494_v45  ;;  %v8204_v6 = vpop.f32.mrf.mxu0  ;;  %v13509_v34 = vld [vmem:[%s20776_s1 + $0x1764] ss:$16 sps:$4 sm:$0xff]   ;;  %v13510_v31 = vld [vmem:[%s20776_s1 + $0x1540] ss:$16 sps:$4 sm:$0xff]  }
 0x169   :  { %8874 = vmatprep.subr.bf16.mxu1 %v13497_v35  ;;  %v8285_v33 = vpop.f32.mrf.mxu1  ;;  %v13501_v35 = vld [vmem:[%s20776_s1 + $0x1780] ss:$16 sps:$4 sm:$0xff]   ;;  %v13512_v1 = vld [vmem:[%s20776_s1 + $0x1544] ss:$16 sps:$4 sm:$0xff]  }
 0x16a   :  { %v13515_v45 = vld [vmem:[%s20776_s1 + $0x1744] ss:$16 sps:$4 sm:$0xff]  }
 0x16b   :  { %8794 = vmatpush2.bf16.msra.mxu0 %v13492_v60  ;;  %v13513_v60 = vld [vmem:[%s20776_s1 + $0x1740] ss:$16 sps:$4 sm:$0xff]   ;;  %v13518_v15 = vld [vmem:[%s20776_s1 + $0x1524] ss:$16 sps:$4 sm:$0xff]  }
 0x16c   :  { %8875 = vmatpush2.bf16.msra.mxu1 %v13495_v18  ;;  %8795 = vmatprep.subr.bf16.mxu0 %v13500_v43  ;;  %v13507_v18 = vld [vmem:[%s20776_s1 + $0x1760] ss:$16 sps:$4 sm:$0xff]   ;;  %v13521_v2 = vld [vmem:[%s20776_s1 + $0x1724] ss:$16 sps:$4 sm:$0xff]  }
 0x16d   :  { %8876 = vmatprep.subr.bf16.mxu1 %v13503_v14  ;;  %v13516_v43 = vld [vmem:[%s20776_s1 + $0x1520] ss:$16 sps:$4 sm:$0xff]   ;;  %v13524_v6 = vld [vmem:[%s20776_s1 + $0x1504] ss:$16 sps:$4 sm:$0xff]  }
 0x16e   :  { %v13519_v14 = vld [vmem:[%s20776_s1 + $0x1720] ss:$16 sps:$4 sm:$0xff]   ;;  %v13527_v33 = vld [vmem:[%s20776_s1 + $0x1704] ss:$16 sps:$4 sm:$0xff]  }
 0x16f   :  { %8796 = vmatpush2.bf16.msra.mxu0 %v13498_v28  ;;  %v13522_v28 = vld [vmem:[%s20776_s1 + $0x1500] ss:$16 sps:$4 sm:$0xff]  }
 0x170   :  { %8877 = vmatpush2.bf16.msra.mxu1 %v13501_v35  ;;  %8797 = vmatprep.subr.bf16.mxu0 %v13506_v0  ;;  %v13525_v35 = vld [vmem:[%s20776_s1 + $0x1700] ss:$16 sps:$4 sm:$0xff]   ;;  %v13536_v0 = vld [vmem:[%s20776_s1 + $0x18e4] ss:$16 sps:$4 sm:$0xff]  }
 0x171   :  { %8878 = vmatprep.subr.bf16.mxu1 %v13509_v34  ;;  %v13539_v34 = vld [vmem:[%s20776_s1 + $0x1ae4] ss:$16 sps:$4 sm:$0xff]  }
 0x173   :  { %8798 = vmatpush2.bf16.msra.mxu0 %v13504_v44  ;;  %v13528_v44 = vld [vmem:[%s20777_s0 + $0x50] ss:$144 sps:$4 sm:$0xff]  }
 0x174   :  { %8879 = vmatpush2.bf16.msra.mxu1 %v13507_v18  ;;  %8799 = vmatprep.subr.bf16.mxu0 %v13512_v1  ;;  %v13531_v18 = vld [vmem:[%s20777_s0 + $0x58] ss:$144 sps:$4 sm:$0xff]   ;;  %v13534_v1 = vld [vmem:[%s20776_s1 + $0x18e0] ss:$16 sps:$4 sm:$0xff]  }
 0x175   :  { %8880 = vmatprep.subr.bf16.mxu1 %v13515_v45  ;;  %v13537_v45 = vld [vmem:[%s20776_s1 + $0x1ae0] ss:$16 sps:$4 sm:$0xff]  }
 0x177   :  { %8800 = vmatpush2.bf16.msra.mxu0 %v13510_v31  ;;  %v13542_v31 = vld [vmem:[%s20776_s1 + $0x18c4] ss:$16 sps:$4 sm:$0xff]  }
 0x178   :  { %8881 = vmatpush2.bf16.msra.mxu1 %v13513_v60  ;;  %8801 = vmatprep.subr.bf16.mxu0 %v13518_v15  ;;  %v13545_v60 = vld [vmem:[%s20776_s1 + $0x1ac4] ss:$16 sps:$4 sm:$0xff]  }
 0x179   :  { %8882 = vmatprep.subr.bf16.mxu1 %v13521_v2  ;;  %v13546_v15 = vld [vmem:[%s20777_s0 + $0x174] ss:$144 sps:$4 sm:$0xff]   ;;  %v13555_v2 = vld [vmem:[%s20777_s0 + $0x17c] ss:$144 sps:$4 sm:$0xff]  }
 0x17b   :  { %8802 = vmatpush2.bf16.msra.mxu0 %v13516_v43 }
 0x17c   :  { %8883 = vmatpush2.bf16.msra.mxu1 %v13519_v14  ;;  %8803 = vmatprep.subr.bf16.mxu0 %v13524_v6  ;;  %v13540_v6 = vld [vmem:[%s20776_s1 + $0x18c0] ss:$16 sps:$4 sm:$0xff]  }
 0x17d   :  { %8884 = vmatprep.subr.bf16.mxu1 %v13527_v33 }
 0x17f   :  { %8804 = vmatpush2.bf16.msra.mxu0 %v13522_v28  ;;  %v13543_v28 = vld [vmem:[%s20776_s1 + $0x1ac0] ss:$16 sps:$4 sm:$0xff]  }
 0x180   :  { %8885 = vmatpush2.bf16.msra.mxu1 %v13525_v35  ;;  %8935 = vmatprep.subr.bf16.mxu0 %v13536_v0 }
 0x181   :  { %9016 = vmatprep.subr.bf16.mxu1 %v13539_v34  ;;  %v13551_v34 = vld [vmem:[%s20776_s1 + $0x18a4] ss:$16 sps:$4 sm:$0xff]  }
 0x182   :  { %v8321_v43 = vpop.f32.mrf.mxu0  ;;  %8806 = vmatmul.mubr.bf16.vlgmr.msra.gmra.mxu0 %v13528_v44  ;;  %v13554_v44 = vld [vmem:[%s20776_s1 + $0x1aa4] ss:$16 sps:$4 sm:$0xff]  }
 0x183   :  { %v8402_v14 = vpop.f32.mrf.mxu1  ;;  %8887 = vmatmul.mubr.bf16.vlgmr.msra.gmra.mxu1 %v13531_v18  ;;  %v8322_v33 = vadd.f32 %v8321_v43, %v16344_v27  ;;  %8936 = vmatpush1.bf16.msra.mxu0 %v13534_v1  ;;  %v13548_v1 = vld [vmem:[%s20777_s0 + $0x170] ss:$144 sps:$4 sm:$0xff]   ;;  %v13557_v43 = vld [vmem:[%s20777_s0 + $0x178] ss:$144 sps:$4 sm:$0xff]  }
 0x184   :  { %9017 = vmatpush1.bf16.msra.mxu1 %v13537_v45  ;;  %v8323_v35 = vpop.f32.mrf.mxu0  ;;  %8937 = vmatprep.subr.bf16.mxu0 %v13542_v31  ;;  %v13549_v45 = vld [vmem:[%s20776_s1 + $0x18a0] ss:$16 sps:$4 sm:$0xff]  }
 0x185   :  { %v8404_v0 = vpop.f32.mrf.mxu1  ;;  %9018 = vmatprep.subr.bf16.mxu1 %v13545_v60  ;;  %v16657_v18 = vadd.f32 %v8402_v14, %v8322_v33  ;;  %v8324_v27 = vadd.f32 %v8323_v35, %v16356_v37  ;;  %8815 = vmatprep.mubr.bf16.mxu0 %v13546_v15  ;;  %v13552_v15 = vld [vmem:[%s20776_s1 + $0x1aa0] ss:$16 sps:$4 sm:$0xff]  }
 0x186   :  { %8896 = vmatprep.mubr.bf16.mxu1 %v13555_v2  ;;  %v8325_v31 = vpop.f32.mrf.mxu0  ;;  %v13560_v2 = vld [vmem:[%s20776_s1 + $0x1884] ss:$16 sps:$4 sm:$0xff]  }
 0x187   :  { %v8406_v60 = vpop.f32.mrf.mxu1  ;;  %v16669_v14 = vadd.f32 %v8404_v0, %v8324_v27  ;;  %v8326_v37 = vadd.f32 %v8325_v31, %v16372_v59  ;;  %8938 = vmatpush1.bf16.msra.mxu0 %v13540_v6  ;;  %v13563_v59 = vld [vmem:[%s20776_s1 + $0x1a84] ss:$16 sps:$4 sm:$0xff]   ;;  %v13573_v0 = vld [vmem:[%s20777_s0 + $0x29c] ss:$144 sps:$4 sm:$0xff]   ;;  %v13558_v27 = vld [vmem:[%s20776_s1 + $0x1880] ss:$16 sps:$4 sm:$0xff]  }
 0x188   :  { %9019 = vmatpush1.bf16.msra.mxu1 %v13543_v28  ;;  %v16675_v33 = vpop.f32.mrf.mxu0  ;;  %8939 = vmatprep.subr.bf16.mxu0 %v13551_v34  ;;  %v13564_v28 = vld [vmem:[%s20777_s0 + $0x294] ss:$144 sps:$4 sm:$0xff]  }
 0x189   :  { %20808 = vst [vmem:[#allocation19_spill] sm:$0xff] %v16675_v33  ;;  %v16677_v35 = vpop.f32.mrf.mxu1  ;;  %9020 = vmatprep.subr.bf16.mxu1 %v13554_v44  ;;  %v16685_v6 = vadd.f32 %v8406_v60, %v8326_v37  ;;  %v13561_v60 = vld [vmem:[%s20776_s1 + $0x1a80] ss:$16 sps:$4 sm:$0xff]   ;;  %v13720_v33 = vld [vmem:[%s20776_s1 + $0x1c04] ss:$16 sps:$4 sm:$0xff]  }
 0x18a   :  { %20809 = vst [vmem:[#allocation20_spill] sm:$0xff] %v16677_v35  ;;  %v8331_v34 = vpop.f32.mrf.mxu0  ;;  %8816 = vmatmul.mubr.bf16.gmra.mxu0 %v13548_v1  ;;  %v13569_v1 = vld [vmem:[%s20776_s1 + $0x1864] ss:$16 sps:$4 sm:$0xff]  }
 0x18b   :  { %v8412_v44 = vpop.f32.mrf.mxu1  ;;  %8897 = vmatmul.mubr.bf16.gmra.mxu1 %v13557_v43  ;;  %v8332_v31 = vadd.f32 %v8331_v34, %v16394_v58  ;;  %8940 = vmatpush1.bf16.msra.mxu0 %v13549_v45  ;;  %v13572_v43 = vld [vmem:[%s20776_s1 + $0x1a64] ss:$16 sps:$4 sm:$0xff]  }
 0x18c   :  { %9021 = vmatpush1.bf16.msra.mxu1 %v13552_v15  ;;  %v8333_v37 = vpop.f32.mrf.mxu0  ;;  %8941 = vmatprep.subr.bf16.mxu0 %v13560_v2  ;;  %v13566_v15 = vld [vmem:[%s20777_s0 + $0x290] ss:$144 sps:$4 sm:$0xff]  }
 0x18d   :  { %v8414_v63 = vpop.f32.mrf.mxu1  ;;  %9022 = vmatprep.subr.bf16.mxu1 %v13563_v59  ;;  %v8334_v58 = vadd.f32 %v8333_v37, %v16406_v36  ;;  %v16707_v45 = vadd.f32 %v8412_v44, %v8332_v31  ;;  %8825 = vmatprep.mubr.bf16.mxu0 %v13564_v28  ;;  %v13567_v2 = vld [vmem:[%s20776_s1 + $0x1860] ss:$16 sps:$4 sm:$0xff]  }
 0x18e   :  { %8906 = vmatprep.mubr.bf16.mxu1 %v13573_v0  ;;  %v8335_v59 = vpop.f32.mrf.mxu0  ;;  %v13570_v28 = vld [vmem:[%s20776_s1 + $0x1a60] ss:$16 sps:$4 sm:$0xff]   ;;  %v13578_v0 = vld [vmem:[%s20776_s1 + $0x1844] ss:$16 sps:$4 sm:$0xff]  }
 0x18f   :  { %v8416_v34 = vpop.f32.mrf.mxu1  ;;  %v8336_v36 = vadd.f32 %v8335_v59, %v16421_v61  ;;  %v16719_v44 = vadd.f32 %v8414_v63, %v8334_v58  ;;  %8942 = vmatpush1.bf16.msra.mxu0 %v13558_v27  ;;  %v13581_v63 = vld [vmem:[%s20776_s1 + $0x1a44] ss:$16 sps:$4 sm:$0xff]  }
 0x190   :  { %9023 = vmatpush1.bf16.msra.mxu1 %v13561_v60  ;;  %v16727_v31 = vpop.f32.mrf.mxu0  ;;  %8943 = vmatprep.subr.bf16.mxu0 %v13569_v1  ;;  %v13584_v61 = vld [vmem:[%s20777_s0 + $0x3b4] ss:$144 sps:$4 sm:$0xff]   ;;  %v13593_v60 = vld [vmem:[%s20777_s0 + $0x3bc] ss:$144 sps:$4 sm:$0xff]   ;;  %v13576_v1 = vld [vmem:[%s20776_s1 + $0x1840] ss:$16 sps:$4 sm:$0xff]  }
 0x191   :  { %20810 = vst [vmem:[#allocation21_spill] sm:$0xff] %v16727_v31  ;;  %v16729_v37 = vpop.f32.mrf.mxu1  ;;  %9024 = vmatprep.subr.bf16.mxu1 %v13572_v43  ;;  %v16737_v27 = vadd.f32 %v8416_v34, %v8336_v36  ;;  %v13579_v34 = vld [vmem:[%s20776_s1 + $0x1a40] ss:$16 sps:$4 sm:$0xff]   ;;  %v13587_v36 = vld [vmem:[%s20776_s1 + $0x1824] ss:$16 sps:$4 sm:$0xff]  }
 0x192   :  { %20811 = vst [vmem:[#allocation22_spill] sm:$0xff] %v16729_v37  ;;  %v8341_v58 = vpop.f32.mrf.mxu0  ;;  %8826 = vmatmul.mubr.bf16.gmra.mxu0 %v13566_v15 }
 0x193   :  { %v8422_v59 = vpop.f32.mrf.mxu1  ;;  %8907 = vmatmul.mubr.bf16.gmra.mxu1 %v13575_v3  ;;  %v8342_v43 = vadd.f32 %v8341_v58, %v16443_v29  ;;  %8944 = vmatpush1.bf16.msra.mxu0 %v13567_v2  ;;  %v13582_v3 = vld [vmem:[%s20777_s0 + $0x3b0] ss:$144 sps:$4 sm:$0xff]   ;;  %v13590_v29 = vld [vmem:[%s20776_s1 + $0x1a24] ss:$16 sps:$4 sm:$0xff]  }
 0x194   :  { %9025 = vmatpush1.bf16.msra.mxu1 %v13570_v28  ;;  %v8343_v37 = vpop.f32.mrf.mxu0  ;;  %8945 = vmatprep.subr.bf16.mxu0 %v13578_v0  ;;  %v13585_v58 = vld [vmem:[%s20776_s1 + $0x1820] ss:$16 sps:$4 sm:$0xff]   ;;  %v13591_v0 = vld [vmem:[%s20777_s0 + $0x3b8] ss:$144 sps:$4 sm:$0xff]  }
 0x195   :  { %v8424_v15 = vpop.f32.mrf.mxu1  ;;  %9026 = vmatprep.subr.bf16.mxu1 %v13581_v63  ;;  %v8344_v2 = vadd.f32 %v8343_v37, %v16458_v50  ;;  %v16759_v28 = vadd.f32 %v8422_v59, %v8342_v43  ;;  %8835 = vmatprep.mubr.bf16.mxu0 %v13584_v61  ;;  %v176_v50 = vld [vmem:[%s20777_s0 + $0x4d8] sm:$0xff]  ;;  %v13596_v59 = vld [vmem:[%s20776_s1 + $0x1804] ss:$16 sps:$4 sm:$0xff]  }
 0x196   :  { %8916 = vmatprep.mubr.bf16.mxu1 %v13593_v60  ;;  %v8345_v63 = vpop.f32.mrf.mxu0  ;;  %v13588_v60 = vld [vmem:[%s20776_s1 + $0x1a20] ss:$16 sps:$4 sm:$0xff]   ;;  %v16821_v35 = vcombine.low %v176_v50, %v176_v50 }
 0x197   :  { %v8426_v31 = vpop.f32.mrf.mxu1  ;;  %v8346_v37 = vadd.f32 %v8345_v63, %v16473_v9  ;;  %v16774_v61 = vadd.f32 %v8424_v15, %v8344_v2  ;;  %8946 = vmatpush1.bf16.msra.mxu0 %v13576_v1  ;;  %v13599_v9 = vld [vmem:[%s20776_s1 + $0x1a04] ss:$16 sps:$4 sm:$0xff]   ;;  %v16793_v15 = vcombine.high %v176_v50, %v176_v50  ;;  %v13657_v50 = vld [vmem:[%s20777_s0 + $0x6c] ss:$144 sps:$4 sm:$0xff]  }
 0x198   :  { %9027 = vmatpush1.bf16.msra.mxu1 %v13579_v34  ;;  %v16782_v43 = vpop.f32.mrf.mxu0  ;;  %8947 = vmatprep.subr.bf16.mxu0 %v13587_v36  ;;  %v16791_v34 = vcombine.high %v175_v22, %v175_v22 }
 0x199   :  { %20812 = vst [vmem:[#allocation23_spill] sm:$0xff] %v16782_v43  ;;  %v16784_v8 = vpop.f32.mrf.mxu1  ;;  %9028 = vmatprep.subr.bf16.mxu1 %v13590_v29  ;;  %v16789_v1 = vadd.f32 %v8426_v31, %v8346_v37  ;;  %v13597_v31 = vld [vmem:[%s20776_s1 + $0x1a00] ss:$16 sps:$4 sm:$0xff]   ;;  %v13604_v29 = vld [vmem:[%s20776_s1 + $0x19e4] ss:$16 sps:$4 sm:$0xff]   ;;  %v16813_v43 = vcombine.low %v175_v22, %v175_v22 }
 0x19a   :  { %20813 = vst [vmem:[#allocation24_spill] sm:$0xff] %v16784_v8  ;;  %v8351_v2 = vpop.f32.mrf.mxu0  ;;  %8836 = vmatmul.mubr.bf16.gmra.mxu0 %v13582_v3  ;;  %v13594_v8 = vld [vmem:[%s20776_s1 + $0x1800] ss:$16 sps:$4 sm:$0xff]   ;;  %v13612_v22 = vld [vmem:[%s20776_s1 + $0x19c4] ss:$16 sps:$4 sm:$0xff]  }
 0x19b   :  { %v8432_v63 = vpop.f32.mrf.mxu1  ;;  %8917 = vmatmul.mubr.bf16.gmra.mxu1 %v13591_v0  ;;  %v8352_v36 = vadd.f32 %v8351_v2, %v16493_v30  ;;  %8948 = vmatpush1.bf16.msra.mxu0 %v13585_v58  ;;  %v13607_v0 = vld [vmem:[%s20776_s1 + $0x1be4] ss:$16 sps:$4 sm:$0xff]  }
 0x19c   :  { %9029 = vmatpush1.bf16.msra.mxu1 %v13588_v60  ;;  %v8353_v37 = vpop.f32.mrf.mxu0  ;;  %8949 = vmatprep.subr.bf16.mxu0 %v13596_v59  ;;  %v13602_v59 = vld [vmem:[%s20776_s1 + $0x19e0] ss:$16 sps:$4 sm:$0xff]  }
 0x19d   :  { %v8434_v3 = vpop.f32.mrf.mxu1  ;;  %9030 = vmatprep.subr.bf16.mxu1 %v13599_v9  ;;  %v8354_v30 = vadd.f32 %v8353_v37, %v16505_v7  ;;  %v16809_v58 = vadd.f32 %v8432_v63, %v8352_v36  ;;  %8845 = vmatprep.mubr.bf16.mxu0 %v16791_v34  ;;  %v13605_v9 = vld [vmem:[%s20776_s1 + $0x1be0] ss:$16 sps:$4 sm:$0xff]   ;;  %v13615_v36 = vld [vmem:[%s20776_s1 + $0x1bc4] ss:$16 sps:$4 sm:$0xff]  }
 0x19e   :  { %8926 = vmatprep.mubr.bf16.mxu1 %v16793_v15  ;;  %v8355_v60 = vpop.f32.mrf.mxu0 }
 0x19f   :  { %v8436_v2 = vpop.f32.mrf.mxu1  ;;  %v8356_v7 = vadd.f32 %v8355_v60, %v16520_v26  ;;  %v16824_v63 = vadd.f32 %v8434_v3, %v8354_v30  ;;  %8950 = vmatpush1.bf16.msra.mxu0 %v13594_v8  ;;  %v13654_v26 = vld [vmem:[%s20777_s0 + $0x64] ss:$144 sps:$4 sm:$0xff]   ;;  %v13613_v30 = vld [vmem:[%s20776_s1 + $0x1bc0] ss:$16 sps:$4 sm:$0xff]  }
 0x1a0   :  { %9031 = vmatpush1.bf16.msra.mxu1 %v13597_v31  ;;  %v16832_v37 = vpop.f32.mrf.mxu0  ;;  %8951 = vmatprep.subr.bf16.mxu0 %v13604_v29  ;;  %v13610_v29 = vld [vmem:[%s20776_s1 + $0x19c0] ss:$16 sps:$4 sm:$0xff]   ;;  %v13618_v60 = vld [vmem:[%s20776_s1 + $0x19a4] ss:$16 sps:$4 sm:$0xff]  }
 0x1a1   :  { %20814 = vst [vmem:[#allocation25_spill] sm:$0xff] %v16832_v37  ;;  %v16834_v20 = vpop.f32.mrf.mxu1  ;;  %9032 = vmatprep.subr.bf16.mxu1 %v13607_v0  ;;  %v16839_v8 = vadd.f32 %v8436_v2, %v8356_v7 }
 0x1a2   :  { %20815 = vst [vmem:[#allocation26_spill] sm:$0xff] %v16834_v20  ;;  %v8361_v31 = vpop.f32.mrf.mxu0  ;;  %8846 = vmatmul.mubr.bf16.gmra.mxu0 %v16813_v43  ;;  %v13621_v20 = vld [vmem:[%s20776_s1 + $0x1ba4] ss:$16 sps:$4 sm:$0xff]  }
 0x1a3   :  { %v8442_v3 = vpop.f32.mrf.mxu1  ;;  %8927 = vmatmul.mubr.bf16.gmra.mxu1 %v16821_v35  ;;  %v8362_v0 = vadd.f32 %v8361_v31, %v16544_v25  ;;  %8952 = vmatpush2.bf16.msra.mxu0 %v13602_v59 }
 0x1a4   :  { %9033 = vmatpush2.bf16.msra.mxu1 %v13605_v9  ;;  %v8363_v2 = vpop.f32.mrf.mxu0  ;;  %8953 = vmatprep.subr.bf16.mxu0 %v13612_v22  ;;  %v13616_v9 = vld [vmem:[%s20776_s1 + $0x19a0] ss:$16 sps:$4 sm:$0xff]  }
 0x1a5   :  { %v8444_v7 = vpop.f32.mrf.mxu1  ;;  %9034 = vmatprep.subr.bf16.mxu1 %v13615_v36  ;;  %v8364_v25 = vadd.f32 %v8363_v2, %v16549_v32  ;;  %v16860_v59 = vadd.f32 %v8442_v3, %v8362_v0  ;;  %8967 = vmatprep.mubr.bf16.mxu0 %v13654_v26  ;;  %v13619_v22 = vld [vmem:[%s20776_s1 + $0x1ba0] ss:$16 sps:$4 sm:$0xff]   ;;  %v13624_v32 = vld [vmem:[%s20776_s1 + $0x1984] ss:$16 sps:$4 sm:$0xff]  }
 0x1a6   :  { %9048 = vmatprep.mubr.bf16.mxu1 %v13657_v50  ;;  %v8365_v31 = vpop.f32.mrf.mxu0  ;;  %v13627_v36 = vld [vmem:[%s20776_s1 + $0x1b84] ss:$16 sps:$4 sm:$0xff]   ;;  %v13622_v50 = vld [vmem:[%s20776_s1 + $0x1980] ss:$16 sps:$4 sm:$0xff]  }
 0x1a7   :  { %v8446_v37 = vpop.f32.mrf.mxu1  ;;  %v16865_v53 = vadd.f32 %v8444_v7, %v8364_v25  ;;  %8954 = vmatpush2.bf16.msra.mxu0 %v13610_v29  ;;  %v13625_v3 = vld [vmem:[%s20776_s1 + $0x1b80] ss:$16 sps:$4 sm:$0xff]   ;;  %v13633_v29 = vld [vmem:[%s20776_s1 + $0x1b64] ss:$16 sps:$4 sm:$0xff]  }
 0x1a8   :  { %9035 = vmatpush2.bf16.msra.mxu1 %v13613_v30  ;;  %8955 = vmatprep.subr.bf16.mxu0 %v13618_v60  ;;  %v8366_v26 = vpop.f32.mrf.mxu0  ;;  %v13628_v0 = vld [vmem:[%s20776_s1 + $0x1960] ss:$16 sps:$4 sm:$0xff]   ;;  %v13636_v60 = vld [vmem:[%s20776_s1 + $0x1944] ss:$16 sps:$4 sm:$0xff]  }
 0x1a9   :  { %9036 = vmatprep.subr.bf16.mxu1 %v13621_v20  ;;  %v8447_v37 = vpop.f32.mrf.mxu1  ;;  %v13630_v20 = vld [vmem:[%s20776_s1 + $0x1964] ss:$16 sps:$4 sm:$0xff]   ;;  %v13631_v30 = vld [vmem:[%s20776_s1 + $0x1b60] ss:$16 sps:$4 sm:$0xff]  }
 0x1aa   :  { %v13639_v2 = vld [vmem:[%s20776_s1 + $0x1b44] ss:$16 sps:$4 sm:$0xff]   ;;  %v13634_v7 = vld [vmem:[%s20776_s1 + $0x1940] ss:$16 sps:$4 sm:$0xff]  }
 0x1ab   :  { %8956 = vmatpush2.bf16.msra.mxu0 %v13616_v9  ;;  %v13637_v25 = vld [vmem:[%s20776_s1 + $0x1b40] ss:$16 sps:$4 sm:$0xff]   ;;  %v13642_v9 = vld [vmem:[%s20776_s1 + $0x1924] ss:$16 sps:$4 sm:$0xff]  }
 0x1ac   :  { %9037 = vmatpush2.bf16.msra.mxu1 %v13619_v22  ;;  %8957 = vmatprep.subr.bf16.mxu0 %v13624_v32  ;;  %v13645_v31 = vld [vmem:[%s20776_s1 + $0x1b24] ss:$16 sps:$4 sm:$0xff]   ;;  %v13640_v22 = vld [vmem:[%s20776_s1 + $0x1920] ss:$16 sps:$4 sm:$0xff]  }
 0x1ad   :  { %9038 = vmatprep.subr.bf16.mxu1 %v13627_v36  ;;  %v13643_v32 = vld [vmem:[%s20776_s1 + $0x1b20] ss:$16 sps:$4 sm:$0xff]   ;;  %v13648_v36 = vld [vmem:[%s20776_s1 + $0x1904] ss:$16 sps:$4 sm:$0xff]  }
 0x1ae   :  { %v13651_v26 = vld [vmem:[%s20776_s1 + $0x1b04] ss:$16 sps:$4 sm:$0xff]   ;;  %v13646_v37 = vld [vmem:[%s20776_s1 + $0x1900] ss:$16 sps:$4 sm:$0xff]  }
 0x1af   :  { %8958 = vmatpush2.bf16.msra.mxu0 %v13622_v50  ;;  %v13649_v50 = vld [vmem:[%s20776_s1 + $0x1b00] ss:$16 sps:$4 sm:$0xff]  }
 0x1b0   :  { %9039 = vmatpush2.bf16.msra.mxu1 %v13625_v3  ;;  %8959 = vmatprep.subr.bf16.mxu0 %v13630_v20  ;;  %v13660_v3 = vld [vmem:[%s20776_s1 + $0x1ce4] ss:$16 sps:$4 sm:$0xff]   ;;  %v13652_v20 = vld [vmem:[%s20777_s0 + $0x60] ss:$144 sps:$4 sm:$0xff]  }
 0x1b1   :  { %9040 = vmatprep.subr.bf16.mxu1 %v13633_v29  ;;  %v13663_v29 = vld [vmem:[%s20776_s1 + $0x1ee4] ss:$16 sps:$4 sm:$0xff]  }
 0x1b3   :  { %8960 = vmatpush2.bf16.msra.mxu0 %v13628_v0  ;;  %v13655_v0 = vld [vmem:[%s20777_s0 + $0x68] ss:$144 sps:$4 sm:$0xff]  }
 0x1b4   :  { %9041 = vmatpush2.bf16.msra.mxu1 %v13631_v30  ;;  %8961 = vmatprep.subr.bf16.mxu0 %v13636_v60  ;;  %v13658_v30 = vld [vmem:[%s20776_s1 + $0x1ce0] ss:$16 sps:$4 sm:$0xff]  }
 0x1b5   :  { %9042 = vmatprep.subr.bf16.mxu1 %v13639_v2  ;;  %v13661_v60 = vld [vmem:[%s20776_s1 + $0x1ee0] ss:$16 sps:$4 sm:$0xff]   ;;  %v13666_v2 = vld [vmem:[%s20776_s1 + $0x1cc4] ss:$16 sps:$4 sm:$0xff]  }
 0x1b7   :  { %8962 = vmatpush2.bf16.msra.mxu0 %v13634_v7  ;;  %v13669_v7 = vld [vmem:[%s20776_s1 + $0x1ec4] ss:$16 sps:$4 sm:$0xff]  }
 0x1b8   :  { %9043 = vmatpush2.bf16.msra.mxu1 %v13637_v25  ;;  %8963 = vmatprep.subr.bf16.mxu0 %v13642_v9  ;;  %v13672_v25 = vld [vmem:[%s20777_s0 + $0x184] ss:$144 sps:$4 sm:$0xff]   ;;  %v13681_v9 = vld [vmem:[%s20777_s0 + $0x18c] ss:$144 sps:$4 sm:$0xff]  }
 0x1b9   :  { %9044 = vmatprep.subr.bf16.mxu1 %v13645_v31 }
 0x1bb   :  { %8964 = vmatpush2.bf16.msra.mxu0 %v13640_v22 }
 0x1bc   :  { %9045 = vmatpush2.bf16.msra.mxu1 %v13643_v32  ;;  %8965 = vmatprep.subr.bf16.mxu0 %v13648_v36  ;;  %v13664_v32 = vld [vmem:[%s20776_s1 + $0x1cc0] ss:$16 sps:$4 sm:$0xff]  }
 0x1bd   :  { %9046 = vmatprep.subr.bf16.mxu1 %v13651_v26  ;;  %v13667_v26 = vld [vmem:[%s20776_s1 + $0x1ec0] ss:$16 sps:$4 sm:$0xff]  }
 0x1bf   :  { %8966 = vmatpush2.bf16.msra.mxu0 %v13646_v37  ;;  %v13675_v37 = vld [vmem:[%s20776_s1 + $0x1ca4] ss:$16 sps:$4 sm:$0xff]  }
 0x1c0   :  { %9047 = vmatpush2.bf16.msra.mxu1 %v13649_v50  ;;  %9097 = vmatprep.subr.bf16.mxu0 %v13660_v3 }
 0x1c1   :  { %9178 = vmatprep.subr.bf16.mxu1 %v13663_v29 }
 0x1c2   :  { %v8483_v31 = vpop.f32.mrf.mxu0  ;;  %8968 = vmatmul.mubr.bf16.vlgmr.msra.gmra.mxu0 %v13652_v20  ;;  %v13678_v20 = vld [vmem:[%s20776_s1 + $0x1ea4] ss:$16 sps:$4 sm:$0xff]  }
 0x1c3   :  { %v8564_v22 = vpop.f32.mrf.mxu1  ;;  %9049 = vmatmul.mubr.bf16.vlgmr.msra.gmra.mxu1 %v13655_v0  ;;  %v8484_v36 = vadd.f32 %v8483_v31, %v16657_v18  ;;  %9098 = vmatpush1.bf16.msra.mxu0 %v13658_v30  ;;  %v13670_v0 = vld [vmem:[%s20777_s0 + $0x180] ss:$144 sps:$4 sm:$0xff]  }
 0x1c4   :  { %9179 = vmatpush1.bf16.msra.mxu1 %v13661_v60  ;;  %v8485_v50 = vpop.f32.mrf.mxu0  ;;  %9099 = vmatprep.subr.bf16.mxu0 %v13666_v2  ;;  %v13673_v2 = vld [vmem:[%s20776_s1 + $0x1ca0] ss:$16 sps:$4 sm:$0xff]  }
 0x1c5   :  { %v8566_v3 = vpop.f32.mrf.mxu1  ;;  %9180 = vmatprep.subr.bf16.mxu1 %v13669_v7  ;;  %v16973_v29 = vadd.f32 %v8564_v22, %v8484_v36  ;;  %v8486_v18 = vadd.f32 %v8485_v50, %v16669_v14  ;;  %8977 = vmatprep.mubr.bf16.mxu0 %v13672_v25  ;;  %v13679_v7 = vld [vmem:[%s20777_s0 + $0x188] ss:$144 sps:$4 sm:$0xff]   ;;  %v13676_v25 = vld [vmem:[%s20776_s1 + $0x1ea0] ss:$16 sps:$4 sm:$0xff]   ;;  %v13684_v36 = vld [vmem:[%s20776_s1 + $0x1c84] ss:$16 sps:$4 sm:$0xff]  }
 0x1c6   :  { %9058 = vmatprep.mubr.bf16.mxu1 %v13681_v9  ;;  %v8487_v30 = vpop.f32.mrf.mxu0  ;;  %v13699_v50 = vld [vmem:[%s20777_s0 + $0x2ac] ss:$144 sps:$4 sm:$0xff]  }
 0x1c7   :  { %v8568_v60 = vpop.f32.mrf.mxu1  ;;  %v16985_v31 = vadd.f32 %v8566_v3, %v8486_v18  ;;  %v8488_v14 = vadd.f32 %v8487_v30, %v16685_v6  ;;  %9100 = vmatpush1.bf16.msra.mxu0 %v13664_v32  ;;  %v13687_v6 = vld [vmem:[%s20776_s1 + $0x1e84] ss:$16 sps:$4 sm:$0xff]   ;;  %v13685_v30 = vld [vmem:[%s20776_s1 + $0x1e80] ss:$16 sps:$4 sm:$0xff]  }
 0x1c8   :  { %9181 = vmatpush1.bf16.msra.mxu1 %v13667_v26  ;;  %v16991_v9 = vpop.f32.mrf.mxu0  ;;  %9101 = vmatprep.subr.bf16.mxu0 %v13675_v37  ;;  %v13690_v26 = vld [vmem:[%s20777_s0 + $0x2a4] ss:$144 sps:$4 sm:$0xff]  }
 0x1c9   :  { %20816 = vst [vmem:[#allocation27_spill] sm:$0xff] %v16991_v9  ;;  %v16993_v22 = vpop.f32.mrf.mxu1  ;;  %9182 = vmatprep.subr.bf16.mxu1 %v13678_v20  ;;  %v17001_v32 = vadd.f32 %v8568_v60, %v8488_v14  ;;  %v13682_v20 = vld [vmem:[%s20776_s1 + $0x1c80] ss:$16 sps:$4 sm:$0xff]  }
 0x1ca   :  { %20817 = vst [vmem:[#allocation28_spill] sm:$0xff] %v16993_v22  ;;  %v8493_v37 = vpop.f32.mrf.mxu0  ;;  %8978 = vmatmul.mubr.bf16.gmra.mxu0 %v13670_v0  ;;  %v13693_v0 = vld [vmem:[%s20776_s1 + $0x1c64] ss:$16 sps:$4 sm:$0xff]   ;;  %v13697_v22 = vld [vmem:[%s20777_s0 + $0x2a8] ss:$144 sps:$4 sm:$0xff]  }
 0x1cb   :  { %v8574_v3 = vpop.f32.mrf.mxu1  ;;  %9059 = vmatmul.mubr.bf16.gmra.mxu1 %v13679_v7  ;;  %v8494_v18 = vadd.f32 %v8493_v37, %v16707_v45  ;;  %9102 = vmatpush1.bf16.msra.mxu0 %v13673_v2  ;;  %v13696_v7 = vld [vmem:[%s20776_s1 + $0x1e64] ss:$16 sps:$4 sm:$0xff]  }
 0x1cc   :  { %9183 = vmatpush1.bf16.msra.mxu1 %v13676_v25  ;;  %v8495_v60 = vpop.f32.mrf.mxu0  ;;  %9103 = vmatprep.subr.bf16.mxu0 %v13684_v36  ;;  %v13688_v25 = vld [vmem:[%s20777_s0 + $0x2a0] ss:$144 sps:$4 sm:$0xff]  }
 0x1cd   :  { %v8576_v14 = vpop.f32.mrf.mxu1  ;;  %9184 = vmatprep.subr.bf16.mxu1 %v13687_v6  ;;  %v8496_v45 = vadd.f32 %v8495_v60, %v16719_v44  ;;  %v17023_v2 = vadd.f32 %v8574_v3, %v8494_v18  ;;  %8987 = vmatprep.mubr.bf16.mxu0 %v13690_v26  ;;  %v13691_v36 = vld [vmem:[%s20776_s1 + $0x1c60] ss:$16 sps:$4 sm:$0xff]  }
 0x1ce   :  { %9068 = vmatprep.mubr.bf16.mxu1 %v13699_v50  ;;  %v8497_v6 = vpop.f32.mrf.mxu0  ;;  %v13694_v26 = vld [vmem:[%s20776_s1 + $0x1e60] ss:$16 sps:$4 sm:$0xff]   ;;  %v13702_v50 = vld [vmem:[%s20776_s1 + $0x1c44] ss:$16 sps:$4 sm:$0xff]  }
 0x1cf   :  { %v8578_v37 = vpop.f32.mrf.mxu1  ;;  %v8498_v44 = vadd.f32 %v8497_v6, %v16737_v27  ;;  %v17035_v3 = vadd.f32 %v8576_v14, %v8496_v45  ;;  %9104 = vmatpush1.bf16.msra.mxu0 %v13682_v20  ;;  %v13705_v27 = vld [vmem:[%s20776_s1 + $0x1e44] ss:$16 sps:$4 sm:$0xff]   ;;  %v13717_v14 = vld [vmem:[%s20777_s0 + $0x3cc] ss:$144 sps:$4 sm:$0xff]   ;;  %v13700_v45 = vld [vmem:[%s20776_s1 + $0x1c40] ss:$16 sps:$4 sm:$0xff]  }
 0x1d0   :  { %9185 = vmatpush1.bf16.msra.mxu1 %v13685_v30  ;;  %v17040_v18 = vpop.f32.mrf.mxu0  ;;  %9105 = vmatprep.subr.bf16.mxu0 %v13693_v0  ;;  %v13708_v30 = vld [vmem:[%s20777_s0 + $0x3c4] ss:$144 sps:$4 sm:$0xff]  }
 0x1d1   :  { %20818 = vst [vmem:[#allocation29_spill] sm:$0xff] %v17040_v18  ;;  %v17042_v60 = vpop.f32.mrf.mxu1  ;;  %9186 = vmatprep.subr.bf16.mxu1 %v13696_v7  ;;  %v17050_v20 = vadd.f32 %v8578_v37, %v8498_v44  ;;  %v13703_v37 = vld [vmem:[%s20776_s1 + $0x1e40] ss:$16 sps:$4 sm:$0xff]  }
 0x1d2   :  { %20819 = vst [vmem:[#allocation30_spill] sm:$0xff] %v17042_v60  ;;  %v8503_v0 = vpop.f32.mrf.mxu0  ;;  %8988 = vmatmul.mubr.bf16.gmra.mxu0 %v13688_v25  ;;  %v13711_v25 = vld [vmem:[%s20776_s1 + $0x1c24] ss:$16 sps:$4 sm:$0xff]  }
 0x1d3   :  { %v8584_v7 = vpop.f32.mrf.mxu1  ;;  %9069 = vmatmul.mubr.bf16.gmra.mxu1 %v13697_v22  ;;  %v8504_v6 = vadd.f32 %v8503_v0, %v16759_v28  ;;  %9106 = vmatpush1.bf16.msra.mxu0 %v13691_v36  ;;  %v13706_v22 = vld [vmem:[%s20777_s0 + $0x3c0] ss:$144 sps:$4 sm:$0xff]   ;;  %v13714_v28 = vld [vmem:[%s20776_s1 + $0x1e24] ss:$16 sps:$4 sm:$0xff]  }
 0x1d4   :  { %9187 = vmatpush1.bf16.msra.mxu1 %v13694_v26  ;;  %v8505_v44 = vpop.f32.mrf.mxu0  ;;  %9107 = vmatprep.subr.bf16.mxu0 %v13702_v50  ;;  %v13709_v50 = vld [vmem:[%s20776_s1 + $0x1c20] ss:$16 sps:$4 sm:$0xff]  }
 0x1d5   :  { %v8586_v60 = vpop.f32.mrf.mxu1  ;;  %9188 = vmatprep.subr.bf16.mxu1 %v13705_v27  ;;  %v8506_v36 = vadd.f32 %v8505_v44, %v16774_v61  ;;  %v17075_v26 = vadd.f32 %v8584_v7, %v8504_v6  ;;  %8997 = vmatprep.mubr.bf16.mxu0 %v13708_v30  ;;  %v13715_v27 = vld [vmem:[%s20777_s0 + $0x3c8] ss:$144 sps:$4 sm:$0xff]   ;;  %v177_v0 = vld [vmem:[%s20777_s0 + $0x4e0] sm:$0xff] }
 0x1d6   :  { %9078 = vmatprep.mubr.bf16.mxu1 %v13717_v14  ;;  %v8507_v18 = vpop.f32.mrf.mxu0  ;;  %v178_v61 = vld [vmem:[%s20777_s0 + $0x4e8] sm:$0xff]  ;;  %v13712_v14 = vld [vmem:[%s20776_s1 + $0x1e20] ss:$16 sps:$4 sm:$0xff]  }
 0x1d7   :  { %v8588_v9 = vpop.f32.mrf.mxu1  ;;  %v8508_v30 = vadd.f32 %v8507_v18, %v16789_v1  ;;  %v17090_v7 = vadd.f32 %v8586_v60, %v8506_v36  ;;  %9108 = vmatpush1.bf16.msra.mxu0 %v13700_v45  ;;  %v13723_v1 = vld [vmem:[%s20776_s1 + $0x1e04] ss:$16 sps:$4 sm:$0xff]   ;;  %v17107_v60 = vcombine.high %v177_v0, %v177_v0  ;;  %v17109_v45 = vcombine.high %v178_v61, %v178_v61 }
 0x1d8   :  { %9189 = vmatpush1.bf16.msra.mxu1 %v13703_v37  ;;  %v17095_v6 = vpop.f32.mrf.mxu0  ;;  %9109 = vmatprep.subr.bf16.mxu0 %v13711_v25  ;;  %v13718_v25 = vld [vmem:[%s20776_s1 + $0x1c00] ss:$16 sps:$4 sm:$0xff]  }
 0x1d9   :  { %20820 = vst [vmem:[#allocation31_spill] sm:$0xff] %v17095_v6  ;;  %v17097_v44 = vpop.f32.mrf.mxu1  ;;  %9190 = vmatprep.subr.bf16.mxu1 %v13714_v28  ;;  %v17105_v18 = vadd.f32 %v8588_v9, %v8508_v30  ;;  %v13721_v9 = vld [vmem:[%s20776_s1 + $0x1e00] ss:$16 sps:$4 sm:$0xff]   ;;  %v17134_v6 = vcombine.low %v178_v61, %v178_v61  ;;  %v13736_v61 = vld [vmem:[%s20776_s1 + $0x1dc4] ss:$16 sps:$4 sm:$0xff]  }
 0x1da   :  { %20821 = vst [vmem:[#allocation32_spill] sm:$0xff] %v17097_v44  ;;  %v8513_v37 = vpop.f32.mrf.mxu0  ;;  %8998 = vmatmul.mubr.bf16.gmra.mxu0 %v13706_v22  ;;  %v13728_v22 = vld [vmem:[%s20776_s1 + $0x1de4] ss:$16 sps:$4 sm:$0xff]  }
 0x1db   :  { %v8594_v36 = vpop.f32.mrf.mxu1  ;;  %9079 = vmatmul.mubr.bf16.gmra.mxu1 %v13715_v27  ;;  %v8514_v28 = vadd.f32 %v8513_v37, %v16809_v58  ;;  %9110 = vmatpush1.bf16.msra.mxu0 %v13709_v50  ;;  %v13731_v27 = vld [vmem:[%s20776_s1 + $0x1fe4] ss:$16 sps:$4 sm:$0xff]  }
 0x1dc   :  { %9191 = vmatpush1.bf16.msra.mxu1 %v13712_v14  ;;  %v8515_v30 = vpop.f32.mrf.mxu0  ;;  %9111 = vmatprep.subr.bf16.mxu0 %v13720_v33  ;;  %v17129_v33 = vcombine.low %v177_v0, %v177_v0 }
 0x1dd   :  { %v8596_v44 = vpop.f32.mrf.mxu1  ;;  %9192 = vmatprep.subr.bf16.mxu1 %v13723_v1  ;;  %v8516_v58 = vadd.f32 %v8515_v30, %v16824_v63  ;;  %v17125_v50 = vadd.f32 %v8594_v36, %v8514_v28  ;;  %9007 = vmatprep.mubr.bf16.mxu0 %v17107_v60  ;;  %v13726_v1 = vld [vmem:[%s20776_s1 + $0x1de0] ss:$16 sps:$4 sm:$0xff]   ;;  %v13781_v28 = vld [vmem:[%s20777_s0 + $0x7c] ss:$144 sps:$4 sm:$0xff]  }
 0x1de   :  { %9088 = vmatprep.mubr.bf16.mxu1 %v17109_v45  ;;  %v8517_v14 = vpop.f32.mrf.mxu0  ;;  %v13729_v63 = vld [vmem:[%s20776_s1 + $0x1fe0] ss:$16 sps:$4 sm:$0xff]  }
 0x1df   :  { %v8598_v37 = vpop.f32.mrf.mxu1  ;;  %v8518_v42 = vadd.f32 %v8517_v14, %v16839_v8  ;;  %v17137_v57 = vadd.f32 %v8596_v44, %v8516_v58  ;;  %9112 = vmatpush1.bf16.msra.mxu0 %v13718_v25  ;;  %v13739_v8 = vld [vmem:[%s20776_s1 + $0x1fc4] ss:$16 sps:$4 sm:$0xff]  }
 0x1e0   :  { %9193 = vmatpush1.bf16.msra.mxu1 %v13721_v9  ;;  %v17142_v36 = vpop.f32.mrf.mxu0  ;;  %9113 = vmatprep.subr.bf16.mxu0 %v13728_v22  ;;  %v13778_v25 = vld [vmem:[%s20777_s0 + $0x74] ss:$144 sps:$4 sm:$0xff]   ;;  %v13734_v22 = vld [vmem:[%s20776_s1 + $0x1dc0] ss:$16 sps:$4 sm:$0xff]  }
 0x1e1   :  { %20822 = vst [vmem:[#allocation33_spill] sm:$0xff] %v17142_v36  ;;  %v17144_v0 = vpop.f32.mrf.mxu1  ;;  %9194 = vmatprep.subr.bf16.mxu1 %v13731_v27  ;;  %v17152_v44 = vadd.f32 %v8598_v37, %v8518_v42  ;;  %v13737_v27 = vld [vmem:[%s20776_s1 + $0x1fc0] ss:$16 sps:$4 sm:$0xff]   ;;  %v13742_v37 = vld [vmem:[%s20776_s1 + $0x1da4] ss:$16 sps:$4 sm:$0xff]  }
 0x1e2   :  { %20823 = vst [vmem:[#allocation34_spill] sm:$0xff] %v17144_v0  ;;  %v8523_v9 = vpop.f32.mrf.mxu0  ;;  %9008 = vmatmul.mubr.bf16.gmra.mxu0 %v17129_v33  ;;  %v13745_v0 = vld [vmem:[%s20776_s1 + $0x1fa4] ss:$16 sps:$4 sm:$0xff]   ;;  %v13743_v36 = vld [vmem:[%s20776_s1 + $0x1fa0] ss:$16 sps:$4 sm:$0xff]  }
 0x1e3   :  { %v8604_v30 = vpop.f32.mrf.mxu1  ;;  %9089 = vmatmul.mubr.bf16.gmra.mxu1 %v17134_v6  ;;  %v8524_v42 = vadd.f32 %v8523_v9, %v16860_v59  ;;  %9114 = vmatpush2.bf16.msra.mxu0 %v13726_v1 }
 0x1e4   :  { %9195 = vmatpush2.bf16.msra.mxu1 %v13729_v63  ;;  %v8525_v58 = vpop.f32.mrf.mxu0  ;;  %9115 = vmatprep.subr.bf16.mxu0 %v13736_v61  ;;  %v13740_v63 = vld [vmem:[%s20776_s1 + $0x1da0] ss:$16 sps:$4 sm:$0xff]  }
 0x1e5   :  { %v8606_v14 = vpop.f32.mrf.mxu1  ;;  %9196 = vmatprep.subr.bf16.mxu1 %v13739_v8  ;;  %v8526_v59 = vadd.f32 %v8525_v58, %v16865_v53  ;;  %v17176_v1 = vadd.f32 %v8604_v30, %v8524_v42  ;;  %9129 = vmatprep.mubr.bf16.mxu0 %v13778_v25  ;;  %v13748_v53 = vld [vmem:[%s20776_s1 + $0x1d84] ss:$16 sps:$4 sm:$0xff]   ;;  %v13752_v58 = vld [vmem:[%s20776_s1 + $0x1d60] ss:$16 sps:$4 sm:$0xff]  }
 0x1e6   :  { %9210 = vmatprep.mubr.bf16.mxu1 %v13781_v28  ;;  %v8527_v61 = vpop.f32.mrf.mxu0  ;;  %v13751_v25 = vld [vmem:[%s20776_s1 + $0x1f84] ss:$16 sps:$4 sm:$0xff]  }
 0x1e7   :  { %v8608_v8 = vpop.f32.mrf.mxu1  ;;  %v17181_v9 = vadd.f32 %v8606_v14, %v8526_v59  ;;  %9116 = vmatpush2.bf16.msra.mxu0 %v13734_v22  ;;  %v13746_v22 = vld [vmem:[%s20776_s1 + $0x1d80] ss:$16 sps:$4 sm:$0xff]   ;;  %v13754_v42 = vld [vmem:[%s20776_s1 + $0x1d64] ss:$16 sps:$4 sm:$0xff]  }
 0x1e8   :  { %9197 = vmatpush2.bf16.msra.mxu1 %v13737_v27  ;;  %9117 = vmatprep.subr.bf16.mxu0 %v13742_v37  ;;  %v8528_v28 = vpop.f32.mrf.mxu0  ;;  %v13757_v27 = vld [vmem:[%s20776_s1 + $0x1f64] ss:$16 sps:$4 sm:$0xff]   ;;  %v13758_v59 = vld [vmem:[%s20776_s1 + $0x1d40] ss:$16 sps:$4 sm:$0xff]  }
 0x1e9   :  { %9198 = vmatprep.subr.bf16.mxu1 %v13745_v0  ;;  %v8609_v30 = vpop.f32.mrf.mxu1  ;;  %v13749_v0 = vld [vmem:[%s20776_s1 + $0x1f80] ss:$16 sps:$4 sm:$0xff]   ;;  %v13760_v14 = vld [vmem:[%s20776_s1 + $0x1d44] ss:$16 sps:$4 sm:$0xff]  }
 0x1ea   :  { %v13763_v37 = vld [vmem:[%s20776_s1 + $0x1f44] ss:$16 sps:$4 sm:$0xff]  }
 0x1eb   :  { %9118 = vmatpush2.bf16.msra.mxu0 %v13740_v63  ;;  %v13761_v63 = vld [vmem:[%s20776_s1 + $0x1f40] ss:$16 sps:$4 sm:$0xff]   ;;  %v13766_v61 = vld [vmem:[%s20776_s1 + $0x1d24] ss:$16 sps:$4 sm:$0xff]  }
 0x1ec   :  { %9199 = vmatpush2.bf16.msra.mxu1 %v13743_v36  ;;  %9119 = vmatprep.subr.bf16.mxu0 %v13748_v53  ;;  %v13755_v36 = vld [vmem:[%s20776_s1 + $0x1f60] ss:$16 sps:$4 sm:$0xff]   ;;  %v13769_v8 = vld [vmem:[%s20776_s1 + $0x1f24] ss:$16 sps:$4 sm:$0xff]  }
 0x1ed   :  { %9200 = vmatprep.subr.bf16.mxu1 %v13751_v25  ;;  %v13764_v53 = vld [vmem:[%s20776_s1 + $0x1d20] ss:$16 sps:$4 sm:$0xff]   ;;  %v13772_v28 = vld [vmem:[%s20776_s1 + $0x1d04] ss:$16 sps:$4 sm:$0xff]  }
 0x1ee   :  { %v13767_v25 = vld [vmem:[%s20776_s1 + $0x1f20] ss:$16 sps:$4 sm:$0xff]   ;;  %v13775_v30 = vld [vmem:[%s20776_s1 + $0x1f04] ss:$16 sps:$4 sm:$0xff]  }
 0x1ef   :  { %9120 = vmatpush2.bf16.msra.mxu0 %v13746_v22  ;;  %v13770_v22 = vld [vmem:[%s20776_s1 + $0x1d00] ss:$16 sps:$4 sm:$0xff]  }
 0x1f0   :  { %9201 = vmatpush2.bf16.msra.mxu1 %v13749_v0  ;;  %9121 = vmatprep.subr.bf16.mxu0 %v13754_v42  ;;  %v13773_v0 = vld [vmem:[%s20776_s1 + $0x1f00] ss:$16 sps:$4 sm:$0xff]  }
 0x1f1   :  { %9202 = vmatprep.subr.bf16.mxu1 %v13757_v27  ;;  %v13776_v42 = vld [vmem:[%s20777_s0 + $0x70] ss:$144 sps:$4 sm:$0xff]   ;;  %v13784_v27 = vld [vmem:[%s20776_s1 + $0x20e4] ss:$16 sps:$4 sm:$0xff]  }
 0x1f3   :  { %9122 = vmatpush2.bf16.msra.mxu0 %v13752_v58  ;;  %v13787_v58 = vld [vmem:[%s20776_s1 + $0x22e4] ss:$16 sps:$4 sm:$0xff]  }
 0x1f4   :  { %9203 = vmatpush2.bf16.msra.mxu1 %v13755_v36  ;;  %9123 = vmatprep.subr.bf16.mxu0 %v13760_v14  ;;  %v13779_v36 = vld [vmem:[%s20777_s0 + $0x78] ss:$144 sps:$4 sm:$0xff]   ;;  %v13782_v14 = vld [vmem:[%s20776_s1 + $0x20e0] ss:$16 sps:$4 sm:$0xff]  }
 0x1f5   :  { %9204 = vmatprep.subr.bf16.mxu1 %v13763_v37  ;;  %v13785_v37 = vld [vmem:[%s20776_s1 + $0x22e0] ss:$16 sps:$4 sm:$0xff]  }
 0x1f7   :  { %9124 = vmatpush2.bf16.msra.mxu0 %v13758_v59  ;;  %v13790_v59 = vld [vmem:[%s20776_s1 + $0x20c4] ss:$16 sps:$4 sm:$0xff]  }
 0x1f8   :  { %9205 = vmatpush2.bf16.msra.mxu1 %v13761_v63  ;;  %9125 = vmatprep.subr.bf16.mxu0 %v13766_v61  ;;  %v13793_v63 = vld [vmem:[%s20776_s1 + $0x22c4] ss:$16 sps:$4 sm:$0xff]  }
 0x1f9   :  { %9206 = vmatprep.subr.bf16.mxu1 %v13769_v8  ;;  %v13796_v61 = vld [vmem:[%s20777_s0 + $0x194] ss:$144 sps:$4 sm:$0xff]   ;;  %v13805_v8 = vld [vmem:[%s20777_s0 + $0x19c] ss:$144 sps:$4 sm:$0xff]  }
 0x1fb   :  { %9126 = vmatpush2.bf16.msra.mxu0 %v13764_v53 }
 0x1fc   :  { %9207 = vmatpush2.bf16.msra.mxu1 %v13767_v25  ;;  %9127 = vmatprep.subr.bf16.mxu0 %v13772_v28  ;;  %v13788_v28 = vld [vmem:[%s20776_s1 + $0x20c0] ss:$16 sps:$4 sm:$0xff]  }
 0x1fd   :  { %9208 = vmatprep.subr.bf16.mxu1 %v13775_v30 }
 0x1ff   :  { %9128 = vmatpush2.bf16.msra.mxu0 %v13770_v22  ;;  %v13791_v22 = vld [vmem:[%s20776_s1 + $0x22c0] ss:$16 sps:$4 sm:$0xff]  }
 0x200   :  { %9209 = vmatpush2.bf16.msra.mxu1 %v13773_v0  ;;  %9259 = vmatprep.subr.bf16.mxu0 %v13784_v27  ;;  %v13799_v0 = vld [vmem:[%s20776_s1 + $0x20a4] ss:$16 sps:$4 sm:$0xff]  }
 0x201   :  { %9340 = vmatprep.subr.bf16.mxu1 %v13787_v58 }
 0x202   :  { %v8645_v53 = vpop.f32.mrf.mxu0  ;;  %9130 = vmatmul.mubr.bf16.vlgmr.msra.gmra.mxu0 %v13776_v42  ;;  %v13794_v42 = vld [vmem:[%s20777_s0 + $0x190] ss:$144 sps:$4 sm:$0xff]  }
 0x203   :  { %v8726_v25 = vpop.f32.mrf.mxu1  ;;  %9211 = vmatmul.mubr.bf16.vlgmr.msra.gmra.mxu1 %v13779_v36  ;;  %v8646_v30 = vadd.f32 %v8645_v53, %v16973_v29  ;;  %9260 = vmatpush1.bf16.msra.mxu0 %v13782_v14  ;;  %v13802_v29 = vld [vmem:[%s20776_s1 + $0x22a4] ss:$16 sps:$4 sm:$0xff]   ;;  %v13800_v53 = vld [vmem:[%s20776_s1 + $0x22a0] ss:$16 sps:$4 sm:$0xff]  }
 0x204   :  { %9341 = vmatpush1.bf16.msra.mxu1 %v13785_v37  ;;  %v8647_v27 = vpop.f32.mrf.mxu0  ;;  %9261 = vmatprep.subr.bf16.mxu0 %v13790_v59  ;;  %v13797_v37 = vld [vmem:[%s20776_s1 + $0x20a0] ss:$16 sps:$4 sm:$0xff]  }
 0x205   :  { %v8728_v58 = vpop.f32.mrf.mxu1  ;;  %9342 = vmatprep.subr.bf16.mxu1 %v13793_v63  ;;  %v17292_v36 = vadd.f32 %v8726_v25, %v8646_v30  ;;  %v8648_v14 = vadd.f32 %v8647_v27, %v16985_v31  ;;  %9139 = vmatprep.mubr.bf16.mxu0 %v13796_v61  ;;  %v13808_v61 = vld [vmem:[%s20776_s1 + $0x2084] ss:$16 sps:$4 sm:$0xff]  }
 0x206   :  { %9220 = vmatprep.mubr.bf16.mxu1 %v13805_v8  ;;  %v8649_v59 = vpop.f32.mrf.mxu0  ;;  %v13811_v8 = vld [vmem:[%s20776_s1 + $0x2284] ss:$16 sps:$4 sm:$0xff]  }
 0x207   :  { %v8730_v63 = vpop.f32.mrf.mxu1  ;;  %v17304_v25 = vadd.f32 %v8728_v58, %v8648_v14  ;;  %v8650_v31 = vadd.f32 %v8649_v59, %v17001_v32  ;;  %9262 = vmatpush1.bf16.msra.mxu0 %v13788_v28  ;;  %v13814_v32 = vld [vmem:[%s20777_s0 + $0x2b4] ss:$144 sps:$4 sm:$0xff]   ;;  %v13806_v59 = vld [vmem:[%s20776_s1 + $0x2080] ss:$16 sps:$4 sm:$0xff]  }
 0x208   :  { %9343 = vmatpush1.bf16.msra.mxu1 %v13791_v22  ;;  %v17313_v30 = vpop.f32.mrf.mxu0  ;;  %9263 = vmatprep.subr.bf16.mxu0 %v13799_v0  ;;  %v13823_v22 = vld [vmem:[%s20777_s0 + $0x2bc] ss:$144 sps:$4 sm:$0xff]  }
 0x209   :  { %20824 = vst [vmem:[#allocation35_spill] sm:$0xff] %v17313_v30  ;;  %v17315_v27 = vpop.f32.mrf.mxu1  ;;  %9344 = vmatprep.subr.bf16.mxu1 %v13802_v29  ;;  %v17320_v28 = vadd.f32 %v8730_v63, %v8650_v31  ;;  %v13809_v29 = vld [vmem:[%s20776_s1 + $0x2280] ss:$16 sps:$4 sm:$0xff]   ;;  %v13817_v63 = vld [vmem:[%s20776_s1 + $0x2064] ss:$16 sps:$4 sm:$0xff]  }
 0x20a   :  { %20825 = vst [vmem:[#allocation36_spill] sm:$0xff] %v17315_v27  ;;  %v8655_v58 = vpop.f32.mrf.mxu0  ;;  %9140 = vmatmul.mubr.bf16.gmra.mxu0 %v13794_v42  ;;  %v13818_v27 = vld [vmem:[%s20776_s1 + $0x2260] ss:$16 sps:$4 sm:$0xff]   ;;  %v13821_v30 = vld [vmem:[%s20777_s0 + $0x2b8] ss:$144 sps:$4 sm:$0xff]  }
 0x20b   :  { %v8736_v14 = vpop.f32.mrf.mxu1  ;;  %9221 = vmatmul.mubr.bf16.gmra.mxu1 %v13803_v39  ;;  %v8656_v0 = vadd.f32 %v8655_v58, %v17023_v2  ;;  %9264 = vmatpush1.bf16.msra.mxu0 %v13797_v37  ;;  %v13812_v39 = vld [vmem:[%s20777_s0 + $0x2b0] ss:$144 sps:$4 sm:$0xff]   ;;  %v13820_v2 = vld [vmem:[%s20776_s1 + $0x2264] ss:$16 sps:$4 sm:$0xff]  }
 0x20c   :  { %9345 = vmatpush1.bf16.msra.mxu1 %v13800_v53  ;;  %v8657_v31 = vpop.f32.mrf.mxu0  ;;  %9265 = vmatprep.subr.bf16.mxu0 %v13808_v61  ;;  %v13815_v58 = vld [vmem:[%s20776_s1 + $0x2060] ss:$16 sps:$4 sm:$0xff]  }
 0x20d   :  { %v8738_v42 = vpop.f32.mrf.mxu1  ;;  %9346 = vmatprep.subr.bf16.mxu1 %v13811_v8  ;;  %v8658_v37 = vadd.f32 %v8657_v31, %v17035_v3  ;;  %v17342_v53 = vadd.f32 %v8736_v14, %v8656_v0  ;;  %9149 = vmatprep.mubr.bf16.mxu0 %v13814_v32  ;;  %v13826_v32 = vld [vmem:[%s20776_s1 + $0x2044] ss:$16 sps:$4 sm:$0xff]  }
 0x20e   :  { %9230 = vmatprep.mubr.bf16.mxu1 %v13823_v22  ;;  %v8659_v61 = vpop.f32.mrf.mxu0  ;;  %v13829_v22 = vld [vmem:[%s20776_s1 + $0x2244] ss:$16 sps:$4 sm:$0xff]  }
 0x20f   :  { %v8740_v8 = vpop.f32.mrf.mxu1  ;;  %v8660_v3 = vadd.f32 %v8659_v61, %v17050_v20  ;;  %v17354_v14 = vadd.f32 %v8738_v42, %v8658_v37  ;;  %9266 = vmatpush1.bf16.msra.mxu0 %v13806_v59  ;;  %v13832_v20 = vld [vmem:[%s20777_s0 + $0x3d4] ss:$144 sps:$4 sm:$0xff]   ;;  %v13824_v61 = vld [vmem:[%s20776_s1 + $0x2040] ss:$16 sps:$4 sm:$0xff]  }
 0x210   :  { %9347 = vmatpush1.bf16.msra.mxu1 %v13809_v29  ;;  %v17362_v0 = vpop.f32.mrf.mxu0  ;;  %9267 = vmatprep.subr.bf16.mxu0 %v13817_v63  ;;  %v13841_v29 = vld [vmem:[%s20777_s0 + $0x3dc] ss:$144 sps:$4 sm:$0xff]  }
 0x211   :  { %20826 = vst [vmem:[#allocation37_spill] sm:$0xff] %v17362_v0  ;;  %v17364_v31 = vpop.f32.mrf.mxu1  ;;  %9348 = vmatprep.subr.bf16.mxu1 %v13820_v2  ;;  %v17369_v59 = vadd.f32 %v8740_v8, %v8660_v3  ;;  %v13827_v2 = vld [vmem:[%s20776_s1 + $0x2240] ss:$16 sps:$4 sm:$0xff]   ;;  %v13835_v8 = vld [vmem:[%s20776_s1 + $0x2024] ss:$16 sps:$4 sm:$0xff]  }
 0x212   :  { %20827 = vst [vmem:[#allocation38_spill] sm:$0xff] %v17364_v31  ;;  %v8665_v42 = vpop.f32.mrf.mxu0  ;;  %9150 = vmatmul.mubr.bf16.gmra.mxu0 %v13812_v39  ;;  %v179_v0 = vld [vmem:[%s20777_s0 + $0x4f0] sm:$0xff] }
 0x213   :  { %v8746_v37 = vpop.f32.mrf.mxu1  ;;  %9231 = vmatmul.mubr.bf16.gmra.mxu1 %v13821_v30  ;;  %v8666_v63 = vadd.f32 %v8665_v42, %v17075_v26  ;;  %9268 = vmatpush1.bf16.msra.mxu0 %v13815_v58  ;;  %v13830_v30 = vld [vmem:[%s20777_s0 + $0x3d0] ss:$144 sps:$4 sm:$0xff]   ;;  %v13838_v26 = vld [vmem:[%s20776_s1 + $0x2224] ss:$16 sps:$4 sm:$0xff]  }
 0x214   :  { %9349 = vmatpush1.bf16.msra.mxu1 %v13818_v27  ;;  %v8667_v3 = vpop.f32.mrf.mxu0  ;;  %9269 = vmatprep.subr.bf16.mxu0 %v13826_v32  ;;  %v13833_v42 = vld [vmem:[%s20776_s1 + $0x2020] ss:$16 sps:$4 sm:$0xff]   ;;  %v13839_v32 = vld [vmem:[%s20777_s0 + $0x3d8] ss:$144 sps:$4 sm:$0xff]  }
 0x215   :  { %v8748_v39 = vpop.f32.mrf.mxu1  ;;  %9350 = vmatprep.subr.bf16.mxu1 %v13829_v22  ;;  %v8668_v27 = vadd.f32 %v8667_v3, %v17090_v7  ;;  %v17391_v58 = vadd.f32 %v8746_v37, %v8666_v63  ;;  %9159 = vmatprep.mubr.bf16.mxu0 %v13832_v20  ;;  %v180_v7 = vld [vmem:[%s20777_s0 + $0x4f8] sm:$0xff]  ;;  %v13844_v63 = vld [vmem:[%s20776_s1 + $0x2004] ss:$16 sps:$4 sm:$0xff]  }
 0x216   :  { %9240 = vmatprep.mubr.bf16.mxu1 %v13841_v29  ;;  %v8669_v22 = vpop.f32.mrf.mxu0  ;;  %v13836_v29 = vld [vmem:[%s20776_s1 + $0x2220] ss:$16 sps:$4 sm:$0xff]   ;;  %v17453_v5 = vcombine.low %v180_v7, %v180_v7 }
 0x217   :  { %v8750_v31 = vpop.f32.mrf.mxu1  ;;  %v8670_v20 = vadd.f32 %v8669_v22, %v17105_v18  ;;  %v17406_v37 = vadd.f32 %v8748_v39, %v8668_v27  ;;  %9270 = vmatpush1.bf16.msra.mxu0 %v13824_v61  ;;  %v13847_v18 = vld [vmem:[%s20776_s1 + $0x2204] ss:$16 sps:$4 sm:$0xff]   ;;  %v17425_v39 = vcombine.high %v180_v7, %v180_v7  ;;  %v13905_v7 = vld [vmem:[%s20777_s0 + $0x8c] ss:$144 sps:$4 sm:$0xff]  }
 0x218   :  { %9351 = vmatpush1.bf16.msra.mxu1 %v13827_v2  ;;  %v17414_v3 = vpop.f32.mrf.mxu0  ;;  %9271 = vmatprep.subr.bf16.mxu0 %v13835_v8  ;;  %v17423_v2 = vcombine.high %v179_v0, %v179_v0  ;;  %20832 = vst [vmem:[#allocation43_spill] sm:$0xff] %v17453_v5 }
 0x219   :  { %20828 = vst [vmem:[#allocation39_spill] sm:$0xff] %v17414_v3  ;;  %v17416_v56 = vpop.f32.mrf.mxu1  ;;  %9352 = vmatprep.subr.bf16.mxu1 %v13838_v26  ;;  %v17421_v61 = vadd.f32 %v8750_v31, %v8670_v20  ;;  %20830 = vst [vmem:[#allocation41_spill] sm:$0xff] %v17425_v39  ;;  %v13845_v31 = vld [vmem:[%s20776_s1 + $0x2200] ss:$16 sps:$4 sm:$0xff]   ;;  %v13852_v26 = vld [vmem:[%s20776_s1 + $0x21e4] ss:$16 sps:$4 sm:$0xff]   ;;  %v17445_v3 = vcombine.low %v179_v0, %v179_v0 }
 0x21a   :  { %20829 = vst [vmem:[#allocation40_spill] sm:$0xff] %v17416_v56  ;;  %v8675_v27 = vpop.f32.mrf.mxu0  ;;  %9160 = vmatmul.mubr.bf16.gmra.mxu0 %v13830_v30  ;;  %v13842_v56 = vld [vmem:[%s20776_s1 + $0x2000] ss:$16 sps:$4 sm:$0xff]   ;;  %v13860_v0 = vld [vmem:[%s20776_s1 + $0x21c4] ss:$16 sps:$4 sm:$0xff]  }
 0x21b   :  { %v8756_v22 = vpop.f32.mrf.mxu1  ;;  %9241 = vmatmul.mubr.bf16.gmra.mxu1 %v13839_v32  ;;  %v8676_v8 = vadd.f32 %v8675_v27, %v17125_v50  ;;  %9272 = vmatpush1.bf16.msra.mxu0 %v13833_v42  ;;  %v13855_v32 = vld [vmem:[%s20776_s1 + $0x23e4] ss:$16 sps:$4 sm:$0xff]   ;;  %20831 = vst [vmem:[#allocation42_spill] sm:$0xff] %v17445_v3 }
 0x21c   :  { %9353 = vmatpush1.bf16.msra.mxu1 %v13836_v29  ;;  %v8677_v20 = vpop.f32.mrf.mxu0  ;;  %9273 = vmatprep.subr.bf16.mxu0 %v13844_v63  ;;  %v13850_v63 = vld [vmem:[%s20776_s1 + $0x21e0] ss:$16 sps:$4 sm:$0xff]  }
 0x21d   :  { %v8758_v30 = vpop.f32.mrf.mxu1  ;;  %9354 = vmatprep.subr.bf16.mxu1 %v13847_v18  ;;  %v8678_v50 = vadd.f32 %v8677_v20, %v17137_v57  ;;  %v17441_v42 = vadd.f32 %v8756_v22, %v8676_v8  ;;  %9169 = vmatprep.mubr.bf16.mxu0 %v17423_v2  ;;  %v13853_v18 = vld [vmem:[%s20776_s1 + $0x23e0] ss:$16 sps:$4 sm:$0xff]   ;;  %v13863_v8 = vld [vmem:[%s20776_s1 + $0x23c4] ss:$16 sps:$4 sm:$0xff]  }
 0x21e   :  { %9250 = vmatprep.mubr.bf16.mxu1 %v17425_v39  ;;  %v8679_v29 = vpop.f32.mrf.mxu0 }
 0x21f   :  { %v8760_v27 = vpop.f32.mrf.mxu1  ;;  %v8680_v57 = vadd.f32 %v8679_v29, %v17152_v44  ;;  %v17456_v22 = vadd.f32 %v8758_v30, %v8678_v50  ;;  %9274 = vmatpush1.bf16.msra.mxu0 %v13842_v56  ;;  %v13902_v44 = vld [vmem:[%s20777_s0 + $0x84] ss:$144 sps:$4 sm:$0xff]   ;;  %v13861_v50 = vld [vmem:[%s20776_s1 + $0x23c0] ss:$16 sps:$4 sm:$0xff]  }
 0x220   :  { %9355 = vmatpush1.bf16.msra.mxu1 %v13845_v31  ;;  %v17464_v20 = vpop.f32.mrf.mxu0  ;;  %9275 = vmatprep.subr.bf16.mxu0 %v13852_v26  ;;  %v13858_v26 = vld [vmem:[%s20776_s1 + $0x21c0] ss:$16 sps:$4 sm:$0xff]   ;;  %v13866_v29 = vld [vmem:[%s20776_s1 + $0x21a4] ss:$16 sps:$4 sm:$0xff]  }
 0x221   :  { %20833 = vst [vmem:[#allocation44_spill] sm:$0xff] %v17464_v20  ;;  %v17466_v4 = vpop.f32.mrf.mxu1  ;;  %9356 = vmatprep.subr.bf16.mxu1 %v13855_v32  ;;  %v17471_v56 = vadd.f32 %v8760_v27, %v8680_v57 }
 0x222   :  { %20834 = vst [vmem:[#allocation45_spill] sm:$0xff] %v17466_v4  ;;  %v8685_v31 = vpop.f32.mrf.mxu0  ;;  %9170 = vmatmul.mubr.bf16.gmra.mxu0 %v17445_v3  ;;  %v13869_v4 = vld [vmem:[%s20776_s1 + $0x23a4] ss:$16 sps:$4 sm:$0xff]   ;;  %v13971_v3 = vld [vmem:[%s20776_s1 + $0x20c] ss:$16 sps:$4 sm:$0xff]  }
 0x223   :  { %v8766_v30 = vpop.f32.mrf.mxu1  ;;  %9251 = vmatmul.mubr.bf16.gmra.mxu1 %v17453_v5  ;;  %v8686_v32 = vadd.f32 %v8685_v31, %v17176_v1  ;;  %9276 = vmatpush2.bf16.msra.mxu0 %v13850_v63 }
 0x224   :  { %9357 = vmatpush2.bf16.msra.mxu1 %v13853_v18  ;;  %v8687_v27 = vpop.f32.mrf.mxu0  ;;  %9277 = vmatprep.subr.bf16.mxu0 %v13860_v0  ;;  %v13864_v18 = vld [vmem:[%s20776_s1 + $0x21a0] ss:$16 sps:$4 sm:$0xff]  }
 0x225   :  { %v8768_v57 = vpop.f32.mrf.mxu1  ;;  %9358 = vmatprep.subr.bf16.mxu1 %v13863_v8  ;;  %v8688_v1 = vadd.f32 %v8687_v27, %v17181_v9  ;;  %v17492_v63 = vadd.f32 %v8766_v30, %v8686_v32  ;;  %9291 = vmatprep.mubr.bf16.mxu0 %v13902_v44  ;;  %v13867_v0 = vld [vmem:[%s20776_s1 + $0x23a0] ss:$16 sps:$4 sm:$0xff]   ;;  %v13872_v9 = vld [vmem:[%s20776_s1 + $0x2184] ss:$16 sps:$4 sm:$0xff]  }
 0x226   :  { %9372 = vmatprep.mubr.bf16.mxu1 %v13905_v7  ;;  %v8689_v31 = vpop.f32.mrf.mxu0  ;;  %v13875_v8 = vld [vmem:[%s20776_s1 + $0x2384] ss:$16 sps:$4 sm:$0xff]   ;;  %v13870_v7 = vld [vmem:[%s20776_s1 + $0x2180] ss:$16 sps:$4 sm:$0xff]  }
 0x227   :  { %v8770_v20 = vpop.f32.mrf.mxu1  ;;  %v17497_v38 = vadd.f32 %v8768_v57, %v8688_v1  ;;  %9278 = vmatpush2.bf16.msra.mxu0 %v13858_v26  ;;  %v13873_v30 = vld [vmem:[%s20776_s1 + $0x2380] ss:$16 sps:$4 sm:$0xff]   ;;  %v13881_v26 = vld [vmem:[%s20776_s1 + $0x2364] ss:$16 sps:$4 sm:$0xff]  }
 0x228   :  { %9359 = vmatpush2.bf16.msra.mxu1 %v13861_v50  ;;  %9279 = vmatprep.subr.bf16.mxu0 %v13866_v29  ;;  %v8690_v44 = vpop.f32.mrf.mxu0  ;;  %v13876_v32 = vld [vmem:[%s20776_s1 + $0x2160] ss:$16 sps:$4 sm:$0xff]   ;;  %v13884_v29 = vld [vmem:[%s20776_s1 + $0x2144] ss:$16 sps:$4 sm:$0xff]  }
 0x229   :  { %9360 = vmatprep.subr.bf16.mxu1 %v13869_v4  ;;  %v8771_v20 = vpop.f32.mrf.mxu1  ;;  %v13878_v4 = vld [vmem:[%s20776_s1 + $0x2164] ss:$16 sps:$4 sm:$0xff]   ;;  %v13879_v50 = vld [vmem:[%s20776_s1 + $0x2360] ss:$16 sps:$4 sm:$0xff]  }
 0x22a   :  { %v13887_v27 = vld [vmem:[%s20776_s1 + $0x2344] ss:$16 sps:$4 sm:$0xff]   ;;  %v13882_v57 = vld [vmem:[%s20776_s1 + $0x2140] ss:$16 sps:$4 sm:$0xff]  }
 0x22b   :  { %9280 = vmatpush2.bf16.msra.mxu0 %v13864_v18  ;;  %v13885_v1 = vld [vmem:[%s20776_s1 + $0x2340] ss:$16 sps:$4 sm:$0xff]   ;;  %v13890_v18 = vld [vmem:[%s20776_s1 + $0x2124] ss:$16 sps:$4 sm:$0xff]  }
 0x22c   :  { %9361 = vmatpush2.bf16.msra.mxu1 %v13867_v0  ;;  %9281 = vmatprep.subr.bf16.mxu0 %v13872_v9  ;;  %v13893_v31 = vld [vmem:[%s20776_s1 + $0x2324] ss:$16 sps:$4 sm:$0xff]   ;;  %v13888_v0 = vld [vmem:[%s20776_s1 + $0x2120] ss:$16 sps:$4 sm:$0xff]  }
 0x22d   :  { %9362 = vmatprep.subr.bf16.mxu1 %v13875_v8  ;;  %v13891_v9 = vld [vmem:[%s20776_s1 + $0x2320] ss:$16 sps:$4 sm:$0xff]   ;;  %v13896_v8 = vld [vmem:[%s20776_s1 + $0x2104] ss:$16 sps:$4 sm:$0xff]  }
 0x22e   :  { %v13899_v44 = vld [vmem:[%s20776_s1 + $0x2304] ss:$16 sps:$4 sm:$0xff]   ;;  %v13894_v20 = vld [vmem:[%s20776_s1 + $0x2100] ss:$16 sps:$4 sm:$0xff]  }
 0x22f   :  { %9282 = vmatpush2.bf16.msra.mxu0 %v13870_v7  ;;  %v13897_v7 = vld [vmem:[%s20776_s1 + $0x2300] ss:$16 sps:$4 sm:$0xff]  }
 0x230   :  { %9363 = vmatpush2.bf16.msra.mxu1 %v13873_v30  ;;  %9283 = vmatprep.subr.bf16.mxu0 %v13878_v4  ;;  %v13900_v30 = vld [vmem:[%s20777_s0 + $0x80] ss:$144 sps:$4 sm:$0xff]   ;;  %v13903_v4 = vld [vmem:[%s20777_s0 + $0x88] ss:$144 sps:$4 sm:$0xff]  }
 0x231   :  { %9364 = vmatprep.subr.bf16.mxu1 %v13881_v26  ;;  %v13908_v26 = vld [vmem:[%s20776_s1 + $0xec] ss:$16 sps:$4 sm:$0xff]  }
 0x233   :  { %9284 = vmatpush2.bf16.msra.mxu0 %v13876_v32  ;;  %v13911_v32 = vld [vmem:[%s20776_s1 + $0x2ec] ss:$16 sps:$4 sm:$0xff]  }
 0x234   :  { %9365 = vmatpush2.bf16.msra.mxu1 %v13879_v50  ;;  %9285 = vmatprep.subr.bf16.mxu0 %v13884_v29  ;;  %v13906_v50 = vld [vmem:[%s20776_s1 + $0xe8] ss:$16 sps:$4 sm:$0xff]  }
 0x235   :  { %9366 = vmatprep.subr.bf16.mxu1 %v13887_v27  ;;  %v13909_v29 = vld [vmem:[%s20776_s1 + $0x2e8] ss:$16 sps:$4 sm:$0xff]   ;;  %v13914_v27 = vld [vmem:[%s20776_s1 + $0xcc] ss:$16 sps:$4 sm:$0xff]  }
 0x237   :  { %9286 = vmatpush2.bf16.msra.mxu0 %v13882_v57  ;;  %v13917_v57 = vld [vmem:[%s20776_s1 + $0x2cc] ss:$16 sps:$4 sm:$0xff]  }
 0x238   :  { %9367 = vmatpush2.bf16.msra.mxu1 %v13885_v1  ;;  %9287 = vmatprep.subr.bf16.mxu0 %v13890_v18  ;;  %v13912_v1 = vld [vmem:[%s20776_s1 + $0xc8] ss:$16 sps:$4 sm:$0xff]  }
 0x239   :  { %9368 = vmatprep.subr.bf16.mxu1 %v13893_v31  ;;  %v13915_v18 = vld [vmem:[%s20776_s1 + $0x2c8] ss:$16 sps:$4 sm:$0xff]   ;;  %v13920_v31 = vld [vmem:[%s20777_s0 + $0x1a4] ss:$144 sps:$4 sm:$0xff]  }
 0x23b   :  { %9288 = vmatpush2.bf16.msra.mxu0 %v13888_v0  ;;  %v13929_v0 = vld [vmem:[%s20777_s0 + $0x1ac] ss:$144 sps:$4 sm:$0xff]  }
 0x23c   :  { %9369 = vmatpush2.bf16.msra.mxu1 %v13891_v9  ;;  %9289 = vmatprep.subr.bf16.mxu0 %v13896_v8 }
 0x23d   :  { %9370 = vmatprep.subr.bf16.mxu1 %v13899_v44 }
 0x23f   :  { %9290 = vmatpush2.bf16.msra.mxu0 %v13894_v20 }
 0x240   :  { %9371 = vmatpush2.bf16.msra.mxu1 %v13897_v7  ;;  %9421 = vmatprep.subr.bf16.mxu0 %v13908_v26  ;;  %v13918_v26 = vld [vmem:[%s20777_s0 + $0x1a0] ss:$144 sps:$4 sm:$0xff]  }
 0x241   :  { %9502 = vmatprep.subr.bf16.mxu1 %v13911_v32  ;;  %v13923_v32 = vld [vmem:[%s20776_s1 + $0xac] ss:$16 sps:$4 sm:$0xff]  }
 0x242   :  { %v8807_v9 = vpop.f32.mrf.mxu0  ;;  %9292 = vmatmul.mubr.bf16.vlgmr.msra.gmra.mxu0 %v13900_v30  ;;  %v13926_v30 = vld [vmem:[%s20776_s1 + $0x2ac] ss:$16 sps:$4 sm:$0xff]  }
 0x243   :  { %v8888_v8 = vpop.f32.mrf.mxu1  ;;  %9373 = vmatmul.mubr.bf16.vlgmr.msra.gmra.mxu1 %v13903_v4  ;;  %v8808_v44 = vadd.f32 %v8807_v9, %v17292_v36  ;;  %9422 = vmatpush1.bf16.msra.mxu0 %v13906_v50  ;;  %v13921_v50 = vld [vmem:[%s20776_s1 + $0xa8] ss:$16 sps:$4 sm:$0xff]  }
 0x244   :  { %9503 = vmatpush1.bf16.msra.mxu1 %v13909_v29  ;;  %v8809_v20 = vpop.f32.mrf.mxu0  ;;  %9423 = vmatprep.subr.bf16.mxu0 %v13914_v27  ;;  %v13924_v29 = vld [vmem:[%s20776_s1 + $0x2a8] ss:$16 sps:$4 sm:$0xff]  }
 0x245   :  { %v8890_v7 = vpop.f32.mrf.mxu1  ;;  %9504 = vmatprep.subr.bf16.mxu1 %v13917_v57  ;;  %v17608_v4 = vadd.f32 %v8888_v8, %v8808_v44  ;;  %v8810_v36 = vadd.f32 %v8809_v20, %v17304_v25  ;;  %9301 = vmatprep.mubr.bf16.mxu0 %v13920_v31  ;;  %v13927_v27 = vld [vmem:[%s20777_s0 + $0x1a8] ss:$144 sps:$4 sm:$0xff]   ;;  %v13932_v20 = vld [vmem:[%s20776_s1 + $0x8c] ss:$16 sps:$4 sm:$0xff]  }
 0x246   :  { %9382 = vmatprep.mubr.bf16.mxu1 %v13929_v0  ;;  %v8811_v57 = vpop.f32.mrf.mxu0  ;;  %v13935_v0 = vld [vmem:[%s20776_s1 + $0x28c] ss:$16 sps:$4 sm:$0xff]  }
 0x247   :  { %v8892_v9 = vpop.f32.mrf.mxu1  ;;  %v17620_v8 = vadd.f32 %v8890_v7, %v8810_v36  ;;  %v8812_v25 = vadd.f32 %v8811_v57, %v17320_v28  ;;  %9424 = vmatpush1.bf16.msra.mxu0 %v13912_v1  ;;  %v13930_v28 = vld [vmem:[%s20776_s1 + $0x88] ss:$16 sps:$4 sm:$0xff]  }
 0x248   :  { %9505 = vmatpush1.bf16.msra.mxu1 %v13915_v18  ;;  %v17623_v31 = vpop.f32.mrf.mxu0  ;;  %9425 = vmatprep.subr.bf16.mxu0 %v13923_v32  ;;  %v13933_v1 = vld [vmem:[%s20776_s1 + $0x288] ss:$16 sps:$4 sm:$0xff]   ;;  %v13938_v18 = vld [vmem:[%s20777_s0 + $0x2c4] ss:$144 sps:$4 sm:$0xff]   ;;  %v13947_v32 = vld [vmem:[%s20777_s0 + $0x2cc] ss:$144 sps:$4 sm:$0xff]  }
 0x249   :  { %20835 = vst [vmem:[#allocation46_spill] sm:$0xff] %v17623_v31  ;;  %v17625_v44 = vpop.f32.mrf.mxu1  ;;  %9506 = vmatprep.subr.bf16.mxu1 %v13926_v30  ;;  %v17633_v7 = vadd.f32 %v8892_v9, %v8812_v25  ;;  %v13941_v31 = vld [vmem:[%s20776_s1 + $0x6c] ss:$16 sps:$4 sm:$0xff]  }
 0x24a   :  { %20836 = vst [vmem:[#allocation47_spill] sm:$0xff] %v17625_v44  ;;  %v8817_v30 = vpop.f32.mrf.mxu0  ;;  %9302 = vmatmul.mubr.bf16.gmra.mxu0 %v13918_v26  ;;  %v13936_v44 = vld [vmem:[%s20777_s0 + $0x2c0] ss:$144 sps:$4 sm:$0xff]   ;;  %v13944_v26 = vld [vmem:[%s20776_s1 + $0x26c] ss:$16 sps:$4 sm:$0xff]  }
 0x24b   :  { %v8898_v36 = vpop.f32.mrf.mxu1  ;;  %9383 = vmatmul.mubr.bf16.gmra.mxu1 %v13927_v27  ;;  %v8818_v57 = vadd.f32 %v8817_v30, %v17342_v53  ;;  %9426 = vmatpush1.bf16.msra.mxu0 %v13921_v50  ;;  %v13942_v27 = vld [vmem:[%s20776_s1 + $0x268] ss:$16 sps:$4 sm:$0xff]  }
 0x24c   :  { %9507 = vmatpush1.bf16.msra.mxu1 %v13924_v29  ;;  %v8819_v9 = vpop.f32.mrf.mxu0  ;;  %9427 = vmatprep.subr.bf16.mxu0 %v13932_v20  ;;  %v13939_v29 = vld [vmem:[%s20776_s1 + $0x68] ss:$16 sps:$4 sm:$0xff]  }
 0x24d   :  { %v8900_v25 = vpop.f32.mrf.mxu1  ;;  %9508 = vmatprep.subr.bf16.mxu1 %v13935_v0  ;;  %v8820_v53 = vadd.f32 %v8819_v9, %v17354_v14  ;;  %v17658_v50 = vadd.f32 %v8898_v36, %v8818_v57  ;;  %9311 = vmatprep.mubr.bf16.mxu0 %v13938_v18  ;;  %v13945_v20 = vld [vmem:[%s20777_s0 + $0x2c8] ss:$144 sps:$4 sm:$0xff]   ;;  %v13950_v9 = vld [vmem:[%s20776_s1 + $0x4c] ss:$16 sps:$4 sm:$0xff]  }
 0x24e   :  { %9392 = vmatprep.mubr.bf16.mxu1 %v13947_v32  ;;  %v8821_v0 = vpop.f32.mrf.mxu0  ;;  %v13953_v32 = vld [vmem:[%s20776_s1 + $0x24c] ss:$16 sps:$4 sm:$0xff]  }
 0x24f   :  { %v8902_v30 = vpop.f32.mrf.mxu1  ;;  %v8822_v14 = vadd.f32 %v8821_v0, %v17369_v59  ;;  %v17670_v36 = vadd.f32 %v8900_v25, %v8820_v53  ;;  %9428 = vmatpush1.bf16.msra.mxu0 %v13930_v28  ;;  %v13948_v59 = vld [vmem:[%s20776_s1 + $0x48] ss:$16 sps:$4 sm:$0xff]   ;;  %v13959_v53 = vld [vmem:[%s20776_s1 + $0x2c] ss:$16 sps:$4 sm:$0xff]  }
 0x250   :  { %9509 = vmatpush1.bf16.msra.mxu1 %v13933_v1  ;;  %v17672_v18 = vpop.f32.mrf.mxu0  ;;  %9429 = vmatprep.subr.bf16.mxu0 %v13941_v31  ;;  %v13951_v28 = vld [vmem:[%s20776_s1 + $0x248] ss:$16 sps:$4 sm:$0xff]   ;;  %v13956_v31 = vld [vmem:[%s20777_s0 + $0x3e4] ss:$144 sps:$4 sm:$0xff]   ;;  %v13965_v1 = vld [vmem:[%s20777_s0 + $0x3ec] ss:$144 sps:$4 sm:$0xff]  }
 0x251   :  { %20837 = vst [vmem:[#allocation48_spill] sm:$0xff] %v17672_v18  ;;  %v17674_v57 = vpop.f32.mrf.mxu1  ;;  %9510 = vmatprep.subr.bf16.mxu1 %v13944_v26  ;;  %v17682_v5 = vadd.f32 %v8902_v30, %v8822_v14 }
 0x252   :  { %20838 = vst [vmem:[#allocation49_spill] sm:$0xff] %v17674_v57  ;;  %v8827_v25 = vpop.f32.mrf.mxu0  ;;  %9312 = vmatmul.mubr.bf16.gmra.mxu0 %v13936_v44  ;;  %v13954_v57 = vld [vmem:[%s20777_s0 + $0x3e0] ss:$144 sps:$4 sm:$0xff]   ;;  %v13962_v44 = vld [vmem:[%s20776_s1 + $0x22c] ss:$16 sps:$4 sm:$0xff]  }
 0x253   :  { %v8908_v26 = vpop.f32.mrf.mxu1  ;;  %9393 = vmatmul.mubr.bf16.gmra.mxu1 %v13945_v20  ;;  %v8828_v0 = vadd.f32 %v8827_v25, %v17391_v58  ;;  %9430 = vmatpush1.bf16.msra.mxu0 %v13939_v29  ;;  %v13963_v20 = vld [vmem:[%s20777_s0 + $0x3e8] ss:$144 sps:$4 sm:$0xff]  }
 0x254   :  { %9511 = vmatpush1.bf16.msra.mxu1 %v13942_v27  ;;  %v8829_v30 = vpop.f32.mrf.mxu0  ;;  %9431 = vmatprep.subr.bf16.mxu0 %v13950_v9  ;;  %v13957_v27 = vld [vmem:[%s20776_s1 + $0x28] ss:$16 sps:$4 sm:$0xff]  }
 0x255   :  { %v8910_v14 = vpop.f32.mrf.mxu1  ;;  %9512 = vmatprep.subr.bf16.mxu1 %v13953_v32  ;;  %v8830_v58 = vadd.f32 %v8829_v30, %v17406_v37  ;;  %v17710_v29 = vadd.f32 %v8908_v26, %v8828_v0  ;;  %9321 = vmatprep.mubr.bf16.mxu0 %v13956_v31  ;;  %v13960_v9 = vld [vmem:[%s20776_s1 + $0x228] ss:$16 sps:$4 sm:$0xff]   ;;  %v181_v32 = vld [vmem:[%s20777_s0 + $0x500] sm:$0xff] }
 0x256   :  { %9402 = vmatprep.mubr.bf16.mxu1 %v13965_v1  ;;  %v182_v37 = vld [vmem:[%s20777_s0 + $0x508] sm:$0xff]  ;;  %v8831_v25 = vpop.f32.mrf.mxu0 }
 0x257   :  { %v8912_v26 = vpop.f32.mrf.mxu1  ;;  %v8832_v31 = vadd.f32 %v8831_v25, %v17421_v61  ;;  %v17725_v0 = vadd.f32 %v8910_v14, %v8830_v58  ;;  %9432 = vmatpush1.bf16.msra.mxu0 %v13948_v59  ;;  %v13968_v1 = vld [vmem:[%s20776_s1 + $0xc] ss:$16 sps:$4 sm:$0xff]   ;;  %v13966_v61 = vld [vmem:[%s20776_s1 + $0x8] ss:$16 sps:$4 sm:$0xff]  }
 0x258   :  { %9513 = vmatpush1.bf16.msra.mxu1 %v13951_v28  ;;  %v17727_v30 = vpop.f32.mrf.mxu0  ;;  %9433 = vmatprep.subr.bf16.mxu0 %v13959_v53  ;;  %v13969_v59 = vld [vmem:[%s20776_s1 + $0x208] ss:$16 sps:$4 sm:$0xff]   ;;  %v17745_v28 = vcombine.high %v181_v32, %v181_v32  ;;  %v17747_v53 = vcombine.high %v182_v37, %v182_v37 }
 0x259   :  { %20839 = vst [vmem:[#allocation50_spill] sm:$0xff] %v17727_v30  ;;  %v17729_v18 = vpop.f32.mrf.mxu1  ;;  %9514 = vmatprep.subr.bf16.mxu1 %v13962_v44  ;;  %v17737_v39 = vadd.f32 %v8912_v26, %v8832_v31  ;;  %v13976_v31 = vld [vmem:[%s20776_s1 + $0x1ec] ss:$16 sps:$4 sm:$0xff]  }
 0x25a   :  { %20840 = vst [vmem:[#allocation51_spill] sm:$0xff] %v17729_v18  ;;  %20841 = vst [vmem:[#allocation52_spill] sm:$0xff] %v17745_v28  ;;  %v8837_v14 = vpop.f32.mrf.mxu0  ;;  %9322 = vmatmul.mubr.bf16.gmra.mxu0 %v13954_v57  ;;  %v13979_v18 = vld [vmem:[%s20776_s1 + $0x3ec] ss:$16 sps:$4 sm:$0xff]  }
 0x25b   :  { %20842 = vst [vmem:[#allocation53_spill] sm:$0xff] %v17747_v53  ;;  %v8918_v44 = vpop.f32.mrf.mxu1  ;;  %9403 = vmatmul.mubr.bf16.gmra.mxu1 %v13963_v20  ;;  %v8838_v58 = vadd.f32 %v8837_v14, %v17441_v42  ;;  %9434 = vmatpush1.bf16.msra.mxu0 %v13957_v27  ;;  %v13974_v42 = vld [vmem:[%s20776_s1 + $0x1e8] ss:$16 sps:$4 sm:$0xff]  }
 0x25c   :  { %9515 = vmatpush1.bf16.msra.mxu1 %v13960_v9  ;;  %v8839_v25 = vpop.f32.mrf.mxu0  ;;  %9435 = vmatprep.subr.bf16.mxu0 %v13968_v1  ;;  %v17767_v9 = vcombine.low %v181_v32, %v181_v32  ;;  %v17769_v1 = vcombine.low %v182_v37, %v182_v37  ;;  %v13987_v32 = vld [vmem:[%s20776_s1 + $0x3cc] ss:$16 sps:$4 sm:$0xff]  }
 0x25d   :  { %v8920_v26 = vpop.f32.mrf.mxu1  ;;  %9516 = vmatprep.subr.bf16.mxu1 %v13971_v3  ;;  %v8840_v57 = vadd.f32 %v8839_v25, %v17456_v22  ;;  %v17757_v30 = vadd.f32 %v8918_v44, %v8838_v58  ;;  %9331 = vmatprep.mubr.bf16.mxu0 %v17745_v28  ;;  %v13977_v3 = vld [vmem:[%s20776_s1 + $0x3e8] ss:$16 sps:$4 sm:$0xff]   ;;  %v13984_v25 = vld [vmem:[%s20776_s1 + $0x1cc] ss:$16 sps:$4 sm:$0xff]  }
 0x25e   :  { %9412 = vmatprep.mubr.bf16.mxu1 %v17747_v53  ;;  %v8841_v20 = vpop.f32.mrf.mxu0  ;;  %20843 = vst [vmem:[#allocation54_spill] sm:$0xff] %v17767_v9  ;;  %20844 = vst [vmem:[#allocation55_spill] sm:$0xff] %v17769_v1 }
 0x25f   :  { %v8922_v27 = vpop.f32.mrf.mxu1  ;;  %v8842_v22 = vadd.f32 %v8841_v20, %v17471_v56  ;;  %v17772_v14 = vadd.f32 %v8920_v26, %v8840_v57  ;;  %9436 = vmatpush1.bf16.msra.mxu0 %v13966_v61  ;;  %v13982_v56 = vld [vmem:[%s20776_s1 + $0x1c8] ss:$16 sps:$4 sm:$0xff]   ;;  %v13990_v20 = vld [vmem:[%s20776_s1 + $0x1ac] ss:$16 sps:$4 sm:$0xff]  }
 0x260   :  { %9517 = vmatpush1.bf16.msra.mxu1 %v13969_v59  ;;  %v17774_v44 = vpop.f32.mrf.mxu0  ;;  %9437 = vmatprep.subr.bf16.mxu0 %v13976_v31  ;;  %v13985_v61 = vld [vmem:[%s20776_s1 + $0x3c8] ss:$16 sps:$4 sm:$0xff]  }
 0x261   :  { %20845 = vst [vmem:[#allocation56_spill] sm:$0xff] %v17774_v44  ;;  %v17776_v58 = vpop.f32.mrf.mxu1  ;;  %9518 = vmatprep.subr.bf16.mxu1 %v13979_v18  ;;  %v17784_v37 = vadd.f32 %v8922_v27, %v8842_v22  ;;  %v13993_v27 = vld [vmem:[%s20776_s1 + $0x3ac] ss:$16 sps:$4 sm:$0xff]  }
 0x262   :  { %20846 = vst [vmem:[#allocation57_spill] sm:$0xff] %v17776_v58  ;;  %v8847_v59 = vpop.f32.mrf.mxu0  ;;  %9332 = vmatmul.mubr.bf16.gmra.mxu0 %v17767_v9 }
 0x263   :  { %v8928_v18 = vpop.f32.mrf.mxu1  ;;  %9413 = vmatmul.mubr.bf16.gmra.mxu1 %v17769_v1  ;;  %v8848_v26 = vadd.f32 %v8847_v59, %v17492_v63  ;;  %9438 = vmatpush2.bf16.msra.mxu0 %v13974_v42  ;;  %v14824_v63 = vld [vmem:[%s20777_s0 + $0x4] ss:$144 sps:$4 sm:$0xff]   ;;  %v14825_v42 = vld [vmem:[%s20777_s0 + $0xc] ss:$144 sps:$4 sm:$0xff]   ;;  %v13991_v59 = vld [vmem:[%s20776_s1 + $0x3a8] ss:$16 sps:$4 sm:$0xff]  }
 0x264   :  { %9519 = vmatpush2.bf16.msra.mxu1 %v13977_v3  ;;  %v8849_v31 = vpop.f32.mrf.mxu0  ;;  %9439 = vmatprep.subr.bf16.mxu0 %v13984_v25  ;;  %v14050_v1 = vld [vmem:[%s20776_s1 + $0x46c] ss:$16 sps:$4 sm:$0xff]  }
 0x265   :  { %v8930_v57 = vpop.f32.mrf.mxu1  ;;  %9520 = vmatprep.subr.bf16.mxu1 %v13987_v32  ;;  %v8850_v22 = vadd.f32 %v8849_v31, %v17497_v38  ;;  %v17802_v9 = vadd.f32 %v8928_v18, %v8848_v26  ;;  %9453 = vmatprep.mubr.bf16.mxu0 %v14824_v63  ;;  %v13988_v38 = vld [vmem:[%s20776_s1 + $0x1a8] ss:$16 sps:$4 sm:$0xff]   ;;  %v13996_v18 = vld [vmem:[%s20776_s1 + $0x18c] ss:$16 sps:$4 sm:$0xff]  }
 0x266   :  { %9534 = vmatprep.mubr.bf16.mxu1 %v14825_v42  ;;  %v8851_v3 = vpop.f32.mrf.mxu0  ;;  %v13999_v26 = vld [vmem:[%s20776_s1 + $0x38c] ss:$16 sps:$4 sm:$0xff]   ;;  %v13994_v31 = vld [vmem:[%s20776_s1 + $0x188] ss:$16 sps:$4 sm:$0xff]  }
 0x267   :  { %v8932_v25 = vpop.f32.mrf.mxu1  ;;  %v17810_v32 = vadd.f32 %v8930_v57, %v8850_v22  ;;  %9440 = vmatpush2.bf16.msra.mxu0 %v13982_v56  ;;  %v13997_v57 = vld [vmem:[%s20776_s1 + $0x388] ss:$16 sps:$4 sm:$0xff]   ;;  %v14008_v42 = vld [vmem:[%s20776_s1 + $0x14c] ss:$16 sps:$4 sm:$0xff]  }
 0x268   :  { %9521 = vmatpush2.bf16.msra.mxu1 %v13985_v61  ;;  %9441 = vmatprep.subr.bf16.mxu0 %v13990_v20  ;;  %v8852_v56 = vpop.f32.mrf.mxu0  ;;  %v14002_v20 = vld [vmem:[%s20776_s1 + $0x16c] ss:$16 sps:$4 sm:$0xff]   ;;  %v14000_v22 = vld [vmem:[%s20776_s1 + $0x168] ss:$16 sps:$4 sm:$0xff]  }
 0x269   :  { %9522 = vmatprep.subr.bf16.mxu1 %v13993_v27  ;;  %v8933_v61 = vpop.f32.mrf.mxu1  ;;  %v14005_v27 = vld [vmem:[%s20776_s1 + $0x36c] ss:$16 sps:$4 sm:$0xff]   ;;  %v14003_v63 = vld [vmem:[%s20776_s1 + $0x368] ss:$16 sps:$4 sm:$0xff]  }
 0x26a   :  { %v14011_v3 = vld [vmem:[%s20776_s1 + $0x34c] ss:$16 sps:$4 sm:$0xff]   ;;  %v14006_v25 = vld [vmem:[%s20776_s1 + $0x148] ss:$16 sps:$4 sm:$0xff]  }
 0x26b   :  { %9442 = vmatpush2.bf16.msra.mxu0 %v13988_v38  ;;  %v14009_v38 = vld [vmem:[%s20776_s1 + $0x348] ss:$16 sps:$4 sm:$0xff]   ;;  %v14020_v61 = vld [vmem:[%s20776_s1 + $0x10c] ss:$16 sps:$4 sm:$0xff]  }
 0x26c   :  { %9523 = vmatpush2.bf16.msra.mxu1 %v13991_v59  ;;  %9443 = vmatprep.subr.bf16.mxu0 %v13996_v18  ;;  %v14014_v59 = vld [vmem:[%s20776_s1 + $0x12c] ss:$16 sps:$4 sm:$0xff]   ;;  %v14015_v56 = vld [vmem:[%s20776_s1 + $0x328] ss:$16 sps:$4 sm:$0xff]  }
 0x26d   :  { %9524 = vmatprep.subr.bf16.mxu1 %v13999_v26  ;;  %v14017_v18 = vld [vmem:[%s20776_s1 + $0x32c] ss:$16 sps:$4 sm:$0xff]   ;;  %v14012_v26 = vld [vmem:[%s20776_s1 + $0x128] ss:$16 sps:$4 sm:$0xff]  }
 0x26f   :  { %9444 = vmatpush2.bf16.msra.mxu0 %v13994_v31  ;;  %v14023_v31 = vld [vmem:[%s20776_s1 + $0x30c] ss:$16 sps:$4 sm:$0xff]  }
 0x270   :  { %9525 = vmatpush2.bf16.msra.mxu1 %v13997_v57  ;;  %9445 = vmatprep.subr.bf16.mxu0 %v14002_v20  ;;  %v14018_v57 = vld [vmem:[%s20776_s1 + $0x108] ss:$16 sps:$4 sm:$0xff]  }
 0x271   :  { %9526 = vmatprep.subr.bf16.mxu1 %v14005_v27  ;;  %v14021_v20 = vld [vmem:[%s20776_s1 + $0x308] ss:$16 sps:$4 sm:$0xff]   ;;  %v14026_v27 = vld [vmem:[%s20776_s1 + $0x4ec] ss:$16 sps:$4 sm:$0xff]  }
 0x273   :  { %9446 = vmatpush2.bf16.msra.mxu0 %v14000_v22  ;;  %v14029_v22 = vld [vmem:[%s20776_s1 + $0x6ec] ss:$16 sps:$4 sm:$0xff]  }
 0x274   :  { %9527 = vmatpush2.bf16.msra.mxu1 %v14003_v63  ;;  %9447 = vmatprep.subr.bf16.mxu0 %v14008_v42  ;;  %v14024_v63 = vld [vmem:[%s20776_s1 + $0x4e8] ss:$16 sps:$4 sm:$0xff]  }
 0x275   :  { %9528 = vmatprep.subr.bf16.mxu1 %v14011_v3  ;;  %v14027_v42 = vld [vmem:[%s20776_s1 + $0x6e8] ss:$16 sps:$4 sm:$0xff]   ;;  %v14032_v3 = vld [vmem:[%s20776_s1 + $0x4cc] ss:$16 sps:$4 sm:$0xff]  }
 0x277   :  { %9448 = vmatpush2.bf16.msra.mxu0 %v14006_v25  ;;  %v14035_v25 = vld [vmem:[%s20776_s1 + $0x6cc] ss:$16 sps:$4 sm:$0xff]  }
 0x278   :  { %9529 = vmatpush2.bf16.msra.mxu1 %v14009_v38  ;;  %9449 = vmatprep.subr.bf16.mxu0 %v14014_v59  ;;  %v14030_v38 = vld [vmem:[%s20776_s1 + $0x4c8] ss:$16 sps:$4 sm:$0xff]  }
 0x279   :  { %9530 = vmatprep.subr.bf16.mxu1 %v14017_v18  ;;  %v14033_v59 = vld [vmem:[%s20776_s1 + $0x6c8] ss:$16 sps:$4 sm:$0xff]  }
 0x27b   :  { %9450 = vmatpush2.bf16.msra.mxu0 %v14012_v26 }
 0x27c   :  { %9531 = vmatpush2.bf16.msra.mxu1 %v14015_v56  ;;  %9451 = vmatprep.subr.bf16.mxu0 %v14020_v61  ;;  %v14826_v56 = vld [vmem:[%s20777_s0] ss:$144 sps:$4 sm:$0xff]   ;;  %v14827_v61 = vld [vmem:[%s20777_s0 + $0x8] ss:$144 sps:$4 sm:$0xff]  }
 0x27d   :  { %9532 = vmatprep.subr.bf16.mxu1 %v14023_v31 }
 0x27f   :  { %9452 = vmatpush2.bf16.msra.mxu0 %v14018_v57 }
 0x280   :  { %9533 = vmatpush2.bf16.msra.mxu1 %v14021_v20  ;;  %9583 = vmatprep.subr.bf16.mxu0 %v14026_v27  ;;  %v14038_v27 = vld [vmem:[%s20776_s1 + $0x4ac] ss:$16 sps:$4 sm:$0xff]  }
 0x281   :  { %9664 = vmatprep.subr.bf16.mxu1 %v14029_v22  ;;  %v14041_v22 = vld [vmem:[%s20776_s1 + $0x6ac] ss:$16 sps:$4 sm:$0xff]  }
 0x282   :  { %v8969_v18 = vpop.f32.mrf.mxu0  ;;  %9454 = vmatmul.mubr.bf16.vlgmr.msra.gmra.mxu0 %v14826_v56 }
 0x283   :  { %v9050_v26 = vpop.f32.mrf.mxu1  ;;  %9535 = vmatmul.mubr.bf16.vlgmr.msra.gmra.mxu1 %v14827_v61  ;;  %v8970_v31 = vadd.f32 %v8969_v18, %v17608_v4  ;;  %9584 = vmatpush1.bf16.msra.mxu0 %v14024_v63  ;;  %v14036_v4 = vld [vmem:[%s20776_s1 + $0x4a8] ss:$16 sps:$4 sm:$0xff]  }
 0x284   :  { %9665 = vmatpush1.bf16.msra.mxu1 %v14027_v42  ;;  %v8971_v57 = vpop.f32.mrf.mxu0  ;;  %9585 = vmatprep.subr.bf16.mxu0 %v14032_v3  ;;  %v14039_v63 = vld [vmem:[%s20776_s1 + $0x6a8] ss:$16 sps:$4 sm:$0xff]   ;;  %v14828_v42 = vld [vmem:[%s20777_s0 + $0x124] ss:$144 sps:$4 sm:$0xff]   ;;  %v14829_v3 = vld [vmem:[%s20777_s0 + $0x12c] ss:$144 sps:$4 sm:$0xff]  }
 0x285   :  { %v9052_v20 = vpop.f32.mrf.mxu1  ;;  %9666 = vmatprep.subr.bf16.mxu1 %v14035_v25  ;;  %v17915_v56 = vadd.f32 %v9050_v26, %v8970_v31  ;;  %v8972_v61 = vadd.f32 %v8971_v57, %v17620_v8  ;;  %9463 = vmatprep.mubr.bf16.mxu0 %v14828_v42  ;;  %v14044_v42 = vld [vmem:[%s20776_s1 + $0x48c] ss:$16 sps:$4 sm:$0xff]  }
 0x286   :  { %9544 = vmatprep.mubr.bf16.mxu1 %v14829_v3  ;;  %v8973_v25 = vpop.f32.mrf.mxu0  ;;  %v14047_v3 = vld [vmem:[%s20776_s1 + $0x68c] ss:$16 sps:$4 sm:$0xff]  }
 0x287   :  { %v9054_v8 = vpop.f32.mrf.mxu1  ;;  %v17930_v18 = vadd.f32 %v9052_v20, %v8972_v61  ;;  %v8974_v26 = vadd.f32 %v8973_v25, %v17633_v7  ;;  %9586 = vmatpush1.bf16.msra.mxu0 %v14030_v38  ;;  %v14042_v7 = vld [vmem:[%s20776_s1 + $0x488] ss:$16 sps:$4 sm:$0xff]  }
 0x288   :  { %9667 = vmatpush1.bf16.msra.mxu1 %v14033_v59  ;;  %v17933_v31 = vpop.f32.mrf.mxu0  ;;  %9587 = vmatprep.subr.bf16.mxu0 %v14038_v27  ;;  %v14045_v38 = vld [vmem:[%s20776_s1 + $0x688] ss:$16 sps:$4 sm:$0xff]  }
 0x289   :  { %20847 = vst [vmem:[#allocation58_spill] sm:$0xff] %v17933_v31  ;;  %v17935_v57 = vpop.f32.mrf.mxu1  ;;  %9668 = vmatprep.subr.bf16.mxu1 %v14041_v22  ;;  %v17943_v20 = vadd.f32 %v9054_v8, %v8974_v26  ;;  %v14830_v22 = vld [vmem:[%s20777_s0 + $0x120] ss:$144 sps:$4 sm:$0xff]   ;;  %v14831_v61 = vld [vmem:[%s20777_s0 + $0x128] ss:$144 sps:$4 sm:$0xff]  }
 0x28a   :  { %20848 = vst [vmem:[#allocation59_spill] sm:$0xff] %v17935_v57  ;;  %v8979_v59 = vpop.f32.mrf.mxu0  ;;  %9464 = vmatmul.mubr.bf16.gmra.mxu0 %v14830_v22  ;;  %v14053_v22 = vld [vmem:[%s20776_s1 + $0x66c] ss:$16 sps:$4 sm:$0xff]  }
 0x28b   :  { %v9060_v27 = vpop.f32.mrf.mxu1  ;;  %9545 = vmatmul.mubr.bf16.gmra.mxu1 %v14831_v61  ;;  %v8980_v25 = vadd.f32 %v8979_v59, %v17658_v50  ;;  %9588 = vmatpush1.bf16.msra.mxu0 %v14036_v4  ;;  %v14048_v50 = vld [vmem:[%s20776_s1 + $0x468] ss:$16 sps:$4 sm:$0xff]  }
 0x28c   :  { %9669 = vmatpush1.bf16.msra.mxu1 %v14039_v63  ;;  %v8981_v8 = vpop.f32.mrf.mxu0  ;;  %9589 = vmatprep.subr.bf16.mxu0 %v14044_v42  ;;  %v14051_v4 = vld [vmem:[%s20776_s1 + $0x668] ss:$16 sps:$4 sm:$0xff]   ;;  %v14832_v63 = vld [vmem:[%s20777_s0 + $0x244] ss:$144 sps:$4 sm:$0xff]   ;;  %v14833_v42 = vld [vmem:[%s20777_s0 + $0x24c] ss:$144 sps:$4 sm:$0xff]  }
 0x28d   :  { %v9062_v26 = vpop.f32.mrf.mxu1  ;;  %9670 = vmatprep.subr.bf16.mxu1 %v14047_v3  ;;  %v8982_v58 = vadd.f32 %v8981_v8, %v17670_v36  ;;  %v17965_v53 = vadd.f32 %v9060_v27, %v8980_v25  ;;  %9473 = vmatprep.mubr.bf16.mxu0 %v14832_v63  ;;  %v14056_v8 = vld [vmem:[%s20776_s1 + $0x44c] ss:$16 sps:$4 sm:$0xff]  }
 0x28e   :  { %9554 = vmatprep.mubr.bf16.mxu1 %v14833_v42  ;;  %v8983_v36 = vpop.f32.mrf.mxu0  ;;  %v14059_v63 = vld [vmem:[%s20776_s1 + $0x64c] ss:$16 sps:$4 sm:$0xff]  }
 0x28f   :  { %v9064_v3 = vpop.f32.mrf.mxu1  ;;  %v8984_v59 = vadd.f32 %v8983_v36, %v17682_v5  ;;  %v17980_v27 = vadd.f32 %v9062_v26, %v8982_v58  ;;  %9590 = vmatpush1.bf16.msra.mxu0 %v14042_v7  ;;  %v14054_v5 = vld [vmem:[%s20776_s1 + $0x448] ss:$16 sps:$4 sm:$0xff]  }
 0x290   :  { %9671 = vmatpush1.bf16.msra.mxu1 %v14045_v38  ;;  %v17982_v61 = vpop.f32.mrf.mxu0  ;;  %9591 = vmatprep.subr.bf16.mxu0 %v14050_v1  ;;  %v14057_v58 = vld [vmem:[%s20776_s1 + $0x648] ss:$16 sps:$4 sm:$0xff]   ;;  %v14834_v38 = vld [vmem:[%s20777_s0 + $0x240] ss:$144 sps:$4 sm:$0xff]  }
 0x291   :  { %20849 = vst [vmem:[#allocation60_spill] sm:$0xff] %v17982_v61  ;;  %v17984_v25 = vpop.f32.mrf.mxu1  ;;  %9672 = vmatprep.subr.bf16.mxu1 %v14053_v22  ;;  %v17992_v42 = vadd.f32 %v9064_v3, %v8984_v59  ;;  %v14835_v26 = vld [vmem:[%s20777_s0 + $0x248] ss:$144 sps:$4 sm:$0xff]   ;;  %v14062_v59 = vld [vmem:[%s20776_s1 + $0x42c] ss:$16 sps:$4 sm:$0xff]  }
 0x292   :  { %20850 = vst [vmem:[#allocation61_spill] sm:$0xff] %v17984_v25  ;;  %v8989_v1 = vpop.f32.mrf.mxu0  ;;  %9474 = vmatmul.mubr.bf16.gmra.mxu0 %v14834_v38  ;;  %v14065_v38 = vld [vmem:[%s20776_s1 + $0x62c] ss:$16 sps:$4 sm:$0xff]  }
 0x293   :  { %v9070_v7 = vpop.f32.mrf.mxu1  ;;  %9555 = vmatmul.mubr.bf16.gmra.mxu1 %v14835_v26  ;;  %v8990_v22 = vadd.f32 %v8989_v1, %v17710_v29  ;;  %9592 = vmatpush1.bf16.msra.mxu0 %v14048_v50  ;;  %v14060_v29 = vld [vmem:[%s20776_s1 + $0x428] ss:$16 sps:$4 sm:$0xff]  }
 0x294   :  { %9673 = vmatpush1.bf16.msra.mxu1 %v14051_v4  ;;  %v8991_v36 = vpop.f32.mrf.mxu0  ;;  %9593 = vmatprep.subr.bf16.mxu0 %v14056_v8  ;;  %v14063_v50 = vld [vmem:[%s20776_s1 + $0x628] ss:$16 sps:$4 sm:$0xff]   ;;  %v14836_v4 = vld [vmem:[%s20777_s0 + $0x364] ss:$144 sps:$4 sm:$0xff]   ;;  %v14837_v8 = vld [vmem:[%s20777_s0 + $0x36c] ss:$144 sps:$4 sm:$0xff]  }
 0x295   :  { %v9072_v3 = vpop.f32.mrf.mxu1  ;;  %9674 = vmatprep.subr.bf16.mxu1 %v14059_v63  ;;  %v8992_v28 = vadd.f32 %v8991_v36, %v17725_v0  ;;  %v18014_v44 = vadd.f32 %v9070_v7, %v8990_v22  ;;  %9483 = vmatprep.mubr.bf16.mxu0 %v14836_v4  ;;  %v14068_v36 = vld [vmem:[%s20776_s1 + $0x40c] ss:$16 sps:$4 sm:$0xff]  }
 0x296   :  { %9564 = vmatprep.mubr.bf16.mxu1 %v14837_v8  ;;  %v8993_v0 = vpop.f32.mrf.mxu0  ;;  %v14071_v4 = vld [vmem:[%s20776_s1 + $0x60c] ss:$16 sps:$4 sm:$0xff]  }
 0x297   :  { %v9074_v63 = vpop.f32.mrf.mxu1  ;;  %v8994_v1 = vadd.f32 %v8993_v0, %v17737_v39  ;;  %v18029_v7 = vadd.f32 %v9072_v3, %v8992_v28  ;;  %9594 = vmatpush1.bf16.msra.mxu0 %v14054_v5  ;;  %v14066_v39 = vld [vmem:[%s20776_s1 + $0x408] ss:$16 sps:$4 sm:$0xff]   ;;  %v14838_v3 = vld [vmem:[%s20777_s0 + $0x360] ss:$144 sps:$4 sm:$0xff]  }
 0x298   :  { %9675 = vmatpush1.bf16.msra.mxu1 %v14057_v58  ;;  %v18031_v26 = vpop.f32.mrf.mxu0  ;;  %9595 = vmatprep.subr.bf16.mxu0 %v14062_v59  ;;  %v14069_v28 = vld [vmem:[%s20776_s1 + $0x608] ss:$16 sps:$4 sm:$0xff]  }
 0x299   :  { %20851 = vst [vmem:[#allocation62_spill] sm:$0xff] %v18031_v26  ;;  %v18033_v22 = vpop.f32.mrf.mxu1  ;;  %9676 = vmatprep.subr.bf16.mxu1 %v14065_v38  ;;  %v18041_v8 = vadd.f32 %v9074_v63, %v8994_v1  ;;  %v14839_v59 = vld [vmem:[%s20777_s0 + $0x368] ss:$144 sps:$4 sm:$0xff]   ;;  %v14074_v1 = vld [vmem:[%s20776_s1 + $0x5ec] ss:$16 sps:$4 sm:$0xff]  }
 0x29a   :  { %20852 = vst [vmem:[#allocation63_spill] sm:$0xff] %v18033_v22  ;;  %v8999_v5 = vpop.f32.mrf.mxu0  ;;  %9484 = vmatmul.mubr.bf16.gmra.mxu0 %v14838_v3  ;;  %v14077_v3 = vld [vmem:[%s20776_s1 + $0x7ec] ss:$16 sps:$4 sm:$0xff]  }
 0x29b   :  { %v9080_v58 = vpop.f32.mrf.mxu1  ;;  %9565 = vmatmul.mubr.bf16.gmra.mxu1 %v14839_v59  ;;  %v9000_v38 = vadd.f32 %v8999_v5, %v17757_v30  ;;  %9596 = vmatpush1.bf16.msra.mxu0 %v14060_v29  ;;  %v14072_v30 = vld [vmem:[%s20776_s1 + $0x5e8] ss:$16 sps:$4 sm:$0xff]  }
 0x29c   :  { %9677 = vmatpush1.bf16.msra.mxu1 %v14063_v50  ;;  %v9001_v0 = vpop.f32.mrf.mxu0  ;;  %9597 = vmatprep.subr.bf16.mxu0 %v14068_v36  ;;  %v14075_v29 = vld [vmem:[%s20776_s1 + $0x7e8] ss:$16 sps:$4 sm:$0xff]  }
 0x29d   :  { %v9082_v63 = vpop.f32.mrf.mxu1  ;;  %9678 = vmatprep.subr.bf16.mxu1 %v14071_v4  ;;  %v9002_v22 = vadd.f32 %v9001_v0, %v17772_v14  ;;  %v18063_v26 = vadd.f32 %v9080_v58, %v9000_v38  ;;  %9493 = vmatprep.mubr.bf16.mxu0 %v15335_v48  ;;  %v14080_v48 = vld [vmem:[%s20776_s1 + $0x5cc] ss:$16 sps:$4 sm:$0xff]  }
 0x29e   :  { %9574 = vmatprep.mubr.bf16.mxu1 %v15337_v49  ;;  %v9003_v50 = vpop.f32.mrf.mxu0  ;;  %v14083_v49 = vld [vmem:[%s20776_s1 + $0x7cc] ss:$16 sps:$4 sm:$0xff]  }
 0x29f   :  { %v9084_v36 = vpop.f32.mrf.mxu1  ;;  %v9004_v4 = vadd.f32 %v9003_v50, %v17784_v37  ;;  %v18074_v5 = vadd.f32 %v9082_v63, %v9002_v22  ;;  %9598 = vmatpush1.bf16.msra.mxu0 %v14066_v39  ;;  %v14078_v37 = vld [vmem:[%s20776_s1 + $0x5c8] ss:$16 sps:$4 sm:$0xff]  }
 0x2a0   :  { %9679 = vmatpush1.bf16.msra.mxu1 %v14069_v28  ;;  %v18076_v14 = vpop.f32.mrf.mxu0  ;;  %9599 = vmatprep.subr.bf16.mxu0 %v14074_v1  ;;  %v14081_v22 = vld [vmem:[%s20776_s1 + $0x7c8] ss:$16 sps:$4 sm:$0xff]   ;;  %v14086_v1 = vld [vmem:[%s20776_s1 + $0x5ac] ss:$16 sps:$4 sm:$0xff]  }
 0x2a1   :  { %20853 = vst [vmem:[#allocation64_spill] sm:$0xff] %v18076_v14  ;;  %v18078_v58 = vpop.f32.mrf.mxu1  ;;  %9680 = vmatprep.subr.bf16.mxu1 %v14077_v3  ;;  %v18086_v59 = vadd.f32 %v9084_v36, %v9004_v4  ;;  %v14089_v3 = vld [vmem:[%s20776_s1 + $0x7ac] ss:$16 sps:$4 sm:$0xff]  }
 0x2a2   :  { %20854 = vst [vmem:[#allocation65_spill] sm:$0xff] %v18078_v58  ;;  %v9009_v39 = vpop.f32.mrf.mxu0  ;;  %9494 = vmatmul.mubr.bf16.gmra.mxu0 %v15353_v54  ;;  %v14164_v58 = vld [vmem:[%s20776_s1 + $0x80c] ss:$16 sps:$4 sm:$0xff]  }
 0x2a3   :  { %v9090_v28 = vpop.f32.mrf.mxu1  ;;  %9575 = vmatmul.mubr.bf16.gmra.mxu1 %v15355_v55  ;;  %v9010_v38 = vadd.f32 %v9009_v39, %v17802_v9  ;;  %9600 = vmatpush2.bf16.msra.mxu0 %v14072_v30  ;;  %v14084_v55 = vld [vmem:[%s20776_s1 + $0x5a8] ss:$16 sps:$4 sm:$0xff]   ;;  %v14840_v30 = vld [vmem:[%s20777_s0 + $0x14] ss:$144 sps:$4 sm:$0xff]  }
 0x2a4   :  { %9681 = vmatpush2.bf16.msra.mxu1 %v14075_v29  ;;  %v9011_v0 = vpop.f32.mrf.mxu0  ;;  %9601 = vmatprep.subr.bf16.mxu0 %v14080_v48  ;;  %v14087_v9 = vld [vmem:[%s20776_s1 + $0x7a8] ss:$16 sps:$4 sm:$0xff]   ;;  %v14841_v29 = vld [vmem:[%s20777_s0 + $0x1c] ss:$144 sps:$4 sm:$0xff]  }
 0x2a5   :  { %v9092_v63 = vpop.f32.mrf.mxu1  ;;  %9682 = vmatprep.subr.bf16.mxu1 %v14083_v49  ;;  %v9012_v54 = vadd.f32 %v9011_v0, %v17810_v32  ;;  %v18104_v50 = vadd.f32 %v9090_v28, %v9010_v38  ;;  %9615 = vmatprep.mubr.bf16.mxu0 %v14840_v30  ;;  %v14092_v48 = vld [vmem:[%s20776_s1 + $0x58c] ss:$16 sps:$4 sm:$0xff]   ;;  %v14090_v38 = vld [vmem:[%s20776_s1 + $0x588] ss:$16 sps:$4 sm:$0xff]  }
 0x2a6   :  { %9696 = vmatprep.mubr.bf16.mxu1 %v14841_v29  ;;  %v9013_v32 = vpop.f32.mrf.mxu0  ;;  %v14095_v49 = vld [vmem:[%s20776_s1 + $0x78c] ss:$16 sps:$4 sm:$0xff]  }
 0x2a7   :  { %v9094_v36 = vpop.f32.mrf.mxu1  ;;  %v18118_v4 = vadd.f32 %v9092_v63, %v9012_v54  ;;  %9602 = vmatpush2.bf16.msra.mxu0 %v14078_v37  ;;  %v14093_v37 = vld [vmem:[%s20776_s1 + $0x788] ss:$16 sps:$4 sm:$0xff]   ;;  %v14101_v0 = vld [vmem:[%s20776_s1 + $0x76c] ss:$16 sps:$4 sm:$0xff]  }
 0x2a8   :  { %9683 = vmatpush2.bf16.msra.mxu1 %v14081_v22  ;;  %9603 = vmatprep.subr.bf16.mxu0 %v14086_v1  ;;  %v9014_v39 = vpop.f32.mrf.mxu0  ;;  %v14098_v22 = vld [vmem:[%s20776_s1 + $0x56c] ss:$16 sps:$4 sm:$0xff]   ;;  %v14096_v63 = vld [vmem:[%s20776_s1 + $0x568] ss:$16 sps:$4 sm:$0xff]  }
 0x2a9   :  { %9684 = vmatprep.subr.bf16.mxu1 %v14089_v3  ;;  %v9095_v28 = vpop.f32.mrf.mxu1  ;;  %v14099_v1 = vld [vmem:[%s20776_s1 + $0x768] ss:$16 sps:$4 sm:$0xff]   ;;  %v14104_v3 = vld [vmem:[%s20776_s1 + $0x54c] ss:$16 sps:$4 sm:$0xff]  }
 0x2aa   :  { %v14107_v54 = vld [vmem:[%s20776_s1 + $0x74c] ss:$16 sps:$4 sm:$0xff]   ;;  %v14108_v32 = vld [vmem:[%s20776_s1 + $0x528] ss:$16 sps:$4 sm:$0xff]  }
 0x2ab   :  { %9604 = vmatpush2.bf16.msra.mxu0 %v14084_v55  ;;  %v14102_v55 = vld [vmem:[%s20776_s1 + $0x548] ss:$16 sps:$4 sm:$0xff]   ;;  %v14110_v30 = vld [vmem:[%s20776_s1 + $0x52c] ss:$16 sps:$4 sm:$0xff]  }
 0x2ac   :  { %9685 = vmatpush2.bf16.msra.mxu1 %v14087_v9  ;;  %9605 = vmatprep.subr.bf16.mxu0 %v14092_v48  ;;  %v14105_v9 = vld [vmem:[%s20776_s1 + $0x748] ss:$16 sps:$4 sm:$0xff]   ;;  %v14113_v29 = vld [vmem:[%s20776_s1 + $0x72c] ss:$16 sps:$4 sm:$0xff]  }
 0x2ad   :  { %9686 = vmatprep.subr.bf16.mxu1 %v14095_v49  ;;  %v14111_v36 = vld [vmem:[%s20776_s1 + $0x728] ss:$16 sps:$4 sm:$0xff]   ;;  %v14116_v48 = vld [vmem:[%s20776_s1 + $0x50c] ss:$16 sps:$4 sm:$0xff]  }
 0x2ae   :  { %v14119_v49 = vld [vmem:[%s20776_s1 + $0x70c] ss:$16 sps:$4 sm:$0xff]   ;;  %v14114_v39 = vld [vmem:[%s20776_s1 + $0x508] ss:$16 sps:$4 sm:$0xff]  }
 0x2af   :  { %9606 = vmatpush2.bf16.msra.mxu0 %v14090_v38  ;;  %v14117_v28 = vld [vmem:[%s20776_s1 + $0x708] ss:$16 sps:$4 sm:$0xff]   ;;  %v14122_v38 = vld [vmem:[%s20776_s1 + $0x8ec] ss:$16 sps:$4 sm:$0xff]  }
 0x2b0   :  { %9687 = vmatpush2.bf16.msra.mxu1 %v14093_v37  ;;  %9607 = vmatprep.subr.bf16.mxu0 %v14098_v22  ;;  %v14125_v37 = vld [vmem:[%s20776_s1 + $0xaec] ss:$16 sps:$4 sm:$0xff]   ;;  %v14120_v22 = vld [vmem:[%s20776_s1 + $0x8e8] ss:$16 sps:$4 sm:$0xff]  }
 0x2b1   :  { %9688 = vmatprep.subr.bf16.mxu1 %v14101_v0  ;;  %v14123_v0 = vld [vmem:[%s20776_s1 + $0xae8] ss:$16 sps:$4 sm:$0xff]  }
 0x2b3   :  { %9608 = vmatpush2.bf16.msra.mxu0 %v14096_v63  ;;  %v14128_v63 = vld [vmem:[%s20776_s1 + $0x8cc] ss:$16 sps:$4 sm:$0xff]  }
 0x2b4   :  { %9689 = vmatpush2.bf16.msra.mxu1 %v14099_v1  ;;  %9609 = vmatprep.subr.bf16.mxu0 %v14104_v3  ;;  %v14131_v1 = vld [vmem:[%s20776_s1 + $0xacc] ss:$16 sps:$4 sm:$0xff]   ;;  %v14126_v3 = vld [vmem:[%s20776_s1 + $0x8c8] ss:$16 sps:$4 sm:$0xff]  }
 0x2b5   :  { %9690 = vmatprep.subr.bf16.mxu1 %v14107_v54  ;;  %v14129_v54 = vld [vmem:[%s20776_s1 + $0xac8] ss:$16 sps:$4 sm:$0xff]  }
 0x2b7   :  { %9610 = vmatpush2.bf16.msra.mxu0 %v14102_v55 }
 0x2b8   :  { %9691 = vmatpush2.bf16.msra.mxu1 %v14105_v9  ;;  %9611 = vmatprep.subr.bf16.mxu0 %v14110_v30  ;;  %v14842_v30 = vld [vmem:[%s20777_s0 + $0x10] ss:$144 sps:$4 sm:$0xff]  }
 0x2b9   :  { %9692 = vmatprep.subr.bf16.mxu1 %v14113_v29  ;;  %v14843_v29 = vld [vmem:[%s20777_s0 + $0x18] ss:$144 sps:$4 sm:$0xff]  }
 0x2bb   :  { %9612 = vmatpush2.bf16.msra.mxu0 %v14108_v32 }
 0x2bc   :  { %9693 = vmatpush2.bf16.msra.mxu1 %v14111_v36  ;;  %9613 = vmatprep.subr.bf16.mxu0 %v14116_v48 }
 0x2bd   :  { %9694 = vmatprep.subr.bf16.mxu1 %v14119_v49  ;;  %v14134_v49 = vld [vmem:[%s20776_s1 + $0x8ac] ss:$16 sps:$4 sm:$0xff]  }
 0x2bf   :  { %9614 = vmatpush2.bf16.msra.mxu0 %v14114_v39  ;;  %v14137_v39 = vld [vmem:[%s20776_s1 + $0xaac] ss:$16 sps:$4 sm:$0xff]  }
 0x2c0   :  { %9695 = vmatpush2.bf16.msra.mxu1 %v14117_v28  ;;  %9745 = vmatprep.subr.bf16.mxu0 %v14122_v38 }
 0x2c1   :  { %9826 = vmatprep.subr.bf16.mxu1 %v14125_v37  ;;  %v14132_v37 = vld [vmem:[%s20776_s1 + $0x8a8] ss:$16 sps:$4 sm:$0xff]  }
 0x2c2   :  { %v9131_v55 = vpop.f32.mrf.mxu0  ;;  %9616 = vmatmul.mubr.bf16.vlgmr.msra.gmra.mxu0 %v14842_v30 }
 0x2c3   :  { %v9212_v9 = vpop.f32.mrf.mxu1  ;;  %9697 = vmatmul.mubr.bf16.vlgmr.msra.gmra.mxu1 %v14843_v29  ;;  %v9132_v32 = vadd.f32 %v9131_v55, %v17915_v56  ;;  %9746 = vmatpush1.bf16.msra.mxu0 %v14120_v22  ;;  %v14844_v56 = vld [vmem:[%s20777_s0 + $0x134] ss:$144 sps:$4 sm:$0xff]   ;;  %v14135_v22 = vld [vmem:[%s20776_s1 + $0xaa8] ss:$16 sps:$4 sm:$0xff]   ;;  %v14140_v29 = vld [vmem:[%s20776_s1 + $0x88c] ss:$16 sps:$4 sm:$0xff]  }
 0x2c4   :  { %9827 = vmatpush1.bf16.msra.mxu1 %v14123_v0  ;;  %v9133_v36 = vpop.f32.mrf.mxu0  ;;  %9747 = vmatprep.subr.bf16.mxu0 %v14128_v63  ;;  %v14845_v0 = vld [vmem:[%s20777_s0 + $0x13c] ss:$144 sps:$4 sm:$0xff]  }
 0x2c5   :  { %v9214_v48 = vpop.f32.mrf.mxu1  ;;  %9828 = vmatprep.subr.bf16.mxu1 %v14131_v1  ;;  %v18217_v28 = vadd.f32 %v9212_v9, %v9132_v32  ;;  %v9134_v38 = vadd.f32 %v9133_v36, %v17930_v18  ;;  %9625 = vmatprep.mubr.bf16.mxu0 %v14844_v56  ;;  %v14143_v32 = vld [vmem:[%s20776_s1 + $0xa8c] ss:$16 sps:$4 sm:$0xff]  }
 0x2c6   :  { %9706 = vmatprep.mubr.bf16.mxu1 %v14845_v0  ;;  %v9135_v63 = vpop.f32.mrf.mxu0 }
 0x2c7   :  { %v9216_v18 = vpop.f32.mrf.mxu1  ;;  %v18232_v1 = vadd.f32 %v9214_v48, %v9134_v38  ;;  %v9136_v55 = vadd.f32 %v9135_v63, %v17943_v20  ;;  %9748 = vmatpush1.bf16.msra.mxu0 %v14126_v3  ;;  %v14846_v20 = vld [vmem:[%s20777_s0 + $0x130] ss:$144 sps:$4 sm:$0xff]   ;;  %v14141_v38 = vld [vmem:[%s20776_s1 + $0xa88] ss:$16 sps:$4 sm:$0xff]   ;;  %v14146_v63 = vld [vmem:[%s20776_s1 + $0x86c] ss:$16 sps:$4 sm:$0xff]  }
 0x2c8   :  { %9829 = vmatpush1.bf16.msra.mxu1 %v14129_v54  ;;  %v18235_v9 = vpop.f32.mrf.mxu0  ;;  %9749 = vmatprep.subr.bf16.mxu0 %v14134_v49  ;;  %v14847_v54 = vld [vmem:[%s20777_s0 + $0x138] ss:$144 sps:$4 sm:$0xff]  }
 0x2c9   :  { %20855 = vst [vmem:[#allocation66_spill] sm:$0xff] %v18235_v9  ;;  %v18237_v30 = vpop.f32.mrf.mxu1  ;;  %9830 = vmatprep.subr.bf16.mxu1 %v14137_v39  ;;  %v18245_v36 = vadd.f32 %v9216_v18, %v9136_v55  ;;  %v14138_v39 = vld [vmem:[%s20776_s1 + $0x888] ss:$16 sps:$4 sm:$0xff]   ;;  %v14848_v18 = vld [vmem:[%s20777_s0 + $0x254] ss:$144 sps:$4 sm:$0xff]  }
 0x2ca   :  { %20856 = vst [vmem:[#allocation67_spill] sm:$0xff] %v18237_v30  ;;  %v9141_v48 = vpop.f32.mrf.mxu0  ;;  %9626 = vmatmul.mubr.bf16.gmra.mxu0 %v14846_v20  ;;  %v14144_v55 = vld [vmem:[%s20776_s1 + $0x868] ss:$16 sps:$4 sm:$0xff]  }
 0x2cb   :  { %v9222_v3 = vpop.f32.mrf.mxu1  ;;  %9707 = vmatmul.mubr.bf16.gmra.mxu1 %v14847_v54  ;;  %v9142_v49 = vadd.f32 %v9141_v48, %v17965_v53  ;;  %9750 = vmatpush1.bf16.msra.mxu0 %v14132_v37  ;;  %v14149_v53 = vld [vmem:[%s20776_s1 + $0xa6c] ss:$16 sps:$4 sm:$0xff]   ;;  %v14552_v30 = vld [vmem:[%s20776_s1 + $0x19e8] ss:$16 sps:$4 sm:$0xff]  }
 0x2cc   :  { %9831 = vmatpush1.bf16.msra.mxu1 %v14135_v22  ;;  %v9143_v56 = vpop.f32.mrf.mxu0  ;;  %9751 = vmatprep.subr.bf16.mxu0 %v14140_v29  ;;  %v14147_v29 = vld [vmem:[%s20776_s1 + $0xa68] ss:$16 sps:$4 sm:$0xff]  }
 0x2cd   :  { %v9224_v0 = vpop.f32.mrf.mxu1  ;;  %9832 = vmatprep.subr.bf16.mxu1 %v14143_v32  ;;  %v9144_v37 = vadd.f32 %v9143_v56, %v17980_v27  ;;  %v18267_v22 = vadd.f32 %v9222_v3, %v9142_v49  ;;  %9635 = vmatprep.mubr.bf16.mxu0 %v14848_v18  ;;  %v14849_v32 = vld [vmem:[%s20777_s0 + $0x25c] ss:$144 sps:$4 sm:$0xff]  }
 0x2ce   :  { %9716 = vmatprep.mubr.bf16.mxu1 %v14849_v32  ;;  %v9145_v27 = vpop.f32.mrf.mxu0  ;;  %v14152_v56 = vld [vmem:[%s20776_s1 + $0x84c] ss:$16 sps:$4 sm:$0xff]  }
 0x2cf   :  { %v9226_v48 = vpop.f32.mrf.mxu1  ;;  %v9146_v20 = vadd.f32 %v9145_v27, %v17992_v42  ;;  %v18282_v3 = vadd.f32 %v9224_v0, %v9144_v37  ;;  %9752 = vmatpush1.bf16.msra.mxu0 %v14138_v39  ;;  %v14155_v18 = vld [vmem:[%s20776_s1 + $0xa4c] ss:$16 sps:$4 sm:$0xff]   ;;  %v14850_v39 = vld [vmem:[%s20777_s0 + $0x250] ss:$144 sps:$4 sm:$0xff]   ;;  %v14851_v0 = vld [vmem:[%s20777_s0 + $0x258] ss:$144 sps:$4 sm:$0xff]  }
 0x2d0   :  { %9833 = vmatpush1.bf16.msra.mxu1 %v14141_v38  ;;  %v18284_v54 = vpop.f32.mrf.mxu0  ;;  %9753 = vmatprep.subr.bf16.mxu0 %v14146_v63  ;;  %v14153_v37 = vld [vmem:[%s20776_s1 + $0xa48] ss:$16 sps:$4 sm:$0xff]  }
 0x2d1   :  { %20857 = vst [vmem:[#allocation68_spill] sm:$0xff] %v18284_v54  ;;  %v18286_v49 = vpop.f32.mrf.mxu1  ;;  %9834 = vmatprep.subr.bf16.mxu1 %v14149_v53  ;;  %v18294_v32 = vadd.f32 %v9226_v48, %v9146_v20  ;;  %v14150_v53 = vld [vmem:[%s20776_s1 + $0x848] ss:$16 sps:$4 sm:$0xff]   ;;  %v14158_v20 = vld [vmem:[%s20776_s1 + $0x82c] ss:$16 sps:$4 sm:$0xff]  }
 0x2d2   :  { %20858 = vst [vmem:[#allocation69_spill] sm:$0xff] %v18286_v49  ;;  %v9151_v42 = vpop.f32.mrf.mxu0  ;;  %9636 = vmatmul.mubr.bf16.gmra.mxu0 %v14850_v39  ;;  %v14853_v39 = vld [vmem:[%s20777_s0 + $0x37c] ss:$144 sps:$4 sm:$0xff]  }
 0x2d3   :  { %v9232_v38 = vpop.f32.mrf.mxu1  ;;  %9717 = vmatmul.mubr.bf16.gmra.mxu1 %v14851_v0  ;;  %v9152_v63 = vadd.f32 %v9151_v42, %v18014_v44  ;;  %9754 = vmatpush1.bf16.msra.mxu0 %v14144_v55  ;;  %v14161_v44 = vld [vmem:[%s20776_s1 + $0xa2c] ss:$16 sps:$4 sm:$0xff]   ;;  %v14852_v42 = vld [vmem:[%s20777_s0 + $0x374] ss:$144 sps:$4 sm:$0xff]  }
 0x2d4   :  { %9835 = vmatpush1.bf16.msra.mxu1 %v14147_v29  ;;  %v9153_v27 = vpop.f32.mrf.mxu0  ;;  %9755 = vmatprep.subr.bf16.mxu0 %v14152_v56  ;;  %v14156_v56 = vld [vmem:[%s20776_s1 + $0x828] ss:$16 sps:$4 sm:$0xff]  }
 0x2d5   :  { %v9234_v48 = vpop.f32.mrf.mxu1  ;;  %9836 = vmatprep.subr.bf16.mxu1 %v14155_v18  ;;  %v9154_v55 = vadd.f32 %v9153_v27, %v18029_v7  ;;  %v18316_v29 = vadd.f32 %v9232_v38, %v9152_v63  ;;  %9645 = vmatprep.mubr.bf16.mxu0 %v14852_v42  ;;  %v14159_v18 = vld [vmem:[%s20776_s1 + $0xa28] ss:$16 sps:$4 sm:$0xff]  }
 0x2d6   :  { %9726 = vmatprep.mubr.bf16.mxu1 %v14853_v39  ;;  %v9155_v7 = vpop.f32.mrf.mxu0  ;;  %v14167_v39 = vld [vmem:[%s20776_s1 + $0xa0c] ss:$16 sps:$4 sm:$0xff]  }
 0x2d7   :  { %v9236_v38 = vpop.f32.mrf.mxu1  ;;  %v9156_v0 = vadd.f32 %v9155_v7, %v18041_v8  ;;  %v18331_v63 = vadd.f32 %v9234_v48, %v9154_v55  ;;  %9756 = vmatpush1.bf16.msra.mxu0 %v14150_v53  ;;  %v14854_v53 = vld [vmem:[%s20777_s0 + $0x370] ss:$144 sps:$4 sm:$0xff]   ;;  %v14855_v48 = vld [vmem:[%s20777_s0 + $0x378] ss:$144 sps:$4 sm:$0xff]  }
 0x2d8   :  { %9837 = vmatpush1.bf16.msra.mxu1 %v14153_v37  ;;  %v18333_v27 = vpop.f32.mrf.mxu0  ;;  %9757 = vmatprep.subr.bf16.mxu0 %v14158_v20  ;;  %v14165_v55 = vld [vmem:[%s20776_s1 + $0xa08] ss:$16 sps:$4 sm:$0xff]  }
 0x2d9   :  { %20859 = vst [vmem:[#allocation70_spill] sm:$0xff] %v18333_v27  ;;  %v18335_v42 = vpop.f32.mrf.mxu1  ;;  %9838 = vmatprep.subr.bf16.mxu1 %v14161_v44  ;;  %v18343_v14 = vadd.f32 %v9236_v38, %v9156_v0  ;;  %v14162_v44 = vld [vmem:[%s20776_s1 + $0x808] ss:$16 sps:$4 sm:$0xff]   ;;  %v14170_v0 = vld [vmem:[%s20776_s1 + $0x9ec] ss:$16 sps:$4 sm:$0xff]  }
 0x2da   :  { %20860 = vst [vmem:[#allocation71_spill] sm:$0xff] %v18335_v42  ;;  %v9161_v8 = vpop.f32.mrf.mxu0  ;;  %9646 = vmatmul.mubr.bf16.gmra.mxu0 %v14854_v53 }
 0x2db   :  { %v9242_v37 = vpop.f32.mrf.mxu1  ;;  %9727 = vmatmul.mubr.bf16.gmra.mxu1 %v14855_v48  ;;  %v9162_v20 = vadd.f32 %v9161_v8, %v18063_v26  ;;  %9758 = vmatpush1.bf16.msra.mxu0 %v14156_v56  ;;  %v14173_v26 = vld [vmem:[%s20776_s1 + $0xbec] ss:$16 sps:$4 sm:$0xff]   ;;  %v14168_v8 = vld [vmem:[%s20776_s1 + $0x9e8] ss:$16 sps:$4 sm:$0xff]  }
 0x2dc   :  { %9839 = vmatpush1.bf16.msra.mxu1 %v14159_v18  ;;  %v9163_v7 = vpop.f32.mrf.mxu0  ;;  %9759 = vmatprep.subr.bf16.mxu0 %v14164_v58  ;;  %v14171_v58 = vld [vmem:[%s20776_s1 + $0xbe8] ss:$16 sps:$4 sm:$0xff]  }
 0x2dd   :  { %v9244_v38 = vpop.f32.mrf.mxu1  ;;  %9840 = vmatprep.subr.bf16.mxu1 %v14167_v39  ;;  %v9164_v56 = vadd.f32 %v9163_v7, %v18074_v5  ;;  %v18365_v18 = vadd.f32 %v9242_v37, %v9162_v20  ;;  %9655 = vmatprep.mubr.bf16.mxu0 %v15593_v10  ;;  %v14176_v37 = vld [vmem:[%s20776_s1 + $0x9cc] ss:$16 sps:$4 sm:$0xff]   ;;  %v14174_v7 = vld [vmem:[%s20776_s1 + $0x9c8] ss:$16 sps:$4 sm:$0xff]  }
 0x2de   :  { %9736 = vmatprep.mubr.bf16.mxu1 %v15595_v11  ;;  %v9165_v39 = vpop.f32.mrf.mxu0  ;;  %v14179_v11 = vld [vmem:[%s20776_s1 + $0xbcc] ss:$16 sps:$4 sm:$0xff]  }
 0x2df   :  { %v9246_v53 = vpop.f32.mrf.mxu1  ;;  %v9166_v48 = vadd.f32 %v9165_v39, %v18086_v59  ;;  %v18376_v42 = vadd.f32 %v9244_v38, %v9164_v56  ;;  %9760 = vmatpush1.bf16.msra.mxu0 %v14162_v44  ;;  %v14177_v38 = vld [vmem:[%s20776_s1 + $0xbc8] ss:$16 sps:$4 sm:$0xff]  }
 0x2e0   :  { %9841 = vmatpush1.bf16.msra.mxu1 %v14165_v55  ;;  %v18378_v5 = vpop.f32.mrf.mxu0  ;;  %9761 = vmatprep.subr.bf16.mxu0 %v14170_v0 }
 0x2e1   :  { %20861 = vst [vmem:[#allocation72_spill] sm:$0xff] %v18378_v5  ;;  %v18380_v10 = vpop.f32.mrf.mxu1  ;;  %9842 = vmatprep.subr.bf16.mxu1 %v14173_v26  ;;  %v18388_v20 = vadd.f32 %v9246_v53, %v9166_v48 }
 0x2e2   :  { %20862 = vst [vmem:[#allocation73_spill] sm:$0xff] %v18380_v10  ;;  %v9171_v59 = vpop.f32.mrf.mxu0  ;;  %9656 = vmatmul.mubr.bf16.gmra.mxu0 %v15611_v16  ;;  %v14182_v16 = vld [vmem:[%s20776_s1 + $0x9ac] ss:$16 sps:$4 sm:$0xff]  }
 0x2e3   :  { %v9252_v44 = vpop.f32.mrf.mxu1  ;;  %9737 = vmatmul.mubr.bf16.gmra.mxu1 %v15619_v19  ;;  %v9172_v55 = vadd.f32 %v9171_v59, %v18104_v50  ;;  %9762 = vmatpush2.bf16.msra.mxu0 %v14168_v8  ;;  %v14185_v19 = vld [vmem:[%s20776_s1 + $0xbac] ss:$16 sps:$4 sm:$0xff]   ;;  %v14856_v8 = vld [vmem:[%s20777_s0 + $0x24] ss:$144 sps:$4 sm:$0xff]  }
 0x2e4   :  { %9843 = vmatpush2.bf16.msra.mxu1 %v14171_v58  ;;  %v9173_v0 = vpop.f32.mrf.mxu0  ;;  %9763 = vmatprep.subr.bf16.mxu0 %v14176_v37  ;;  %v14857_v58 = vld [vmem:[%s20777_s0 + $0x2c] ss:$144 sps:$4 sm:$0xff]   ;;  %v14183_v37 = vld [vmem:[%s20776_s1 + $0xba8] ss:$16 sps:$4 sm:$0xff]  }
 0x2e5   :  { %v9254_v26 = vpop.f32.mrf.mxu1  ;;  %9844 = vmatprep.subr.bf16.mxu1 %v14179_v11  ;;  %v9174_v50 = vadd.f32 %v9173_v0, %v18118_v4  ;;  %v18406_v56 = vadd.f32 %v9252_v44, %v9172_v55  ;;  %9777 = vmatprep.mubr.bf16.mxu0 %v14856_v8  ;;  %v14180_v4 = vld [vmem:[%s20776_s1 + $0x9a8] ss:$16 sps:$4 sm:$0xff]   ;;  %v14188_v11 = vld [vmem:[%s20776_s1 + $0x98c] ss:$16 sps:$4 sm:$0xff]  }
 0x2e6   :  { %9858 = vmatprep.mubr.bf16.mxu1 %v14857_v58  ;;  %v9175_v39 = vpop.f32.mrf.mxu0  ;;  %v14191_v59 = vld [vmem:[%s20776_s1 + $0xb8c] ss:$16 sps:$4 sm:$0xff]   ;;  %v14198_v58 = vld [vmem:[%s20776_s1 + $0x948] ss:$16 sps:$4 sm:$0xff]  }
 0x2e7   :  { %v9256_v53 = vpop.f32.mrf.mxu1  ;;  %v18414_v48 = vadd.f32 %v9254_v26, %v9174_v50  ;;  %9764 = vmatpush2.bf16.msra.mxu0 %v14174_v7  ;;  %v14186_v7 = vld [vmem:[%s20776_s1 + $0x988] ss:$16 sps:$4 sm:$0xff]   ;;  %v14194_v0 = vld [vmem:[%s20776_s1 + $0x96c] ss:$16 sps:$4 sm:$0xff]  }
 0x2e8   :  { %9845 = vmatpush2.bf16.msra.mxu1 %v14177_v38  ;;  %9765 = vmatprep.subr.bf16.mxu0 %v14182_v16  ;;  %v9176_v44 = vpop.f32.mrf.mxu0  ;;  %v14189_v38 = vld [vmem:[%s20776_s1 + $0xb88] ss:$16 sps:$4 sm:$0xff]   ;;  %v14197_v26 = vld [vmem:[%s20776_s1 + $0xb6c] ss:$16 sps:$4 sm:$0xff]  }
 0x2e9   :  { %9846 = vmatprep.subr.bf16.mxu1 %v14185_v19  ;;  %v9257_v55 = vpop.f32.mrf.mxu1  ;;  %v14192_v16 = vld [vmem:[%s20776_s1 + $0x968] ss:$16 sps:$4 sm:$0xff]   ;;  %v14200_v50 = vld [vmem:[%s20776_s1 + $0x94c] ss:$16 sps:$4 sm:$0xff]  }
 0x2ea   :  { %v14195_v19 = vld [vmem:[%s20776_s1 + $0xb68] ss:$16 sps:$4 sm:$0xff]   ;;  %v14203_v8 = vld [vmem:[%s20776_s1 + $0xb4c] ss:$16 sps:$4 sm:$0xff]  }
 0x2eb   :  { %9766 = vmatpush2.bf16.msra.mxu0 %v14180_v4  ;;  %v14201_v39 = vld [vmem:[%s20776_s1 + $0xb48] ss:$16 sps:$4 sm:$0xff]   ;;  %v14206_v53 = vld [vmem:[%s20776_s1 + $0x92c] ss:$16 sps:$4 sm:$0xff]  }
 0x2ec   :  { %9847 = vmatpush2.bf16.msra.mxu1 %v14183_v37  ;;  %9767 = vmatprep.subr.bf16.mxu0 %v14188_v11  ;;  %v14209_v4 = vld [vmem:[%s20776_s1 + $0xb2c] ss:$16 sps:$4 sm:$0xff]   ;;  %v14204_v37 = vld [vmem:[%s20776_s1 + $0x928] ss:$16 sps:$4 sm:$0xff]  }
 0x2ed   :  { %9848 = vmatprep.subr.bf16.mxu1 %v14191_v59  ;;  %v14207_v11 = vld [vmem:[%s20776_s1 + $0xb28] ss:$16 sps:$4 sm:$0xff]   ;;  %v14212_v59 = vld [vmem:[%s20776_s1 + $0x90c] ss:$16 sps:$4 sm:$0xff]  }
 0x2ee   :  { %v14215_v44 = vld [vmem:[%s20776_s1 + $0xb0c] ss:$16 sps:$4 sm:$0xff]   ;;  %v14210_v55 = vld [vmem:[%s20776_s1 + $0x908] ss:$16 sps:$4 sm:$0xff]  }
 0x2ef   :  { %9768 = vmatpush2.bf16.msra.mxu0 %v14186_v7  ;;  %v14213_v7 = vld [vmem:[%s20776_s1 + $0xb08] ss:$16 sps:$4 sm:$0xff]   ;;  %v14245_v10 = vld [vmem:[%s20776_s1 + $0xe6c] ss:$16 sps:$4 sm:$0xff]  }
 0x2f0   :  { %9849 = vmatpush2.bf16.msra.mxu1 %v14189_v38  ;;  %9769 = vmatprep.subr.bf16.mxu0 %v14194_v0  ;;  %v14218_v38 = vld [vmem:[%s20776_s1 + $0xcec] ss:$16 sps:$4 sm:$0xff]  }
 0x2f1   :  { %9850 = vmatprep.subr.bf16.mxu1 %v14197_v26  ;;  %v14221_v0 = vld [vmem:[%s20776_s1 + $0xeec] ss:$16 sps:$4 sm:$0xff]   ;;  %v14216_v26 = vld [vmem:[%s20776_s1 + $0xce8] ss:$16 sps:$4 sm:$0xff]  }
 0x2f3   :  { %9770 = vmatpush2.bf16.msra.mxu0 %v14192_v16  ;;  %v14219_v16 = vld [vmem:[%s20776_s1 + $0xee8] ss:$16 sps:$4 sm:$0xff]  }
 0x2f4   :  { %9851 = vmatpush2.bf16.msra.mxu1 %v14195_v19  ;;  %9771 = vmatprep.subr.bf16.mxu0 %v14200_v50  ;;  %v14224_v19 = vld [vmem:[%s20776_s1 + $0xccc] ss:$16 sps:$4 sm:$0xff]  }
 0x2f5   :  { %9852 = vmatprep.subr.bf16.mxu1 %v14203_v8  ;;  %v14227_v50 = vld [vmem:[%s20776_s1 + $0xecc] ss:$16 sps:$4 sm:$0xff]   ;;  %v14222_v8 = vld [vmem:[%s20776_s1 + $0xcc8] ss:$16 sps:$4 sm:$0xff]  }
 0x2f7   :  { %9772 = vmatpush2.bf16.msra.mxu0 %v14198_v58  ;;  %v14225_v58 = vld [vmem:[%s20776_s1 + $0xec8] ss:$16 sps:$4 sm:$0xff]  }
 0x2f8   :  { %9853 = vmatpush2.bf16.msra.mxu1 %v14201_v39  ;;  %9773 = vmatprep.subr.bf16.mxu0 %v14206_v53 }
 0x2f9   :  { %9854 = vmatprep.subr.bf16.mxu1 %v14209_v4  ;;  %v14858_v4 = vld [vmem:[%s20777_s0 + $0x20] ss:$144 sps:$4 sm:$0xff]  }
 0x2fb   :  { %9774 = vmatpush2.bf16.msra.mxu0 %v14204_v37  ;;  %v14859_v37 = vld [vmem:[%s20777_s0 + $0x28] ss:$144 sps:$4 sm:$0xff]  }
 0x2fc   :  { %9855 = vmatpush2.bf16.msra.mxu1 %v14207_v11  ;;  %9775 = vmatprep.subr.bf16.mxu0 %v14212_v59 }
 0x2fd   :  { %9856 = vmatprep.subr.bf16.mxu1 %v14215_v44 }
 0x2ff   :  { %9776 = vmatpush2.bf16.msra.mxu0 %v14210_v55  ;;  %v14230_v55 = vld [vmem:[%s20776_s1 + $0xcac] ss:$16 sps:$4 sm:$0xff]  }
 0x300   :  { %9857 = vmatpush2.bf16.msra.mxu1 %v14213_v7  ;;  %9907 = vmatprep.subr.bf16.mxu0 %v14218_v38  ;;  %v14233_v7 = vld [vmem:[%s20776_s1 + $0xeac] ss:$16 sps:$4 sm:$0xff]  }
 0x301   :  { %9988 = vmatprep.subr.bf16.mxu1 %v14221_v0 }
 0x302   :  { %v9293_v39 = vpop.f32.mrf.mxu0  ;;  %9778 = vmatmul.mubr.bf16.vlgmr.msra.gmra.mxu0 %v14858_v4 }
 0x303   :  { %v9374_v53 = vpop.f32.mrf.mxu1  ;;  %9859 = vmatmul.mubr.bf16.vlgmr.msra.gmra.mxu1 %v14859_v37  ;;  %v9294_v11 = vadd.f32 %v9293_v39, %v18217_v28  ;;  %9908 = vmatpush1.bf16.msra.mxu0 %v14216_v26  ;;  %v14860_v28 = vld [vmem:[%s20777_s0 + $0x144] ss:$144 sps:$4 sm:$0xff]   ;;  %v14228_v26 = vld [vmem:[%s20776_s1 + $0xca8] ss:$16 sps:$4 sm:$0xff]  }
 0x304   :  { %9989 = vmatpush1.bf16.msra.mxu1 %v14219_v16  ;;  %v9295_v59 = vpop.f32.mrf.mxu0  ;;  %9909 = vmatprep.subr.bf16.mxu0 %v14224_v19  ;;  %v14231_v16 = vld [vmem:[%s20776_s1 + $0xea8] ss:$16 sps:$4 sm:$0xff]   ;;  %v14861_v19 = vld [vmem:[%s20777_s0 + $0x14c] ss:$144 sps:$4 sm:$0xff]  }
 0x305   :  { %v9376_v44 = vpop.f32.mrf.mxu1  ;;  %9990 = vmatprep.subr.bf16.mxu1 %v14227_v50  ;;  %v9375_v38 = vadd.f32 %v9374_v53, %v9294_v11  ;;  %v9296_v0 = vadd.f32 %v9295_v59, %v18232_v1  ;;  %9787 = vmatprep.mubr.bf16.mxu0 %v14860_v28  ;;  %v14236_v11 = vld [vmem:[%s20776_s1 + $0xc8c] ss:$16 sps:$4 sm:$0xff]  }
 0x306   :  { %9868 = vmatprep.mubr.bf16.mxu1 %v14861_v19  ;;  %v9297_v50 = vpop.f32.mrf.mxu0  ;;  %v14239_v59 = vld [vmem:[%s20776_s1 + $0xe8c] ss:$16 sps:$4 sm:$0xff]  }
 0x307   :  { %v9378_v1 = vpop.f32.mrf.mxu1  ;;  %v18532_v39 = vadd.f32 %v9376_v44, %v9296_v0  ;;  %v9298_v53 = vadd.f32 %v9297_v50, %v18245_v36  ;;  %9910 = vmatpush1.bf16.msra.mxu0 %v14222_v8  ;;  %v14234_v36 = vld [vmem:[%s20776_s1 + $0xc88] ss:$16 sps:$4 sm:$0xff]   ;;  %v10879_v28 = vmax.f32 %v9375_v38, 0.0 }
 0x308   :  { %9991 = vmatpush1.bf16.msra.mxu1 %v14225_v58  ;;  %v18535_v4 = vpop.f32.mrf.mxu0  ;;  %9911 = vmatprep.subr.bf16.mxu0 %v14230_v55  ;;  %v14237_v8 = vld [vmem:[%s20776_s1 + $0xe88] ss:$16 sps:$4 sm:$0xff]   ;;  %v14862_v55 = vld [vmem:[%s20777_s0 + $0x140] ss:$144 sps:$4 sm:$0xff]  }
 0x309   :  { %20863 = vst [vmem:[#allocation74_spill] sm:$0xff] %v18532_v39  ;;  %20864 = vst [vmem:[#allocation75_spill] sm:$0xff] %v18535_v4  ;;  %v18537_v37 = vpop.f32.mrf.mxu1  ;;  %9992 = vmatprep.subr.bf16.mxu1 %v14233_v7  ;;  %v9379_v44 = vadd.f32 %v9378_v1, %v9298_v53  ;;  %v14863_v0 = vld [vmem:[%s20777_s0 + $0x148] ss:$144 sps:$4 sm:$0xff]  }
 0x30a   :  { %20865 = vst [vmem:[#allocation76_spill] sm:$0xff] %v18537_v37  ;;  %v9303_v58 = vpop.f32.mrf.mxu0  ;;  %9788 = vmatmul.mubr.bf16.gmra.mxu0 %v14862_v55  ;;  %v14242_v55 = vld [vmem:[%s20776_s1 + $0xc6c] ss:$16 sps:$4 sm:$0xff]   ;;  %v14456_v37 = vld [vmem:[%s20776_s1 + $0x15e8] ss:$16 sps:$4 sm:$0xff]  }
 0x30b   :  { %v9384_v7 = vpop.f32.mrf.mxu1  ;;  %9869 = vmatmul.mubr.bf16.gmra.mxu1 %v14863_v0  ;;  %v10883_v19 = vmax.f32 %v9379_v44, 0.0  ;;  %v9304_v50 = vadd.f32 %v9303_v58, %v18267_v22  ;;  %9912 = vmatpush1.bf16.msra.mxu0 %v14228_v26  ;;  %v14864_v22 = vld [vmem:[%s20777_s0 + $0x264] ss:$144 sps:$4 sm:$0xff]   ;;  %v14240_v26 = vld [vmem:[%s20776_s1 + $0xc68] ss:$16 sps:$4 sm:$0xff]  }
 0x30c   :  { %9993 = vmatpush1.bf16.msra.mxu1 %v14231_v16  ;;  %v9305_v1 = vpop.f32.mrf.mxu0  ;;  %9913 = vmatprep.subr.bf16.mxu0 %v14236_v11  ;;  %v14243_v16 = vld [vmem:[%s20776_s1 + $0xe68] ss:$16 sps:$4 sm:$0xff]   ;;  %v14865_v11 = vld [vmem:[%s20777_s0 + $0x26c] ss:$144 sps:$4 sm:$0xff]  }
 0x30d   :  { %v9386_v53 = vpop.f32.mrf.mxu1  ;;  %9994 = vmatprep.subr.bf16.mxu1 %v14239_v59  ;;  %v18564_v5 = vpack.c.bf16 %v10883_v19, %v10879_v28  ;;  %v9306_v38 = vadd.f32 %v9305_v1, %v18282_v3  ;;  %v9385_v44 = vadd.f32 %v9384_v7, %v9304_v50  ;;  %9797 = vmatprep.mubr.bf16.mxu0 %v14864_v22  ;;  %v14248_v19 = vld [vmem:[%s20776_s1 + $0xc4c] ss:$16 sps:$4 sm:$0xff]  }
 0x30e   :  { %9878 = vmatprep.mubr.bf16.mxu1 %v14865_v11  ;;  %v9307_v3 = vpop.f32.mrf.mxu0  ;;  %v14251_v50 = vld [vmem:[%s20776_s1 + $0xe4c] ss:$16 sps:$4 sm:$0xff]  }
 0x30f   :  { %20866 = vst [vmem:[#allocation77_spill] sm:$0xff] %v18564_v5  ;;  %v9388_v59 = vpop.f32.mrf.mxu1  ;;  %v9308_v58 = vadd.f32 %v9307_v3, %v18294_v32  ;;  %v18580_v7 = vadd.f32 %v9386_v53, %v9306_v38  ;;  %9914 = vmatpush1.bf16.msra.mxu0 %v14234_v36  ;;  %v14246_v32 = vld [vmem:[%s20776_s1 + $0xc48] ss:$16 sps:$4 sm:$0xff]   ;;  %v10887_v38 = vmax.f32 %v9385_v44, 0.0 }
 0x310   :  { %9995 = vmatpush1.bf16.msra.mxu1 %v14237_v8  ;;  %v18582_v0 = vpop.f32.mrf.mxu0  ;;  %9915 = vmatprep.subr.bf16.mxu0 %v14242_v55  ;;  %v14249_v36 = vld [vmem:[%s20776_s1 + $0xe48] ss:$16 sps:$4 sm:$0xff]  }
 0x311   :  { %20867 = vst [vmem:[#allocation78_spill] sm:$0xff] %v18580_v7  ;;  %20868 = vst [vmem:[#allocation79_spill] sm:$0xff] %v18582_v0  ;;  %v18584_v28 = vpop.f32.mrf.mxu1  ;;  %9996 = vmatprep.subr.bf16.mxu1 %v14245_v10  ;;  %v9389_v1 = vadd.f32 %v9388_v59, %v9308_v58  ;;  %v14866_v10 = vld [vmem:[%s20777_s0 + $0x260] ss:$144 sps:$4 sm:$0xff]   ;;  %v14867_v55 = vld [vmem:[%s20777_s0 + $0x268] ss:$144 sps:$4 sm:$0xff]  }
 0x312   :  { %20869 = vst [vmem:[#allocation80_spill] sm:$0xff] %v18584_v28  ;;  %v9313_v8 = vpop.f32.mrf.mxu0  ;;  %9798 = vmatmul.mubr.bf16.gmra.mxu0 %v14866_v10  ;;  %v14254_v58 = vld [vmem:[%s20776_s1 + $0xc2c] ss:$16 sps:$4 sm:$0xff]  }
 0x313   :  { %v9394_v53 = vpop.f32.mrf.mxu1  ;;  %9879 = vmatmul.mubr.bf16.gmra.mxu1 %v14867_v55  ;;  %v10891_v22 = vmax.f32 %v9389_v1, 0.0  ;;  %v9314_v11 = vadd.f32 %v9313_v8, %v18316_v29  ;;  %9916 = vmatpush1.bf16.msra.mxu0 %v14240_v26  ;;  %v14257_v10 = vld [vmem:[%s20776_s1 + $0xe2c] ss:$16 sps:$4 sm:$0xff]   ;;  %v14868_v29 = vld [vmem:[%s20777_s0 + $0x384] ss:$144 sps:$4 sm:$0xff]  }
 0x314   :  { %9997 = vmatpush1.bf16.msra.mxu1 %v14243_v16  ;;  %v9315_v3 = vpop.f32.mrf.mxu0  ;;  %9917 = vmatprep.subr.bf16.mxu0 %v14248_v19  ;;  %v14252_v26 = vld [vmem:[%s20776_s1 + $0xc28] ss:$16 sps:$4 sm:$0xff]   ;;  %v14869_v19 = vld [vmem:[%s20777_s0 + $0x38c] ss:$144 sps:$4 sm:$0xff]  }
 0x315   :  { %v9396_v59 = vpop.f32.mrf.mxu1  ;;  %9998 = vmatprep.subr.bf16.mxu1 %v14251_v50  ;;  %v18611_v5 = vpack.c.bf16 %v10891_v22, %v10887_v38  ;;  %v9316_v44 = vadd.f32 %v9315_v3, %v18331_v63  ;;  %v9395_v1 = vadd.f32 %v9394_v53, %v9314_v11  ;;  %9807 = vmatprep.mubr.bf16.mxu0 %v14868_v29  ;;  %v14255_v16 = vld [vmem:[%s20776_s1 + $0xe28] ss:$16 sps:$4 sm:$0xff]   ;;  %v14260_v22 = vld [vmem:[%s20776_s1 + $0xc0c] ss:$16 sps:$4 sm:$0xff]  }
 0x316   :  { %9888 = vmatprep.mubr.bf16.mxu1 %v14869_v19  ;;  %v9317_v63 = vpop.f32.mrf.mxu0  ;;  %v14263_v11 = vld [vmem:[%s20776_s1 + $0xe0c] ss:$16 sps:$4 sm:$0xff]   ;;  %v14258_v29 = vld [vmem:[%s20776_s1 + $0xc08] ss:$16 sps:$4 sm:$0xff]  }
 0x317   :  { %20870 = vst [vmem:[#allocation81_spill] sm:$0xff] %v18611_v5  ;;  %v9398_v50 = vpop.f32.mrf.mxu1  ;;  %v9318_v8 = vadd.f32 %v9317_v63, %v18343_v14  ;;  %v18627_v53 = vadd.f32 %v9396_v59, %v9316_v44  ;;  %9918 = vmatpush1.bf16.msra.mxu0 %v14246_v32  ;;  %v14870_v32 = vld [vmem:[%s20777_s0 + $0x380] ss:$144 sps:$4 sm:$0xff]   ;;  %v14871_v59 = vld [vmem:[%s20777_s0 + $0x388] ss:$144 sps:$4 sm:$0xff]  }
 0x318   :  { %9999 = vmatpush1.bf16.msra.mxu1 %v14249_v36  ;;  %v18629_v55 = vpop.f32.mrf.mxu0  ;;  %9919 = vmatprep.subr.bf16.mxu0 %v14254_v58  ;;  %v10895_v58 = vmax.f32 %v9395_v1, 0.0  ;;  %v14261_v19 = vld [vmem:[%s20776_s1 + $0xe08] ss:$16 sps:$4 sm:$0xff]   ;;  %v14266_v1 = vld [vmem:[%s20776_s1 + $0xdec] ss:$16 sps:$4 sm:$0xff]  }
 0x319   :  { %20871 = vst [vmem:[#allocation82_spill] sm:$0xff] %v18627_v53  ;;  %20872 = vst [vmem:[#allocation83_spill] sm:$0xff] %v18629_v55  ;;  %v18631_v38 = vpop.f32.mrf.mxu1  ;;  %10000 = vmatprep.subr.bf16.mxu1 %v14257_v10  ;;  %v9399_v3 = vadd.f32 %v9398_v50, %v9318_v8  ;;  %v14348_v5 = vld [vmem:[%s20776_s1 + $0x1028] ss:$16 sps:$4 sm:$0xff]  }
 0x31a   :  { %20873 = vst [vmem:[#allocation84_spill] sm:$0xff] %v18631_v38  ;;  %v9323_v14 = vpop.f32.mrf.mxu0  ;;  %9808 = vmatmul.mubr.bf16.gmra.mxu0 %v14870_v32  ;;  %v14264_v32 = vld [vmem:[%s20776_s1 + $0xde8] ss:$16 sps:$4 sm:$0xff]  }
 0x31b   :  { %v9404_v36 = vpop.f32.mrf.mxu1  ;;  %9889 = vmatmul.mubr.bf16.gmra.mxu1 %v14871_v59  ;;  %v10899_v10 = vmax.f32 %v9399_v3, 0.0  ;;  %v9324_v44 = vadd.f32 %v9323_v14, %v18365_v18  ;;  %9920 = vmatpush1.bf16.msra.mxu0 %v14252_v26  ;;  %v14269_v18 = vld [vmem:[%s20776_s1 + $0xfec] ss:$16 sps:$4 sm:$0xff]   ;;  %v14363_v38 = vld [vmem:[%s20776_s1 + $0x13e8] ss:$16 sps:$4 sm:$0xff]  }
 0x31c   :  { %10001 = vmatpush1.bf16.msra.mxu1 %v14255_v16  ;;  %v9325_v63 = vpop.f32.mrf.mxu0  ;;  %9921 = vmatprep.subr.bf16.mxu0 %v14260_v22 }
 0x31d   :  { %v9406_v50 = vpop.f32.mrf.mxu1  ;;  %10002 = vmatprep.subr.bf16.mxu1 %v14263_v11  ;;  %v18658_v26 = vpack.c.bf16 %v10899_v10, %v10895_v58  ;;  %v9326_v16 = vadd.f32 %v9325_v63, %v18376_v42  ;;  %v9405_v8 = vadd.f32 %v9404_v36, %v9324_v44  ;;  %9817 = vmatprep.mubr.bf16.mxu0 %v15851_v40  ;;  %v14267_v42 = vld [vmem:[%s20776_s1 + $0xfe8] ss:$16 sps:$4 sm:$0xff]  }
 0x31e   :  { %9898 = vmatprep.mubr.bf16.mxu1 %v15853_v41  ;;  %v9327_v3 = vpop.f32.mrf.mxu0  ;;  %v14272_v41 = vld [vmem:[%s20776_s1 + $0xdcc] ss:$16 sps:$4 sm:$0xff]   ;;  %v14270_v63 = vld [vmem:[%s20776_s1 + $0xdc8] ss:$16 sps:$4 sm:$0xff]  }
 0x31f   :  { %20874 = vst [vmem:[#allocation85_spill] sm:$0xff] %v18658_v26  ;;  %v9408_v22 = vpop.f32.mrf.mxu1  ;;  %v9328_v11 = vadd.f32 %v9327_v3, %v18388_v20  ;;  %v18664_v14 = vadd.f32 %v9406_v50, %v9326_v16  ;;  %9922 = vmatpush1.bf16.msra.mxu0 %v14258_v29  ;;  %v14275_v20 = vld [vmem:[%s20776_s1 + $0xfcc] ss:$16 sps:$4 sm:$0xff]   ;;  %v10903_v44 = vmax.f32 %v9405_v8, 0.0  ;;  %v14273_v50 = vld [vmem:[%s20776_s1 + $0xfc8] ss:$16 sps:$4 sm:$0xff]  }
 0x320   :  { %10003 = vmatpush1.bf16.msra.mxu1 %v14261_v19  ;;  %v18672_v36 = vpop.f32.mrf.mxu0  ;;  %9923 = vmatprep.subr.bf16.mxu0 %v14266_v1  ;;  %v14872_v3 = vld [vmem:[%s20777_s0 + $0x34] ss:$144 sps:$4 sm:$0xff]  }
 0x321   :  { %20875 = vst [vmem:[#allocation86_spill] sm:$0xff] %v18664_v14  ;;  %20876 = vst [vmem:[#allocation87_spill] sm:$0xff] %v18672_v36  ;;  %v18674_v40 = vpop.f32.mrf.mxu1  ;;  %10004 = vmatprep.subr.bf16.mxu1 %v14269_v18  ;;  %v9409_v59 = vadd.f32 %v9408_v22, %v9328_v11  ;;  %v14873_v22 = vld [vmem:[%s20777_s0 + $0x3c] ss:$144 sps:$4 sm:$0xff]  }
 0x322   :  { %20877 = vst [vmem:[#allocation88_spill] sm:$0xff] %v18674_v40  ;;  %v9333_v58 = vpop.f32.mrf.mxu0  ;;  %9818 = vmatmul.mubr.bf16.gmra.mxu0 %v15869_v46  ;;  %v14278_v46 = vld [vmem:[%s20776_s1 + $0xdac] ss:$16 sps:$4 sm:$0xff]  }
 0x323   :  { %v9414_v10 = vpop.f32.mrf.mxu1  ;;  %9899 = vmatmul.mubr.bf16.gmra.mxu1 %v15877_v51  ;;  %v10907_v29 = vmax.f32 %v9409_v59, 0.0  ;;  %v9334_v19 = vadd.f32 %v9333_v58, %v18406_v56  ;;  %9924 = vmatpush2.bf16.msra.mxu0 %v14264_v32  ;;  %v14281_v51 = vld [vmem:[%s20776_s1 + $0xfac] ss:$16 sps:$4 sm:$0xff]  }
 0x324   :  { %10005 = vmatpush2.bf16.msra.mxu1 %v14267_v42  ;;  %v9335_v1 = vpop.f32.mrf.mxu0  ;;  %9925 = vmatprep.subr.bf16.mxu0 %v14272_v41  ;;  %v14279_v41 = vld [vmem:[%s20776_s1 + $0xfa8] ss:$16 sps:$4 sm:$0xff]   ;;  %v14287_v59 = vld [vmem:[%s20776_s1 + $0xf8c] ss:$16 sps:$4 sm:$0xff]  }
 0x325   :  { %v9416_v18 = vpop.f32.mrf.mxu1  ;;  %10006 = vmatprep.subr.bf16.mxu1 %v14275_v20  ;;  %v18697_v56 = vpack.c.bf16 %v10907_v29, %v10903_v44  ;;  %v9336_v16 = vadd.f32 %v9335_v1, %v18414_v48  ;;  %v18700_v8 = vadd.f32 %v9414_v10, %v9334_v19  ;;  %9939 = vmatprep.mubr.bf16.mxu0 %v14872_v3  ;;  %v14276_v48 = vld [vmem:[%s20776_s1 + $0xda8] ss:$16 sps:$4 sm:$0xff]   ;;  %v14284_v20 = vld [vmem:[%s20776_s1 + $0xd8c] ss:$16 sps:$4 sm:$0xff]  }
 0x326   :  { %10020 = vmatprep.mubr.bf16.mxu1 %v14873_v22  ;;  %v9337_v11 = vpop.f32.mrf.mxu0  ;;  %v14282_v44 = vld [vmem:[%s20776_s1 + $0xd88] ss:$16 sps:$4 sm:$0xff]   ;;  %v14290_v19 = vld [vmem:[%s20776_s1 + $0xd6c] ss:$16 sps:$4 sm:$0xff]  }
 0x327   :  { %20878 = vst [vmem:[#allocation89_spill] sm:$0xff] %v18697_v56  ;;  %20879 = vst [vmem:[#allocation90_spill] sm:$0xff] %v18700_v8  ;;  %v9418_v32 = vpop.f32.mrf.mxu1  ;;  %v18708_v42 = vadd.f32 %v9416_v18, %v9336_v16  ;;  %9926 = vmatpush2.bf16.msra.mxu0 %v14270_v63  ;;  %v14285_v29 = vld [vmem:[%s20776_s1 + $0xf88] ss:$16 sps:$4 sm:$0xff]   ;;  %v14293_v63 = vld [vmem:[%s20776_s1 + $0xf6c] ss:$16 sps:$4 sm:$0xff]  }
 0x328   :  { %10007 = vmatpush2.bf16.msra.mxu1 %v14273_v50  ;;  %9927 = vmatprep.subr.bf16.mxu0 %v14278_v46  ;;  %v9338_v58 = vpop.f32.mrf.mxu0  ;;  %v14288_v50 = vld [vmem:[%s20776_s1 + $0xd68] ss:$16 sps:$4 sm:$0xff]   ;;  %v14296_v18 = vld [vmem:[%s20776_s1 + $0xd4c] ss:$16 sps:$4 sm:$0xff]  }
 0x329   :  { %20880 = vst [vmem:[#allocation91_spill] sm:$0xff] %v18708_v42  ;;  %10008 = vmatprep.subr.bf16.mxu1 %v14281_v51  ;;  %v9419_v10 = vpop.f32.mrf.mxu1  ;;  %v14291_v1 = vld [vmem:[%s20776_s1 + $0xf68] ss:$16 sps:$4 sm:$0xff]   ;;  %v14299_v46 = vld [vmem:[%s20776_s1 + $0xf4c] ss:$16 sps:$4 sm:$0xff]   ;;  %v1347_v58 = vsub.s32 2, %v15959_v21 }
 0x32a   :  { %v14294_v51 = vld [vmem:[%s20776_s1 + $0xd48] ss:$16 sps:$4 sm:$0xff]   ;;  %v14302_v3 = vld [vmem:[%s20776_s1 + $0xd2c] ss:$16 sps:$4 sm:$0xff]  }
 0x32b   :  { %9928 = vmatpush2.bf16.msra.mxu0 %v14276_v48  ;;  %v14297_v16 = vld [vmem:[%s20776_s1 + $0xf48] ss:$16 sps:$4 sm:$0xff]   ;;  %v14305_v22 = vld [vmem:[%s20776_s1 + $0xf2c] ss:$16 sps:$4 sm:$0xff]  }
 0x32c   :  { %10009 = vmatpush2.bf16.msra.mxu1 %v14279_v41  ;;  %9929 = vmatprep.subr.bf16.mxu0 %v14284_v20  ;;  %v14300_v11 = vld [vmem:[%s20776_s1 + $0xd28] ss:$16 sps:$4 sm:$0xff]   ;;  %v14308_v48 = vld [vmem:[%s20776_s1 + $0xd0c] ss:$16 sps:$4 sm:$0xff]  }
 0x32d   :  { %10010 = vmatprep.subr.bf16.mxu1 %v14287_v59  ;;  %v14303_v32 = vld [vmem:[%s20776_s1 + $0xf28] ss:$16 sps:$4 sm:$0xff]   ;;  %v14311_v41 = vld [vmem:[%s20776_s1 + $0xf0c] ss:$16 sps:$4 sm:$0xff]  }
 0x32e   :  { %v14306_v20 = vld [vmem:[%s20776_s1 + $0xd08] ss:$16 sps:$4 sm:$0xff]   ;;  %v14314_v10 = vld [vmem:[%s20776_s1 + $0x10ec] ss:$16 sps:$4 sm:$0xff]  }
 0x32f   :  { %9930 = vmatpush2.bf16.msra.mxu0 %v14282_v44  ;;  %v14309_v59 = vld [vmem:[%s20776_s1 + $0xf08] ss:$16 sps:$4 sm:$0xff]   ;;  %v14317_v44 = vld [vmem:[%s20776_s1 + $0x12ec] ss:$16 sps:$4 sm:$0xff]  }
 0x330   :  { %10011 = vmatpush2.bf16.msra.mxu1 %v14285_v29  ;;  %9931 = vmatprep.subr.bf16.mxu0 %v14290_v19  ;;  %v1351_v29 = vsub.s32 3, %v15959_v21  ;;  %v14874_v19 = vld [vmem:[%s20778_s2] sm:$0xf]  ;;  %v14320_v21 = vld [vmem:[%s20776_s1 + $0x10cc] ss:$16 sps:$4 sm:$0xff]  }
 0x331   :  { %10012 = vmatprep.subr.bf16.mxu1 %v14293_v63  ;;  %v18787_v63 = vrot.slane %v14874_v19, %v1347_v58  ;;  %v14329_v58 = vld [vmem:[%s20776_s1 + $0x12ac] ss:$16 sps:$4 sm:$0xff]   ;;  %v14336_v8 = vld [vmem:[%s20776_s1 + $0x1068] ss:$16 sps:$4 sm:$0xff]  }
 0x333   :  { %9932 = vmatpush2.bf16.msra.mxu0 %v14288_v50  ;;  %v14312_v50 = vld [vmem:[%s20776_s1 + $0x10e8] ss:$16 sps:$4 sm:$0xff]  }
 0x334   :  { %10013 = vmatpush2.bf16.msra.mxu1 %v14291_v1  ;;  %9933 = vmatprep.subr.bf16.mxu0 %v14296_v18  ;;  %v14315_v1 = vld [vmem:[%s20776_s1 + $0x12e8] ss:$16 sps:$4 sm:$0xff]   ;;  %v14323_v18 = vld [vmem:[%s20776_s1 + $0x12cc] ss:$16 sps:$4 sm:$0xff]  }
 0x335   :  { %10014 = vmatprep.subr.bf16.mxu1 %v14299_v46  ;;  %v18801_v46 = vrot.slane %v14874_v19, %v1351_v29  ;;  %v14877_v29 = vld [vmem:[%s20777_s0 + $0x154] ss:$144 sps:$4 sm:$0xff]   ;;  %v14878_v19 = vld [vmem:[%s20777_s0 + $0x15c] ss:$144 sps:$4 sm:$0xff]  }
 0x337   :  { %9934 = vmatpush2.bf16.msra.mxu0 %v14294_v51 }
 0x338   :  { %10015 = vmatpush2.bf16.msra.mxu1 %v14297_v16  ;;  %9935 = vmatprep.subr.bf16.mxu0 %v14302_v3  ;;  %v14875_v3 = vld [vmem:[%s20777_s0 + $0x30] ss:$144 sps:$4 sm:$0xff]  }
 0x339   :  { %10016 = vmatprep.subr.bf16.mxu1 %v14305_v22  ;;  %v14876_v22 = vld [vmem:[%s20777_s0 + $0x38] ss:$144 sps:$4 sm:$0xff]  }
 0x33b   :  { %9936 = vmatpush2.bf16.msra.mxu0 %v14300_v11 }
 0x33c   :  { %10017 = vmatpush2.bf16.msra.mxu1 %v14303_v32  ;;  %9937 = vmatprep.subr.bf16.mxu0 %v14308_v48  ;;  %v14318_v32 = vld [vmem:[%s20776_s1 + $0x10c8] ss:$16 sps:$4 sm:$0xff]  }
 0x33d   :  { %10018 = vmatprep.subr.bf16.mxu1 %v14311_v41  ;;  %v14321_v48 = vld [vmem:[%s20776_s1 + $0x12c8] ss:$16 sps:$4 sm:$0xff]  }
 0x33f   :  { %9938 = vmatpush2.bf16.msra.mxu0 %v14306_v20 }
 0x340   :  { %10019 = vmatpush2.bf16.msra.mxu1 %v14309_v59  ;;  %10069 = vmatprep.subr.bf16.mxu0 %v14314_v10  ;;  %v14326_v59 = vld [vmem:[%s20776_s1 + $0x10ac] ss:$16 sps:$4 sm:$0xff]  }
 0x341   :  { %10150 = vmatprep.subr.bf16.mxu1 %v14317_v44 }
 0x342   :  { %v9455_v51 = vpop.f32.mrf.mxu0  ;;  %9940 = vmatmul.mubr.bf16.vlgmr.msra.gmra.mxu0 %v14875_v3 }
 0x343   :  { %v9536_v16 = vpop.f32.mrf.mxu1  ;;  %10021 = vmatmul.mubr.bf16.vlgmr.msra.gmra.mxu1 %v14876_v22  ;;  %v9456_v11 = vadd.f32 %v9455_v51, %v18787_v63  ;;  %10070 = vmatpush1.bf16.msra.mxu0 %v14312_v50  ;;  %v14324_v51 = vld [vmem:[%s20776_s1 + $0x10a8] ss:$16 sps:$4 sm:$0xff]  }
 0x344   :  { %10151 = vmatpush1.bf16.msra.mxu1 %v14315_v1  ;;  %v9457_v41 = vpop.f32.mrf.mxu0  ;;  %10071 = vmatprep.subr.bf16.mxu0 %v14320_v21 }
 0x345   :  { %v9538_v20 = vpop.f32.mrf.mxu1  ;;  %10152 = vmatprep.subr.bf16.mxu1 %v14323_v18  ;;  %v18822_v10 = vadd.f32 %v9536_v16, %v9456_v11  ;;  %v9458_v44 = vadd.f32 %v9457_v41, %v18801_v46  ;;  %9949 = vmatprep.mubr.bf16.mxu0 %v14877_v29  ;;  %v14327_v16 = vld [vmem:[%s20776_s1 + $0x12a8] ss:$16 sps:$4 sm:$0xff]   ;;  %v14332_v11 = vld [vmem:[%s20776_s1 + $0x108c] ss:$16 sps:$4 sm:$0xff]   ;;  %v14879_v41 = vld [vmem:[%s20777_s0 + $0x150] ss:$144 sps:$4 sm:$0xff]  }
 0x346   :  { %10030 = vmatprep.mubr.bf16.mxu1 %v14878_v19  ;;  %v9459_v50 = vpop.f32.mrf.mxu0  ;;  %v14333_v29 = vld [vmem:[%s20776_s1 + $0x1288] ss:$16 sps:$4 sm:$0xff]  }
 0x347   :  { %v9540_v1 = vpop.f32.mrf.mxu1  ;;  %v18831_v21 = vadd.f32 %v9538_v20, %v9458_v44  ;;  %v9460_v18 = vadd.f32 %v9459_v50, %v18787_v63  ;;  %10072 = vmatpush1.bf16.msra.mxu0 %v14318_v32  ;;  %v14335_v32 = vld [vmem:[%s20776_s1 + $0x128c] ss:$16 sps:$4 sm:$0xff]   ;;  %v14880_v20 = vld [vmem:[%s20777_s0 + $0x158] ss:$144 sps:$4 sm:$0xff]  }
 0x348   :  { %10153 = vmatpush1.bf16.msra.mxu1 %v14321_v48  ;;  %v18840_v3 = vpop.f32.mrf.mxu0  ;;  %10073 = vmatprep.subr.bf16.mxu0 %v14326_v59  ;;  %v14330_v44 = vld [vmem:[%s20776_s1 + $0x1088] ss:$16 sps:$4 sm:$0xff]   ;;  %v14338_v50 = vld [vmem:[%s20776_s1 + $0x106c] ss:$16 sps:$4 sm:$0xff]  }
 0x349   :  { %v18842_v22 = vpop.f32.mrf.mxu1  ;;  %10154 = vmatprep.subr.bf16.mxu1 %v14329_v58  ;;  %v18850_v48 = vadd.f32 %v9540_v1, %v9460_v18  ;;  %v14341_v1 = vld [vmem:[%s20776_s1 + $0x126c] ss:$16 sps:$4 sm:$0xff]  }
 0x34a   :  { %9950 = vmatmul.mubr.bf16.gmra.mxu0 %v14879_v41  ;;  %v9465_v59 = vpop.f32.mrf.mxu0 }
 0x34b   :  { %10031 = vmatmul.mubr.bf16.gmra.mxu1 %v14880_v20  ;;  %v9546_v58 = vpop.f32.mrf.mxu1  ;;  %10074 = vmatpush1.bf16.msra.mxu0 %v14324_v51  ;;  %v9466_v19 = vadd.f32 %v9465_v59, %v18787_v63 }
 0x34c   :  { %10155 = vmatpush1.bf16.msra.mxu1 %v14327_v16  ;;  %10075 = vmatprep.subr.bf16.mxu0 %v14332_v11  ;;  %v9467_v18 = vpop.f32.mrf.mxu0  ;;  %v14881_v16 = vld [vmem:[%s20777_s0 + $0x274] ss:$144 sps:$4 sm:$0xff]   ;;  %v14882_v11 = vld [vmem:[%s20777_s0 + $0x27c] ss:$144 sps:$4 sm:$0xff]  }
 0x34d   :  { %10156 = vmatprep.subr.bf16.mxu1 %v14335_v32  ;;  %v9548_v51 = vpop.f32.mrf.mxu1  ;;  %9959 = vmatprep.mubr.bf16.mxu0 %v14881_v16  ;;  %v9468_v32 = vadd.f32 %v9467_v18, %v18801_v46  ;;  %v18878_v41 = vadd.f32 %v9546_v58, %v9466_v19  ;;  %v14339_v16 = vld [vmem:[%s20776_s1 + $0x1268] ss:$16 sps:$4 sm:$0xff]   ;;  %v14344_v58 = vld [vmem:[%s20776_s1 + $0x104c] ss:$16 sps:$4 sm:$0xff]  }
 0x34e   :  { %10040 = vmatprep.mubr.bf16.mxu1 %v14882_v11  ;;  %v9469_v20 = vpop.f32.mrf.mxu0 }
 0x34f   :  { %v9550_v59 = vpop.f32.mrf.mxu1  ;;  %10076 = vmatpush1.bf16.msra.mxu0 %v14330_v44  ;;  %v9470_v56 = vadd.f32 %v9469_v20, %v18787_v63  ;;  %v18887_v42 = vadd.f32 %v9548_v51, %v9468_v32  ;;  %v14347_v44 = vld [vmem:[%s20776_s1 + $0x124c] ss:$16 sps:$4 sm:$0xff]   ;;  %v14883_v51 = vld [vmem:[%s20777_s0 + $0x270] ss:$144 sps:$4 sm:$0xff]   ;;  %v14342_v32 = vld [vmem:[%s20776_s1 + $0x1048] ss:$16 sps:$4 sm:$0xff]  }
 0x350   :  { %10157 = vmatpush1.bf16.msra.mxu1 %v14333_v29  ;;  %10077 = vmatprep.subr.bf16.mxu0 %v14338_v50  ;;  %v18895_v29 = vpop.f32.mrf.mxu0  ;;  %v14884_v50 = vld [vmem:[%s20777_s0 + $0x278] ss:$144 sps:$4 sm:$0xff]  }
 0x351   :  { %10158 = vmatprep.subr.bf16.mxu1 %v14341_v1  ;;  %v18897_v19 = vpop.f32.mrf.mxu1  ;;  %v18899_v18 = vadd.f32 %v9550_v59, %v9470_v56  ;;  %v14345_v56 = vld [vmem:[%s20776_s1 + $0x1248] ss:$16 sps:$4 sm:$0xff]   ;;  %v14350_v59 = vld [vmem:[%s20776_s1 + $0x102c] ss:$16 sps:$4 sm:$0xff]  }
 0x352   :  { %9960 = vmatmul.mubr.bf16.gmra.mxu0 %v14883_v51  ;;  %v9475_v1 = vpop.f32.mrf.mxu0 }
 0x353   :  { %10041 = vmatmul.mubr.bf16.gmra.mxu1 %v14884_v50  ;;  %v9556_v11 = vpop.f32.mrf.mxu1  ;;  %10078 = vmatpush1.bf16.msra.mxu0 %v14336_v8  ;;  %v9476_v20 = vadd.f32 %v9475_v1, %v18787_v63  ;;  %v14353_v8 = vld [vmem:[%s20776_s1 + $0x122c] ss:$16 sps:$4 sm:$0xff]   ;;  %v14885_v50 = vld [vmem:[%s20777_s0 + $0x394] ss:$144 sps:$4 sm:$0xff]  }
 0x354   :  { %10159 = vmatpush1.bf16.msra.mxu1 %v14339_v16  ;;  %10079 = vmatprep.subr.bf16.mxu0 %v14344_v58  ;;  %v9477_v16 = vpop.f32.mrf.mxu0  ;;  %v14886_v58 = vld [vmem:[%s20777_s0 + $0x39c] ss:$144 sps:$4 sm:$0xff]  }
 0x355   :  { %10160 = vmatprep.subr.bf16.mxu1 %v14347_v44  ;;  %v9558_v51 = vpop.f32.mrf.mxu1  ;;  %9969 = vmatprep.mubr.bf16.mxu0 %v14885_v50  ;;  %v9478_v44 = vadd.f32 %v9477_v16, %v18801_v46  ;;  %v18927_v1 = vadd.f32 %v9556_v11, %v9476_v20  ;;  %v14351_v50 = vld [vmem:[%s20776_s1 + $0x1228] ss:$16 sps:$4 sm:$0xff]   ;;  %v14356_v11 = vld [vmem:[%s20776_s1 + $0x100c] ss:$16 sps:$4 sm:$0xff]  }
 0x356   :  { %10050 = vmatprep.mubr.bf16.mxu1 %v14886_v58  ;;  %v9479_v26 = vpop.f32.mrf.mxu0  ;;  %v14354_v58 = vld [vmem:[%s20776_s1 + $0x1008] ss:$16 sps:$4 sm:$0xff]  }
 0x357   :  { %v9560_v14 = vpop.f32.mrf.mxu1  ;;  %10080 = vmatpush1.bf16.msra.mxu0 %v14342_v32  ;;  %v9480_v40 = vadd.f32 %v9479_v26, %v18787_v63  ;;  %v18936_v53 = vadd.f32 %v9558_v51, %v9478_v44  ;;  %v14359_v32 = vld [vmem:[%s20776_s1 + $0x120c] ss:$16 sps:$4 sm:$0xff]   ;;  %v14887_v26 = vld [vmem:[%s20777_s0 + $0x390] ss:$144 sps:$4 sm:$0xff]  }
 0x358   :  { %10161 = vmatpush1.bf16.msra.mxu1 %v14345_v56  ;;  %10081 = vmatprep.subr.bf16.mxu0 %v14350_v59  ;;  %v18944_v56 = vpop.f32.mrf.mxu0  ;;  %v14888_v59 = vld [vmem:[%s20777_s0 + $0x398] ss:$144 sps:$4 sm:$0xff]   ;;  %v14362_v44 = vld [vmem:[%s20776_s1 + $0x11ec] ss:$16 sps:$4 sm:$0xff]  }
 0x359   :  { %10162 = vmatprep.subr.bf16.mxu1 %v14353_v8  ;;  %v18946_v20 = vpop.f32.mrf.mxu1  ;;  %v18948_v16 = vadd.f32 %v9560_v14, %v9480_v40  ;;  %v14357_v14 = vld [vmem:[%s20776_s1 + $0x1208] ss:$16 sps:$4 sm:$0xff]  }
 0x35a   :  { %9970 = vmatmul.mubr.bf16.gmra.mxu0 %v14887_v26  ;;  %v9485_v8 = vpop.f32.mrf.mxu0 }
 0x35b   :  { %10051 = vmatmul.mubr.bf16.gmra.mxu1 %v14888_v59  ;;  %v9566_v51 = vpop.f32.mrf.mxu1  ;;  %10082 = vmatpush1.bf16.msra.mxu0 %v14348_v5  ;;  %v9486_v40 = vadd.f32 %v9485_v8, %v18787_v63  ;;  %v14365_v5 = vld [vmem:[%s20776_s1 + $0x13ec] ss:$16 sps:$4 sm:$0xff]   ;;  %v14360_v8 = vld [vmem:[%s20776_s1 + $0x11e8] ss:$16 sps:$4 sm:$0xff]  }
 0x35c   :  { %10163 = vmatpush1.bf16.msra.mxu1 %v14351_v50  ;;  %10083 = vmatprep.subr.bf16.mxu0 %v14356_v11  ;;  %v9487_v50 = vpop.f32.mrf.mxu0 }
 0x35d   :  { %10164 = vmatprep.subr.bf16.mxu1 %v14359_v32  ;;  %v9568_v26 = vpop.f32.mrf.mxu1  ;;  %9979 = vmatprep.mubr.bf16.mxu0 %v16157_v23  ;;  %v9488_v59 = vadd.f32 %v9487_v50, %v18801_v46  ;;  %v18972_v36 = vadd.f32 %v9566_v51, %v9486_v40  ;;  %v14371_v51 = vld [vmem:[%s20776_s1 + $0x13cc] ss:$16 sps:$4 sm:$0xff]   ;;  %v14366_v50 = vld [vmem:[%s20776_s1 + $0x11c8] ss:$16 sps:$4 sm:$0xff]  }
 0x35e   :  { %10060 = vmatprep.mubr.bf16.mxu1 %v16159_v24  ;;  %v9489_v11 = vpop.f32.mrf.mxu0  ;;  %v14368_v24 = vld [vmem:[%s20776_s1 + $0x11cc] ss:$16 sps:$4 sm:$0xff]  }
 0x35f   :  { %v9570_v32 = vpop.f32.mrf.mxu1  ;;  %10084 = vmatpush1.bf16.msra.mxu0 %v14354_v58  ;;  %v9490_v23 = vadd.f32 %v9489_v11, %v18787_v63  ;;  %v18981_v7 = vadd.f32 %v9568_v26, %v9488_v59  ;;  %v14369_v26 = vld [vmem:[%s20776_s1 + $0x13c8] ss:$16 sps:$4 sm:$0xff]  }
 0x360   :  { %10165 = vmatpush1.bf16.msra.mxu1 %v14357_v14  ;;  %10085 = vmatprep.subr.bf16.mxu0 %v14362_v44  ;;  %v18989_v58 = vpop.f32.mrf.mxu0 }
 0x361   :  { %10166 = vmatprep.subr.bf16.mxu1 %v14365_v5  ;;  %v18991_v14 = vpop.f32.mrf.mxu1  ;;  %v18993_v40 = vadd.f32 %v9570_v32, %v9490_v23  ;;  %v14890_v23 = vld [vmem:[%s20777_s0 + $0x4c] ss:$144 sps:$4 sm:$0xff]  }
 0x362   :  { %9980 = vmatmul.mubr.bf16.gmra.mxu0 %v16181_v47  ;;  %v9495_v44 = vpop.f32.mrf.mxu0  ;;  %v14374_v47 = vld [vmem:[%s20776_s1 + $0x11ac] ss:$16 sps:$4 sm:$0xff]  }
 0x363   :  { %10061 = vmatmul.mubr.bf16.gmra.mxu1 %v16186_v52  ;;  %v9576_v5 = vpop.f32.mrf.mxu1  ;;  %10086 = vmatpush2.bf16.msra.mxu0 %v14360_v8  ;;  %v9496_v59 = vadd.f32 %v9495_v44, %v18787_v63  ;;  %v14377_v52 = vld [vmem:[%s20776_s1 + $0x13ac] ss:$16 sps:$4 sm:$0xff]   ;;  %v14889_v63 = vld [vmem:[%s20777_s0 + $0x44] ss:$144 sps:$4 sm:$0xff]   ;;  %v14372_v44 = vld [vmem:[%s20776_s1 + $0x11a8] ss:$16 sps:$4 sm:$0xff]  }
 0x364   :  { %10167 = vmatpush2.bf16.msra.mxu1 %v14363_v38  ;;  %10087 = vmatprep.subr.bf16.mxu0 %v14368_v24  ;;  %v9497_v38 = vpop.f32.mrf.mxu0 }
 0x365   :  { %10168 = vmatprep.subr.bf16.mxu1 %v14371_v51  ;;  %v9578_v11 = vpop.f32.mrf.mxu1  ;;  %v9498_v32 = vadd.f32 %v9497_v38, %v18801_v46  ;;  %v19011_v8 = vadd.f32 %v9576_v5, %v9496_v59  ;;  %10101 = vmatprep.mubr.bf16.mxu0 %v14889_v63  ;;  %v14375_v5 = vld [vmem:[%s20776_s1 + $0x13a8] ss:$16 sps:$4 sm:$0xff]   ;;  %v14380_v38 = vld [vmem:[%s20776_s1 + $0x118c] ss:$16 sps:$4 sm:$0xff]  }
 0x366   :  { %10182 = vmatprep.mubr.bf16.mxu1 %v14890_v23  ;;  %v9499_v24 = vpop.f32.mrf.mxu0  ;;  %v14378_v23 = vld [vmem:[%s20776_s1 + $0x1188] ss:$16 sps:$4 sm:$0xff]  }
 0x367   :  { %v9580_v51 = vpop.f32.mrf.mxu1  ;;  %10088 = vmatpush2.bf16.msra.mxu0 %v14366_v50  ;;  %v19025_v59 = vadd.f32 %v9578_v11, %v9498_v32  ;;  %v14383_v50 = vld [vmem:[%s20776_s1 + $0x138c] ss:$16 sps:$4 sm:$0xff]   ;;  %v14384_v32 = vld [vmem:[%s20776_s1 + $0x1168] ss:$16 sps:$4 sm:$0xff]  }
 0x368   :  { %10169 = vmatpush2.bf16.msra.mxu1 %v14369_v26  ;;  %10089 = vmatprep.subr.bf16.mxu0 %v14374_v47  ;;  %v9500_v26 = vpop.f32.mrf.mxu0  ;;  %v14381_v47 = vld [vmem:[%s20776_s1 + $0x1388] ss:$16 sps:$4 sm:$0xff]   ;;  %v14389_v11 = vld [vmem:[%s20776_s1 + $0x136c] ss:$16 sps:$4 sm:$0xff]  }
 0x369   :  { %10170 = vmatprep.subr.bf16.mxu1 %v14377_v52  ;;  %v9581_v63 = vpop.f32.mrf.mxu1  ;;  %v14386_v52 = vld [vmem:[%s20776_s1 + $0x116c] ss:$16 sps:$4 sm:$0xff]   ;;  %v14387_v24 = vld [vmem:[%s20776_s1 + $0x1368] ss:$16 sps:$4 sm:$0xff]  }
 0x36a   :  { %v14392_v51 = vld [vmem:[%s20776_s1 + $0x114c] ss:$16 sps:$4 sm:$0xff]   ;;  %v14396_v63 = vld [vmem:[%s20776_s1 + $0x1128] ss:$16 sps:$4 sm:$0xff]  }
 0x36b   :  { %10090 = vmatpush2.bf16.msra.mxu0 %v14372_v44  ;;  %v14395_v44 = vld [vmem:[%s20776_s1 + $0x134c] ss:$16 sps:$4 sm:$0xff]  }
 0x36c   :  { %10171 = vmatpush2.bf16.msra.mxu1 %v14375_v5  ;;  %10091 = vmatprep.subr.bf16.mxu0 %v14380_v38  ;;  %v14390_v5 = vld [vmem:[%s20776_s1 + $0x1148] ss:$16 sps:$4 sm:$0xff]   ;;  %v14401_v26 = vld [vmem:[%s20776_s1 + $0x132c] ss:$16 sps:$4 sm:$0xff]  }
 0x36d   :  { %10172 = vmatprep.subr.bf16.mxu1 %v14383_v50  ;;  %v14393_v38 = vld [vmem:[%s20776_s1 + $0x1348] ss:$16 sps:$4 sm:$0xff]   ;;  %v14398_v50 = vld [vmem:[%s20776_s1 + $0x112c] ss:$16 sps:$4 sm:$0xff]  }
 0x36f   :  { %10092 = vmatpush2.bf16.msra.mxu0 %v14378_v23  ;;  %v14399_v23 = vld [vmem:[%s20776_s1 + $0x1328] ss:$16 sps:$4 sm:$0xff]  }
 0x370   :  { %10173 = vmatpush2.bf16.msra.mxu1 %v14381_v47  ;;  %10093 = vmatprep.subr.bf16.mxu0 %v14386_v52  ;;  %v14404_v47 = vld [vmem:[%s20776_s1 + $0x110c] ss:$16 sps:$4 sm:$0xff]  }
 0x371   :  { %10174 = vmatprep.subr.bf16.mxu1 %v14389_v11  ;;  %v14407_v52 = vld [vmem:[%s20776_s1 + $0x130c] ss:$16 sps:$4 sm:$0xff]   ;;  %v14402_v11 = vld [vmem:[%s20776_s1 + $0x1108] ss:$16 sps:$4 sm:$0xff]  }
 0x373   :  { %10094 = vmatpush2.bf16.msra.mxu0 %v14384_v32  ;;  %v14405_v32 = vld [vmem:[%s20776_s1 + $0x1308] ss:$16 sps:$4 sm:$0xff]  }
 0x374   :  { %10175 = vmatpush2.bf16.msra.mxu1 %v14387_v24  ;;  %10095 = vmatprep.subr.bf16.mxu0 %v14392_v51  ;;  %v14410_v24 = vld [vmem:[%s20776_s1 + $0x14ec] ss:$16 sps:$4 sm:$0xff]  }
 0x375   :  { %10176 = vmatprep.subr.bf16.mxu1 %v14395_v44  ;;  %v14413_v51 = vld [vmem:[%s20776_s1 + $0x16ec] ss:$16 sps:$4 sm:$0xff]   ;;  %v14408_v44 = vld [vmem:[%s20776_s1 + $0x14e8] ss:$16 sps:$4 sm:$0xff]  }
 0x377   :  { %10096 = vmatpush2.bf16.msra.mxu0 %v14390_v5  ;;  %v14411_v5 = vld [vmem:[%s20776_s1 + $0x16e8] ss:$16 sps:$4 sm:$0xff]  }
 0x378   :  { %10177 = vmatpush2.bf16.msra.mxu1 %v14393_v38  ;;  %10097 = vmatprep.subr.bf16.mxu0 %v14398_v50  ;;  %v14416_v38 = vld [vmem:[%s20776_s1 + $0x14cc] ss:$16 sps:$4 sm:$0xff]  }
 0x379   :  { %10178 = vmatprep.subr.bf16.mxu1 %v14401_v26  ;;  %v14419_v50 = vld [vmem:[%s20776_s1 + $0x16cc] ss:$16 sps:$4 sm:$0xff]  }
 0x37b   :  { %10098 = vmatpush2.bf16.msra.mxu0 %v14396_v63 }
 0x37c   :  { %10179 = vmatpush2.bf16.msra.mxu1 %v14399_v23  ;;  %10099 = vmatprep.subr.bf16.mxu0 %v14404_v47  ;;  %v14891_v23 = vld [vmem:[%s20777_s0 + $0x40] ss:$144 sps:$4 sm:$0xff]   ;;  %v14892_v47 = vld [vmem:[%s20777_s0 + $0x48] ss:$144 sps:$4 sm:$0xff]  }
 0x37d   :  { %10180 = vmatprep.subr.bf16.mxu1 %v14407_v52 }
 0x37f   :  { %10100 = vmatpush2.bf16.msra.mxu0 %v14402_v11  ;;  %v14414_v11 = vld [vmem:[%s20776_s1 + $0x14c8] ss:$16 sps:$4 sm:$0xff]  }
 0x380   :  { %10181 = vmatpush2.bf16.msra.mxu1 %v14405_v32  ;;  %10231 = vmatprep.subr.bf16.mxu0 %v14410_v24  ;;  %v14417_v32 = vld [vmem:[%s20776_s1 + $0x16c8] ss:$16 sps:$4 sm:$0xff]  }
 0x381   :  { %10312 = vmatprep.subr.bf16.mxu1 %v14413_v51 }
 0x382   :  { %v9617_v26 = vpop.f32.mrf.mxu0  ;;  %10102 = vmatmul.mubr.bf16.vlgmr.msra.gmra.mxu0 %v14891_v23  ;;  %v14422_v23 = vld [vmem:[%s20776_s1 + $0x14ac] ss:$16 sps:$4 sm:$0xff]  }
 0x383   :  { %v9698_v63 = vpop.f32.mrf.mxu1  ;;  %10183 = vmatmul.mubr.bf16.vlgmr.msra.gmra.mxu1 %v14892_v47  ;;  %v9618_v52 = vadd.f32 %v9617_v26, %v18822_v10  ;;  %10232 = vmatpush1.bf16.msra.mxu0 %v14408_v44  ;;  %v14425_v10 = vld [vmem:[%s20776_s1 + $0x16ac] ss:$16 sps:$4 sm:$0xff]   ;;  %v14893_v26 = vld [vmem:[%s20777_s0 + $0x164] ss:$144 sps:$4 sm:$0xff]  }
 0x384   :  { %10313 = vmatpush1.bf16.msra.mxu1 %v14411_v5  ;;  %v9619_v24 = vpop.f32.mrf.mxu0  ;;  %10233 = vmatprep.subr.bf16.mxu0 %v14416_v38  ;;  %v14894_v38 = vld [vmem:[%s20777_s0 + $0x16c] ss:$144 sps:$4 sm:$0xff]  }
 0x385   :  { %v9700_v51 = vpop.f32.mrf.mxu1  ;;  %10314 = vmatprep.subr.bf16.mxu1 %v14419_v50  ;;  %v19124_v44 = vadd.f32 %v9698_v63, %v9618_v52  ;;  %v9620_v5 = vadd.f32 %v9619_v24, %v18831_v21  ;;  %10111 = vmatprep.mubr.bf16.mxu0 %v14893_v26  ;;  %v14420_v21 = vld [vmem:[%s20776_s1 + $0x14a8] ss:$16 sps:$4 sm:$0xff]  }
 0x386   :  { %10192 = vmatprep.mubr.bf16.mxu1 %v14894_v38  ;;  %v9621_v50 = vpop.f32.mrf.mxu0  ;;  %v14423_v63 = vld [vmem:[%s20776_s1 + $0x16a8] ss:$16 sps:$4 sm:$0xff]  }
 0x387   :  { %v9702_v47 = vpop.f32.mrf.mxu1  ;;  %v19133_v55 = vadd.f32 %v9700_v51, %v9620_v5  ;;  %v9622_v28 = vadd.f32 %v9621_v50, %v18850_v48  ;;  %10234 = vmatpush1.bf16.msra.mxu0 %v14414_v11  ;;  %v14428_v48 = vld [vmem:[%s20776_s1 + $0x148c] ss:$16 sps:$4 sm:$0xff]   ;;  %v14895_v5 = vld [vmem:[%s20777_s0 + $0x160] ss:$144 sps:$4 sm:$0xff]   ;;  %v14429_v38 = vld [vmem:[%s20776_s1 + $0x1688] ss:$16 sps:$4 sm:$0xff]  }
 0x388   :  { %10315 = vmatpush1.bf16.msra.mxu1 %v14417_v32  ;;  %v19142_v52 = vpop.f32.mrf.mxu0  ;;  %10235 = vmatprep.subr.bf16.mxu0 %v14422_v23  ;;  %v14431_v11 = vld [vmem:[%s20776_s1 + $0x168c] ss:$16 sps:$4 sm:$0xff]   ;;  %v14896_v23 = vld [vmem:[%s20777_s0 + $0x168] ss:$144 sps:$4 sm:$0xff]  }
 0x389   :  { %v19144_v24 = vpop.f32.mrf.mxu1  ;;  %10316 = vmatprep.subr.bf16.mxu1 %v14425_v10  ;;  %v19152_v32 = vadd.f32 %v9702_v47, %v9622_v28  ;;  %v14426_v28 = vld [vmem:[%s20776_s1 + $0x1488] ss:$16 sps:$4 sm:$0xff]  }
 0x38a   :  { %v9627_v51 = vpop.f32.mrf.mxu0  ;;  %10112 = vmatmul.mubr.bf16.gmra.mxu0 %v14895_v5  ;;  %v14434_v5 = vld [vmem:[%s20776_s1 + $0x146c] ss:$16 sps:$4 sm:$0xff]  }
 0x38b   :  { %v9708_v26 = vpop.f32.mrf.mxu1  ;;  %10193 = vmatmul.mubr.bf16.gmra.mxu1 %v14896_v23  ;;  %v9628_v10 = vadd.f32 %v9627_v51, %v18878_v41  ;;  %10236 = vmatpush1.bf16.msra.mxu0 %v14420_v21  ;;  %v14437_v41 = vld [vmem:[%s20776_s1 + $0x166c] ss:$16 sps:$4 sm:$0xff]   ;;  %v14897_v51 = vld [vmem:[%s20777_s0 + $0x284] ss:$144 sps:$4 sm:$0xff]  }
 0x38c   :  { %10317 = vmatpush1.bf16.msra.mxu1 %v14423_v63  ;;  %v9629_v50 = vpop.f32.mrf.mxu0  ;;  %10237 = vmatprep.subr.bf16.mxu0 %v14428_v48  ;;  %v14898_v48 = vld [vmem:[%s20777_s0 + $0x28c] ss:$144 sps:$4 sm:$0xff]  }
 0x38d   :  { %v9710_v47 = vpop.f32.mrf.mxu1  ;;  %10318 = vmatprep.subr.bf16.mxu1 %v14431_v11  ;;  %v9630_v21 = vadd.f32 %v9629_v50, %v18887_v42  ;;  %v19174_v63 = vadd.f32 %v9708_v26, %v9628_v10  ;;  %10121 = vmatprep.mubr.bf16.mxu0 %v14897_v51  ;;  %v14432_v42 = vld [vmem:[%s20776_s1 + $0x1468] ss:$16 sps:$4 sm:$0xff]  }
 0x38e   :  { %10202 = vmatprep.mubr.bf16.mxu1 %v14898_v48  ;;  %v9631_v11 = vpop.f32.mrf.mxu0  ;;  %v14435_v26 = vld [vmem:[%s20776_s1 + $0x1668] ss:$16 sps:$4 sm:$0xff]  }
 0x38f   :  { %v9712_v23 = vpop.f32.mrf.mxu1  ;;  %v9632_v39 = vadd.f32 %v9631_v11, %v18899_v18  ;;  %v19183_v27 = vadd.f32 %v9710_v47, %v9630_v21  ;;  %10238 = vmatpush1.bf16.msra.mxu0 %v14426_v28  ;;  %v14440_v18 = vld [vmem:[%s20776_s1 + $0x144c] ss:$16 sps:$4 sm:$0xff]   ;;  %v14899_v21 = vld [vmem:[%s20777_s0 + $0x280] ss:$144 sps:$4 sm:$0xff]   ;;  %v14441_v48 = vld [vmem:[%s20776_s1 + $0x1648] ss:$16 sps:$4 sm:$0xff]  }
 0x390   :  { %10319 = vmatpush1.bf16.msra.mxu1 %v14429_v38  ;;  %v19191_v10 = vpop.f32.mrf.mxu0  ;;  %10239 = vmatprep.subr.bf16.mxu0 %v14434_v5  ;;  %v14443_v28 = vld [vmem:[%s20776_s1 + $0x164c] ss:$16 sps:$4 sm:$0xff]   ;;  %v14900_v5 = vld [vmem:[%s20777_s0 + $0x288] ss:$144 sps:$4 sm:$0xff]  }
 0x391   :  { %v19193_v50 = vpop.f32.mrf.mxu1  ;;  %10320 = vmatprep.subr.bf16.mxu1 %v14437_v41  ;;  %v19201_v38 = vadd.f32 %v9712_v23, %v9632_v39  ;;  %v14438_v39 = vld [vmem:[%s20776_s1 + $0x1448] ss:$16 sps:$4 sm:$0xff]  }
 0x392   :  { %v9637_v47 = vpop.f32.mrf.mxu0  ;;  %10122 = vmatmul.mubr.bf16.gmra.mxu0 %v14899_v21  ;;  %v14446_v21 = vld [vmem:[%s20776_s1 + $0x142c] ss:$16 sps:$4 sm:$0xff]  }
 0x393   :  { %v9718_v51 = vpop.f32.mrf.mxu1  ;;  %10203 = vmatmul.mubr.bf16.gmra.mxu1 %v14900_v5  ;;  %v9638_v41 = vadd.f32 %v9637_v47, %v18927_v1  ;;  %10240 = vmatpush1.bf16.msra.mxu0 %v14432_v42  ;;  %v14449_v1 = vld [vmem:[%s20776_s1 + $0x162c] ss:$16 sps:$4 sm:$0xff]   ;;  %v14901_v47 = vld [vmem:[%s20777_s0 + $0x3a4] ss:$144 sps:$4 sm:$0xff]  }
 0x394   :  { %10321 = vmatpush1.bf16.msra.mxu1 %v14435_v26  ;;  %v9639_v11 = vpop.f32.mrf.mxu0  ;;  %10241 = vmatprep.subr.bf16.mxu0 %v14440_v18  ;;  %v14902_v18 = vld [vmem:[%s20777_s0 + $0x3ac] ss:$144 sps:$4 sm:$0xff]  }
 0x395   :  { %v9720_v23 = vpop.f32.mrf.mxu1  ;;  %10322 = vmatprep.subr.bf16.mxu1 %v14443_v28  ;;  %v9640_v42 = vadd.f32 %v9639_v11, %v18936_v53  ;;  %v19223_v26 = vadd.f32 %v9718_v51, %v9638_v41  ;;  %10131 = vmatprep.mubr.bf16.mxu0 %v14901_v47  ;;  %v14444_v53 = vld [vmem:[%s20776_s1 + $0x1428] ss:$16 sps:$4 sm:$0xff]  }
 0x396   :  { %10212 = vmatprep.mubr.bf16.mxu1 %v14902_v18  ;;  %v9641_v28 = vpop.f32.mrf.mxu0  ;;  %v14447_v51 = vld [vmem:[%s20776_s1 + $0x1628] ss:$16 sps:$4 sm:$0xff]  }
 0x397   :  { %v9722_v5 = vpop.f32.mrf.mxu1  ;;  %v9642_v0 = vadd.f32 %v9641_v28, %v18948_v16  ;;  %v19232_v49 = vadd.f32 %v9720_v23, %v9640_v42  ;;  %10242 = vmatpush1.bf16.msra.mxu0 %v14438_v39  ;;  %v14452_v16 = vld [vmem:[%s20776_s1 + $0x140c] ss:$16 sps:$4 sm:$0xff]   ;;  %v14903_v42 = vld [vmem:[%s20777_s0 + $0x3a0] ss:$144 sps:$4 sm:$0xff]   ;;  %v14453_v18 = vld [vmem:[%s20776_s1 + $0x1608] ss:$16 sps:$4 sm:$0xff]  }
 0x398   :  { %10323 = vmatpush1.bf16.msra.mxu1 %v14441_v48  ;;  %v19240_v41 = vpop.f32.mrf.mxu0  ;;  %10243 = vmatprep.subr.bf16.mxu0 %v14446_v21  ;;  %v14455_v39 = vld [vmem:[%s20776_s1 + $0x160c] ss:$16 sps:$4 sm:$0xff]   ;;  %v14904_v21 = vld [vmem:[%s20777_s0 + $0x3a8] ss:$144 sps:$4 sm:$0xff]  }
 0x399   :  { %v19242_v11 = vpop.f32.mrf.mxu1  ;;  %10324 = vmatprep.subr.bf16.mxu1 %v14449_v1  ;;  %v19250_v48 = vadd.f32 %v9722_v5, %v9642_v0  ;;  %v14450_v0 = vld [vmem:[%s20776_s1 + $0x1408] ss:$16 sps:$4 sm:$0xff]  }
 0x39a   :  { %v9647_v23 = vpop.f32.mrf.mxu0  ;;  %10132 = vmatmul.mubr.bf16.gmra.mxu0 %v14903_v42  ;;  %v14458_v42 = vld [vmem:[%s20776_s1 + $0x15ec] ss:$16 sps:$4 sm:$0xff]  }
 0x39b   :  { %v9728_v47 = vpop.f32.mrf.mxu1  ;;  %10213 = vmatmul.mubr.bf16.gmra.mxu1 %v14904_v21  ;;  %v9648_v1 = vadd.f32 %v9647_v23, %v18972_v36  ;;  %10244 = vmatpush1.bf16.msra.mxu0 %v14444_v53  ;;  %v14461_v36 = vld [vmem:[%s20776_s1 + $0x17ec] ss:$16 sps:$4 sm:$0xff]  }
 0x39c   :  { %10325 = vmatpush1.bf16.msra.mxu1 %v14447_v51  ;;  %v9649_v28 = vpop.f32.mrf.mxu0  ;;  %10245 = vmatprep.subr.bf16.mxu0 %v14452_v16 }
 0x39d   :  { %v9730_v5 = vpop.f32.mrf.mxu1  ;;  %10326 = vmatprep.subr.bf16.mxu1 %v14455_v39  ;;  %v9650_v53 = vadd.f32 %v9649_v28, %v18981_v7  ;;  %v19272_v51 = vadd.f32 %v9728_v47, %v9648_v1  ;;  %10141 = vmatprep.mubr.bf16.mxu0 %v16475_v12  ;;  %v14459_v7 = vld [vmem:[%s20776_s1 + $0x17e8] ss:$16 sps:$4 sm:$0xff]  }
 0x39e   :  { %10222 = vmatprep.mubr.bf16.mxu1 %v16477_v13  ;;  %v9651_v23 = vpop.f32.mrf.mxu0  ;;  %v14464_v13 = vld [vmem:[%s20776_s1 + $0x15cc] ss:$16 sps:$4 sm:$0xff]  }
 0x39f   :  { %v9732_v21 = vpop.f32.mrf.mxu1  ;;  %v9652_v16 = vadd.f32 %v9651_v23, %v18993_v40  ;;  %v19277_v39 = vadd.f32 %v9730_v5, %v9650_v53  ;;  %10246 = vmatpush1.bf16.msra.mxu0 %v14450_v0  ;;  %v14467_v40 = vld [vmem:[%s20776_s1 + $0x17cc] ss:$16 sps:$4 sm:$0xff]   ;;  %v14462_v5 = vld [vmem:[%s20776_s1 + $0x15c8] ss:$16 sps:$4 sm:$0xff]   ;;  %v14905_v23 = vld [vmem:[%s20777_s0 + $0x54] ss:$144 sps:$4 sm:$0xff]  }
 0x3a0   :  { %10327 = vmatpush1.bf16.msra.mxu1 %v14453_v18  ;;  %v19285_v47 = vpop.f32.mrf.mxu0  ;;  %10247 = vmatprep.subr.bf16.mxu0 %v14458_v42  ;;  %v14465_v42 = vld [vmem:[%s20776_s1 + $0x17c8] ss:$16 sps:$4 sm:$0xff]  }
 0x3a1   :  { %v19287_v12 = vpop.f32.mrf.mxu1  ;;  %10328 = vmatprep.subr.bf16.mxu1 %v14461_v36  ;;  %v19295_v1 = vadd.f32 %v9732_v21, %v9652_v16  ;;  %v14906_v21 = vld [vmem:[%s20777_s0 + $0x5c] ss:$144 sps:$4 sm:$0xff]  }
 0x3a2   :  { %v9657_v0 = vpop.f32.mrf.mxu0  ;;  %10142 = vmatmul.mubr.bf16.gmra.mxu0 %v16497_v62  ;;  %v14470_v62 = vld [vmem:[%s20776_s1 + $0x15ac] ss:$16 sps:$4 sm:$0xff]  }
 0x3a3   :  { %v9738_v18 = vpop.f32.mrf.mxu1  ;;  %10223 = vmatmul.mubr.bf16.gmra.mxu1 %v16502_v17  ;;  %v9658_v28 = vadd.f32 %v9657_v0, %v19011_v8  ;;  %10248 = vmatpush2.bf16.msra.mxu0 %v14456_v37  ;;  %v14473_v17 = vld [vmem:[%s20776_s1 + $0x17ac] ss:$16 sps:$4 sm:$0xff]  }
 0x3a4   :  { %10329 = vmatpush2.bf16.msra.mxu1 %v14459_v7  ;;  %v9659_v36 = vpop.f32.mrf.mxu0  ;;  %10249 = vmatprep.subr.bf16.mxu0 %v14464_v13  ;;  %v14476_v0 = vld [vmem:[%s20776_s1 + $0x158c] ss:$16 sps:$4 sm:$0xff]  }
 0x3a5   :  { %v9740_v53 = vpop.f32.mrf.mxu1  ;;  %10330 = vmatprep.subr.bf16.mxu1 %v14467_v40  ;;  %v9660_v37 = vadd.f32 %v9659_v36, %v19025_v59  ;;  %v19313_v8 = vadd.f32 %v9738_v18, %v9658_v28  ;;  %10263 = vmatprep.mubr.bf16.mxu0 %v14905_v23  ;;  %v14468_v59 = vld [vmem:[%s20776_s1 + $0x15a8] ss:$16 sps:$4 sm:$0xff]   ;;  %v14479_v18 = vld [vmem:[%s20776_s1 + $0x178c] ss:$16 sps:$4 sm:$0xff]  }
 0x3a6   :  { %10344 = vmatprep.mubr.bf16.mxu1 %v14906_v21  ;;  %v9661_v16 = vpop.f32.mrf.mxu0  ;;  %v14471_v40 = vld [vmem:[%s20776_s1 + $0x17a8] ss:$16 sps:$4 sm:$0xff]   ;;  %v14488_v23 = vld [vmem:[%s20776_s1 + $0x154c] ss:$16 sps:$4 sm:$0xff]  }
 0x3a7   :  { %v9742_v7 = vpop.f32.mrf.mxu1  ;;  %v19321_v13 = vadd.f32 %v9740_v53, %v9660_v37  ;;  %10250 = vmatpush2.bf16.msra.mxu0 %v14462_v5  ;;  %v14477_v36 = vld [vmem:[%s20776_s1 + $0x1788] ss:$16 sps:$4 sm:$0xff]   ;;  %v14482_v53 = vld [vmem:[%s20776_s1 + $0x156c] ss:$16 sps:$4 sm:$0xff]  }
 0x3a8   :  { %10331 = vmatpush2.bf16.msra.mxu1 %v14465_v42  ;;  %10251 = vmatprep.subr.bf16.mxu0 %v14470_v62  ;;  %v9662_v28 = vpop.f32.mrf.mxu0  ;;  %v14474_v42 = vld [vmem:[%s20776_s1 + $0x1588] ss:$16 sps:$4 sm:$0xff]   ;;  %v14485_v62 = vld [vmem:[%s20776_s1 + $0x176c] ss:$16 sps:$4 sm:$0xff]  }
 0x3a9   :  { %10332 = vmatprep.subr.bf16.mxu1 %v14473_v17  ;;  %v9743_v5 = vpop.f32.mrf.mxu1  ;;  %v14480_v17 = vld [vmem:[%s20776_s1 + $0x1568] ss:$16 sps:$4 sm:$0xff]   ;;  %v14491_v21 = vld [vmem:[%s20776_s1 + $0x174c] ss:$16 sps:$4 sm:$0xff]  }
 0x3aa   :  { %v14483_v37 = vld [vmem:[%s20776_s1 + $0x1768] ss:$16 sps:$4 sm:$0xff]   ;;  %v14500_v28 = vld [vmem:[%s20776_s1 + $0x150c] ss:$16 sps:$4 sm:$0xff]  }
 0x3ab   :  { %10252 = vmatpush2.bf16.msra.mxu0 %v14468_v59  ;;  %v14486_v16 = vld [vmem:[%s20776_s1 + $0x1548] ss:$16 sps:$4 sm:$0xff]   ;;  %v14494_v59 = vld [vmem:[%s20776_s1 + $0x152c] ss:$16 sps:$4 sm:$0xff]  }
 0x3ac   :  { %10333 = vmatpush2.bf16.msra.mxu1 %v14471_v40  ;;  %10253 = vmatprep.subr.bf16.mxu0 %v14476_v0  ;;  %v14489_v7 = vld [vmem:[%s20776_s1 + $0x1748] ss:$16 sps:$4 sm:$0xff]   ;;  %v14497_v40 = vld [vmem:[%s20776_s1 + $0x172c] ss:$16 sps:$4 sm:$0xff]  }
 0x3ad   :  { %10334 = vmatprep.subr.bf16.mxu1 %v14479_v18  ;;  %v14492_v0 = vld [vmem:[%s20776_s1 + $0x1528] ss:$16 sps:$4 sm:$0xff]   ;;  %v14503_v5 = vld [vmem:[%s20776_s1 + $0x170c] ss:$16 sps:$4 sm:$0xff]  }
 0x3ae   :  { %v14495_v18 = vld [vmem:[%s20776_s1 + $0x1728] ss:$16 sps:$4 sm:$0xff]  }
 0x3af   :  { %10254 = vmatpush2.bf16.msra.mxu0 %v14474_v42  ;;  %v14498_v42 = vld [vmem:[%s20776_s1 + $0x1508] ss:$16 sps:$4 sm:$0xff]  }
 0x3b0   :  { %10335 = vmatpush2.bf16.msra.mxu1 %v14477_v36  ;;  %10255 = vmatprep.subr.bf16.mxu0 %v14482_v53  ;;  %v14501_v36 = vld [vmem:[%s20776_s1 + $0x1708] ss:$16 sps:$4 sm:$0xff]   ;;  %v14506_v53 = vld [vmem:[%s20776_s1 + $0x18ec] ss:$16 sps:$4 sm:$0xff]  }
 0x3b1   :  { %10336 = vmatprep.subr.bf16.mxu1 %v14485_v62  ;;  %v14509_v62 = vld [vmem:[%s20776_s1 + $0x1aec] ss:$16 sps:$4 sm:$0xff]  }
 0x3b3   :  { %10256 = vmatpush2.bf16.msra.mxu0 %v14480_v17  ;;  %v14504_v17 = vld [vmem:[%s20776_s1 + $0x18e8] ss:$16 sps:$4 sm:$0xff]  }
 0x3b4   :  { %10337 = vmatpush2.bf16.msra.mxu1 %v14483_v37  ;;  %10257 = vmatprep.subr.bf16.mxu0 %v14488_v23  ;;  %v14507_v37 = vld [vmem:[%s20776_s1 + $0x1ae8] ss:$16 sps:$4 sm:$0xff]   ;;  %v14512_v23 = vld [vmem:[%s20776_s1 + $0x18cc] ss:$16 sps:$4 sm:$0xff]  }
 0x3b5   :  { %10338 = vmatprep.subr.bf16.mxu1 %v14491_v21  ;;  %v14515_v21 = vld [vmem:[%s20776_s1 + $0x1acc] ss:$16 sps:$4 sm:$0xff]  }
 0x3b7   :  { %10258 = vmatpush2.bf16.msra.mxu0 %v14486_v16 }
 0x3b8   :  { %10339 = vmatpush2.bf16.msra.mxu1 %v14489_v7  ;;  %10259 = vmatprep.subr.bf16.mxu0 %v14494_v59  ;;  %v14907_v59 = vld [vmem:[%s20777_s0 + $0x50] ss:$144 sps:$4 sm:$0xff]  }
 0x3b9   :  { %10340 = vmatprep.subr.bf16.mxu1 %v14497_v40  ;;  %v14908_v40 = vld [vmem:[%s20777_s0 + $0x58] ss:$144 sps:$4 sm:$0xff]  }
 0x3bb   :  { %10260 = vmatpush2.bf16.msra.mxu0 %v14492_v0 }
 0x3bc   :  { %10341 = vmatpush2.bf16.msra.mxu1 %v14495_v18  ;;  %10261 = vmatprep.subr.bf16.mxu0 %v14500_v28  ;;  %v14510_v18 = vld [vmem:[%s20776_s1 + $0x18c8] ss:$16 sps:$4 sm:$0xff]  }
 0x3bd   :  { %10342 = vmatprep.subr.bf16.mxu1 %v14503_v5  ;;  %v14513_v28 = vld [vmem:[%s20776_s1 + $0x1ac8] ss:$16 sps:$4 sm:$0xff]  }
 0x3bf   :  { %10262 = vmatpush2.bf16.msra.mxu0 %v14498_v42 }
 0x3c0   :  { %10343 = vmatpush2.bf16.msra.mxu1 %v14501_v36  ;;  %10393 = vmatprep.subr.bf16.mxu0 %v14506_v53  ;;  %v14518_v36 = vld [vmem:[%s20776_s1 + $0x18ac] ss:$16 sps:$4 sm:$0xff]  }
 0x3c1   :  { %10474 = vmatprep.subr.bf16.mxu1 %v14509_v62 }
 0x3c2   :  { %v9779_v16 = vpop.f32.mrf.mxu0  ;;  %10264 = vmatmul.mubr.bf16.vlgmr.msra.gmra.mxu0 %v14907_v59 }
 0x3c3   :  { %v9860_v7 = vpop.f32.mrf.mxu1  ;;  %10345 = vmatmul.mubr.bf16.vlgmr.msra.gmra.mxu1 %v14908_v40  ;;  %v9780_v0 = vadd.f32 %v9779_v16, %v19124_v44  ;;  %10394 = vmatpush1.bf16.msra.mxu0 %v14504_v17  ;;  %v14521_v44 = vld [vmem:[%s20776_s1 + $0x1aac] ss:$16 sps:$4 sm:$0xff]   ;;  %v14909_v17 = vld [vmem:[%s20777_s0 + $0x174] ss:$144 sps:$4 sm:$0xff]  }
 0x3c4   :  { %10475 = vmatpush1.bf16.msra.mxu1 %v14507_v37  ;;  %v9781_v5 = vpop.f32.mrf.mxu0  ;;  %10395 = vmatprep.subr.bf16.mxu0 %v14512_v23  ;;  %v14910_v37 = vld [vmem:[%s20777_s0 + $0x17c] ss:$144 sps:$4 sm:$0xff]  }
 0x3c5   :  { %v9862_v42 = vpop.f32.mrf.mxu1  ;;  %10476 = vmatprep.subr.bf16.mxu1 %v14515_v21  ;;  %v19426_v53 = vadd.f32 %v9860_v7, %v9780_v0  ;;  %v9782_v62 = vadd.f32 %v9781_v5, %v19133_v55  ;;  %10273 = vmatprep.mubr.bf16.mxu0 %v14909_v17  ;;  %v14516_v55 = vld [vmem:[%s20776_s1 + $0x18a8] ss:$16 sps:$4 sm:$0xff]  }
 0x3c6   :  { %10354 = vmatprep.mubr.bf16.mxu1 %v14910_v37  ;;  %v9783_v23 = vpop.f32.mrf.mxu0  ;;  %v14519_v7 = vld [vmem:[%s20776_s1 + $0x1aa8] ss:$16 sps:$4 sm:$0xff]  }
 0x3c7   :  { %v9864_v21 = vpop.f32.mrf.mxu1  ;;  %v19435_v16 = vadd.f32 %v9862_v42, %v9782_v62  ;;  %v9784_v59 = vadd.f32 %v9783_v23, %v19152_v32  ;;  %10396 = vmatpush1.bf16.msra.mxu0 %v14510_v18  ;;  %v14524_v32 = vld [vmem:[%s20776_s1 + $0x188c] ss:$16 sps:$4 sm:$0xff]   ;;  %v14911_v42 = vld [vmem:[%s20777_s0 + $0x170] ss:$144 sps:$4 sm:$0xff]   ;;  %v14522_v17 = vld [vmem:[%s20776_s1 + $0x1888] ss:$16 sps:$4 sm:$0xff]  }
 0x3c8   :  { %10477 = vmatpush1.bf16.msra.mxu1 %v14513_v28  ;;  %v19444_v40 = vpop.f32.mrf.mxu0  ;;  %10397 = vmatprep.subr.bf16.mxu0 %v14518_v36  ;;  %v14527_v18 = vld [vmem:[%s20776_s1 + $0x1a8c] ss:$16 sps:$4 sm:$0xff]   ;;  %v14912_v36 = vld [vmem:[%s20777_s0 + $0x178] ss:$144 sps:$4 sm:$0xff]  }
 0x3c9   :  { %v19446_v0 = vpop.f32.mrf.mxu1  ;;  %10478 = vmatprep.subr.bf16.mxu1 %v14521_v44  ;;  %v19454_v28 = vadd.f32 %v9864_v21, %v9784_v59  ;;  %v14525_v37 = vld [vmem:[%s20776_s1 + $0x1a88] ss:$16 sps:$4 sm:$0xff]   ;;  %v14530_v59 = vld [vmem:[%s20776_s1 + $0x186c] ss:$16 sps:$4 sm:$0xff]  }
 0x3ca   :  { %v9789_v5 = vpop.f32.mrf.mxu0  ;;  %10274 = vmatmul.mubr.bf16.gmra.mxu0 %v14911_v42 }
 0x3cb   :  { %v9870_v62 = vpop.f32.mrf.mxu1  ;;  %10355 = vmatmul.mubr.bf16.gmra.mxu1 %v14912_v36  ;;  %v9790_v44 = vadd.f32 %v9789_v5, %v19174_v63  ;;  %10398 = vmatpush1.bf16.msra.mxu0 %v14516_v55  ;;  %v14533_v63 = vld [vmem:[%s20776_s1 + $0x1a6c] ss:$16 sps:$4 sm:$0xff]   ;;  %v14913_v5 = vld [vmem:[%s20777_s0 + $0x294] ss:$144 sps:$4 sm:$0xff]  }
 0x3cc   :  { %10479 = vmatpush1.bf16.msra.mxu1 %v14519_v7  ;;  %v9791_v23 = vpop.f32.mrf.mxu0  ;;  %10399 = vmatprep.subr.bf16.mxu0 %v14524_v32  ;;  %v14914_v32 = vld [vmem:[%s20777_s0 + $0x29c] ss:$144 sps:$4 sm:$0xff]  }
 0x3cd   :  { %v9872_v21 = vpop.f32.mrf.mxu1  ;;  %10480 = vmatprep.subr.bf16.mxu1 %v14527_v18  ;;  %v9792_v55 = vadd.f32 %v9791_v23, %v19183_v27  ;;  %v19476_v7 = vadd.f32 %v9870_v62, %v9790_v44  ;;  %10283 = vmatprep.mubr.bf16.mxu0 %v14913_v5  ;;  %v14528_v27 = vld [vmem:[%s20776_s1 + $0x1868] ss:$16 sps:$4 sm:$0xff]  }
 0x3ce   :  { %10364 = vmatprep.mubr.bf16.mxu1 %v14914_v32  ;;  %v9793_v18 = vpop.f32.mrf.mxu0  ;;  %v14531_v62 = vld [vmem:[%s20776_s1 + $0x1a68] ss:$16 sps:$4 sm:$0xff]  }
 0x3cf   :  { %v9874_v42 = vpop.f32.mrf.mxu1  ;;  %v9794_v36 = vadd.f32 %v9793_v18, %v19201_v38  ;;  %v19485_v54 = vadd.f32 %v9872_v21, %v9792_v55  ;;  %10400 = vmatpush1.bf16.msra.mxu0 %v14522_v17  ;;  %v14536_v38 = vld [vmem:[%s20776_s1 + $0x184c] ss:$16 sps:$4 sm:$0xff]   ;;  %v14915_v55 = vld [vmem:[%s20777_s0 + $0x290] ss:$144 sps:$4 sm:$0xff]   ;;  %v14534_v32 = vld [vmem:[%s20776_s1 + $0x1848] ss:$16 sps:$4 sm:$0xff]  }
 0x3d0   :  { %10481 = vmatpush1.bf16.msra.mxu1 %v14525_v37  ;;  %v19493_v44 = vpop.f32.mrf.mxu0  ;;  %10401 = vmatprep.subr.bf16.mxu0 %v14530_v59  ;;  %v14539_v17 = vld [vmem:[%s20776_s1 + $0x1a4c] ss:$16 sps:$4 sm:$0xff]   ;;  %v14916_v59 = vld [vmem:[%s20777_s0 + $0x298] ss:$144 sps:$4 sm:$0xff]  }
 0x3d1   :  { %v19495_v23 = vpop.f32.mrf.mxu1  ;;  %10482 = vmatprep.subr.bf16.mxu1 %v14533_v63  ;;  %v19503_v37 = vadd.f32 %v9874_v42, %v9794_v36  ;;  %v14537_v18 = vld [vmem:[%s20776_s1 + $0x1a48] ss:$16 sps:$4 sm:$0xff]  }
 0x3d2   :  { %v9799_v21 = vpop.f32.mrf.mxu0  ;;  %10284 = vmatmul.mubr.bf16.gmra.mxu0 %v14915_v55  ;;  %v14542_v55 = vld [vmem:[%s20776_s1 + $0x182c] ss:$16 sps:$4 sm:$0xff]  }
 0x3d3   :  { %v9880_v5 = vpop.f32.mrf.mxu1  ;;  %10365 = vmatmul.mubr.bf16.gmra.mxu1 %v14916_v59  ;;  %v9800_v63 = vadd.f32 %v9799_v21, %v19223_v26  ;;  %10402 = vmatpush1.bf16.msra.mxu0 %v14528_v27  ;;  %v14545_v26 = vld [vmem:[%s20776_s1 + $0x1a2c] ss:$16 sps:$4 sm:$0xff]   ;;  %v14917_v21 = vld [vmem:[%s20777_s0 + $0x3b4] ss:$144 sps:$4 sm:$0xff]  }
 0x3d4   :  { %10483 = vmatpush1.bf16.msra.mxu1 %v14531_v62  ;;  %v9801_v42 = vpop.f32.mrf.mxu0  ;;  %10403 = vmatprep.subr.bf16.mxu0 %v14536_v38  ;;  %v14918_v38 = vld [vmem:[%s20777_s0 + $0x3bc] ss:$144 sps:$4 sm:$0xff]  }
 0x3d5   :  { %v9882_v36 = vpop.f32.mrf.mxu1  ;;  %10484 = vmatprep.subr.bf16.mxu1 %v14539_v17  ;;  %v9802_v27 = vadd.f32 %v9801_v42, %v19232_v49  ;;  %v19525_v62 = vadd.f32 %v9880_v5, %v9800_v63  ;;  %10293 = vmatprep.mubr.bf16.mxu0 %v14917_v21  ;;  %v14540_v49 = vld [vmem:[%s20776_s1 + $0x1828] ss:$16 sps:$4 sm:$0xff]  }
 0x3d6   :  { %10374 = vmatprep.mubr.bf16.mxu1 %v14918_v38  ;;  %v9803_v17 = vpop.f32.mrf.mxu0  ;;  %v14543_v5 = vld [vmem:[%s20776_s1 + $0x1a28] ss:$16 sps:$4 sm:$0xff]  }
 0x3d7   :  { %v9884_v59 = vpop.f32.mrf.mxu1  ;;  %v9804_v4 = vadd.f32 %v9803_v17, %v19250_v48  ;;  %v19534_v25 = vadd.f32 %v9882_v36, %v9802_v27  ;;  %10404 = vmatpush1.bf16.msra.mxu0 %v14534_v32  ;;  %v14548_v48 = vld [vmem:[%s20776_s1 + $0x180c] ss:$16 sps:$4 sm:$0xff]   ;;  %v14919_v27 = vld [vmem:[%s20777_s0 + $0x3b0] ss:$144 sps:$4 sm:$0xff]   ;;  %v14549_v38 = vld [vmem:[%s20776_s1 + $0x1a08] ss:$16 sps:$4 sm:$0xff]  }
 0x3d8   :  { %10485 = vmatpush1.bf16.msra.mxu1 %v14537_v18  ;;  %v19542_v63 = vpop.f32.mrf.mxu0  ;;  %10405 = vmatprep.subr.bf16.mxu0 %v14542_v55  ;;  %v14551_v32 = vld [vmem:[%s20776_s1 + $0x1a0c] ss:$16 sps:$4 sm:$0xff]   ;;  %v14920_v55 = vld [vmem:[%s20777_s0 + $0x3b8] ss:$144 sps:$4 sm:$0xff]  }
 0x3d9   :  { %v19544_v42 = vpop.f32.mrf.mxu1  ;;  %10486 = vmatprep.subr.bf16.mxu1 %v14545_v26  ;;  %v19552_v18 = vadd.f32 %v9884_v59, %v9804_v4  ;;  %v14546_v4 = vld [vmem:[%s20776_s1 + $0x1808] ss:$16 sps:$4 sm:$0xff]  }
 0x3da   :  { %v9809_v36 = vpop.f32.mrf.mxu0  ;;  %10294 = vmatmul.mubr.bf16.gmra.mxu0 %v14919_v27  ;;  %v14554_v27 = vld [vmem:[%s20776_s1 + $0x19ec] ss:$16 sps:$4 sm:$0xff]  }
 0x3db   :  { %v9890_v21 = vpop.f32.mrf.mxu1  ;;  %10375 = vmatmul.mubr.bf16.gmra.mxu1 %v14920_v55  ;;  %v9810_v26 = vadd.f32 %v9809_v36, %v19272_v51  ;;  %10406 = vmatpush1.bf16.msra.mxu0 %v14540_v49  ;;  %v14557_v51 = vld [vmem:[%s20776_s1 + $0x1bec] ss:$16 sps:$4 sm:$0xff]  }
 0x3dc   :  { %10487 = vmatpush1.bf16.msra.mxu1 %v14543_v5  ;;  %v9811_v17 = vpop.f32.mrf.mxu0  ;;  %10407 = vmatprep.subr.bf16.mxu0 %v14548_v48 }
 0x3dd   :  { %v9892_v59 = vpop.f32.mrf.mxu1  ;;  %10488 = vmatprep.subr.bf16.mxu1 %v14551_v32  ;;  %v9812_v49 = vadd.f32 %v9811_v17, %v19277_v39  ;;  %v19574_v5 = vadd.f32 %v9890_v21, %v9810_v26  ;;  %10303 = vmatprep.mubr.bf16.mxu0 %v16791_v34  ;;  %v14555_v39 = vld [vmem:[%s20776_s1 + $0x1be8] ss:$16 sps:$4 sm:$0xff]  }
 0x3de   :  { %10384 = vmatprep.mubr.bf16.mxu1 %v16793_v15  ;;  %v9813_v36 = vpop.f32.mrf.mxu0  ;;  %v14560_v15 = vld [vmem:[%s20776_s1 + $0x19cc] ss:$16 sps:$4 sm:$0xff]  }
 0x3df   :  { %v9894_v55 = vpop.f32.mrf.mxu1  ;;  %v9814_v48 = vadd.f32 %v9813_v36, %v19295_v1  ;;  %v19579_v32 = vadd.f32 %v9892_v59, %v9812_v49  ;;  %10408 = vmatpush1.bf16.msra.mxu0 %v14546_v4  ;;  %v14563_v1 = vld [vmem:[%s20776_s1 + $0x1bcc] ss:$16 sps:$4 sm:$0xff]   ;;  %v14558_v59 = vld [vmem:[%s20776_s1 + $0x19c8] ss:$16 sps:$4 sm:$0xff]   ;;  %v14921_v36 = vld [vmem:[%s20777_s0 + $0x64] ss:$144 sps:$4 sm:$0xff]  }
 0x3e0   :  { %10489 = vmatpush1.bf16.msra.mxu1 %v14549_v38  ;;  %v19587_v21 = vpop.f32.mrf.mxu0  ;;  %10409 = vmatprep.subr.bf16.mxu0 %v14554_v27  ;;  %v14561_v27 = vld [vmem:[%s20776_s1 + $0x1bc8] ss:$16 sps:$4 sm:$0xff]  }
 0x3e1   :  { %v19589_v34 = vpop.f32.mrf.mxu1  ;;  %10490 = vmatprep.subr.bf16.mxu1 %v14557_v51  ;;  %v19597_v26 = vadd.f32 %v9894_v55, %v9814_v48  ;;  %v14922_v55 = vld [vmem:[%s20777_s0 + $0x6c] ss:$144 sps:$4 sm:$0xff]  }
 0x3e2   :  { %v9819_v4 = vpop.f32.mrf.mxu0  ;;  %10304 = vmatmul.mubr.bf16.gmra.mxu0 %v16813_v43  ;;  %v14569_v43 = vld [vmem:[%s20776_s1 + $0x1bac] ss:$16 sps:$4 sm:$0xff]  }
 0x3e3   :  { %v9900_v38 = vpop.f32.mrf.mxu1  ;;  %10385 = vmatmul.mubr.bf16.gmra.mxu1 %v16821_v35  ;;  %v9820_v17 = vadd.f32 %v9819_v4, %v19313_v8  ;;  %10410 = vmatpush2.bf16.msra.mxu0 %v14552_v30  ;;  %v14566_v35 = vld [vmem:[%s20776_s1 + $0x19ac] ss:$16 sps:$4 sm:$0xff]  }
 0x3e4   :  { %10491 = vmatpush2.bf16.msra.mxu1 %v14555_v39  ;;  %v9821_v51 = vpop.f32.mrf.mxu0  ;;  %10411 = vmatprep.subr.bf16.mxu0 %v14560_v15  ;;  %v14572_v4 = vld [vmem:[%s20776_s1 + $0x198c] ss:$16 sps:$4 sm:$0xff]  }
 0x3e5   :  { %v9902_v49 = vpop.f32.mrf.mxu1  ;;  %10492 = vmatprep.subr.bf16.mxu1 %v14563_v1  ;;  %v9822_v30 = vadd.f32 %v9821_v51, %v19321_v13  ;;  %v19615_v8 = vadd.f32 %v9900_v38, %v9820_v17  ;;  %10425 = vmatprep.mubr.bf16.mxu0 %v14921_v36  ;;  %v14564_v13 = vld [vmem:[%s20776_s1 + $0x19a8] ss:$16 sps:$4 sm:$0xff]   ;;  %v14575_v38 = vld [vmem:[%s20776_s1 + $0x1b8c] ss:$16 sps:$4 sm:$0xff]  }
 0x3e6   :  { %10506 = vmatprep.mubr.bf16.mxu1 %v14922_v55  ;;  %v9823_v48 = vpop.f32.mrf.mxu0  ;;  %v14567_v1 = vld [vmem:[%s20776_s1 + $0x1ba8] ss:$16 sps:$4 sm:$0xff]   ;;  %v14584_v36 = vld [vmem:[%s20776_s1 + $0x194c] ss:$16 sps:$4 sm:$0xff]  }
 0x3e7   :  { %v9904_v39 = vpop.f32.mrf.mxu1  ;;  %v19623_v15 = vadd.f32 %v9902_v49, %v9822_v30  ;;  %10412 = vmatpush2.bf16.msra.mxu0 %v14558_v59  ;;  %v14573_v51 = vld [vmem:[%s20776_s1 + $0x1b88] ss:$16 sps:$4 sm:$0xff]   ;;  %v14578_v49 = vld [vmem:[%s20776_s1 + $0x196c] ss:$16 sps:$4 sm:$0xff]  }
 0x3e8   :  { %10493 = vmatpush2.bf16.msra.mxu1 %v14561_v27  ;;  %10413 = vmatprep.subr.bf16.mxu0 %v14566_v35  ;;  %v9824_v17 = vpop.f32.mrf.mxu0  ;;  %v14570_v27 = vld [vmem:[%s20776_s1 + $0x1988] ss:$16 sps:$4 sm:$0xff]   ;;  %v14581_v35 = vld [vmem:[%s20776_s1 + $0x1b6c] ss:$16 sps:$4 sm:$0xff]  }
 0x3e9   :  { %10494 = vmatprep.subr.bf16.mxu1 %v14569_v43  ;;  %v9905_v59 = vpop.f32.mrf.mxu1  ;;  %v14576_v43 = vld [vmem:[%s20776_s1 + $0x1968] ss:$16 sps:$4 sm:$0xff]   ;;  %v14587_v55 = vld [vmem:[%s20776_s1 + $0x1b4c] ss:$16 sps:$4 sm:$0xff]  }
 0x3ea   :  { %v14579_v30 = vld [vmem:[%s20776_s1 + $0x1b68] ss:$16 sps:$4 sm:$0xff]   ;;  %v14596_v17 = vld [vmem:[%s20776_s1 + $0x190c] ss:$16 sps:$4 sm:$0xff]  }
 0x3eb   :  { %10414 = vmatpush2.bf16.msra.mxu0 %v14564_v13  ;;  %v14582_v48 = vld [vmem:[%s20776_s1 + $0x1948] ss:$16 sps:$4 sm:$0xff]   ;;  %v14590_v13 = vld [vmem:[%s20776_s1 + $0x192c] ss:$16 sps:$4 sm:$0xff]  }
 0x3ec   :  { %10495 = vmatpush2.bf16.msra.mxu1 %v14567_v1  ;;  %10415 = vmatprep.subr.bf16.mxu0 %v14572_v4  ;;  %v14585_v39 = vld [vmem:[%s20776_s1 + $0x1b48] ss:$16 sps:$4 sm:$0xff]   ;;  %v14593_v1 = vld [vmem:[%s20776_s1 + $0x1b2c] ss:$16 sps:$4 sm:$0xff]  }
 0x3ed   :  { %10496 = vmatprep.subr.bf16.mxu1 %v14575_v38  ;;  %v14588_v4 = vld [vmem:[%s20776_s1 + $0x1928] ss:$16 sps:$4 sm:$0xff]   ;;  %v14599_v59 = vld [vmem:[%s20776_s1 + $0x1b0c] ss:$16 sps:$4 sm:$0xff]  }
 0x3ee   :  { %v14591_v38 = vld [vmem:[%s20776_s1 + $0x1b28] ss:$16 sps:$4 sm:$0xff]  }
 0x3ef   :  { %10416 = vmatpush2.bf16.msra.mxu0 %v14570_v27  ;;  %v14594_v27 = vld [vmem:[%s20776_s1 + $0x1908] ss:$16 sps:$4 sm:$0xff]  }
 0x3f0   :  { %10497 = vmatpush2.bf16.msra.mxu1 %v14573_v51  ;;  %10417 = vmatprep.subr.bf16.mxu0 %v14578_v49  ;;  %v14597_v51 = vld [vmem:[%s20776_s1 + $0x1b08] ss:$16 sps:$4 sm:$0xff]   ;;  %v14602_v49 = vld [vmem:[%s20776_s1 + $0x1cec] ss:$16 sps:$4 sm:$0xff]  }
 0x3f1   :  { %10498 = vmatprep.subr.bf16.mxu1 %v14581_v35  ;;  %v14605_v35 = vld [vmem:[%s20776_s1 + $0x1eec] ss:$16 sps:$4 sm:$0xff]  }
 0x3f3   :  { %10418 = vmatpush2.bf16.msra.mxu0 %v14576_v43  ;;  %v14600_v43 = vld [vmem:[%s20776_s1 + $0x1ce8] ss:$16 sps:$4 sm:$0xff]  }
 0x3f4   :  { %10499 = vmatpush2.bf16.msra.mxu1 %v14579_v30  ;;  %10419 = vmatprep.subr.bf16.mxu0 %v14584_v36  ;;  %v14603_v30 = vld [vmem:[%s20776_s1 + $0x1ee8] ss:$16 sps:$4 sm:$0xff]   ;;  %v14608_v36 = vld [vmem:[%s20776_s1 + $0x1ccc] ss:$16 sps:$4 sm:$0xff]  }
 0x3f5   :  { %10500 = vmatprep.subr.bf16.mxu1 %v14587_v55  ;;  %v14611_v55 = vld [vmem:[%s20776_s1 + $0x1ecc] ss:$16 sps:$4 sm:$0xff]  }
 0x3f7   :  { %10420 = vmatpush2.bf16.msra.mxu0 %v14582_v48 }
 0x3f8   :  { %10501 = vmatpush2.bf16.msra.mxu1 %v14585_v39  ;;  %10421 = vmatprep.subr.bf16.mxu0 %v14590_v13  ;;  %v14923_v13 = vld [vmem:[%s20777_s0 + $0x60] ss:$144 sps:$4 sm:$0xff]  }
 0x3f9   :  { %10502 = vmatprep.subr.bf16.mxu1 %v14593_v1  ;;  %v14924_v1 = vld [vmem:[%s20777_s0 + $0x68] ss:$144 sps:$4 sm:$0xff]  }
 0x3fb   :  { %10422 = vmatpush2.bf16.msra.mxu0 %v14588_v4 }
 0x3fc   :  { %10503 = vmatpush2.bf16.msra.mxu1 %v14591_v38  ;;  %10423 = vmatprep.subr.bf16.mxu0 %v14596_v17  ;;  %v14606_v38 = vld [vmem:[%s20776_s1 + $0x1cc8] ss:$16 sps:$4 sm:$0xff]  }
 0x3fd   :  { %10504 = vmatprep.subr.bf16.mxu1 %v14599_v59  ;;  %v14609_v17 = vld [vmem:[%s20776_s1 + $0x1ec8] ss:$16 sps:$4 sm:$0xff]  }
 0x3ff   :  { %10424 = vmatpush2.bf16.msra.mxu0 %v14594_v27 }
 0x400   :  { %10505 = vmatpush2.bf16.msra.mxu1 %v14597_v51  ;;  %10555 = vmatprep.subr.bf16.mxu0 %v14602_v49  ;;  %v14614_v51 = vld [vmem:[%s20776_s1 + $0x1cac] ss:$16 sps:$4 sm:$0xff]  }
 0x401   :  { %10636 = vmatprep.subr.bf16.mxu1 %v14605_v35 }
 0x402   :  { %v9941_v48 = vpop.f32.mrf.mxu0  ;;  %10426 = vmatmul.mubr.bf16.vlgmr.msra.gmra.mxu0 %v14923_v13 }
 0x403   :  { %v10022_v39 = vpop.f32.mrf.mxu1  ;;  %10507 = vmatmul.mubr.bf16.vlgmr.msra.gmra.mxu1 %v14924_v1  ;;  %v9942_v4 = vadd.f32 %v9941_v48, %v19426_v53  ;;  %10556 = vmatpush1.bf16.msra.mxu0 %v14600_v43  ;;  %v14617_v53 = vld [vmem:[%s20776_s1 + $0x1eac] ss:$16 sps:$4 sm:$0xff]   ;;  %v14925_v43 = vld [vmem:[%s20777_s0 + $0x184] ss:$144 sps:$4 sm:$0xff]  }
 0x404   :  { %10637 = vmatpush1.bf16.msra.mxu1 %v14603_v30  ;;  %v9943_v59 = vpop.f32.mrf.mxu0  ;;  %10557 = vmatprep.subr.bf16.mxu0 %v14608_v36  ;;  %v14926_v30 = vld [vmem:[%s20777_s0 + $0x18c] ss:$144 sps:$4 sm:$0xff]  }
 0x405   :  { %v10024_v27 = vpop.f32.mrf.mxu1  ;;  %10638 = vmatprep.subr.bf16.mxu1 %v14611_v55  ;;  %v19728_v49 = vadd.f32 %v10022_v39, %v9942_v4  ;;  %v9944_v35 = vadd.f32 %v9943_v59, %v19435_v16  ;;  %10435 = vmatprep.mubr.bf16.mxu0 %v14925_v43  ;;  %v14612_v16 = vld [vmem:[%s20776_s1 + $0x1ca8] ss:$16 sps:$4 sm:$0xff]   ;;  %v14620_v1 = vld [vmem:[%s20776_s1 + $0x1c8c] ss:$16 sps:$4 sm:$0xff]  }
 0x406   :  { %10516 = vmatprep.mubr.bf16.mxu1 %v14926_v30  ;;  %v9945_v36 = vpop.f32.mrf.mxu0  ;;  %v14615_v39 = vld [vmem:[%s20776_s1 + $0x1ea8] ss:$16 sps:$4 sm:$0xff]   ;;  %v14626_v30 = vld [vmem:[%s20776_s1 + $0x1c6c] ss:$16 sps:$4 sm:$0xff]  }
 0x407   :  { %v10026_v55 = vpop.f32.mrf.mxu1  ;;  %v19737_v48 = vadd.f32 %v10024_v27, %v9944_v35  ;;  %v9946_v13 = vadd.f32 %v9945_v36, %v19454_v28  ;;  %10558 = vmatpush1.bf16.msra.mxu0 %v14606_v38  ;;  %v14623_v28 = vld [vmem:[%s20776_s1 + $0x1e8c] ss:$16 sps:$4 sm:$0xff]   ;;  %v14621_v27 = vld [vmem:[%s20776_s1 + $0x1e88] ss:$16 sps:$4 sm:$0xff]  }
 0x408   :  { %10639 = vmatpush1.bf16.msra.mxu1 %v14609_v17  ;;  %v19749_v4 = vpop.f32.mrf.mxu0  ;;  %10559 = vmatprep.subr.bf16.mxu0 %v14614_v51  ;;  %v14618_v17 = vld [vmem:[%s20776_s1 + $0x1c88] ss:$16 sps:$4 sm:$0xff]   ;;  %v14927_v51 = vld [vmem:[%s20777_s0 + $0x180] ss:$144 sps:$4 sm:$0xff]  }
 0x409   :  { %v19751_v59 = vpop.f32.mrf.mxu1  ;;  %10640 = vmatprep.subr.bf16.mxu1 %v14617_v53  ;;  %v19756_v38 = vadd.f32 %v10026_v55, %v9946_v13  ;;  %v14928_v43 = vld [vmem:[%s20777_s0 + $0x188] ss:$144 sps:$4 sm:$0xff]  }
 0x40a   :  { %v9951_v35 = vpop.f32.mrf.mxu0  ;;  %10436 = vmatmul.mubr.bf16.gmra.mxu0 %v14927_v51  ;;  %v14629_v51 = vld [vmem:[%s20776_s1 + $0x1e6c] ss:$16 sps:$4 sm:$0xff]  }
 0x40b   :  { %v10032_v53 = vpop.f32.mrf.mxu1  ;;  %10517 = vmatmul.mubr.bf16.gmra.mxu1 %v14928_v43  ;;  %v9952_v36 = vadd.f32 %v9951_v35, %v19476_v7  ;;  %10560 = vmatpush1.bf16.msra.mxu0 %v14612_v16  ;;  %v14929_v43 = vld [vmem:[%s20777_s0 + $0x2a4] ss:$144 sps:$4 sm:$0xff]   ;;  %v14624_v7 = vld [vmem:[%s20776_s1 + $0x1c68] ss:$16 sps:$4 sm:$0xff]  }
 0x40c   :  { %10641 = vmatpush1.bf16.msra.mxu1 %v14615_v39  ;;  %v9953_v55 = vpop.f32.mrf.mxu0  ;;  %10561 = vmatprep.subr.bf16.mxu0 %v14620_v1  ;;  %v14627_v16 = vld [vmem:[%s20776_s1 + $0x1e68] ss:$16 sps:$4 sm:$0xff]   ;;  %v14930_v39 = vld [vmem:[%s20777_s0 + $0x2ac] ss:$144 sps:$4 sm:$0xff]  }
 0x40d   :  { %v10034_v13 = vpop.f32.mrf.mxu1  ;;  %10642 = vmatprep.subr.bf16.mxu1 %v14623_v28  ;;  %v9954_v61 = vadd.f32 %v9953_v55, %v19485_v54  ;;  %v19778_v9 = vadd.f32 %v10032_v53, %v9952_v36  ;;  %10445 = vmatprep.mubr.bf16.mxu0 %v14929_v43  ;;  %v14632_v28 = vld [vmem:[%s20776_s1 + $0x1c4c] ss:$16 sps:$4 sm:$0xff]  }
 0x40e   :  { %10526 = vmatprep.mubr.bf16.mxu1 %v14930_v39  ;;  %v9955_v54 = vpop.f32.mrf.mxu0  ;;  %v14635_v43 = vld [vmem:[%s20776_s1 + $0x1e4c] ss:$16 sps:$4 sm:$0xff]  }
 0x40f   :  { %v10036_v1 = vpop.f32.mrf.mxu1  ;;  %v9956_v35 = vadd.f32 %v9955_v54, %v19503_v37  ;;  %v19796_v53 = vadd.f32 %v10034_v13, %v9954_v61  ;;  %10562 = vmatpush1.bf16.msra.mxu0 %v14618_v17  ;;  %v14630_v37 = vld [vmem:[%s20776_s1 + $0x1c48] ss:$16 sps:$4 sm:$0xff]  }
 0x410   :  { %10643 = vmatpush1.bf16.msra.mxu1 %v14621_v27  ;;  %v19798_v36 = vpop.f32.mrf.mxu0  ;;  %10563 = vmatprep.subr.bf16.mxu0 %v14626_v30  ;;  %v14633_v61 = vld [vmem:[%s20776_s1 + $0x1e48] ss:$16 sps:$4 sm:$0xff]   ;;  %v14931_v27 = vld [vmem:[%s20777_s0 + $0x2a0] ss:$144 sps:$4 sm:$0xff]  }
 0x411   :  { %20881 = vst [vmem:[#allocation92_spill] sm:$0xff] %v19798_v36  ;;  %v19800_v55 = vpop.f32.mrf.mxu1  ;;  %10644 = vmatprep.subr.bf16.mxu1 %v14629_v51  ;;  %v19805_v39 = vadd.f32 %v10036_v1, %v9956_v35  ;;  %v14932_v13 = vld [vmem:[%s20777_s0 + $0x2a8] ss:$144 sps:$4 sm:$0xff]   ;;  %v14638_v51 = vld [vmem:[%s20776_s1 + $0x1c2c] ss:$16 sps:$4 sm:$0xff]  }
 0x412   :  { %20882 = vst [vmem:[#allocation93_spill] sm:$0xff] %v19800_v55  ;;  %v9961_v17 = vpop.f32.mrf.mxu0  ;;  %10446 = vmatmul.mubr.bf16.gmra.mxu0 %v14931_v27  ;;  %v14641_v27 = vld [vmem:[%s20776_s1 + $0x1e2c] ss:$16 sps:$4 sm:$0xff]  }
 0x413   :  { %v10042_v30 = vpop.f32.mrf.mxu1  ;;  %10527 = vmatmul.mubr.bf16.gmra.mxu1 %v14932_v13  ;;  %v9962_v54 = vadd.f32 %v9961_v17, %v19525_v62  ;;  %10564 = vmatpush1.bf16.msra.mxu0 %v14624_v7  ;;  %v14933_v13 = vld [vmem:[%s20777_s0 + $0x3c4] ss:$144 sps:$4 sm:$0xff]   ;;  %v14636_v62 = vld [vmem:[%s20776_s1 + $0x1c28] ss:$16 sps:$4 sm:$0xff]  }
 0x414   :  { %10645 = vmatpush1.bf16.msra.mxu1 %v14627_v16  ;;  %v9963_v1 = vpop.f32.mrf.mxu0  ;;  %10565 = vmatprep.subr.bf16.mxu0 %v14632_v28  ;;  %v14639_v7 = vld [vmem:[%s20776_s1 + $0x1e28] ss:$16 sps:$4 sm:$0xff]   ;;  %v14934_v16 = vld [vmem:[%s20777_s0 + $0x3cc] ss:$144 sps:$4 sm:$0xff]  }
 0x415   :  { %v10044_v35 = vpop.f32.mrf.mxu1  ;;  %10646 = vmatprep.subr.bf16.mxu1 %v14635_v43  ;;  %v9964_v57 = vadd.f32 %v9963_v1, %v19534_v25  ;;  %v19827_v55 = vadd.f32 %v10042_v30, %v9962_v54  ;;  %10455 = vmatprep.mubr.bf16.mxu0 %v14933_v13  ;;  %v14644_v43 = vld [vmem:[%s20776_s1 + $0x1c0c] ss:$16 sps:$4 sm:$0xff]  }
 0x416   :  { %10536 = vmatprep.mubr.bf16.mxu1 %v14934_v16  ;;  %v9965_v25 = vpop.f32.mrf.mxu0  ;;  %v14647_v13 = vld [vmem:[%s20776_s1 + $0x1e0c] ss:$16 sps:$4 sm:$0xff]  }
 0x417   :  { %v10046_v28 = vpop.f32.mrf.mxu1  ;;  %v9966_v17 = vadd.f32 %v9965_v25, %v19552_v18  ;;  %v19845_v30 = vadd.f32 %v10044_v35, %v9964_v57  ;;  %10566 = vmatpush1.bf16.msra.mxu0 %v14630_v37  ;;  %v14642_v18 = vld [vmem:[%s20776_s1 + $0x1c08] ss:$16 sps:$4 sm:$0xff]  }
 0x418   :  { %10647 = vmatpush1.bf16.msra.mxu1 %v14633_v61  ;;  %v19847_v54 = vpop.f32.mrf.mxu0  ;;  %10567 = vmatprep.subr.bf16.mxu0 %v14638_v51  ;;  %v14645_v57 = vld [vmem:[%s20776_s1 + $0x1e08] ss:$16 sps:$4 sm:$0xff]   ;;  %v14935_v61 = vld [vmem:[%s20777_s0 + $0x3c0] ss:$144 sps:$4 sm:$0xff]  }
 0x419   :  { %v19849_v1 = vpop.f32.mrf.mxu1  ;;  %10648 = vmatprep.subr.bf16.mxu1 %v14641_v27  ;;  %v19854_v16 = vadd.f32 %v10046_v28, %v9966_v17  ;;  %v14936_v35 = vld [vmem:[%s20777_s0 + $0x3c8] ss:$144 sps:$4 sm:$0xff]   ;;  %v14650_v27 = vld [vmem:[%s20776_s1 + $0x1dec] ss:$16 sps:$4 sm:$0xff]  }
 0x41a   :  { %v9971_v37 = vpop.f32.mrf.mxu0  ;;  %10456 = vmatmul.mubr.bf16.gmra.mxu0 %v14935_v61  ;;  %v14653_v61 = vld [vmem:[%s20776_s1 + $0x1fec] ss:$16 sps:$4 sm:$0xff]  }
 0x41b   :  { %v10052_v51 = vpop.f32.mrf.mxu1  ;;  %10537 = vmatmul.mubr.bf16.gmra.mxu1 %v14936_v35  ;;  %v9972_v25 = vadd.f32 %v9971_v37, %v19574_v5  ;;  %10568 = vmatpush1.bf16.msra.mxu0 %v14636_v62  ;;  %v14648_v5 = vld [vmem:[%s20776_s1 + $0x1de8] ss:$16 sps:$4 sm:$0xff]  }
 0x41c   :  { %10649 = vmatpush1.bf16.msra.mxu1 %v14639_v7  ;;  %v9973_v28 = vpop.f32.mrf.mxu0  ;;  %10569 = vmatprep.subr.bf16.mxu0 %v14644_v43  ;;  %v14651_v62 = vld [vmem:[%s20776_s1 + $0x1fe8] ss:$16 sps:$4 sm:$0xff]  }
 0x41d   :  { %v10054_v17 = vpop.f32.mrf.mxu1  ;;  %10650 = vmatprep.subr.bf16.mxu1 %v14647_v13  ;;  %v9974_v31 = vadd.f32 %v9973_v28, %v19579_v32  ;;  %v19876_v36 = vadd.f32 %v10052_v51, %v9972_v25  ;;  %10465 = vmatprep.mubr.bf16.mxu0 %v17107_v60  ;;  %v14656_v32 = vld [vmem:[%s20776_s1 + $0x1dcc] ss:$16 sps:$4 sm:$0xff]  }
 0x41e   :  { %10546 = vmatprep.mubr.bf16.mxu1 %v17109_v45  ;;  %v9975_v7 = vpop.f32.mrf.mxu0  ;;  %v14659_v45 = vld [vmem:[%s20776_s1 + $0x1fcc] ss:$16 sps:$4 sm:$0xff]  }
 0x41f   :  { %v10056_v43 = vpop.f32.mrf.mxu1  ;;  %v9976_v13 = vadd.f32 %v9975_v7, %v19597_v26  ;;  %v19890_v37 = vadd.f32 %v10054_v17, %v9974_v31  ;;  %10570 = vmatpush1.bf16.msra.mxu0 %v14642_v18  ;;  %v14654_v18 = vld [vmem:[%s20776_s1 + $0x1dc8] ss:$16 sps:$4 sm:$0xff]  }
 0x420   :  { %10651 = vmatpush1.bf16.msra.mxu1 %v14645_v57  ;;  %v19892_v60 = vpop.f32.mrf.mxu0  ;;  %10571 = vmatprep.subr.bf16.mxu0 %v14650_v27  ;;  %v14657_v57 = vld [vmem:[%s20776_s1 + $0x1fc8] ss:$16 sps:$4 sm:$0xff]  }
 0x421   :  { %v19894_v51 = vpop.f32.mrf.mxu1  ;;  %10652 = vmatprep.subr.bf16.mxu1 %v14653_v61  ;;  %v19899_v35 = vadd.f32 %v10056_v43, %v9976_v13  ;;  %v14937_v61 = vld [vmem:[%s20777_s0 + $0x74] ss:$144 sps:$4 sm:$0xff]   ;;  %v14668_v13 = vld [vmem:[%s20776_s1 + $0x1d8c] ss:$16 sps:$4 sm:$0xff]  }
 0x422   :  { %v9981_v25 = vpop.f32.mrf.mxu0  ;;  %10466 = vmatmul.mubr.bf16.gmra.mxu0 %v17129_v33  ;;  %v14665_v33 = vld [vmem:[%s20776_s1 + $0x1fac] ss:$16 sps:$4 sm:$0xff]  }
 0x423   :  { %v10062_v26 = vpop.f32.mrf.mxu1  ;;  %10547 = vmatmul.mubr.bf16.gmra.mxu1 %v17134_v6  ;;  %v9982_v31 = vadd.f32 %v9981_v25, %v19615_v8  ;;  %10572 = vmatpush2.bf16.msra.mxu0 %v14648_v5  ;;  %v14662_v6 = vld [vmem:[%s20776_s1 + $0x1dac] ss:$16 sps:$4 sm:$0xff]  }
 0x424   :  { %10653 = vmatpush2.bf16.msra.mxu1 %v14651_v62  ;;  %v9983_v27 = vpop.f32.mrf.mxu0  ;;  %10573 = vmatprep.subr.bf16.mxu0 %v14656_v32  ;;  %v14938_v5 = vld [vmem:[%s20777_s0 + $0x7c] ss:$144 sps:$4 sm:$0xff]   ;;  %v14663_v32 = vld [vmem:[%s20776_s1 + $0x1fa8] ss:$16 sps:$4 sm:$0xff]  }
 0x425   :  { %v10064_v28 = vpop.f32.mrf.mxu1  ;;  %10654 = vmatprep.subr.bf16.mxu1 %v14659_v45  ;;  %v9984_v8 = vadd.f32 %v9983_v27, %v19623_v15  ;;  %v19917_v17 = vadd.f32 %v10062_v26, %v9982_v31  ;;  %10587 = vmatprep.mubr.bf16.mxu0 %v14937_v61  ;;  %v14660_v15 = vld [vmem:[%s20776_s1 + $0x1da8] ss:$16 sps:$4 sm:$0xff]   ;;  %v14671_v45 = vld [vmem:[%s20776_s1 + $0x1f8c] ss:$16 sps:$4 sm:$0xff]  }
 0x426   :  { %10668 = vmatprep.mubr.bf16.mxu1 %v14938_v5  ;;  %v9985_v62 = vpop.f32.mrf.mxu0  ;;  %v14666_v31 = vld [vmem:[%s20776_s1 + $0x1d88] ss:$16 sps:$4 sm:$0xff]   ;;  %v14677_v27 = vld [vmem:[%s20776_s1 + $0x1f6c] ss:$16 sps:$4 sm:$0xff]  }
 0x427   :  { %v10066_v7 = vpop.f32.mrf.mxu1  ;;  %v19925_v43 = vadd.f32 %v10064_v28, %v9984_v8  ;;  %10574 = vmatpush2.bf16.msra.mxu0 %v14654_v18  ;;  %v14669_v18 = vld [vmem:[%s20776_s1 + $0x1f88] ss:$16 sps:$4 sm:$0xff]   ;;  %v14683_v8 = vld [vmem:[%s20776_s1 + $0x1f4c] ss:$16 sps:$4 sm:$0xff]  }
 0x428   :  { %10655 = vmatpush2.bf16.msra.mxu1 %v14657_v57  ;;  %10575 = vmatprep.subr.bf16.mxu0 %v14662_v6  ;;  %v9986_v25 = vpop.f32.mrf.mxu0  ;;  %v14674_v57 = vld [vmem:[%s20776_s1 + $0x1d6c] ss:$16 sps:$4 sm:$0xff]   ;;  %v14672_v28 = vld [vmem:[%s20776_s1 + $0x1d68] ss:$16 sps:$4 sm:$0xff]  }
 0x429   :  { %10656 = vmatprep.subr.bf16.mxu1 %v14665_v33  ;;  %v10067_v26 = vpop.f32.mrf.mxu1  ;;  %v14675_v6 = vld [vmem:[%s20776_s1 + $0x1f68] ss:$16 sps:$4 sm:$0xff]   ;;  %v14680_v33 = vld [vmem:[%s20776_s1 + $0x1d4c] ss:$16 sps:$4 sm:$0xff]  }
 0x42a   :  { %v14678_v61 = vld [vmem:[%s20776_s1 + $0x1d48] ss:$16 sps:$4 sm:$0xff]   ;;  %v14686_v62 = vld [vmem:[%s20776_s1 + $0x1d2c] ss:$16 sps:$4 sm:$0xff]  }
 0x42b   :  { %10576 = vmatpush2.bf16.msra.mxu0 %v14660_v15  ;;  %v14681_v5 = vld [vmem:[%s20776_s1 + $0x1f48] ss:$16 sps:$4 sm:$0xff]   ;;  %v14689_v7 = vld [vmem:[%s20776_s1 + $0x1f2c] ss:$16 sps:$4 sm:$0xff]  }
 0x42c   :  { %10657 = vmatpush2.bf16.msra.mxu1 %v14663_v32  ;;  %10577 = vmatprep.subr.bf16.mxu0 %v14668_v13  ;;  %v14684_v15 = vld [vmem:[%s20776_s1 + $0x1d28] ss:$16 sps:$4 sm:$0xff]   ;;  %v14692_v13 = vld [vmem:[%s20776_s1 + $0x1d0c] ss:$16 sps:$4 sm:$0xff]  }
 0x42d   :  { %10658 = vmatprep.subr.bf16.mxu1 %v14671_v45  ;;  %v14687_v32 = vld [vmem:[%s20776_s1 + $0x1f28] ss:$16 sps:$4 sm:$0xff]   ;;  %v14695_v45 = vld [vmem:[%s20776_s1 + $0x1f0c] ss:$16 sps:$4 sm:$0xff]  }
 0x42e   :  { %v14690_v25 = vld [vmem:[%s20776_s1 + $0x1d08] ss:$16 sps:$4 sm:$0xff]  }
 0x42f   :  { %10578 = vmatpush2.bf16.msra.mxu0 %v14666_v31  ;;  %v14693_v26 = vld [vmem:[%s20776_s1 + $0x1f08] ss:$16 sps:$4 sm:$0xff]   ;;  %v14698_v31 = vld [vmem:[%s20776_s1 + $0x20ec] ss:$16 sps:$4 sm:$0xff]  }
 0x430   :  { %10659 = vmatpush2.bf16.msra.mxu1 %v14669_v18  ;;  %10579 = vmatprep.subr.bf16.mxu0 %v14674_v57  ;;  %v14701_v18 = vld [vmem:[%s20776_s1 + $0x22ec] ss:$16 sps:$4 sm:$0xff]   ;;  %v14696_v57 = vld [vmem:[%s20776_s1 + $0x20e8] ss:$16 sps:$4 sm:$0xff]  }
 0x431   :  { %10660 = vmatprep.subr.bf16.mxu1 %v14677_v27  ;;  %v14699_v27 = vld [vmem:[%s20776_s1 + $0x22e8] ss:$16 sps:$4 sm:$0xff]  }
 0x433   :  { %10580 = vmatpush2.bf16.msra.mxu0 %v14672_v28  ;;  %v14704_v28 = vld [vmem:[%s20776_s1 + $0x20cc] ss:$16 sps:$4 sm:$0xff]  }
 0x434   :  { %10661 = vmatpush2.bf16.msra.mxu1 %v14675_v6  ;;  %10581 = vmatprep.subr.bf16.mxu0 %v14680_v33  ;;  %v14707_v6 = vld [vmem:[%s20776_s1 + $0x22cc] ss:$16 sps:$4 sm:$0xff]   ;;  %v9482_v33 = vadd.f32 %v18944_v56, %v18801_v46  ;;  %v14702_v56 = vld [vmem:[%s20776_s1 + $0x20c8] ss:$16 sps:$4 sm:$0xff]  }
 0x435   :  { %10662 = vmatprep.subr.bf16.mxu1 %v14683_v8 }
 0x437   :  { %10582 = vmatpush2.bf16.msra.mxu0 %v14678_v61 }
 0x438   :  { %10663 = vmatpush2.bf16.msra.mxu1 %v14681_v5  ;;  %10583 = vmatprep.subr.bf16.mxu0 %v14686_v62  ;;  %v14939_v5 = vld [vmem:[%s20777_s0 + $0x70] ss:$144 sps:$4 sm:$0xff]   ;;  %v14940_v62 = vld [vmem:[%s20777_s0 + $0x78] ss:$144 sps:$4 sm:$0xff]  }
 0x439   :  { %10664 = vmatprep.subr.bf16.mxu1 %v14689_v7 }
 0x43b   :  { %10584 = vmatpush2.bf16.msra.mxu0 %v14684_v15  ;;  %v14705_v15 = vld [vmem:[%s20776_s1 + $0x22c8] ss:$16 sps:$4 sm:$0xff]  }
 0x43c   :  { %10665 = vmatpush2.bf16.msra.mxu1 %v14687_v32  ;;  %10585 = vmatprep.subr.bf16.mxu0 %v14692_v13 }
 0x43d   :  { %10666 = vmatprep.subr.bf16.mxu1 %v14695_v45  ;;  %v14710_v45 = vld [vmem:[%s20776_s1 + $0x20ac] ss:$16 sps:$4 sm:$0xff]  }
 0x43f   :  { %10586 = vmatpush2.bf16.msra.mxu0 %v14690_v25  ;;  %v9563_v25 = vadd.f32 %v18946_v20, %v9482_v33  ;;  %v14711_v33 = vld [vmem:[%s20776_s1 + $0x22a8] ss:$16 sps:$4 sm:$0xff]  }
 0x440   :  { %10667 = vmatpush2.bf16.msra.mxu1 %v14693_v26  ;;  %10717 = vmatprep.subr.bf16.mxu0 %v14698_v31 }
 0x441   :  { %10798 = vmatprep.subr.bf16.mxu1 %v14701_v18  ;;  %v14941_v18 = vld [vmem:[%s20777_s0 + $0x194] ss:$144 sps:$4 sm:$0xff]  }
 0x442   :  { %v10103_v8 = vpop.f32.mrf.mxu0  ;;  %10588 = vmatmul.mubr.bf16.vlgmr.msra.gmra.mxu0 %v14939_v5 }
 0x443   :  { %v10184_v61 = vpop.f32.mrf.mxu1  ;;  %10669 = vmatmul.mubr.bf16.vlgmr.msra.gmra.mxu1 %v14940_v62  ;;  %v10104_v7 = vadd.f32 %v10103_v8, %v19728_v49  ;;  %10718 = vmatpush1.bf16.msra.mxu0 %v14696_v57  ;;  %v14713_v49 = vld [vmem:[%s20776_s1 + $0x22ac] ss:$16 sps:$4 sm:$0xff]  }
 0x444   :  { %10799 = vmatpush1.bf16.msra.mxu1 %v14699_v27  ;;  %v10105_v32 = vpop.f32.mrf.mxu0  ;;  %10719 = vmatprep.subr.bf16.mxu0 %v14704_v28  ;;  %v14942_v57 = vld [vmem:[%s20777_s0 + $0x19c] ss:$144 sps:$4 sm:$0xff]  }
 0x445   :  { %v10186_v13 = vpop.f32.mrf.mxu1  ;;  %10800 = vmatprep.subr.bf16.mxu1 %v14707_v6  ;;  %v20033_v26 = vadd.f32 %v10184_v61, %v10104_v7  ;;  %v10106_v31 = vadd.f32 %v10105_v32, %v19737_v48  ;;  %10597 = vmatprep.mubr.bf16.mxu0 %v14941_v18  ;;  %v9644_v6 = vadd.f32 %v19240_v41, %v9563_v25  ;;  %v14708_v48 = vld [vmem:[%s20776_s1 + $0x20a8] ss:$16 sps:$4 sm:$0xff]   ;;  %v14719_v62 = vld [vmem:[%s20776_s1 + $0x228c] ss:$16 sps:$4 sm:$0xff]  }
 0x446   :  { %10678 = vmatprep.mubr.bf16.mxu1 %v14942_v57  ;;  %v10107_v27 = vpop.f32.mrf.mxu0  ;;  %v9492_v61 = vadd.f32 %v18989_v58, %v18801_v46  ;;  %v14943_v58 = vld [vmem:[%s20777_s0 + $0x190] ss:$144 sps:$4 sm:$0xff]   ;;  %v14944_v32 = vld [vmem:[%s20777_s0 + $0x198] ss:$144 sps:$4 sm:$0xff]  }
 0x447   :  { %v10188_v28 = vpop.f32.mrf.mxu1  ;;  %v20043_v8 = vadd.f32 %v10186_v13, %v10106_v31  ;;  %v10108_v20 = vadd.f32 %v10107_v27, %v19756_v38  ;;  %10720 = vmatpush1.bf16.msra.mxu0 %v14702_v56  ;;  %v14716_v38 = vld [vmem:[%s20776_s1 + $0x208c] ss:$16 sps:$4 sm:$0xff]   ;;  %v9725_v13 = vadd.f32 %v19242_v11, %v9644_v6  ;;  %v14717_v25 = vld [vmem:[%s20776_s1 + $0x2288] ss:$16 sps:$4 sm:$0xff]  }
 0x448   :  { %10801 = vmatpush1.bf16.msra.mxu1 %v14705_v15  ;;  %v20054_v5 = vpop.f32.mrf.mxu0  ;;  %10721 = vmatprep.subr.bf16.mxu0 %v14710_v45  ;;  %v9573_v31 = vadd.f32 %v18991_v14, %v9492_v61  ;;  %v14725_v11 = vld [vmem:[%s20776_s1 + $0x226c] ss:$16 sps:$4 sm:$0xff]   ;;  %v14945_v14 = vld [vmem:[%s20777_s0 + $0x2b4] ss:$144 sps:$4 sm:$0xff]  }
 0x449   :  { %v20056_v41 = vpop.f32.mrf.mxu1  ;;  %10802 = vmatprep.subr.bf16.mxu1 %v14713_v49  ;;  %v20064_v7 = vadd.f32 %v10188_v28, %v10108_v20  ;;  %v14714_v49 = vld [vmem:[%s20776_s1 + $0x2088] ss:$16 sps:$4 sm:$0xff]   ;;  %v9806_v27 = vadd.f32 %v19542_v63, %v9725_v13  ;;  %v14946_v20 = vld [vmem:[%s20777_s0 + $0x2bc] ss:$144 sps:$4 sm:$0xff]  }
 0x44a   :  { %v10113_v56 = vpop.f32.mrf.mxu0  ;;  %10598 = vmatmul.mubr.bf16.gmra.mxu0 %v14943_v58  ;;  %v9654_v61 = vadd.f32 %v19285_v47, %v9573_v31  ;;  %v14728_v47 = vld [vmem:[%s20776_s1 + $0x204c] ss:$16 sps:$4 sm:$0xff]  }
 0x44b   :  { %v10194_v15 = vpop.f32.mrf.mxu1  ;;  %10679 = vmatmul.mubr.bf16.gmra.mxu1 %v14944_v32  ;;  %v10114_v45 = vadd.f32 %v10113_v56, %v19778_v9  ;;  %10722 = vmatpush1.bf16.msra.mxu0 %v14708_v48  ;;  %v14722_v9 = vld [vmem:[%s20776_s1 + $0x206c] ss:$16 sps:$4 sm:$0xff]  }
 0x44c   :  { %10803 = vmatpush1.bf16.msra.mxu1 %v14711_v33  ;;  %v10115_v18 = vpop.f32.mrf.mxu0  ;;  %10723 = vmatprep.subr.bf16.mxu0 %v14716_v38  ;;  %v9735_v31 = vadd.f32 %v19287_v12, %v9654_v61  ;;  %v14734_v12 = vld [vmem:[%s20776_s1 + $0x202c] ss:$16 sps:$4 sm:$0xff]  }
 0x44d   :  { %v10196_v57 = vpop.f32.mrf.mxu1  ;;  %10804 = vmatprep.subr.bf16.mxu1 %v14719_v62  ;;  %v10116_v28 = vadd.f32 %v10115_v18, %v19796_v53  ;;  %v20089_v6 = vadd.f32 %v10194_v15, %v10114_v45  ;;  %10607 = vmatprep.mubr.bf16.mxu0 %v14945_v14  ;;  %v14720_v53 = vld [vmem:[%s20776_s1 + $0x2068] ss:$16 sps:$4 sm:$0xff]   ;;  %v9887_v15 = vadd.f32 %v19544_v42, %v9806_v27  ;;  %v14947_v45 = vld [vmem:[%s20777_s0 + $0x2b0] ss:$144 sps:$4 sm:$0xff]  }
 0x44e   :  { %10688 = vmatprep.mubr.bf16.mxu1 %v14946_v20  ;;  %v10117_v48 = vpop.f32.mrf.mxu0  ;;  %v14723_v62 = vld [vmem:[%s20776_s1 + $0x2268] ss:$16 sps:$4 sm:$0xff]   ;;  %v14949_v20 = vld [vmem:[%s20777_s0 + $0x3d4] ss:$144 sps:$4 sm:$0xff]  }
 0x44f   :  { %v10198_v33 = vpop.f32.mrf.mxu1  ;;  %v10118_v63 = vadd.f32 %v10117_v48, %v19805_v39  ;;  %v20099_v38 = vadd.f32 %v10196_v57, %v10116_v28  ;;  %10724 = vmatpush1.bf16.msra.mxu0 %v14714_v49  ;;  %v14731_v39 = vld [vmem:[%s20776_s1 + $0x224c] ss:$16 sps:$4 sm:$0xff]   ;;  %v9968_v18 = vadd.f32 %v19847_v54, %v9887_v15  ;;  %v14726_v57 = vld [vmem:[%s20776_s1 + $0x2048] ss:$16 sps:$4 sm:$0xff]   ;;  %v9816_v54 = vadd.f32 %v19587_v21, %v9735_v31 }
 0x450   :  { %10805 = vmatpush1.bf16.msra.mxu1 %v14717_v25  ;;  %v20107_v56 = vpop.f32.mrf.mxu0  ;;  %10725 = vmatprep.subr.bf16.mxu0 %v14722_v9  ;;  %v14948_v25 = vld [vmem:[%s20777_s0 + $0x2b8] ss:$144 sps:$4 sm:$0xff]   ;;  %v14950_v48 = vld [vmem:[%s20777_s0 + $0x3dc] ss:$144 sps:$4 sm:$0xff]  }
 0x451   :  { %v20109_v58 = vpop.f32.mrf.mxu1  ;;  %10806 = vmatprep.subr.bf16.mxu1 %v14725_v11  ;;  %v20118_v32 = vadd.f32 %v10198_v33, %v10118_v63  ;;  %v14729_v9 = vld [vmem:[%s20776_s1 + $0x2248] ss:$16 sps:$4 sm:$0xff]   ;;  %v10049_v63 = vadd.f32 %v19849_v1, %v9968_v18  ;;  %v14740_v1 = vld [vmem:[%s20776_s1 + $0x200c] ss:$16 sps:$4 sm:$0xff]   ;;  %v9897_v15 = vadd.f32 %v19589_v34, %v9816_v54 }
 0x452   :  { %v10123_v13 = vpop.f32.mrf.mxu0  ;;  %10608 = vmatmul.mubr.bf16.gmra.mxu0 %v14947_v45  ;;  %v14952_v18 = vld [vmem:[%s20777_s0 + $0x3d8] ss:$144 sps:$4 sm:$0xff]  }
 0x453   :  { %v10204_v49 = vpop.f32.mrf.mxu1  ;;  %10689 = vmatmul.mubr.bf16.gmra.mxu1 %v14948_v25  ;;  %v10124_v42 = vadd.f32 %v10123_v13, %v19827_v55  ;;  %10726 = vmatpush1.bf16.msra.mxu0 %v14720_v53  ;;  %v14737_v55 = vld [vmem:[%s20776_s1 + $0x222c] ss:$16 sps:$4 sm:$0xff]   ;;  %v14951_v25 = vld [vmem:[%s20777_s0 + $0x3d0] ss:$144 sps:$4 sm:$0xff]  }
 0x454   :  { %10807 = vmatpush1.bf16.msra.mxu1 %v14723_v62  ;;  %v10125_v11 = vpop.f32.mrf.mxu0  ;;  %10727 = vmatprep.subr.bf16.mxu0 %v14728_v47  ;;  %v14735_v62 = vld [vmem:[%s20776_s1 + $0x2228] ss:$16 sps:$4 sm:$0xff]  }
 0x455   :  { %v10206_v27 = vpop.f32.mrf.mxu1  ;;  %10808 = vmatprep.subr.bf16.mxu1 %v14731_v39  ;;  %v10126_v28 = vadd.f32 %v10125_v11, %v19845_v30  ;;  %v20143_v14 = vadd.f32 %v10204_v49, %v10124_v42  ;;  %10617 = vmatprep.mubr.bf16.mxu0 %v14949_v20  ;;  %v14732_v30 = vld [vmem:[%s20776_s1 + $0x2028] ss:$16 sps:$4 sm:$0xff]   ;;  %v9978_v42 = vadd.f32 %v19892_v60, %v9897_v15  ;;  %v14749_v60 = vld [vmem:[%s20776_s1 + $0x23ec] ss:$16 sps:$4 sm:$0xff]  }
 0x456   :  { %10698 = vmatprep.mubr.bf16.mxu1 %v14950_v48  ;;  %v10127_v33 = vpop.f32.mrf.mxu0  ;;  %v14741_v11 = vld [vmem:[%s20776_s1 + $0x2208] ss:$16 sps:$4 sm:$0xff]  }
 0x457   :  { %v10208_v61 = vpop.f32.mrf.mxu1  ;;  %v10128_v21 = vadd.f32 %v10127_v33, %v19854_v16  ;;  %v20153_v53 = vadd.f32 %v10206_v27, %v10126_v28  ;;  %10728 = vmatpush1.bf16.msra.mxu0 %v14726_v57  ;;  %v14743_v16 = vld [vmem:[%s20776_s1 + $0x220c] ss:$16 sps:$4 sm:$0xff]   ;;  %v10059_v33 = vadd.f32 %v19894_v51, %v9978_v42 }
 0x458   :  { %10809 = vmatpush1.bf16.msra.mxu1 %v14729_v9  ;;  %v10129_v47 = vpop.f32.mrf.mxu0  ;;  %10729 = vmatprep.subr.bf16.mxu0 %v14734_v12  ;;  %v14738_v9 = vld [vmem:[%s20776_s1 + $0x2008] ss:$16 sps:$4 sm:$0xff]   ;;  %v14752_v51 = vld [vmem:[%s20776_s1 + $0x21cc] ss:$16 sps:$4 sm:$0xff]  }
 0x459   :  { %v10210_v39 = vpop.f32.mrf.mxu1  ;;  %10810 = vmatprep.subr.bf16.mxu1 %v14737_v55  ;;  %v10130_v13 = vadd.f32 %v10129_v47, %v10049_v63  ;;  %v20168_v45 = vadd.f32 %v10208_v61, %v10128_v21  ;;  %v20883_v28 = vld [vmem:[#allocation41_spill] sm:$0xff]  ;;  %v20885_v15 = vld [vmem:[#allocation43_spill] sm:$0xff] }
 0x45a   :  { %v10133_v49 = vpop.f32.mrf.mxu0  ;;  %10618 = vmatmul.mubr.bf16.gmra.mxu0 %v14951_v25  ;;  %v14750_v25 = vld [vmem:[%s20776_s1 + $0x21c8] ss:$16 sps:$4 sm:$0xff]  }
 0x45b   :  { %v10214_v31 = vpop.f32.mrf.mxu1  ;;  %10699 = vmatmul.mubr.bf16.gmra.mxu1 %v14952_v18  ;;  %v10134_v57 = vadd.f32 %v10133_v49, %v19876_v36  ;;  %v20178_v34 = vadd.f32 %v10210_v39, %v10130_v13  ;;  %10730 = vmatpush1.bf16.msra.mxu0 %v14732_v30  ;;  %v14746_v36 = vld [vmem:[%s20776_s1 + $0x21ec] ss:$16 sps:$4 sm:$0xff]   ;;  %v20886_v18 = vld [vmem:[#allocation2_spill] sm:$0xff] }
 0x45c   :  { %10811 = vmatpush1.bf16.msra.mxu1 %v14735_v62  ;;  %v10135_v27 = vpop.f32.mrf.mxu0  ;;  %10731 = vmatprep.subr.bf16.mxu0 %v14740_v1  ;;  %v20884_v1 = vld [vmem:[#allocation42_spill] sm:$0xff]  ;;  %v20887_v42 = vld [vmem:[#allocation3_spill] sm:$0xff] }
 0x45d   :  { %v10216_v12 = vpop.f32.mrf.mxu1  ;;  %10812 = vmatprep.subr.bf16.mxu1 %v14743_v16  ;;  %v10136_v55 = vadd.f32 %v10135_v27, %v19890_v37  ;;  %v20193_v54 = vadd.f32 %v10214_v31, %v10134_v57  ;;  %10627 = vmatprep.mubr.bf16.mxu0 %v17423_v2  ;;  %v14744_v37 = vld [vmem:[%s20776_s1 + $0x21e8] ss:$16 sps:$4 sm:$0xff]   ;;  %v8004_v57 = vadd.f32 %v20887_v42, %v20886_v18  ;;  %v14761_v27 = vld [vmem:[%s20776_s1 + $0x23ac] ss:$16 sps:$4 sm:$0xff]  }
 0x45e   :  { %10708 = vmatprep.mubr.bf16.mxu1 %v20883_v28  ;;  %v10137_v20 = vpop.f32.mrf.mxu0  ;;  %v14747_v2 = vld [vmem:[%s20776_s1 + $0x23e8] ss:$16 sps:$4 sm:$0xff]  }
 0x45f   :  { %v10218_v48 = vpop.f32.mrf.mxu1  ;;  %v10138_v61 = vadd.f32 %v10137_v20, %v19899_v35  ;;  %v20199_v63 = vadd.f32 %v10216_v12, %v10136_v55  ;;  %10732 = vmatpush1.bf16.msra.mxu0 %v14738_v9  ;;  %v14755_v35 = vld [vmem:[%s20776_s1 + $0x23cc] ss:$16 sps:$4 sm:$0xff]   ;;  %v14753_v31 = vld [vmem:[%s20776_s1 + $0x23c8] ss:$16 sps:$4 sm:$0xff]  }
 0x460   :  { %10813 = vmatpush1.bf16.msra.mxu1 %v14741_v11  ;;  %v10139_v21 = vpop.f32.mrf.mxu0  ;;  %10733 = vmatprep.subr.bf16.mxu0 %v14746_v36  ;;  %v14954_v55 = vld [vmem:[%s20777_s0 + $0x8c] ss:$144 sps:$4 sm:$0xff]  }
 0x461   :  { %v10220_v30 = vpop.f32.mrf.mxu1  ;;  %10814 = vmatprep.subr.bf16.mxu1 %v14749_v60  ;;  %v10140_v62 = vadd.f32 %v10139_v21, %v10059_v33  ;;  %v20213_v47 = vadd.f32 %v10218_v48, %v10138_v61  ;;  %v14953_v60 = vld [vmem:[%s20777_s0 + $0x84] ss:$144 sps:$4 sm:$0xff]   ;;  %v14759_v33 = vld [vmem:[%s20776_s1 + $0x23a8] ss:$16 sps:$4 sm:$0xff]   ;;  %v14767_v21 = vld [vmem:[%s20776_s1 + $0x238c] ss:$16 sps:$4 sm:$0xff]  }
 0x462   :  { %v10143_v39 = vpop.f32.mrf.mxu0  ;;  %10628 = vmatmul.mubr.bf16.gmra.mxu0 %v20884_v1  ;;  %v20888_v61 = vld [vmem:[#allocation4_spill] sm:$0xff]  ;;  %v14762_v1 = vld [vmem:[%s20776_s1 + $0x2188] ss:$16 sps:$4 sm:$0xff]  }
 0x463   :  { %v10224_v16 = vpop.f32.mrf.mxu1  ;;  %10709 = vmatmul.mubr.bf16.gmra.mxu1 %v20885_v15  ;;  %v10144_v13 = vadd.f32 %v10143_v39, %v19917_v17  ;;  %v20218_v49 = vadd.f32 %v10220_v30, %v10140_v62  ;;  %10734 = vmatpush2.bf16.msra.mxu0 %v14744_v37  ;;  %v14758_v17 = vld [vmem:[%s20776_s1 + $0x21ac] ss:$16 sps:$4 sm:$0xff]   ;;  %v8085_v37 = vadd.f32 %v20888_v61, %v8004_v57  ;;  %v14774_v61 = vld [vmem:[%s20776_s1 + $0x2148] ss:$16 sps:$4 sm:$0xff]  }
 0x464   :  { %10815 = vmatpush2.bf16.msra.mxu1 %v14747_v2  ;;  %v10145_v9 = vpop.f32.mrf.mxu0  ;;  %10735 = vmatprep.subr.bf16.mxu0 %v14752_v51  ;;  %v14764_v2 = vld [vmem:[%s20776_s1 + $0x218c] ss:$16 sps:$4 sm:$0xff]   ;;  %v9462_v39 = vadd.f32 %v18840_v3, %v18801_v46 }
 0x465   :  { %v10226_v11 = vpop.f32.mrf.mxu1  ;;  %10816 = vmatprep.subr.bf16.mxu1 %v14755_v35  ;;  %v10146_v12 = vadd.f32 %v10145_v9, %v19925_v43  ;;  %v20235_v36 = vadd.f32 %v10224_v16, %v10144_v13  ;;  %10749 = vmatprep.mubr.bf16.mxu0 %v14953_v60  ;;  %v14756_v43 = vld [vmem:[%s20776_s1 + $0x21a8] ss:$16 sps:$4 sm:$0xff]   ;;  %v14773_v3 = vld [vmem:[%s20776_s1 + $0x236c] ss:$16 sps:$4 sm:$0xff]  }
 0x466   :  { %10830 = vmatprep.mubr.bf16.mxu1 %v14954_v55  ;;  %v10147_v28 = vpop.f32.mrf.mxu0  ;;  %v20889_v35 = vld [vmem:[#allocation11_spill] sm:$0xff]  ;;  %v20890_v15 = vld [vmem:[#allocation5_spill] sm:$0xff]  ;;  %v9543_v57 = vadd.f32 %v18842_v22, %v9462_v39 }
 0x467   :  { %v10228_v20 = vpop.f32.mrf.mxu1  ;;  %v20243_v48 = vadd.f32 %v10226_v11, %v10146_v12  ;;  %10736 = vmatpush2.bf16.msra.mxu0 %v14750_v25  ;;  %v8166_v62 = vadd.f32 %v20889_v35, %v8085_v37  ;;  %v14765_v16 = vld [vmem:[%s20776_s1 + $0x2388] ss:$16 sps:$4 sm:$0xff]   ;;  %v8014_v13 = vadd.f32 %v20890_v15, %v20886_v18  ;;  %v14770_v25 = vld [vmem:[%s20776_s1 + $0x216c] ss:$16 sps:$4 sm:$0xff]   ;;  %v20897_v35 = vld [vmem:[#allocation14_spill] sm:$0xff] }
 0x468   :  { %10817 = vmatpush2.bf16.msra.mxu1 %v14753_v31  ;;  %10737 = vmatprep.subr.bf16.mxu0 %v14758_v17  ;;  %v10148_v30 = vpop.f32.mrf.mxu0  ;;  %v20891_v31 = vld [vmem:[#allocation12_spill] sm:$0xff]  ;;  %v14768_v9 = vld [vmem:[%s20776_s1 + $0x2168] ss:$16 sps:$4 sm:$0xff]   ;;  %v20892_v17 = vld [vmem:[#allocation6_spill] sm:$0xff]  ;;  %v9624_v28 = vadd.f32 %v19142_v52, %v9543_v57 }
 0x469   :  { %10818 = vmatprep.subr.bf16.mxu1 %v14761_v27  ;;  %v10229_v51 = vpop.f32.mrf.mxu1  ;;  %v8247_v42 = vadd.f32 %v20891_v31, %v8166_v62  ;;  %v14771_v11 = vld [vmem:[%s20776_s1 + $0x2368] ss:$16 sps:$4 sm:$0xff]   ;;  %v8095_v27 = vadd.f32 %v20892_v17, %v8014_v13  ;;  %v14776_v22 = vld [vmem:[%s20776_s1 + $0x214c] ss:$16 sps:$4 sm:$0xff]   ;;  %v20896_v30 = vld [vmem:[#allocation20_spill] sm:$0xff] }
 0x46a   :  { %v20893_v12 = vld [vmem:[#allocation19_spill] sm:$0xff]  ;;  %v20894_v20 = vld [vmem:[#allocation13_spill] sm:$0xff]  ;;  %v9705_v51 = vadd.f32 %v19144_v24, %v9624_v28  ;;  %v20902_v17 = vld [vmem:[#allocation28_spill] sm:$0xff] }
 0x46b   :  { %10738 = vmatpush2.bf16.msra.mxu0 %v14756_v43  ;;  %v8328_v60 = vadd.f32 %v20893_v12, %v8247_v42  ;;  %v14779_v55 = vld [vmem:[%s20776_s1 + $0x234c] ss:$16 sps:$4 sm:$0xff]   ;;  %v8176_v43 = vadd.f32 %v20894_v20, %v8095_v27  ;;  %v14777_v37 = vld [vmem:[%s20776_s1 + $0x2348] ss:$16 sps:$4 sm:$0xff]  }
 0x46c   :  { %10819 = vmatpush2.bf16.msra.mxu1 %v14759_v33  ;;  %10739 = vmatprep.subr.bf16.mxu0 %v14764_v2  ;;  %v9472_v33 = vadd.f32 %v18895_v29, %v18801_v46  ;;  %v20895_v2 = vld [vmem:[#allocation7_spill] sm:$0xff]  ;;  %v9786_v15 = vadd.f32 %v19444_v40, %v9705_v51  ;;  %v20900_v31 = vld [vmem:[#allocation21_spill] sm:$0xff] }
 0x46d   :  { %10820 = vmatprep.subr.bf16.mxu1 %v14767_v21  ;;  %v8024_v21 = vadd.f32 %v20895_v2, %v20886_v18  ;;  %v8409_v52 = vadd.f32 %v20896_v30, %v8328_v60  ;;  %v14782_v46 = vld [vmem:[%s20776_s1 + $0x212c] ss:$16 sps:$4 sm:$0xff]   ;;  %v8257_v62 = vadd.f32 %v20897_v35, %v8176_v43  ;;  %v14780_v13 = vld [vmem:[%s20776_s1 + $0x2128] ss:$16 sps:$4 sm:$0xff]   ;;  %v20906_v2 = vld [vmem:[#allocation16_spill] sm:$0xff] }
 0x46e   :  { %v14785_v29 = vld [vmem:[%s20776_s1 + $0x232c] ss:$16 sps:$4 sm:$0xff]   ;;  %v9867_v12 = vadd.f32 %v19446_v0, %v9786_v15  ;;  %v14786_v60 = vld [vmem:[%s20776_s1 + $0x2108] ss:$16 sps:$4 sm:$0xff]   ;;  %v20912_v15 = vld [vmem:[#allocation30_spill] sm:$0xff] }
 0x46f   :  { %10740 = vmatpush2.bf16.msra.mxu0 %v14762_v1  ;;  %v20898_v39 = vld [vmem:[#allocation27_spill] sm:$0xff]  ;;  %v8338_v42 = vadd.f32 %v20900_v31, %v8257_v62  ;;  %v14792_v0 = vld [vmem:[%s20779_s3 + $0x78] sm:$0xff]   ;;  %v20910_v62 = vld [vmem:[#allocation36_spill] sm:$0xff] }
 0x470   :  { %10821 = vmatpush2.bf16.msra.mxu1 %v14765_v16  ;;  %10741 = vmatprep.subr.bf16.mxu0 %v14770_v25  ;;  %v8490_v1 = vadd.f32 %v20898_v39, %v8409_v52  ;;  %v9553_v16 = vadd.f32 %v18897_v19, %v9472_v33  ;;  %v14783_v25 = vld [vmem:[%s20776_s1 + $0x2328] ss:$16 sps:$4 sm:$0xff]   ;;  %v14788_v19 = vld [vmem:[%s20776_s1 + $0x210c] ss:$16 sps:$4 sm:$0xff]  }
 0x471   :  { %10822 = vmatprep.subr.bf16.mxu1 %v14773_v3  ;;  %v20899_v3 = vld [vmem:[#allocation8_spill] sm:$0xff]  ;;  %v14791_v40 = vld [vmem:[%s20776_s1 + $0x230c] ss:$16 sps:$4 sm:$0xff]  }
 0x472   :  { %v8105_v24 = vadd.f32 %v20899_v3, %v8024_v21  ;;  %v9634_v57 = vadd.f32 %v19191_v10, %v9553_v16  ;;  %v8571_v27 = vadd.f32 %v20902_v17, %v8490_v1  ;;  %v20904_v10 = vld [vmem:[#allocation22_spill] sm:$0xff]  ;;  %v20905_v43 = vld [vmem:[#allocation35_spill] sm:$0xff]  ;;  %v20907_v30 = vld [vmem:[#allocation29_spill] sm:$0xff] }
 0x473   :  { %10742 = vmatpush2.bf16.msra.mxu0 %v14768_v9  ;;  %v20901_v9 = vld [vmem:[#allocation15_spill] sm:$0xff]  ;;  %v8419_v20 = vadd.f32 %v20904_v10, %v8338_v42  ;;  %v14794_v1 = vld [vmem:[%s20779_s3 + $0x70] sm:$0xff]  }
 0x474   :  { %10823 = vmatpush2.bf16.msra.mxu1 %v14771_v11  ;;  %10743 = vmatprep.subr.bf16.mxu0 %v14776_v22  ;;  %v8186_v11 = vadd.f32 %v20901_v9, %v8105_v24  ;;  %v14789_v22 = vld [vmem:[%s20776_s1 + $0x2308] ss:$16 sps:$4 sm:$0xff]   ;;  %v8652_v33 = vadd.f32 %v20905_v43, %v8571_v27  ;;  %v14955_v42 = vld [vmem:[%s20777_s0 + $0x80] ss:$144 sps:$4 sm:$0xff]   ;;  %v14957_v9 = vld [vmem:[%s20777_s0 + $0x1a4] ss:$144 sps:$4 sm:$0xff]  }
 0x475   :  { %10824 = vmatprep.subr.bf16.mxu1 %v14779_v55  ;;  %v20903_v55 = vld [vmem:[#allocation9_spill] sm:$0xff]  ;;  %v8500_v52 = vadd.f32 %v20907_v30, %v8419_v20  ;;  %v20909_v51 = vld [vmem:[#allocation23_spill] sm:$0xff]  ;;  %v20914_v17 = vld [vmem:[#allocation24_spill] sm:$0xff] }
 0x476   :  { %v8034_v28 = vadd.f32 %v20903_v55, %v20886_v18  ;;  %v8267_v21 = vadd.f32 %v20906_v2, %v8186_v11  ;;  %v8733_v39 = vadd.f32 %v20910_v62, %v8652_v33  ;;  %v14958_v11 = vld [vmem:[%s20777_s0 + $0x1ac] ss:$144 sps:$4 sm:$0xff]   ;;  %v20917_v43 = vld [vmem:[#allocation18_spill] sm:$0xff] }
 0x477   :  { %10744 = vmatpush2.bf16.msra.mxu0 %v14774_v61  ;;  %v9715_v61 = vadd.f32 %v19193_v50, %v9634_v57  ;;  %v14793_v50 = vld [vmem:[%s20779_s3 + $0x38] sm:$0xff]   ;;  %v14796_v20 = vld [vmem:[%s20779_s3 + $0x68] sm:$0xff]  }
 0x478   :  { %10825 = vmatpush2.bf16.msra.mxu1 %v14777_v37  ;;  %10745 = vmatprep.subr.bf16.mxu0 %v14782_v46  ;;  %v9948_v37 = vadd.f32 %v19749_v4, %v9867_v12  ;;  %v20908_v46 = vld [vmem:[#allocation10_spill] sm:$0xff]  ;;  %v8348_v35 = vadd.f32 %v20909_v51, %v8267_v21  ;;  %v20915_v12 = vld [vmem:[#allocation37_spill] sm:$0xff]  ;;  %v20919_v21 = vld [vmem:[#allocation47_spill] sm:$0xff] }
 0x479   :  { %10826 = vmatprep.subr.bf16.mxu1 %v14785_v29  ;;  %v9796_v18 = vadd.f32 %v19493_v44, %v9715_v61  ;;  %v8115_v29 = vadd.f32 %v20908_v46, %v8034_v28  ;;  %v20911_v44 = vld [vmem:[#allocation17_spill] sm:$0xff]  ;;  %v20921_v51 = vld [vmem:[#allocation38_spill] sm:$0xff] }
 0x47a   :  { %v10029_v4 = vadd.f32 %v19751_v59, %v9948_v37  ;;  %v14956_v59 = vld [vmem:[%s20777_s0 + $0x88] ss:$144 sps:$4 sm:$0xff]   ;;  %v8429_v27 = vadd.f32 %v20914_v17, %v8348_v35  ;;  %v14962_v17 = vld [vmem:[%s20777_s0 + $0x2cc] ss:$144 sps:$4 sm:$0xff]  }
 0x47b   :  { %10746 = vmatpush2.bf16.msra.mxu0 %v14780_v13  ;;  %v8196_v16 = vadd.f32 %v20911_v44, %v8115_v29  ;;  %v8581_v13 = vadd.f32 %v20912_v15, %v8500_v52  ;;  %v20923_v44 = vld [vmem:[#allocation93_spill] sm:$0xff] }
 0x47c   :  { %10827 = vmatpush2.bf16.msra.mxu1 %v14783_v25  ;;  %10747 = vmatprep.subr.bf16.mxu0 %v14788_v19  ;;  %v20913_v25 = vld [vmem:[#allocation46_spill] sm:$0xff]  ;;  %v9877_v19 = vadd.f32 %v19495_v23, %v9796_v18 }
 0x47d   :  { %10828 = vmatprep.subr.bf16.mxu1 %v14791_v40  ;;  %v8814_v3 = vadd.f32 %v20913_v25, %v8733_v39  ;;  %v10110_v40 = vadd.f32 %v20054_v5, %v10029_v4  ;;  %v20916_v5 = vld [vmem:[#allocation92_spill] sm:$0xff]  ;;  %v8277_v33 = vadd.f32 %v20917_v43, %v8196_v16  ;;  %v20922_v4 = vld [vmem:[#allocation58_spill] sm:$0xff]  ;;  %v20929_v43 = vld [vmem:[#allocation33_spill] sm:$0xff] }
 0x47e   :  { %v9958_v55 = vadd.f32 %v20916_v5, %v9877_v19 }
 0x47f   :  { %10748 = vmatpush2.bf16.msra.mxu0 %v14786_v60  ;;  %v8662_v60 = vadd.f32 %v20915_v12, %v8581_v13  ;;  %v8895_v30 = vadd.f32 %v20919_v21, %v8814_v3  ;;  %v10191_v52 = vadd.f32 %v20056_v41, %v10110_v40  ;;  %v20924_v13 = vld [vmem:[#allocation32_spill] sm:$0xff]  ;;  %v20931_v21 = vld [vmem:[#allocation66_spill] sm:$0xff] }
 0x480   :  { %10829 = vmatpush2.bf16.msra.mxu1 %v14789_v22  ;;  %12720 = vmatprep.subr.bf16.mxu0 %v14792_v0  ;;  %v20918_v0 = vld [vmem:[#allocation31_spill] sm:$0xff]  ;;  %v10039_v16 = vadd.f32 %v20923_v44, %v9958_v55  ;;  %v20925_v3 = vld [vmem:[#allocation48_spill] sm:$0xff] }
 0x481   :  { %v8510_v61 = vadd.f32 %v20918_v0, %v8429_v27  ;;  %v8743_v35 = vadd.f32 %v20921_v51, %v8662_v60  ;;  %v20926_v27 = vld [vmem:[#allocation26_spill] sm:$0xff]  ;;  %v20927_v60 = vld [vmem:[#allocation39_spill] sm:$0xff]  ;;  %v20930_v0 = vld [vmem:[#allocation49_spill] sm:$0xff] }
 0x482   :  { %v10265_v24 = vpop.f32.mrf.mxu0  ;;  %10750 = vmatmul.mubr.bf16.vlgmr.msra.gmra.mxu0 %v14955_v42  ;;  %v14959_v42 = vld [vmem:[%s20777_s0 + $0x1a0] ss:$144 sps:$4 sm:$0xff]   ;;  %v10120_v40 = vadd.f32 %v20107_v56, %v10039_v16 }
 0x483   :  { %v10346_v31 = vpop.f32.mrf.mxu1  ;;  %10831 = vmatmul.mubr.bf16.vlgmr.msra.gmra.mxu1 %v14956_v59  ;;  %v10266_v57 = vadd.f32 %v10265_v24, %v20033_v26  ;;  %10759 = vmatprep.mubr.bf16.mxu0 %v14957_v9  ;;  %v14795_v26 = vld [vmem:[%s20779_s3 + $0x30] sm:$0xff]   ;;  %v8591_v25 = vadd.f32 %v20924_v13, %v8510_v61  ;;  %v8824_v24 = vadd.f32 %v20925_v3, %v8743_v35  ;;  %v14960_v59 = vld [vmem:[%s20777_s0 + $0x1a8] ss:$144 sps:$4 sm:$0xff]   ;;  %v20935_v16 = vld [vmem:[#allocation50_spill] sm:$0xff] }
 0x484   :  { %10840 = vmatprep.mubr.bf16.mxu1 %v14958_v11  ;;  %v10267_v22 = vpop.f32.mrf.mxu0  ;;  %12721 = vmatpush3.bf16.msra.mxu0 %v14793_v50  ;;  %v14797_v50 = vld [vmem:[%s20779_s3 + $0x28] sm:$0xff]   ;;  %v14961_v11 = vld [vmem:[%s20777_s0 + $0x2c4] ss:$144 sps:$4 sm:$0xff]   ;;  %v14963_v13 = vld [vmem:[%s20777_s0 + $0x2c0] ss:$144 sps:$4 sm:$0xff]  }
 0x485   :  { %v10348_v23 = vpop.f32.mrf.mxu1  ;;  %v20385_v28 = vadd.f32 %v10346_v31, %v10266_v57  ;;  %v10268_v10 = vadd.f32 %v10267_v22, %v20043_v8  ;;  %12722 = vmatprep.subr.bf16.mxu0 %v14794_v1  ;;  %v20920_v8 = vld [vmem:[#allocation25_spill] sm:$0xff]  ;;  %v8976_v1 = vadd.f32 %v20922_v4, %v8895_v30  ;;  %v8672_v22 = vadd.f32 %v20927_v60, %v8591_v25 }
 0x486   :  { %v10269_v37 = vpop.f32.mrf.mxu0  ;;  %v8358_v29 = vadd.f32 %v20920_v8, %v8277_v33  ;;  %v8905_v61 = vadd.f32 %v20930_v0, %v8824_v24  ;;  %v20932_v8 = vld [vmem:[#allocation40_spill] sm:$0xff]  ;;  %v14964_v25 = vld [vmem:[%s20777_s0 + $0x2c8] ss:$144 sps:$4 sm:$0xff]  }
 0x487   :  { %v10350_v2 = vpop.f32.mrf.mxu1  ;;  %v20395_v18 = vadd.f32 %v10348_v23, %v10268_v10  ;;  %v10270_v46 = vadd.f32 %v10269_v37, %v20064_v7  ;;  %v14798_v7 = vld [vmem:[%s20779_s3 + $0x60] sm:$0xff]   ;;  %v20936_v24 = vld [vmem:[#allocation67_spill] sm:$0xff] }
 0x488   :  { %v10271_v62 = vpop.f32.mrf.mxu0  ;;  %12723 = vmatpush3.bf16.msra.mxu0 %v14795_v26  ;;  %v8439_v12 = vadd.f32 %v20926_v27, %v8358_v29  ;;  %v20928_v26 = vld [vmem:[#allocation59_spill] sm:$0xff]  ;;  %v8753_v29 = vadd.f32 %v20932_v8, %v8672_v22 }
 0x489   :  { %v10352_v39 = vpop.f32.mrf.mxu1  ;;  %v20405_v41 = vadd.f32 %v10350_v2, %v10270_v46  ;;  %v10272_v15 = vadd.f32 %v10271_v62, %v10191_v52  ;;  %12724 = vmatprep.subr.bf16.mxu0 %v14796_v20  ;;  %v9057_v5 = vadd.f32 %v20928_v26, %v8976_v1  ;;  %v14800_v20 = vld [vmem:[%s20779_s3 + $0x58] sm:$0xff]   ;;  %v10201_v52 = vadd.f32 %v20109_v58, %v10120_v40  ;;  %v14802_v58 = vld [vmem:[%s20779_s3 + $0x50] sm:$0xff]   ;;  %v20939_v22 = vld [vmem:[#allocation75_spill] sm:$0xff] }
 0x48a   :  { %v10275_v31 = vpop.f32.mrf.mxu0  ;;  %10760 = vmatmul.mubr.bf16.gmra.mxu0 %v14959_v42  ;;  %v8520_v33 = vadd.f32 %v20929_v43, %v8439_v12  ;;  %v14801_v62 = vld [vmem:[%s20779_s3 + $0x18] sm:$0xff]   ;;  %v14804_v26 = vld [vmem:[%s20779_s3 + $0x48] sm:$0xff]  }
 0x48b   :  { %10841 = vmatmul.mubr.bf16.gmra.mxu1 %v14960_v59  ;;  %v10356_v19 = vpop.f32.mrf.mxu1  ;;  %v20419_v57 = vadd.f32 %v10352_v39, %v10272_v15  ;;  %v10276_v9 = vadd.f32 %v10275_v31, %v20089_v6  ;;  %10769 = vmatprep.mubr.bf16.mxu0 %v14961_v11  ;;  %v14799_v6 = vld [vmem:[%s20779_s3 + $0x20] sm:$0xff]   ;;  %v9138_v30 = vadd.f32 %v20931_v21, %v9057_v5  ;;  %v20933_v39 = vld [vmem:[#allocation60_spill] sm:$0xff]  ;;  %v14966_v40 = vld [vmem:[%s20777_s0 + $0x3ec] ss:$144 sps:$4 sm:$0xff]  }
 0x48c   :  { %10850 = vmatprep.mubr.bf16.mxu1 %v14962_v17  ;;  %v10277_v23 = vpop.f32.mrf.mxu0  ;;  %12725 = vmatpush3.bf16.msra.mxu0 %v14797_v50  ;;  %v8986_v50 = vadd.f32 %v20933_v39, %v8905_v61  ;;  %v8834_v15 = vadd.f32 %v20935_v16, %v8753_v29  ;;  %v20938_v12 = vld [vmem:[#allocation61_spill] sm:$0xff]  ;;  %v20940_v5 = vld [vmem:[#allocation51_spill] sm:$0xff]  ;;  %v20944_v29 = vld [vmem:[#allocation76_spill] sm:$0xff] }
 0x48d   :  { %v10358_v56 = vpop.f32.mrf.mxu1  ;;  %v10278_v55 = vadd.f32 %v10277_v23, %v20099_v38  ;;  %v20435_v10 = vadd.f32 %v10356_v19, %v10276_v9  ;;  %12726 = vmatprep.subr.bf16.mxu0 %v14798_v7  ;;  %v9219_v31 = vadd.f32 %v20936_v24, %v9138_v30  ;;  %v14965_v19 = vld [vmem:[%s20777_s0 + $0x3e4] ss:$144 sps:$4 sm:$0xff]   ;;  %v14805_v8 = vld [vmem:[%s20779_s3 + $0x8] sm:$0xff]  }
 0x48e   :  { %v10279_v37 = vpop.f32.mrf.mxu0  ;;  %v20937_v9 = vld [vmem:[#allocation44_spill] sm:$0xff]  ;;  %v9067_v60 = vadd.f32 %v20938_v12, %v8986_v50 }
 0x48f   :  { %v10360_v2 = vpop.f32.mrf.mxu1  ;;  %v10280_v46 = vadd.f32 %v10279_v37, %v20118_v32  ;;  %v20445_v38 = vadd.f32 %v10358_v56, %v10278_v55  ;;  %v20934_v32 = vld [vmem:[#allocation34_spill] sm:$0xff]  ;;  %v9300_v23 = vadd.f32 %v20939_v22, %v9219_v31  ;;  %v8915_v55 = vadd.f32 %v20940_v5, %v8834_v15  ;;  %v20945_v39 = vld [vmem:[#allocation56_spill] sm:$0xff] }
 0x490   :  { %v10281_v51 = vpop.f32.mrf.mxu0  ;;  %12727 = vmatpush3.bf16.msra.mxu0 %v14799_v6  ;;  %v8601_v44 = vadd.f32 %v20934_v32, %v8520_v33  ;;  %v20941_v33 = vld [vmem:[#allocation68_spill] sm:$0xff]  ;;  %v14968_v32 = vld [vmem:[%s20777_s0 + $0x3e8] ss:$144 sps:$4 sm:$0xff]   ;;  %v20952_v22 = vld [vmem:[#allocation70_spill] sm:$0xff] }
 0x491   :  { %v10362_v35 = vpop.f32.mrf.mxu1  ;;  %v10282_v4 = vadd.f32 %v10281_v51, %v10201_v52  ;;  %v20452_v1 = vadd.f32 %v10360_v2, %v10280_v46  ;;  %12728 = vmatprep.subr.bf16.mxu0 %v14800_v20  ;;  %v9148_v0 = vadd.f32 %v20941_v33, %v9067_v60  ;;  %v20942_v2 = vld [vmem:[#allocation45_spill] sm:$0xff]  ;;  %v9381_v51 = vadd.f32 %v20944_v29, %v9300_v23 }
 0x492   :  { %v10285_v7 = vpop.f32.mrf.mxu0  ;;  %10770 = vmatmul.mubr.bf16.gmra.mxu0 %v14963_v13  ;;  %v8682_v11 = vadd.f32 %v20937_v9, %v8601_v44  ;;  %v20946_v44 = vld [vmem:[#allocation69_spill] sm:$0xff]  ;;  %v20947_v13 = vld [vmem:[#allocation52_spill] sm:$0xff]  ;;  %v20950_v9 = vld [vmem:[#allocation79_spill] sm:$0xff] }
 0x493   :  { %10851 = vmatmul.mubr.bf16.gmra.mxu1 %v14964_v25  ;;  %v10366_v3 = vpop.f32.mrf.mxu1  ;;  %v10286_v42 = vadd.f32 %v10285_v7, %v20143_v14  ;;  %v20467_v59 = vadd.f32 %v10362_v35, %v10282_v4  ;;  %10779 = vmatprep.mubr.bf16.mxu0 %v14965_v19  ;;  %v14803_v14 = vld [vmem:[%s20779_s3 + $0x10] sm:$0xff]   ;;  %v9229_v16 = vadd.f32 %v20946_v44, %v9148_v0  ;;  %v20948_v25 = vld [vmem:[#allocation53_spill] sm:$0xff]  ;;  %v14807_v19 = vld [vmem:[%s20779_s3] sm:$0xff]  }
 0x494   :  { %10860 = vmatprep.mubr.bf16.mxu1 %v14966_v40  ;;  %v10287_v17 = vpop.f32.mrf.mxu0  ;;  %12729 = vmatpush3.bf16.msra.mxu0 %v14801_v62  ;;  %v8763_v21 = vadd.f32 %v20942_v2, %v8682_v11  ;;  %v10884_v40 = vmax.f32 %v9381_v51, 0.0 }
 0x495   :  { %v10368_v27 = vpop.f32.mrf.mxu1  ;;  %v10288_v56 = vadd.f32 %v10287_v17, %v20153_v53  ;;  %v20482_v6 = vadd.f32 %v10366_v3, %v10286_v42  ;;  %12730 = vmatprep.subr.bf16.mxu0 %v14802_v58  ;;  %v20943_v53 = vld [vmem:[#allocation62_spill] sm:$0xff]  ;;  %v20949_v3 = vld [vmem:[#allocation63_spill] sm:$0xff]  ;;  %v9310_v11 = vadd.f32 %v20950_v9, %v9229_v16  ;;  %v20963_v9 = vld [vmem:[#allocation84_spill] sm:$0xff] }
 0x496   :  { %v10289_v20 = vpop.f32.mrf.mxu0  ;;  %v8996_v30 = vadd.f32 %v20943_v53, %v8915_v55  ;;  %v8844_v50 = vadd.f32 %v20945_v39, %v8763_v21  ;;  %v14967_v58 = vld [vmem:[%s20777_s0 + $0x3e0] ss:$144 sps:$4 sm:$0xff]  }
 0x497   :  { %v10370_v43 = vpop.f32.mrf.mxu1  ;;  %v10290_v61 = vadd.f32 %v10289_v20, %v20168_v45  ;;  %v20490_v37 = vadd.f32 %v10368_v27, %v10288_v56  ;;  %v14806_v45 = vld [vmem:[%s20779_s3 + $0x40] sm:$0xff]   ;;  %v20951_v27 = vld [vmem:[#allocation57_spill] sm:$0xff]  ;;  %v20954_v20 = vld [vmem:[#allocation64_spill] sm:$0xff] }
 0x498   :  { %v10291_v52 = vpop.f32.mrf.mxu0  ;;  %12731 = vmatpush3.bf16.msra.mxu0 %v14803_v14  ;;  %v9077_v24 = vadd.f32 %v20949_v3, %v8996_v30  ;;  %v8925_v14 = vadd.f32 %v20951_v27, %v8844_v50  ;;  %v20953_v56 = vld [vmem:[#allocation74_spill] sm:$0xff]  ;;  %v20964_v27 = vld [vmem:[#allocation77_spill] sm:$0xff] }
 0x499   :  { %v10372_v46 = vpop.f32.mrf.mxu1  ;;  %v10292_v35 = vadd.f32 %v10291_v52, %v20178_v34  ;;  %v20499_v62 = vadd.f32 %v10370_v43, %v10290_v61  ;;  %12732 = vmatprep.subr.bf16.mxu0 %v14804_v26  ;;  %v10880_v26 = vmax.f32 %v20953_v56, 0.0  ;;  %v20956_v52 = vld [vmem:[#allocation54_spill] sm:$0xff]  ;;  %v20966_v56 = vld [vmem:[#allocation87_spill] sm:$0xff] }
 0x49a   :  { %v10295_v4 = vpop.f32.mrf.mxu0  ;;  %10780 = vmatmul.mubr.bf16.gmra.mxu0 %v14967_v58  ;;  %v9158_v23 = vadd.f32 %v20952_v22, %v9077_v24  ;;  %v9006_v43 = vadd.f32 %v20954_v20, %v8925_v14  ;;  %v20960_v58 = vld [vmem:[#allocation83_spill] sm:$0xff]  ;;  %v20962_v3 = vld [vmem:[#allocation78_spill] sm:$0xff]  ;;  %v14811_v14 = vld [vmem:[%s20779_s3 + $0xb0] sm:$0xff]  }
 0x49b   :  { %10861 = vmatmul.mubr.bf16.gmra.mxu1 %v14968_v32  ;;  %v10376_v34 = vpop.f32.mrf.mxu1  ;;  %v10296_v15 = vadd.f32 %v10295_v4, %v20193_v54  ;;  %v20513_v7 = vadd.f32 %v10372_v46, %v10292_v35  ;;  %10789 = vmatprep.mubr.bf16.mxu0 %v20947_v13  ;;  %v10916_v53 = vpack.c.bf16 %v10884_v40, %v10880_v26  ;;  %v20957_v46 = vld [vmem:[#allocation55_spill] sm:$0xff]  ;;  %v20961_v13 = vld [vmem:[#allocation72_spill] sm:$0xff]  ;;  %v20967_v20 = vld [vmem:[#allocation82_spill] sm:$0xff] }
 0x49c   :  { %10870 = vmatprep.mubr.bf16.mxu1 %v20948_v25  ;;  %v10297_v31 = vpop.f32.mrf.mxu0  ;;  %12733 = vmatpush3.bf16.msra.mxu0 %v14805_v8  ;;  %v20958_v8 = vld [vmem:[#allocation71_spill] sm:$0xff] }
 0x49d   :  { %v10378_v42 = vpop.f32.mrf.mxu1  ;;  %v10298_v54 = vadd.f32 %v10297_v31, %v20199_v63  ;;  %v20523_v17 = vadd.f32 %v10376_v34, %v10296_v15  ;;  %12734 = vmatprep.subr.bf16.mxu0 %v14806_v45  ;;  %v20955_v63 = vld [vmem:[#allocation80_spill] sm:$0xff]  ;;  %v9239_v29 = vadd.f32 %v20958_v8, %v9158_v23  ;;  %v20959_v45 = vld [vmem:[#allocation65_spill] sm:$0xff]  ;;  %v14812_v22 = vld [vmem:[%s20779_s3 + $0xe8] sm:$0xff]  }
 0x49e   :  { %v10299_v12 = vpop.f32.mrf.mxu0  ;;  %v9391_v61 = vadd.f32 %v20955_v63, %v9310_v11  ;;  %v9087_v39 = vadd.f32 %v20959_v45, %v9006_v43  ;;  %v14808_v31 = vld [vmem:[%s20779_s3 + $0xf8] sm:$0xff]   ;;  %v10896_v43 = vmax.f32 %v20967_v20, 0.0  ;;  %v20972_v45 = vld [vmem:[#allocation91_spill] sm:$0xff]  ;;  %v14823_v20 = vld [vmem:[%s20779_s3 + $0x80] sm:$0xff]  }
 0x49f   :  { %v10380_v60 = vpop.f32.mrf.mxu1  ;;  %v10300_v5 = vadd.f32 %v10299_v12, %v20213_v47  ;;  %v20529_v55 = vadd.f32 %v10378_v42, %v10298_v54  ;;  %v9320_v32 = vadd.f32 %v20960_v58, %v9239_v29  ;;  %v14809_v42 = vld [vmem:[%s20779_s3 + $0xb8] sm:$0xff]   ;;  %12766 = vmatprep.subr.bf16.mxu1 %v14808_v31  ;;  %v14819_v31 = vld [vmem:[%s20779_s3 + $0x90] sm:$0xff]  }
 0x4a0   :  { %v10301_v33 = vpop.f32.mrf.mxu0  ;;  %12735 = vmatpush3.bf16.msra.mxu0 %v14807_v19  ;;  %v10892_v4 = vmax.f32 %v9391_v61, 0.0  ;;  %v9168_v25 = vadd.f32 %v20961_v13, %v9087_v39  ;;  %12767 = vmatpush3.bf16.msra.mxu1 %v14809_v42  ;;  %v20965_v12 = vld [vmem:[#allocation73_spill] sm:$0xff]  ;;  %v10912_v39 = vmax.f32 %v20972_v45, 0.0 }
 0x4a1   :  { %v10382_v0 = vpop.f32.mrf.mxu1  ;;  %v10302_v2 = vadd.f32 %v10301_v33, %v20218_v49  ;;  %v20534_v21 = vadd.f32 %v10380_v60, %v10300_v5  ;;  %v9401_v11 = vadd.f32 %v20963_v9, %v9320_v32  ;;  %v14813_v5 = vld [vmem:[%s20779_s3 + $0xa8] sm:$0xff]   ;;  %v14814_v33 = vld [vmem:[%s20779_s3 + $0xe0] sm:$0xff]   ;;  %v20973_v58 = vld [vmem:[#allocation89_spill] sm:$0xff] }
 0x4a2   :  { %v10305_v30 = vpop.f32.mrf.mxu0  ;;  %10790 = vmatmul.mubr.bf16.gmra.mxu0 %v20956_v52  ;;  %v9249_v60 = vadd.f32 %v20965_v12, %v9168_v25  ;;  %v14818_v25 = vld [vmem:[%s20779_s3 + $0xd0] sm:$0xff]  }
 0x4a3   :  { %10871 = vmatmul.mubr.bf16.gmra.mxu1 %v20957_v46  ;;  %v10386_v47 = vpop.f32.mrf.mxu1  ;;  %v10306_v51 = vadd.f32 %v10305_v30, %v20235_v36  ;;  %v20540_v35 = vadd.f32 %v10382_v0, %v10302_v2  ;;  %11230 = vmatprep.mubr.bf16.mxu0 %v10916_v53  ;;  %v10888_v36 = vmax.f32 %v20962_v3, 0.0  ;;  %v10900_v23 = vmax.f32 %v9401_v11, 0.0  ;;  %v20968_v0 = vld [vmem:[#allocation88_spill] sm:$0xff]  ;;  %v20969_v2 = vld [vmem:[#allocation81_spill] sm:$0xff]  ;;  %v14815_v53 = vld [vmem:[%s20779_s3 + $0xa0] sm:$0xff]  }
 0x4a4   :  { %v10307_v50 = vpop.f32.mrf.mxu0  ;;  %v9330_v26 = vadd.f32 %v20966_v56, %v9249_v60  ;;  %v14816_v30 = vld [vmem:[%s20779_s3 + $0xd8] sm:$0xff]  }
 0x4a5   :  { %v10388_v49 = vpop.f32.mrf.mxu1  ;;  %v10308_v34 = vadd.f32 %v10307_v50, %v20243_v48  ;;  %v20545_v44 = vadd.f32 %v10386_v47, %v10306_v51  ;;  %v14810_v48 = vld [vmem:[%s20779_s3 + $0xf0] sm:$0xff]   ;;  %v10920_v54 = vpack.c.bf16 %v10892_v4, %v10888_v36  ;;  %v10924_v61 = vpack.c.bf16 %v10900_v23, %v10896_v43  ;;  %v14817_v46 = vld [vmem:[%s20779_s3 + $0x98] sm:$0xff]   ;;  %v20970_v47 = vld [vmem:[#allocation86_spill] sm:$0xff] }
 0x4a6   :  { %v10309_v16 = vpop.f32.mrf.mxu0  ;;  %12768 = vmatprep.subr.bf16.mxu1 %v14810_v48  ;;  %v9411_v63 = vadd.f32 %v20968_v0, %v9330_v26  ;;  %v10904_v8 = vmax.f32 %v20970_v47, 0.0  ;;  %v20971_v51 = vld [vmem:[#allocation85_spill] sm:$0xff]  ;;  %v10932_v50 = vpack.c.bf16 %v10912_v39, %v10912_v39  ;;  %v14822_v26 = vld [vmem:[%s20779_s3 + $0xc0] sm:$0xff]  }
 0x4a7   :  { %v10390_v15 = vpop.f32.mrf.mxu1  ;;  %v20549_v24 = vadd.f32 %v10388_v49, %v10308_v34  ;;  %12769 = vmatpush3.bf16.msra.mxu1 %v14811_v14  ;;  %v20974_v34 = vld [vmem:[#allocation90_spill] sm:$0xff]  ;;  %v14821_v14 = vld [vmem:[%s20779_s3 + $0x88] sm:$0xff]  }
 0x4a8   :  { %v10310_v19 = vpop.f32.mrf.mxu0  ;;  %12770 = vmatprep.subr.bf16.mxu1 %v14812_v22  ;;  %v10908_v52 = vmax.f32 %v9411_v63, 0.0  ;;  %v10911_v16 = vmax.f32 %v20974_v34, 0.0 }
 0x4a9   :  { %v10391_v40 = vpop.f32.mrf.mxu1 }
 0x4aa   :  { %11231 = vmatmul.mubr.bf16.vlgmr.msra.gmra.mxu0 %v20964_v27  ;;  %v10928_v29 = vpack.c.bf16 %v10908_v52, %v10904_v8  ;;  %v10931_v40 = vpack.c.bf16 %v10911_v16, %v10911_v16 }
 0x4ab   :  { %11238 = vmatprep.mubr.bf16.mxu0 %v10920_v54  ;;  %12771 = vmatpush3.bf16.msra.mxu1 %v14813_v5  ;;  %v14820_v54 = vld [vmem:[%s20779_s3 + $0xc8] sm:$0xff]  }
 0x4ac   :  { %12772 = vmatprep.subr.bf16.mxu1 %v14814_v33 }
 0x4af   :  { %12773 = vmatpush3.bf16.msra.mxu1 %v14815_v53 }
 0x4b0   :  { %12774 = vmatprep.subr.bf16.mxu1 %v14816_v30 }
 0x4b2   :  { %11239 = vmatmul.mubr.bf16.gmra.mxu0 %v20969_v2 }
 0x4b3   :  { %11246 = vmatprep.mubr.bf16.mxu0 %v10924_v61  ;;  %12775 = vmatpush3.bf16.msra.mxu1 %v14817_v46 }
 0x4b4   :  { %12776 = vmatprep.subr.bf16.mxu1 %v14818_v25 }
 0x4b7   :  { %12777 = vmatpush3.bf16.msra.mxu1 %v14819_v31 }
 0x4b8   :  { %12778 = vmatprep.subr.bf16.mxu1 %v14820_v54 }
 0x4ba   :  { %11247 = vmatmul.mubr.bf16.gmra.mxu0 %v20971_v51 }
 0x4bb   :  { %11254 = vmatprep.mubr.bf16.mxu0 %v10928_v29  ;;  %12779 = vmatpush3.bf16.msra.mxu1 %v14821_v14 }
 0x4bc   :  { %12780 = vmatprep.subr.bf16.mxu1 %v14822_v26 }
 0x4bf   :  { %12781 = vmatpush3.bf16.msra.mxu1 %v14823_v20 }
 0x4c2   :  { %v10427_v49 = vpop.f32.mrf.mxu0  ;;  %11255 = vmatmul.mubr.bf16.gmra.mxu0 %v20973_v58 }
 0x4c3   :  { %v10508_v4 = vpop.f32.mrf.mxu1  ;;  %v10428_v32 = vadd.f32 %v10427_v49, %v20385_v28  ;;  %11262 = vmatprep.mubr.bf16.mxu0 %v10932_v50 }
 0x4c4   :  { %v10429_v15 = vpop.f32.mrf.mxu0 }
 0x4c5   :  { %v10510_v13 = vpop.f32.mrf.mxu1  ;;  %v20597_v3 = vadd.f32 %v10508_v4, %v10428_v32  ;;  %v10430_v36 = vadd.f32 %v10429_v15, %v20395_v18 }
 0x4c6   :  { %v10431_v42 = vpop.f32.mrf.mxu0 }
 0x4c7   :  { %v10512_v48 = vpop.f32.mrf.mxu1  ;;  %v20603_v28 = vadd.f32 %v10510_v13, %v10430_v36  ;;  %v10432_v19 = vadd.f32 %v10431_v42, %v20405_v41 }
 0x4c8   :  { %v10433_v9 = vpop.f32.mrf.mxu0 }
 0x4c9   :  { %v10514_v11 = vpop.f32.mrf.mxu1  ;;  %v20609_v18 = vadd.f32 %v10512_v48, %v10432_v19  ;;  %v10434_v27 = vadd.f32 %v10433_v9, %v20419_v57 }
 0x4ca   :  { %v10437_v12 = vpop.f32.mrf.mxu0  ;;  %11263 = vmatmul.mubr.bf16.gmra.mxu0 %v10931_v40 }
 0x4cb   :  { %v10518_v60 = vpop.f32.mrf.mxu1  ;;  %v20615_v41 = vadd.f32 %v10514_v11, %v10434_v27  ;;  %v10438_v22 = vadd.f32 %v10437_v12, %v20435_v10 }
 0x4cc   :  { %v10439_v23 = vpop.f32.mrf.mxu0 }
 0x4cd   :  { %v10520_v56 = vpop.f32.mrf.mxu1  ;;  %v10440_v57 = vadd.f32 %v10439_v23, %v20445_v38  ;;  %v20622_v5 = vadd.f32 %v10518_v60, %v10438_v22 }
 0x4ce   :  { %v10441_v43 = vpop.f32.mrf.mxu0 }
 0x4cf   :  { %v10522_v33 = vpop.f32.mrf.mxu1  ;;  %v10442_v10 = vadd.f32 %v10441_v43, %v20452_v1  ;;  %v20628_v0 = vadd.f32 %v10520_v56, %v10440_v57 }
 0x4d0   :  { %v10443_v63 = vpop.f32.mrf.mxu0 }
 0x4d1   :  { %v10524_v61 = vpop.f32.mrf.mxu1  ;;  %v10444_v2 = vadd.f32 %v10443_v63, %v20467_v59  ;;  %v20631_v53 = vadd.f32 %v10522_v33, %v10442_v10 }
 0x4d2   :  { %v10447_v38 = vpop.f32.mrf.mxu0 }
 0x4d3   :  { %v10528_v30 = vpop.f32.mrf.mxu1  ;;  %v10448_v52 = vadd.f32 %v10447_v38, %v20482_v6  ;;  %v20634_v46 = vadd.f32 %v10524_v61, %v10444_v2 }
 0x4d4   :  { %v10449_v47 = vpop.f32.mrf.mxu0 }
 0x4d5   :  { %v10530_v8 = vpop.f32.mrf.mxu1  ;;  %v10450_v29 = vadd.f32 %v10449_v47, %v20490_v37  ;;  %v20637_v1 = vadd.f32 %v10528_v30, %v10448_v52 }
 0x4d6   :  { %v10451_v51 = vpop.f32.mrf.mxu0 }
 0x4d7   :  { %v10532_v45 = vpop.f32.mrf.mxu1  ;;  %v10452_v39 = vadd.f32 %v10451_v51, %v20499_v62  ;;  %v20640_v50 = vadd.f32 %v10530_v8, %v10450_v29 }
 0x4d8   :  { %v10453_v59 = vpop.f32.mrf.mxu0 }
 0x4d9   :  { %v10534_v49 = vpop.f32.mrf.mxu1  ;;  %v10454_v4 = vadd.f32 %v10453_v59, %v20513_v7  ;;  %v20643_v58 = vadd.f32 %v10532_v45, %v10452_v39 }
 0x4da   :  { %v10457_v6 = vpop.f32.mrf.mxu0 }
 0x4db   :  { %v10538_v32 = vpop.f32.mrf.mxu1  ;;  %v10458_v34 = vadd.f32 %v10457_v6, %v20523_v17  ;;  %v20646_v16 = vadd.f32 %v10534_v49, %v10454_v4 }
 0x4dc   :  { %v10459_v37 = vpop.f32.mrf.mxu0 }
 0x4dd   :  { %v10540_v15 = vpop.f32.mrf.mxu1  ;;  %v10460_v13 = vadd.f32 %v10459_v37, %v20529_v55  ;;  %v20649_v25 = vadd.f32 %v10538_v32, %v10458_v34 }
 0x4de   :  { %v10461_v62 = vpop.f32.mrf.mxu0 }
 0x4df   :  { %v10542_v36 = vpop.f32.mrf.mxu1  ;;  %v10462_v31 = vadd.f32 %v10461_v62, %v20534_v21  ;;  %v20652_v42 = vadd.f32 %v10540_v15, %v10460_v13 }
 0x4e0   :  { %v10463_v7 = vpop.f32.mrf.mxu0 }
 0x4e1   :  { %v10544_v48 = vpop.f32.mrf.mxu1  ;;  %v10464_v19 = vadd.f32 %v10463_v7, %v20540_v35  ;;  %v20655_v40 = vadd.f32 %v10542_v36, %v10462_v31 }
 0x4e2   :  { %v10467_v17 = vpop.f32.mrf.mxu0 }
 0x4e3   :  { %v10548_v9 = vpop.f32.mrf.mxu1  ;;  %v10468_v11 = vadd.f32 %v10467_v17, %v20545_v44  ;;  %v20658_v54 = vadd.f32 %v10544_v48, %v10464_v19 }
 0x4e4   :  { %v10469_v55 = vpop.f32.mrf.mxu0 }
 0x4e5   :  { %v10550_v27 = vpop.f32.mrf.mxu1  ;;  %v10470_v14 = vadd.f32 %v10469_v55, %v20549_v24  ;;  %v20661_v12 = vadd.f32 %v10548_v9, %v10468_v11 }
 0x4e6   :  { %v10471_v21 = vpop.f32.mrf.mxu0 }
 0x4e7   :  { %v10552_v60 = vpop.f32.mrf.mxu1  ;;  %v20663_v22 = vadd.f32 %v10550_v27, %v10470_v14 }
 0x4e8   :  { %v10472_v23 = vpop.f32.mrf.mxu0 }
 0x4e9   :  { %v10553_v35 = vpop.f32.mrf.mxu1 }
 0x502   :  { %v10589_v56 = vpop.f32.mrf.mxu0 }
 0x503   :  { %v10670_v26 = vpop.f32.mrf.mxu1  ;;  %v10590_v57 = vadd.f32 %v10589_v56, %v20597_v3 }
 0x504   :  { %v10591_v20 = vpop.f32.mrf.mxu0 }
 0x505   :  { %v10672_v44 = vpop.f32.mrf.mxu1  ;;  %v20666_v43 = vadd.f32 %v10670_v26, %v10590_v57  ;;  %v10592_v33 = vadd.f32 %v10591_v20, %v20603_v28 }
 0x506   :  { %v10593_v10 = vpop.f32.mrf.mxu0 }
 0x507   :  { %v10674_v24 = vpop.f32.mrf.mxu1  ;;  %v20669_v63 = vadd.f32 %v10672_v44, %v10592_v33  ;;  %v10594_v61 = vadd.f32 %v10593_v10, %v20609_v18 }
 0x508   :  { %v10595_v2 = vpop.f32.mrf.mxu0 }
 0x509   :  { %v20672_v38 = vpop.f32.mrf.mxu1  ;;  %v20674_v30 = vadd.f32 %v10674_v24, %v10594_v61 }
 0x50a   :  { %v10599_v52 = vpop.f32.mrf.mxu0 }
 0x50b   :  { %v10680_v47 = vpop.f32.mrf.mxu1  ;;  %v10600_v3 = vadd.f32 %v10599_v52, %v20622_v5 }
 0x50c   :  { %v10601_v8 = vpop.f32.mrf.mxu0 }
 0x50d   :  { %v10682_v29 = vpop.f32.mrf.mxu1  ;;  %v10602_v51 = vadd.f32 %v10601_v8, %v20628_v0  ;;  %v20678_v28 = vadd.f32 %v10680_v47, %v10600_v3  ;;  %v10596_v47 = vadd.f32 %v10595_v2, %v20615_v41 }
 0x50e   :  { %v10603_v45 = vpop.f32.mrf.mxu0 }
 0x50f   :  { %v10684_v39 = vpop.f32.mrf.mxu1  ;;  %v10604_v59 = vadd.f32 %v10603_v45, %v20631_v53  ;;  %v20681_v18 = vadd.f32 %v10682_v29, %v10602_v51 }
 0x510   :  { %v10605_v49 = vpop.f32.mrf.mxu0 }
 0x511   :  { %v20683_v4 = vpop.f32.mrf.mxu1  ;;  %v20685_v6 = vadd.f32 %v10684_v39, %v10604_v59  ;;  %v10677_v39 = vadd.f32 %v20672_v38, %v10596_v47  ;;  %v10606_v41 = vadd.f32 %v10605_v49, %v20634_v46 }
 0x512   :  { %v10609_v32 = vpop.f32.mrf.mxu0 }
 0x513   :  { %v10690_v34 = vpop.f32.mrf.mxu1  ;;  %v10610_v5 = vadd.f32 %v10609_v32, %v20637_v1 }
 0x514   :  { %v10611_v37 = vpop.f32.mrf.mxu0 }
 0x515   :  { %v10692_v15 = vpop.f32.mrf.mxu1  ;;  %v10612_v0 = vadd.f32 %v10611_v37, %v20640_v50  ;;  %v20689_v13 = vadd.f32 %v10690_v34, %v10610_v5 }
 0x516   :  { %v10613_v62 = vpop.f32.mrf.mxu0 }
 0x517   :  { %v10694_v36 = vpop.f32.mrf.mxu1  ;;  %v10614_v53 = vadd.f32 %v10613_v62, %v20643_v58  ;;  %v20692_v31 = vadd.f32 %v10692_v15, %v10612_v0 }
 0x518   :  { %v20694_v7 = vpop.f32.mrf.mxu0 }
 0x519   :  { %v20696_v48 = vpop.f32.mrf.mxu1  ;;  %v20698_v19 = vadd.f32 %v10694_v36, %v10614_v53 }
 0x51a   :  { %v10619_v17 = vpop.f32.mrf.mxu0 }
 0x51b   :  { %v10700_v1 = vpop.f32.mrf.mxu1  ;;  %v10620_v9 = vadd.f32 %v10619_v17, %v20649_v25 }
 0x51c   :  { %v10621_v11 = vpop.f32.mrf.mxu0 }
 0x51d   :  { %v10702_v50 = vpop.f32.mrf.mxu1  ;;  %v10622_v55 = vadd.f32 %v10621_v11, %v20652_v42  ;;  %v20702_v27 = vadd.f32 %v10700_v1, %v10620_v9 }
 0x51e   :  { %v10623_v14 = vpop.f32.mrf.mxu0 }
 0x51f   :  { %v10704_v58 = vpop.f32.mrf.mxu1  ;;  %v10624_v21 = vadd.f32 %v10623_v14, %v20655_v40  ;;  %v20705_v60 = vadd.f32 %v10702_v50, %v10622_v55  ;;  %v10687_v14 = vadd.f32 %v20683_v4, %v10606_v41 }
 0x520   :  { %v20707_v23 = vpop.f32.mrf.mxu0 }
 0x521   :  { %v20709_v35 = vpop.f32.mrf.mxu1  ;;  %v20711_v56 = vadd.f32 %v10704_v58, %v10624_v21 }
 0x522   :  { %v10629_v26 = vpop.f32.mrf.mxu0 }
 0x523   :  { %v10710_v25 = vpop.f32.mrf.mxu1  ;;  %v10630_v57 = vadd.f32 %v10629_v26, %v20661_v12 }
 0x524   :  { %v20714_v20 = vpop.f32.mrf.mxu0 }
 0x525   :  { %v20716_v42 = vpop.f32.mrf.mxu1  ;;  %v20718_v44 = vadd.f32 %v10710_v25, %v10630_v57 }
 0x526   :  { %v10633_v33 = vpop.f32.mrf.mxu0 }
 0x527   :  { %v10714_v40 = vpop.f32.mrf.mxu1  ;;  %v10616_v33 = vadd.f32 %v20694_v7, %v20646_v16 }
 0x528   :  { %v10634_v10 = vpop.f32.mrf.mxu0 }
 0x529   :  { %v10715_v24 = vpop.f32.mrf.mxu1 }
 0x542   :  { %v10751_v61 = vpop.f32.mrf.mxu0 }
 0x543   :  { %v10832_v52 = vpop.f32.mrf.mxu1  ;;  %v10752_v3 = vadd.f32 %v10751_v61, %v20666_v43 }
 0x544   :  { %v10753_v8 = vpop.f32.mrf.mxu0 }
 0x545   :  { %v10834_v29 = vpop.f32.mrf.mxu1  ;;  %v10754_v12 = vadd.f32 %v10753_v8, %v20669_v63  ;;  %v10833_v59 = vadd.f32 %v10832_v52, %v10752_v3 }
 0x546   :  { %v10755_v51 = vpop.f32.mrf.mxu0 }
 0x547   :  { %v10836_v45 = vpop.f32.mrf.mxu1  ;;  %v10756_v32 = vadd.f32 %v10755_v51, %v20674_v30  ;;  %v10835_v37 = vadd.f32 %v10834_v29, %v10754_v12  ;;  %v10881_v62 = vmax.f32 %v10833_v59, 0.0 }
 0x548   :  { %v10757_v34 = vpop.f32.mrf.mxu0 }
 0x549   :  { %v10838_v5 = vpop.f32.mrf.mxu1  ;;  %v10837_v15 = vadd.f32 %v10836_v45, %v10756_v32  ;;  %v10758_v0 = vadd.f32 %v10757_v34, %v10677_v39  ;;  %v10882_v38 = vmax.f32 %v10835_v37, 0.0  ;;  %v10697_v45 = vadd.f32 %v20696_v48, %v10616_v33 }
 0x54a   :  { %v10761_v2 = vpop.f32.mrf.mxu0  ;;  %v10626_v37 = vadd.f32 %v20707_v23, %v20658_v54  ;;  %v10632_v54 = vadd.f32 %v20714_v20, %v20663_v22 }
 0x54b   :  { %v10842_v43 = vpop.f32.mrf.mxu1  ;;  %v10885_v36 = vmax.f32 %v10837_v15, 0.0  ;;  %v10839_v53 = vadd.f32 %v10838_v5, %v10758_v0  ;;  %v10762_v63 = vadd.f32 %v10761_v2, %v20678_v28 }
 0x54c   :  { %v10763_v17 = vpop.f32.mrf.mxu0 }
 0x54d   :  { %v10844_v1 = vpop.f32.mrf.mxu1  ;;  %v10917_v9 = vpack.c.bf16 %v10885_v36, %v10881_v62  ;;  %v10886_v11 = vmax.f32 %v10839_v53, 0.0  ;;  %v10764_v30 = vadd.f32 %v10763_v17, %v20681_v18  ;;  %v10843_v46 = vadd.f32 %v10842_v43, %v10762_v63 }
 0x54e   :  { %v10765_v50 = vpop.f32.mrf.mxu0  ;;  %v10707_v17 = vadd.f32 %v20709_v35, %v10626_v37 }
 0x54f   :  { %v10846_v55 = vpop.f32.mrf.mxu1  ;;  %v10918_v58 = vpack.c.bf16 %v10886_v11, %v10882_v38  ;;  %v10766_v49 = vadd.f32 %v10765_v50, %v20685_v6  ;;  %v10845_v25 = vadd.f32 %v10844_v1, %v10764_v30  ;;  %v10889_v18 = vmax.f32 %v10843_v46, 0.0 }
 0x550   :  { %v10767_v21 = vpop.f32.mrf.mxu0 }
 0x551   :  { %v10848_v26 = vpop.f32.mrf.mxu1  ;;  %v10847_v57 = vadd.f32 %v10846_v55, %v10766_v49  ;;  %v10768_v28 = vadd.f32 %v10767_v21, %v10687_v14  ;;  %11302 = vmatprep.mubr.bf16.mxu1 %v10918_v58  ;;  %v10890_v6 = vmax.f32 %v10845_v25, 0.0 }
 0x552   :  { %v10771_v40 = vpop.f32.mrf.mxu0  ;;  %11303 = vmatmul.mubr.bf16.vlgmr.msra.gmra.mxu1 %v10917_v9 }
 0x553   :  { %v10852_v10 = vpop.f32.mrf.mxu1  ;;  %v10893_v24 = vmax.f32 %v10847_v57, 0.0  ;;  %v10849_v61 = vadd.f32 %v10848_v26, %v10768_v28  ;;  %v10772_v4 = vadd.f32 %v10771_v40, %v20689_v13 }
 0x554   :  { %v10773_v52 = vpop.f32.mrf.mxu0 }
 0x555   :  { %v10854_v47 = vpop.f32.mrf.mxu1  ;;  %v10921_v3 = vpack.c.bf16 %v10893_v24, %v10889_v18  ;;  %v10894_v8 = vmax.f32 %v10849_v61, 0.0  ;;  %v10774_v29 = vadd.f32 %v10773_v52, %v20692_v31  ;;  %v10853_v7 = vadd.f32 %v10852_v10, %v10772_v4 }
 0x556   :  { %v10775_v12 = vpop.f32.mrf.mxu0 }
 0x557   :  { %v10856_v51 = vpop.f32.mrf.mxu1  ;;  %v10922_v16 = vpack.c.bf16 %v10894_v8, %v10890_v6  ;;  %v10776_v39 = vadd.f32 %v10775_v12, %v20698_v19  ;;  %v10855_v34 = vadd.f32 %v10854_v47, %v10774_v29  ;;  %v10897_v31 = vmax.f32 %v10853_v7, 0.0 }
 0x558   :  { %v10777_v59 = vpop.f32.mrf.mxu0 }
 0x559   :  { %v10858_v32 = vpop.f32.mrf.mxu1  ;;  %v10857_v5 = vadd.f32 %v10856_v51, %v10776_v39  ;;  %v10778_v13 = vadd.f32 %v10777_v59, %v10697_v45  ;;  %11310 = vmatprep.mubr.bf16.mxu1 %v10922_v16  ;;  %v10898_v19 = vmax.f32 %v10855_v34, 0.0 }
 0x55a   :  { %v10781_v15 = vpop.f32.mrf.mxu0  ;;  %11311 = vmatmul.mubr.bf16.gmra.mxu1 %v10921_v3 }
 0x55b   :  { %v10862_v0 = vpop.f32.mrf.mxu1  ;;  %v10901_v41 = vmax.f32 %v10857_v5, 0.0  ;;  %v10859_v2 = vadd.f32 %v10858_v32, %v10778_v13  ;;  %v10782_v48 = vadd.f32 %v10781_v15, %v20702_v27 }
 0x55c   :  { %v10783_v43 = vpop.f32.mrf.mxu0 }
 0x55d   :  { %v10864_v62 = vpop.f32.mrf.mxu1  ;;  %v10925_v36 = vpack.c.bf16 %v10901_v41, %v10897_v31  ;;  %v10902_v53 = vmax.f32 %v10859_v2, 0.0  ;;  %v10784_v63 = vadd.f32 %v10783_v43, %v20705_v60  ;;  %v10863_v9 = vadd.f32 %v10862_v0, %v10782_v48 }
 0x55e   :  { %v10785_v1 = vpop.f32.mrf.mxu0  ;;  %v10713_v60 = vadd.f32 %v20716_v42, %v10632_v54 }
 0x55f   :  { %v10866_v38 = vpop.f32.mrf.mxu1  ;;  %v10926_v23 = vpack.c.bf16 %v10902_v53, %v10898_v19  ;;  %v10786_v11 = vadd.f32 %v10785_v1, %v20711_v56  ;;  %v10865_v50 = vadd.f32 %v10864_v62, %v10784_v63  ;;  %v10905_v35 = vmax.f32 %v10863_v9, 0.0  ;;  %v12687_v1 = vld [vmem:[%s20780_s4] ss:$0 sm:$0xff] }
 0x560   :  { %v10787_v30 = vpop.f32.mrf.mxu0 }
 0x561   :  { %v10868_v27 = vpop.f32.mrf.mxu1  ;;  %v10867_v55 = vadd.f32 %v10866_v38, %v10786_v11  ;;  %v10788_v14 = vadd.f32 %v10787_v30, %v10707_v17  ;;  %11318 = vmatprep.mubr.bf16.mxu1 %v10926_v23  ;;  %v10906_v25 = vmax.f32 %v10865_v50, 0.0 }
 0x562   :  { %v10791_v58 = vpop.f32.mrf.mxu0  ;;  %11319 = vmatmul.mubr.bf16.gmra.mxu1 %v10925_v36 }
 0x563   :  { %v10872_v46 = vpop.f32.mrf.mxu1  ;;  %v10909_v49 = vmax.f32 %v10867_v55, 0.0  ;;  %v10869_v21 = vadd.f32 %v10868_v27, %v10788_v14  ;;  %v10792_v22 = vadd.f32 %v10791_v58, %v20718_v44 }
 0x564   :  { %v10793_v20 = vpop.f32.mrf.mxu0 }
 0x565   :  { %v10874_v26 = vpop.f32.mrf.mxu1  ;;  %v10929_v56 = vpack.c.bf16 %v10909_v49, %v10905_v35  ;;  %v10910_v57 = vmax.f32 %v10869_v21, 0.0  ;;  %v10794_v28 = vadd.f32 %v10793_v20, %v10713_v60  ;;  %v10873_v24 = vadd.f32 %v10872_v46, %v10792_v22 }
 0x566   :  { %v10795_v33 = vpop.f32.mrf.mxu0 }
 0x567   :  { %v10876_v40 = vpop.f32.mrf.mxu1  ;;  %v10930_v10 = vpack.c.bf16 %v10910_v57, %v10906_v25  ;;  %v10875_v18 = vadd.f32 %v10874_v26, %v10794_v28  ;;  %v10913_v6 = vmax.f32 %v10873_v24, 0.0 }
 0x568   :  { %v10796_v61 = vpop.f32.mrf.mxu0 }
 0x569   :  { %v10877_v4 = vpop.f32.mrf.mxu1  ;;  %v10914_v52 = vmax.f32 %v10875_v18, 0.0  ;;  %11326 = vmatprep.mubr.bf16.mxu1 %v10930_v10  ;;  %v10933_v29 = vpack.c.bf16 %v10913_v6, %v10913_v6 }
 0x56a   :  { %v12736_v42 = vpop.f32.mrf.mxu0  ;;  %11327 = vmatmul.mubr.bf16.gmra.mxu1 %v10929_v56 }
 0x56b   :  { %v10934_v47 = vpack.c.bf16 %v10914_v52, %v10914_v52 }
 0x56c   :  { %v12737_v44 = vpop.f32.mrf.mxu0 }
 0x56d   :  { %v12738_v3 = vadd.f32 %v12737_v44, %v12736_v42  ;;  %11334 = vmatprep.mubr.bf16.mxu1 %v10934_v47 }
 0x56e   :  { %v12739_v8 = vpop.f32.mrf.mxu0 }
 0x56f   :  { %v11233_v23 = vadd.f32 %v12738_v3, %v12687_v1 }
 0x570   :  { %v12740_v12 = vpop.f32.mrf.mxu0 }
 0x571   :  { %v12741_v51 = vadd.f32 %v12740_v12, %v12739_v8 }
 0x572   :  { %v12742_v45 = vpop.f32.mrf.mxu0  ;;  %11335 = vmatmul.mubr.bf16.gmra.mxu1 %v10933_v29 }
 0x573   :  { %v11236_v50 = vadd.f32 %v12741_v51, %v12687_v1 }
 0x574   :  { %v12743_v16 = vpop.f32.mrf.mxu0 }
 0x575   :  { %v12744_v7 = vadd.f32 %v12743_v16, %v12742_v45 }
 0x576   :  { %v12745_v39 = vpop.f32.mrf.mxu0 }
 0x577   :  { %v11241_v60 = vadd.f32 %v12744_v7, %v12687_v1 }
 0x578   :  { %v12746_v59 = vpop.f32.mrf.mxu0 }
 0x579   :  { %v12747_v32 = vadd.f32 %v12746_v59, %v12745_v39 }
 0x57a   :  { %v12748_v34 = vpop.f32.mrf.mxu0 }
 0x57b   :  { %v11244_v20 = vadd.f32 %v12747_v32, %v12687_v1 }
 0x57c   :  { %v12749_v5 = vpop.f32.mrf.mxu0 }
 0x57d   :  { %v12750_v13 = vadd.f32 %v12749_v5, %v12748_v34 }
 0x57e   :  { %v12751_v37 = vpop.f32.mrf.mxu0 }
 0x57f   :  { %v11249_v28 = vadd.f32 %v12750_v13, %v12687_v1 }
 0x580   :  { %v12752_v15 = vpop.f32.mrf.mxu0 }
 0x581   :  { %v12753_v0 = vadd.f32 %v12752_v15, %v12751_v37 }
 0x582   :  { %v12754_v31 = vpop.f32.mrf.mxu0 }
 0x583   :  { %v11252_v24 = vadd.f32 %v12753_v0, %v12687_v1 }
 0x584   :  { %v12755_v41 = vpop.f32.mrf.mxu0 }
 0x585   :  { %v12756_v2 = vadd.f32 %v12755_v41, %v12754_v31 }
 0x586   :  { %v12757_v48 = vpop.f32.mrf.mxu0 }
 0x587   :  { %v11257_v47 = vadd.f32 %v12756_v2, %v12687_v1 }
 0x588   :  { %v12758_v43 = vpop.f32.mrf.mxu0 }
 0x589   :  { %v12759_v62 = vadd.f32 %v12758_v43, %v12757_v48 }
 0x58a   :  { %v12760_v19 = vpop.f32.mrf.mxu0 }
 0x58b   :  { %v11260_v29 = vadd.f32 %v12759_v62, %v12687_v1 }
 0x58c   :  { %v12761_v36 = vpop.f32.mrf.mxu0 }
 0x58d   :  { %v12762_v53 = vadd.f32 %v12761_v36, %v12760_v19 }
 0x58e   :  { %v12763_v63 = vpop.f32.mrf.mxu0 }
 0x58f   :  { %v11265_v7 = vadd.f32 %v12762_v53, %v12687_v1 }
 0x590   :  { %v12764_v17 = vpop.f32.mrf.mxu0 }
 0x612   :  { %v12782_v38 = vpop.f32.mrf.mxu1 }
 0x614   :  { %v12783_v54 = vpop.f32.mrf.mxu1 }
 0x615   :  { %v12784_v9 = vadd.f32 %v12783_v54, %v12782_v38 }
 0x616   :  { %v12785_v11 = vpop.f32.mrf.mxu1 }
 0x617   :  { %v11305_v30 = vadd.f32 %v12784_v9, %v11233_v23 }
 0x618   :  { %v12786_v27 = vpop.f32.mrf.mxu1 }
 0x619   :  { %11342 = vst [vmem:[%s20781_s5] sm:$0xff] %v11305_v30  ;;  %v12787_v55 = vadd.f32 %v12786_v27, %v12785_v11 }
 0x61a   :  { %v12788_v14 = vpop.f32.mrf.mxu1 }
 0x61b   :  { %v11308_v58 = vadd.f32 %v12787_v55, %v11236_v50 }
 0x61c   :  { %v12789_v46 = vpop.f32.mrf.mxu1 }
 0x61d   :  { %11343 = vst [vmem:[%s20781_s5 + $0x8] sm:$0xff] %v11308_v58  ;;  %v12790_v35 = vadd.f32 %v12789_v46, %v12788_v14 }
 0x61e   :  { %v12791_v49 = vpop.f32.mrf.mxu1 }
 0x61f   :  { %v11313_v21 = vadd.f32 %v12790_v35, %v11241_v60 }
 0x620   :  { %v12792_v22 = vpop.f32.mrf.mxu1 }
 0x621   :  { %11344 = vst [vmem:[%s20781_s5 + $0x10] sm:$0xff] %v11313_v21  ;;  %v12793_v26 = vadd.f32 %v12792_v22, %v12791_v49 }
 0x622   :  { %v12794_v25 = vpop.f32.mrf.mxu1 }
 0x623   :  { %v11316_v56 = vadd.f32 %v12793_v26, %v11244_v20 }
 0x624   :  { %v12795_v57 = vpop.f32.mrf.mxu1 }
 0x625   :  { %11345 = vst [vmem:[%s20781_s5 + $0x18] sm:$0xff] %v11316_v56  ;;  %v12796_v33 = vadd.f32 %v12795_v57, %v12794_v25 }
 0x626   :  { %v12797_v40 = vpop.f32.mrf.mxu1 }
 0x627   :  { %v11321_v10 = vadd.f32 %v12796_v33, %v11249_v28 }
 0x628   :  { %v12798_v18 = vpop.f32.mrf.mxu1 }
 0x629   :  { %11346 = vst [vmem:[%s20781_s5 + $0x20] sm:$0xff] %v11321_v10  ;;  %v12799_v61 = vadd.f32 %v12798_v18, %v12797_v40 }
 0x62a   :  { %v12800_v4 = vpop.f32.mrf.mxu1 }
 0x62b   :  { %v11324_v52 = vadd.f32 %v12799_v61, %v11252_v24 }
 0x62c   :  { %v12801_v42 = vpop.f32.mrf.mxu1 }
 0x62d   :  { %11347 = vst [vmem:[%s20781_s5 + $0x28] sm:$0xff] %v11324_v52  ;;  %v12802_v6 = vadd.f32 %v12801_v42, %v12800_v4 }
 0x62e   :  { %v12803_v44 = vpop.f32.mrf.mxu1 }
 0x62f   :  { %v11329_v3 = vadd.f32 %v12802_v6, %v11257_v47 }
 0x630   :  { %v12804_v8 = vpop.f32.mrf.mxu1 }
 0x631   :  { %11348 = vst [vmem:[%s20781_s5 + $0x30] sm:$0xff] %v11329_v3  ;;  %v12805_v12 = vadd.f32 %v12804_v8, %v12803_v44 }
 0x632   :  { %v12806_v51 = vpop.f32.mrf.mxu1 }
 0x633   :  { %v11332_v45 = vadd.f32 %v12805_v12, %v11260_v29 }
 0x634   :  { %v12807_v16 = vpop.f32.mrf.mxu1 }
 0x635   :  { %11349 = vst [vmem:[%s20781_s5 + $0x38] sm:$0xff] %v11332_v45  ;;  %v12808_v39 = vadd.f32 %v12807_v16, %v12806_v51 }
 0x636   :  { %v12809_v59 = vpop.f32.mrf.mxu1 }
 0x637   :  { %v11337_v32 = vadd.f32 %v12808_v39, %v11265_v7 }
 0x638   :  { %v12810_v34 = vpop.f32.mrf.mxu1 }
 0x639   :  { %11350 = vst [vmem:[%s20781_s5 + $0x40] sm:$0xff] %v11337_v32 }

</bundles_post_ra>
